<compile_context>
chip_gen: v7x
topology: tpu7x:2x2x1
jax: 0.10.0
libtpu: 0.0.40
codegen_flags: <defaults>
</compile_context>

<pallas_src>
import functools

import jax
import jax.numpy as jnp
from jax.experimental import pallas as pl
from jax.experimental.pallas import tpu as pltpu


# ----------------------------------------------------------------------------
# Pallas kernels
# ----------------------------------------------------------------------------

def _mm_bn_act_kernel(*refs, act, residual):
    """o = act((a @ b) * scale + shift [+ identity]); scale/shift broadcast over rows.

    a / b / identity are bf16 (native MXU rate); accumulation and the epilogue are f32."""
    if residual:
        a_ref, b_ref, scale_ref, shift_ref, id_ref, o_ref = refs
    else:
        a_ref, b_ref, scale_ref, shift_ref, o_ref = refs
        id_ref = None
    y = jnp.dot(a_ref[...], b_ref[...], preferred_element_type=jnp.float32)
    y = y * scale_ref[...] + shift_ref[...]
    if residual:
        y = y + id_ref[...].astype(jnp.float32)
    if act == "relu":
        y = jnp.maximum(y, 0.0)
    elif act == "silu":
        y = y * jax.nn.sigmoid(y)
    # act == "none": identity
    o_ref[...] = y.astype(o_ref.dtype)


def _maxpool_kernel(x_ref, o_ref):
    # x_ref: (tm, kh*kw, C) patches -> max over the window axis (single reduction).
    o_ref[...] = jnp.max(x_ref[...], axis=1).astype(o_ref.dtype)


def _tail_kernel(x_ref, fcw_ref, fcb_ref, hw_ref, hb_ref, probs_ref, idx_ref,
                 *, num_heads, out_dim):
    """Fused: global avg pool -> fc + SiLU -> 5 heads (one matmul) -> softmax + argmax."""
    xf = x_ref[...].astype(jnp.float32)                      # (tb, HW, C)
    feats = jnp.mean(xf, axis=1)                             # (tb, C)  f32 accumulate
    emb = jnp.dot(feats.astype(jnp.bfloat16), fcw_ref[...],
                  preferred_element_type=jnp.float32) + fcb_ref[...]
    emb = emb * jax.nn.sigmoid(emb)                          # SiLU (vision_activation), f32
    logits = jnp.dot(emb.astype(jnp.bfloat16), hw_ref[...],
                     preferred_element_type=jnp.float32) + hb_ref[...]   # (tb, H*O)
    for h in range(num_heads):                               # static python loop
        lh = logits[:, h * out_dim:(h + 1) * out_dim]        # (tb, O), static slice
        m = jnp.max(lh, axis=-1, keepdims=True)
        e = jnp.exp(lh - m)
        probs_ref[h] = (e / jnp.sum(e, axis=-1, keepdims=True)).astype(probs_ref.dtype)
        # argmax on the logits (same result as argmax of softmax), first-max tie-break.
        iota = jax.lax.broadcasted_iota(jnp.int32, lh.shape, 1)
        masked = jnp.where(lh >= m, iota, jnp.int32(out_dim))
        idx_ref[h] = jnp.min(masked, axis=-1, keepdims=True).astype(jnp.int32)


# ----------------------------------------------------------------------------
# Pallas wrappers (BlockSpecs / grids; no padding copies)
# ----------------------------------------------------------------------------

def matmul_bn_act(a, b, scale, shift, *, act="none", identity=None,
                  out_dtype=jnp.bfloat16, tm=256):
    """a:(M,K) @ b:(K,N), per-column scale/shift, optional residual add, activation."""
    M, K = a.shape
    N = b.shape[1]
    # Block M: multiple of 8 (or the full M when it is smaller than the tile).
    bm = M if M < tm else tm
    a_bf = a.astype(jnp.bfloat16)
    b_bf = b.astype(jnp.bfloat16)
    sc = scale.reshape(1, N).astype(jnp.float32)
    sh = shift.reshape(1, N).astype(jnp.float32)
    in_specs = [
        pl.BlockSpec((bm, K), lambda i: (i, 0)),
        pl.BlockSpec((K, N), lambda i: (0, 0)),
        pl.BlockSpec((1, N), lambda i: (0, 0)),
        pl.BlockSpec((1, N), lambda i: (0, 0)),
    ]
    args = [a_bf, b_bf, sc, sh]
    residual = identity is not None
    if residual:
        in_specs.append(pl.BlockSpec((bm, N), lambda i: (i, 0)))
        args.append(identity.astype(jnp.bfloat16))
    kern = functools.partial(_mm_bn_act_kernel, act=act, residual=residual)
    out = pl.pallas_call(
        kern,
        out_shape=jax.ShapeDtypeStruct((M, N), out_dtype),
        grid=(pl.cdiv(M, bm),),
        in_specs=in_specs,
        out_specs=pl.BlockSpec((bm, N), lambda i: (i, 0)),
        compiler_params=pltpu.CompilerParams(dimension_semantics=("parallel",)),
    )(*args)
    return out


def _extract_patches(x, kh, kw, stride, pad, pad_value=0.0):
    """x: (B,H,W,C) -> patches (B,Ho,Wo,kh*kw,C).  Plain-JAX glue, static slicing only.
    TODO(synk): fuse the patch build into the conv kernel with halo'd spatial tiles so the
                (kh*kw)x-inflated patch tensor never hits HBM (biggest remaining HBM saver)."""
    B, H, W, C = x.shape
    xp = jnp.pad(x, ((0, 0), (pad, pad), (pad, pad), (0, 0)), constant_values=pad_value)
    Hp, Wp = H + 2 * pad, W + 2 * pad
    Ho = (Hp - kh) // stride + 1
    Wo = (Wp - kw) // stride + 1
    cols = []
    for i in range(kh):
        for j in range(kw):
            cols.append(xp[:, i:i + (Ho - 1) * stride + 1:stride,
                           j:j + (Wo - 1) * stride + 1:stride, :])
    patches = jnp.stack(cols, axis=3)  # (B, Ho, Wo, kh*kw, C)
    return patches, Ho, Wo


def conv_bn_act(x, w, bn_scale, bn_shift, *, kh, kw, stride, pad, act, identity=None):
    """Conv2d(bias=False, NHWC) + eval BatchNorm + (optional residual) + activation,
    fused into one MXU matmul kernel.  1x1 convs skip im2col entirely."""
    B, H, W, C = x.shape
    if kh == 1 and kw == 1 and pad == 0:
        xs = x[:, ::stride, ::stride, :] if stride != 1 else x
        _, Ho, Wo, _ = xs.shape
        a = xs.reshape(B * Ho * Wo, C)
    else:
        patches, Ho, Wo = _extract_patches(x, kh, kw, stride, pad, 0.0)
        a = patches.reshape(B * Ho * Wo, kh * kw * C)
    idm = None if identity is None else identity.reshape(B * Ho * Wo, -1)
    y = matmul_bn_act(a, w, bn_scale, bn_shift, act=act, identity=idm)
    return y.reshape(B, Ho, Wo, -1)


def maxpool_3x3_s2(x, tm=512):
    B, H, W, C = x.shape
    patches, Ho, Wo = _extract_patches(x, 3, 3, 2, 1, pad_value=-3.0e38)
    p = patches.reshape(B * Ho * Wo, 9, C)
    M = B * Ho * Wo
    bm = M if M < tm else tm
    out = pl.pallas_call(
        _maxpool_kernel,
        out_shape=jax.ShapeDtypeStruct((M, C), x.dtype),
        grid=(pl.cdiv(M, bm),),
        in_specs=[pl.BlockSpec((bm, 9, C), lambda i: (i, 0, 0))],
        out_specs=pl.BlockSpec((bm, C), lambda i: (i, 0)),
        compiler_params=pltpu.CompilerParams(dimension_semantics=("parallel",)),
    )(p)
    return out.reshape(B, Ho, Wo, C)


def tail_pool_fc_heads(x, fc_w, fc_b, head_w, head_b, tb_max=128):
    """x:(B,H,W,C) feature map -> (probs (H,B,O) f32, argmax (H,B) int32), one pallas_call."""
    B, H, W, C = x.shape
    HW = H * W
    xr = x.reshape(B, HW, C).astype(jnp.bfloat16)
    NH, D, O = head_w.shape
    Dv = fc_w.shape[1]
    # All 5 heads as one lane-dense (D, H*O) matmul.
    hw_flat = jnp.transpose(head_w, (1, 0, 2)).reshape(D, NH * O).astype(jnp.bfloat16)
    hb_flat = head_b.reshape(1, NH * O).astype(jnp.float32)
    fcw = fc_w.astype(jnp.bfloat16)
    fcb = fc_b.reshape(1, Dv).astype(jnp.float32)
    tb = B if B < tb_max else tb_max
    kern = functools.partial(_tail_kernel, num_heads=NH, out_dim=O)
    probs, idx = pl.pallas_call(
        kern,
        out_shape=(jax.ShapeDtypeStruct((NH, B, O), jnp.float32),
                   jax.ShapeDtypeStruct((NH, B, 1), jnp.int32)),
        grid=(pl.cdiv(B, tb),),
        in_specs=[
            pl.BlockSpec((tb, HW, C), lambda i: (i, 0, 0)),
            pl.BlockSpec((C, Dv), lambda i: (0, 0)),
            pl.BlockSpec((1, Dv), lambda i: (0, 0)),
            pl.BlockSpec((D, NH * O), lambda i: (0, 0)),
            pl.BlockSpec((1, NH * O), lambda i: (0, 0)),
        ],
        out_specs=(pl.BlockSpec((NH, tb, O), lambda i: (0, i, 0)),
                   pl.BlockSpec((NH, tb, 1), lambda i: (0, i, 0))),
        compiler_params=pltpu.CompilerParams(dimension_semantics=("parallel",)),
    )(xr, fcw, fcb, hw_flat, hb_flat)
    return probs, idx[..., 0]


# ----------------------------------------------------------------------------
# ResNet-50 (bottleneck) backbone + OCR heads — parameters & forward
# ----------------------------------------------------------------------------

LAYERS = (3, 4, 6, 3)  # static architecture config; kept OUT of the jitted param pytree


class _KeyGen:
    def __init__(self, key):
        self.key = key

    def __call__(self):
        self.key, k = jax.random.split(self.key)
        return k


def init_ocr_params(key, *, in_ch=3, base=8, expansion=4,
                    vision_output_dim=64, model_output_count=5, model_output_dim=32):
    kg = _KeyGen(key)

    def conv_w(kh, kw, cin, cout):
        fan_in = kh * kw * cin
        w = jax.random.normal(kg(), (fan_in, cout), jnp.float32) / (fan_in ** 0.5)
        return w.astype(jnp.bfloat16)          # weights stored bf16 (MXU-native)

    def bn(c):
        gamma = 1.0 + 0.1 * jax.random.normal(kg(), (c,), jnp.float32)
        beta = 0.1 * jax.random.normal(kg(), (c,), jnp.float32)
        mean = 0.05 * jax.random.normal(kg(), (c,), jnp.float32)
        var = 1.0 + 0.1 * jnp.abs(jax.random.normal(kg(), (c,), jnp.float32))
        scale = gamma / jnp.sqrt(var + 1e-5)
        shift = beta - mean * scale
        return (scale, shift)                  # f32 epilogue

    params = {"stem_w": conv_w(7, 7, in_ch, base), "stem_bn": bn(base)}
    stages = []
    cin = base
    planes = base
    for si, nblocks in enumerate(LAYERS):
        stride = 1 if si == 0 else 2
        blocks = []
        for bi in range(nblocks):
            cout = planes * expansion
            blk = {
                "conv1_w": conv_w(1, 1, cin, planes), "bn1": bn(planes),
                "conv2_w": conv_w(3, 3, planes, planes), "bn2": bn(planes),
                "conv3_w": conv_w(1, 1, planes, cout), "bn3": bn(cout),
            }
            if bi == 0 and (stride != 1 or cin != cout):
                blk["down_w"] = conv_w(1, 1, cin, cout)
                blk["down_bn"] = bn(cout)
            blocks.append(blk)
            cin = cout
        stages.append(blocks)                  # arrays only — no python ints in the pytree
        planes *= 2
    params["stages"] = stages

    feat_dim = cin
    params["fc_w"] = (jax.random.normal(kg(), (feat_dim, vision_output_dim), jnp.float32)
                      / (feat_dim ** 0.5)).astype(jnp.bfloat16)
    params["fc_b"] = 0.1 * jax.random.normal(kg(), (vision_output_dim,), jnp.float32)
    params["head_w"] = (jax.random.normal(
        kg(), (model_output_count, vision_output_dim, model_output_dim), jnp.float32)
        / (vision_output_dim ** 0.5)).astype(jnp.bfloat16)
    params["head_b"] = 0.1 * jax.random.normal(kg(), (model_output_count, model_output_dim),
                                               jnp.float32)
    return params


def _bottleneck(x, p, stride):
    out = conv_bn_act(x, p["conv1_w"], *p["bn1"], kh=1, kw=1, stride=1, pad=0, act="relu")
    out = conv_bn_act(out, p["conv2_w"], *p["bn2"], kh=3, kw=3, stride=stride, pad=1, act="relu")
    if "down_w" in p:
        identity = conv_bn_act(x, p["down_w"], *p["down_bn"], kh=1, kw=1, stride=stride,
                               pad=0, act="none")
    else:
        identity = x
    # conv3 + BN + residual add + ReLU fused in a single matmul kernel.
    out = conv_bn_act(out, p["conv3_w"], *p["bn3"], kh=1, kw=1, stride=1, pad=0,
                      act="relu", identity=identity)
    return out


def ocr_forward(params, image_nchw, return_logits=False, batch_first=True):
    assert image_nchw.shape[1] == 3, "expect NCHW images with 3 channels"
    # NCHW -> NHWC once; trunk activations run in bf16.
    x = jnp.transpose(image_nchw, (0, 2, 3, 1)).astype(jnp.bfloat16)

    # ResNet stem
    x = conv_bn_act(x, params["stem_w"], *params["stem_bn"], kh=7, kw=7, stride=2, pad=3,
                    act="relu")
    x = maxpool_3x3_s2(x)

    # Bottleneck stages (strides are static Python ints, NOT traced params)
    for si, blocks in enumerate(params["stages"]):
        stage_stride = 1 if si == 0 else 2
        for bi, blk in enumerate(blocks):
            x = _bottleneck(x, blk, stride=stage_stride if bi == 0 else 1)

    # Fused tail: global avg pool -> fc + SiLU -> 5 heads -> softmax -> argmax
    probs_hbo, idx_hb = tail_pool_fc_heads(x, params["fc_w"], params["fc_b"],
                                           params["head_w"], params["head_b"])
    if batch_first:
        probs = jnp.transpose(probs_hbo, (1, 0, 2))           # (B, H, O)
        idx = jnp.transpose(idx_hb, (1, 0))                   # (B, H)
    else:
        probs = probs_hbo
        idx = idx_hb
    return probs if return_logits else idx                    # int32 (torch: int64)


# ----------------------------------------------------------------------------
# Demo
# ----------------------------------------------------------------------------

if __name__ == "__main__":
    BATCH, IMG = 2, 32  # small synthetic config (real module uses 3x224x224)

    key = jax.random.PRNGKey(0)
    k_params, k_img = jax.random.split(key)
    params = init_ocr_params(k_params, in_ch=3, base=8, expansion=4,
                             vision_output_dim=64, model_output_count=5, model_output_dim=32)
    images = jax.random.normal(k_img, (BATCH, 3, IMG, IMG), jnp.float32)

    fwd = jax.jit(lambda p, x: ocr_forward(p, x, return_logits=False, batch_first=True))
    pred = jax.block_until_ready(fwd(params, images))   # (BATCH, 5) int32 class indices

    assert pred.shape == (BATCH, 5)
    assert pred.dtype == jnp.int32
    assert bool(jnp.all((pred >= 0) & (pred < 32)))
    print("KERNEL_OK")
</pallas_src>

<mosaic_0001>
module attributes {stable_mosaic.version = 11 : i64} {
  func.func @_mm_bn_act_kernel(%arg0: i32, %arg1: memref<256x147xbf16, #tpu.memory_space<vmem>>, %arg2: memref<147x8xbf16, #tpu.memory_space<vmem>>, %arg3: memref<1x8xf32, #tpu.memory_space<vmem>>, %arg4: memref<1x8xf32, #tpu.memory_space<vmem>>, %arg5: memref<256x8xbf16, #tpu.memory_space<vmem>>) attributes {dimension_semantics = [#tpu.dimension_semantics<parallel>], iteration_bounds = array<i64: 2>, scalar_prefetch = 0 : i64, scratch_operands = 0 : i64, tpu.core_type = #tpu.core_type<tc>, window_params = [{transform_indices = @transform_0, window_bounds = array<i64: 256, 147>}, {pipeline_mode = #tpu.pipeline_mode<synchronous>, transform_indices = @transform_1, window_bounds = array<i64: 147, 8>}, {pipeline_mode = #tpu.pipeline_mode<synchronous>, transform_indices = @transform_2, window_bounds = array<i64: 1, 8>}, {pipeline_mode = #tpu.pipeline_mode<synchronous>, transform_indices = @transform_3, window_bounds = array<i64: 1, 8>}, {transform_indices = @transform_4, window_bounds = array<i64: 256, 8>}]} {
    %c0 = arith.constant 0 : index
    %c0_0 = arith.constant 0 : index
    %0 = vector.load %arg1[%c0, %c0_0] : memref<256x147xbf16, #tpu.memory_space<vmem>>, vector<256x147xbf16>
    %c0_1 = arith.constant 0 : index
    %c0_2 = arith.constant 0 : index
    %1 = vector.load %arg2[%c0_1, %c0_2] : memref<147x8xbf16, #tpu.memory_space<vmem>>, vector<147x8xbf16>
    %cst = arith.constant dense<0.000000e+00> : vector<256x8xf32>
    %2 = tpu.matmul %0, %1, %cst {dimension_numbers = #tpu.dot_dimension_numbers<[1], [0], [0], [1], [0, 0, 1, 1], [], []>} : vector<256x147xbf16>, vector<147x8xbf16>, vector<256x8xf32> -> vector<256x8xf32>
    %c0_3 = arith.constant 0 : index
    %c0_4 = arith.constant 0 : index
    %3 = vector.load %arg3[%c0_3, %c0_4] : memref<1x8xf32, #tpu.memory_space<vmem>>, vector<1x8xf32>
    %4 = vector.broadcast %3 : vector<1x8xf32> to vector<256x8xf32>
    %5 = arith.mulf %2, %4 : vector<256x8xf32>
    %c0_5 = arith.constant 0 : index
    %c0_6 = arith.constant 0 : index
    %6 = vector.load %arg4[%c0_5, %c0_6] : memref<1x8xf32, #tpu.memory_space<vmem>>, vector<1x8xf32>
    %7 = vector.broadcast %6 : vector<1x8xf32> to vector<256x8xf32>
    %8 = arith.addf %5, %7 : vector<256x8xf32>
    %cst_7 = arith.constant 0.000000e+00 : f32
    %9 = vector.broadcast %cst_7 : f32 to vector<256x8xf32>
    %10 = arith.maximumf %8, %9 : vector<256x8xf32>
    %11 = arith.truncf %10 : vector<256x8xf32> to vector<256x8xbf16>
    %c0_8 = arith.constant 0 : index
    %c0_9 = arith.constant 0 : index
    %12 = vector.load %arg5[%c0_8, %c0_9] : memref<256x8xbf16, #tpu.memory_space<vmem>>, vector<256x8xbf16>
    tpu.vector_store %arg5[%c0_8, %c0_9], %11 {strides = array<i32>} : memref<256x8xbf16, #tpu.memory_space<vmem>>, vector<256x8xbf16>,
    return
  }
  func.func @transform_0(%arg0: i32) -> (i32, i32) {
    %c0_i32 = arith.constant 0 : i32
    %c0_i32_0 = arith.constant 0 : i32
    return %arg0, %c0_i32 : i32, i32
  }
  func.func @transform_1(%arg0: i32) -> (i32, i32) {
    %c0_i32 = arith.constant 0 : i32
    %c0_i32_0 = arith.constant 0 : i32
    %c0_i32_1 = arith.constant 0 : i32
    return %c0_i32, %c0_i32_0 : i32, i32
  }
  func.func @transform_2(%arg0: i32) -> (i32, i32) {
    %c0_i32 = arith.constant 0 : i32
    %c0_i32_0 = arith.constant 0 : i32
    %c0_i32_1 = arith.constant 0 : i32
    return %c0_i32, %c0_i32_0 : i32, i32
  }
  func.func @transform_3(%arg0: i32) -> (i32, i32) {
    %c0_i32 = arith.constant 0 : i32
    %c0_i32_0 = arith.constant 0 : i32
    %c0_i32_1 = arith.constant 0 : i32
    return %c0_i32, %c0_i32_0 : i32, i32
  }
  func.func @transform_4(%arg0: i32) -> (i32, i32) {
    %c0_i32 = arith.constant 0 : i32
    %c0_i32_0 = arith.constant 0 : i32
    return %arg0, %c0_i32 : i32, i32
  }
}

module attributes {stable_mosaic.version = 11 : i64} {
  func.func @_maxpool_kernel(%arg0: i32, %arg1: memref<128x9x8xbf16, #tpu.memory_space<vmem>>, %arg2: memref<128x8xbf16, #tpu.memory_space<vmem>>) attributes {dimension_semantics = [#tpu.dimension_semantics<parallel>], iteration_bounds = array<i64: 1>, scalar_prefetch = 0 : i64, scratch_operands = 0 : i64, tpu.core_type = #tpu.core_type<tc>, window_params = [{transform_indices = @transform_0, window_bounds = array<i64: 128, 9, 8>}, {transform_indices = @transform_1, window_bounds = array<i64: 128, 8>}]} {
    %c0 = arith.constant 0 : index
    %c0_0 = arith.constant 0 : index
    %c0_1 = arith.constant 0 : index
    %0 = vector.load %arg1[%c0, %c0_0, %c0_1] : memref<128x9x8xbf16, #tpu.memory_space<vmem>>, vector<128x9x8xbf16>
    %cst = arith.constant dense<0xFF80> : vector<128x8xbf16>
    %1 = vector.multi_reduction <maximumf>, %0, %cst [1] : vector<128x9x8xbf16> to vector<128x8xbf16>
    %c0_2 = arith.constant 0 : index
    %c0_3 = arith.constant 0 : index
    %2 = vector.load %arg2[%c0_2, %c0_3] : memref<128x8xbf16, #tpu.memory_space<vmem>>, vector<128x8xbf16>
    tpu.vector_store %arg2[%c0_2, %c0_3], %1 {strides = array<i32>} : memref<128x8xbf16, #tpu.memory_space<vmem>>, vector<128x8xbf16>,
    return
  }
  func.func @transform_0(%arg0: i32) -> (i32, i32, i32) {
    %c0_i32 = arith.constant 0 : i32
    %c0_i32_0 = arith.constant 0 : i32
    %c0_i32_1 = arith.constant 0 : i32
    return %arg0, %c0_i32, %c0_i32_0 : i32, i32, i32
  }
  func.func @transform_1(%arg0: i32) -> (i32, i32) {
    %c0_i32 = arith.constant 0 : i32
    %c0_i32_0 = arith.constant 0 : i32
    return %arg0, %c0_i32 : i32, i32
  }
}

module attributes {stable_mosaic.version = 11 : i64} {
  func.func @_mm_bn_act_kernel(%arg0: i32, %arg1: memref<128x8xbf16, #tpu.memory_space<vmem>>, %arg2: memref<8x8xbf16, #tpu.memory_space<vmem>>, %arg3: memref<1x8xf32, #tpu.memory_space<vmem>>, %arg4: memref<1x8xf32, #tpu.memory_space<vmem>>, %arg5: memref<128x8xbf16, #tpu.memory_space<vmem>>) attributes {dimension_semantics = [#tpu.dimension_semantics<parallel>], iteration_bounds = array<i64: 1>, scalar_prefetch = 0 : i64, scratch_operands = 0 : i64, tpu.core_type = #tpu.core_type<tc>, window_params = [{transform_indices = @transform_0, window_bounds = array<i64: 128, 8>}, {pipeline_mode = #tpu.pipeline_mode<synchronous>, transform_indices = @transform_1, window_bounds = array<i64: 8, 8>}, {pipeline_mode = #tpu.pipeline_mode<synchronous>, transform_indices = @transform_2, window_bounds = array<i64: 1, 8>}, {pipeline_mode = #tpu.pipeline_mode<synchronous>, transform_indices = @transform_3, window_bounds = array<i64: 1, 8>}, {transform_indices = @transform_4, window_bounds = array<i64: 128, 8>}]} {
    %c0 = arith.constant 0 : index
    %c0_0 = arith.constant 0 : index
    %0 = vector.load %arg1[%c0, %c0_0] : memref<128x8xbf16, #tpu.memory_space<vmem>>, vector<128x8xbf16>
    %c0_1 = arith.constant 0 : index
    %c0_2 = arith.constant 0 : index
    %1 = vector.load %arg2[%c0_1, %c0_2] : memref<8x8xbf16, #tpu.memory_space<vmem>>, vector<8x8xbf16>
    %cst = arith.constant dense<0.000000e+00> : vector<128x8xf32>
    %2 = tpu.matmul %0, %1, %cst {dimension_numbers = #tpu.dot_dimension_numbers<[1], [0], [0], [1], [0, 0, 1, 1], [], []>} : vector<128x8xbf16>, vector<8x8xbf16>, vector<128x8xf32> -> vector<128x8xf32>
    %c0_3 = arith.constant 0 : index
    %c0_4 = arith.constant 0 : index
    %3 = vector.load %arg3[%c0_3, %c0_4] : memref<1x8xf32, #tpu.memory_space<vmem>>, vector<1x8xf32>
    %4 = vector.broadcast %3 : vector<1x8xf32> to vector<128x8xf32>
    %5 = arith.mulf %2, %4 : vector<128x8xf32>
    %c0_5 = arith.constant 0 : index
    %c0_6 = arith.constant 0 : index
    %6 = vector.load %arg4[%c0_5, %c0_6] : memref<1x8xf32, #tpu.memory_space<vmem>>, vector<1x8xf32>
    %7 = vector.broadcast %6 : vector<1x8xf32> to vector<128x8xf32>
    %8 = arith.addf %5, %7 : vector<128x8xf32>
    %cst_7 = arith.constant 0.000000e+00 : f32
    %9 = vector.broadcast %cst_7 : f32 to vector<128x8xf32>
    %10 = arith.maximumf %8, %9 : vector<128x8xf32>
    %11 = arith.truncf %10 : vector<128x8xf32> to vector<128x8xbf16>
    %c0_8 = arith.constant 0 : index
    %c0_9 = arith.constant 0 : index
    %12 = vector.load %arg5[%c0_8, %c0_9] : memref<128x8xbf16, #tpu.memory_space<vmem>>, vector<128x8xbf16>
    tpu.vector_store %arg5[%c0_8, %c0_9], %11 {strides = array<i32>} : memref<128x8xbf16, #tpu.memory_space<vmem>>, vector<128x8xbf16>,
    return
  }
  func.func @transform_0(%arg0: i32) -> (i32, i32) {
    %c0_i32 = arith.constant 0 : i32
    %c0_i32_0 = arith.constant 0 : i32
    return %arg0, %c0_i32 : i32, i32
  }
  func.func @transform_1(%arg0: i32) -> (i32, i32) {
    %c0_i32 = arith.constant 0 : i32
    %c0_i32_0 = arith.constant 0 : i32
    %c0_i32_1 = arith.constant 0 : i32
    return %c0_i32, %c0_i32_0 : i32, i32
  }
  func.func @transform_2(%arg0: i32) -> (i32, i32) {
    %c0_i32 = arith.constant 0 : i32
    %c0_i32_0 = arith.constant 0 : i32
    %c0_i32_1 = arith.constant 0 : i32
    return %c0_i32, %c0_i32_0 : i32, i32
  }
  func.func @transform_3(%arg0: i32) -> (i32, i32) {
    %c0_i32 = arith.constant 0 : i32
    %c0_i32_0 = arith.constant 0 : i32
    %c0_i32_1 = arith.constant 0 : i32
    return %c0_i32, %c0_i32_0 : i32, i32
  }
  func.func @transform_4(%arg0: i32) -> (i32, i32) {
    %c0_i32 = arith.constant 0 : i32
    %c0_i32_0 = arith.constant 0 : i32
    return %arg0, %c0_i32 : i32, i32
  }
}

module attributes {stable_mosaic.version = 11 : i64} {
  func.func @_mm_bn_act_kernel(%arg0: i32, %arg1: memref<128x72xbf16, #tpu.memory_space<vmem>>, %arg2: memref<72x8xbf16, #tpu.memory_space<vmem>>, %arg3: memref<1x8xf32, #tpu.memory_space<vmem>>, %arg4: memref<1x8xf32, #tpu.memory_space<vmem>>, %arg5: memref<128x8xbf16, #tpu.memory_space<vmem>>) attributes {dimension_semantics = [#tpu.dimension_semantics<parallel>], iteration_bounds = array<i64: 1>, scalar_prefetch = 0 : i64, scratch_operands = 0 : i64, tpu.core_type = #tpu.core_type<tc>, window_params = [{transform_indices = @transform_0, window_bounds = array<i64: 128, 72>}, {pipeline_mode = #tpu.pipeline_mode<synchronous>, transform_indices = @transform_1, window_bounds = array<i64: 72, 8>}, {pipeline_mode = #tpu.pipeline_mode<synchronous>, transform_indices = @transform_2, window_bounds = array<i64: 1, 8>}, {pipeline_mode = #tpu.pipeline_mode<synchronous>, transform_indices = @transform_3, window_bounds = array<i64: 1, 8>}, {transform_indices = @transform_4, window_bounds = array<i64: 128, 8>}]} {
    %c0 = arith.constant 0 : index
    %c0_0 = arith.constant 0 : index
    %0 = vector.load %arg1[%c0, %c0_0] : memref<128x72xbf16, #tpu.memory_space<vmem>>, vector<128x72xbf16>
    %c0_1 = arith.constant 0 : index
    %c0_2 = arith.constant 0 : index
    %1 = vector.load %arg2[%c0_1, %c0_2] : memref<72x8xbf16, #tpu.memory_space<vmem>>, vector<72x8xbf16>
    %cst = arith.constant dense<0.000000e+00> : vector<128x8xf32>
    %2 = tpu.matmul %0, %1, %cst {dimension_numbers = #tpu.dot_dimension_numbers<[1], [0], [0], [1], [0, 0, 1, 1], [], []>} : vector<128x72xbf16>, vector<72x8xbf16>, vector<128x8xf32> -> vector<128x8xf32>
    %c0_3 = arith.constant 0 : index
    %c0_4 = arith.constant 0 : index
    %3 = vector.load %arg3[%c0_3, %c0_4] : memref<1x8xf32, #tpu.memory_space<vmem>>, vector<1x8xf32>
    %4 = vector.broadcast %3 : vector<1x8xf32> to vector<128x8xf32>
    %5 = arith.mulf %2, %4 : vector<128x8xf32>
    %c0_5 = arith.constant 0 : index
    %c0_6 = arith.constant 0 : index
    %6 = vector.load %arg4[%c0_5, %c0_6] : memref<1x8xf32, #tpu.memory_space<vmem>>, vector<1x8xf32>
    %7 = vector.broadcast %6 : vector<1x8xf32> to vector<128x8xf32>
    %8 = arith.addf %5, %7 : vector<128x8xf32>
    %cst_7 = arith.constant 0.000000e+00 : f32
    %9 = vector.broadcast %cst_7 : f32 to vector<128x8xf32>
    %10 = arith.maximumf %8, %9 : vector<128x8xf32>
    %11 = arith.truncf %10 : vector<128x8xf32> to vector<128x8xbf16>
    %c0_8 = arith.constant 0 : index
    %c0_9 = arith.constant 0 : index
    %12 = vector.load %arg5[%c0_8, %c0_9] : memref<128x8xbf16, #tpu.memory_space<vmem>>, vector<128x8xbf16>
    tpu.vector_store %arg5[%c0_8, %c0_9], %11 {strides = array<i32>} : memref<128x8xbf16, #tpu.memory_space<vmem>>, vector<128x8xbf16>,
    return
  }
  func.func @transform_0(%arg0: i32) -> (i32, i32) {
    %c0_i32 = arith.constant 0 : i32
    %c0_i32_0 = arith.constant 0 : i32
    return %arg0, %c0_i32 : i32, i32
  }
  func.func @transform_1(%arg0: i32) -> (i32, i32) {
    %c0_i32 = arith.constant 0 : i32
    %c0_i32_0 = arith.constant 0 : i32
    %c0_i32_1 = arith.constant 0 : i32
    return %c0_i32, %c0_i32_0 : i32, i32
  }
  func.func @transform_2(%arg0: i32) -> (i32, i32) {
    %c0_i32 = arith.constant 0 : i32
    %c0_i32_0 = arith.constant 0 : i32
    %c0_i32_1 = arith.constant 0 : i32
    return %c0_i32, %c0_i32_0 : i32, i32
  }
  func.func @transform_3(%arg0: i32) -> (i32, i32) {
    %c0_i32 = arith.constant 0 : i32
    %c0_i32_0 = arith.constant 0 : i32
    %c0_i32_1 = arith.constant 0 : i32
    return %c0_i32, %c0_i32_0 : i32, i32
  }
  func.func @transform_4(%arg0: i32) -> (i32, i32) {
    %c0_i32 = arith.constant 0 : i32
    %c0_i32_0 = arith.constant 0 : i32
    return %arg0, %c0_i32 : i32, i32
  }
}

module attributes {stable_mosaic.version = 11 : i64} {
  func.func @_mm_bn_act_kernel(%arg0: i32, %arg1: memref<128x8xbf16, #tpu.memory_space<vmem>>, %arg2: memref<8x32xbf16, #tpu.memory_space<vmem>>, %arg3: memref<1x32xf32, #tpu.memory_space<vmem>>, %arg4: memref<1x32xf32, #tpu.memory_space<vmem>>, %arg5: memref<128x32xbf16, #tpu.memory_space<vmem>>) attributes {dimension_semantics = [#tpu.dimension_semantics<parallel>], iteration_bounds = array<i64: 1>, scalar_prefetch = 0 : i64, scratch_operands = 0 : i64, tpu.core_type = #tpu.core_type<tc>, window_params = [{transform_indices = @transform_0, window_bounds = array<i64: 128, 8>}, {pipeline_mode = #tpu.pipeline_mode<synchronous>, transform_indices = @transform_1, window_bounds = array<i64: 8, 32>}, {pipeline_mode = #tpu.pipeline_mode<synchronous>, transform_indices = @transform_2, window_bounds = array<i64: 1, 32>}, {pipeline_mode = #tpu.pipeline_mode<synchronous>, transform_indices = @transform_3, window_bounds = array<i64: 1, 32>}, {transform_indices = @transform_4, window_bounds = array<i64: 128, 32>}]} {
    %c0 = arith.constant 0 : index
    %c0_0 = arith.constant 0 : index
    %0 = vector.load %arg1[%c0, %c0_0] : memref<128x8xbf16, #tpu.memory_space<vmem>>, vector<128x8xbf16>
    %c0_1 = arith.constant 0 : index
    %c0_2 = arith.constant 0 : index
    %1 = vector.load %arg2[%c0_1, %c0_2] : memref<8x32xbf16, #tpu.memory_space<vmem>>, vector<8x32xbf16>
    %cst = arith.constant dense<0.000000e+00> : vector<128x32xf32>
    %2 = tpu.matmul %0, %1, %cst {dimension_numbers = #tpu.dot_dimension_numbers<[1], [0], [0], [1], [0, 0, 1, 1], [], []>} : vector<128x8xbf16>, vector<8x32xbf16>, vector<128x32xf32> -> vector<128x32xf32>
    %c0_3 = arith.constant 0 : index
    %c0_4 = arith.constant 0 : index
    %3 = vector.load %arg3[%c0_3, %c0_4] : memref<1x32xf32, #tpu.memory_space<vmem>>, vector<1x32xf32>
    %4 = vector.broadcast %3 : vector<1x32xf32> to vector<128x32xf32>
    %5 = arith.mulf %2, %4 : vector<128x32xf32>
    %c0_5 = arith.constant 0 : index
    %c0_6 = arith.constant 0 : index
    %6 = vector.load %arg4[%c0_5, %c0_6] : memref<1x32xf32, #tpu.memory_space<vmem>>, vector<1x32xf32>
    %7 = vector.broadcast %6 : vector<1x32xf32> to vector<128x32xf32>
    %8 = arith.addf %5, %7 : vector<128x32xf32>
    %9 = arith.truncf %8 : vector<128x32xf32> to vector<128x32xbf16>
    %c0_7 = arith.constant 0 : index
    %c0_8 = arith.constant 0 : index
    %10 = vector.load %arg5[%c0_7, %c0_8] : memref<128x32xbf16, #tpu.memory_space<vmem>>, vector<128x32xbf16>
    tpu.vector_store %arg5[%c0_7, %c0_8], %9 {strides = array<i32>} : memref<128x32xbf16, #tpu.memory_space<vmem>>, vector<128x32xbf16>,
    return
  }
  func.func @transform_0(%arg0: i32) -> (i32, i32) {
    %c0_i32 = arith.constant 0 : i32
    %c0_i32_0 = arith.constant 0 : i32
    return %arg0, %c0_i32 : i32, i32
  }
  func.func @transform_1(%arg0: i32) -> (i32, i32) {
    %c0_i32 = arith.constant 0 : i32
    %c0_i32_0 = arith.constant 0 : i32
    %c0_i32_1 = arith.constant 0 : i32
    return %c0_i32, %c0_i32_0 : i32, i32
  }
  func.func @transform_2(%arg0: i32) -> (i32, i32) {
    %c0_i32 = arith.constant 0 : i32
    %c0_i32_0 = arith.constant 0 : i32
    %c0_i32_1 = arith.constant 0 : i32
    return %c0_i32, %c0_i32_0 : i32, i32
  }
  func.func @transform_3(%arg0: i32) -> (i32, i32) {
    %c0_i32 = arith.constant 0 : i32
    %c0_i32_0 = arith.constant 0 : i32
    %c0_i32_1 = arith.constant 0 : i32
    return %c0_i32, %c0_i32_0 : i32, i32
  }
  func.func @transform_4(%arg0: i32) -> (i32, i32) {
    %c0_i32 = arith.constant 0 : i32
    %c0_i32_0 = arith.constant 0 : i32
    return %arg0, %c0_i32 : i32, i32
  }
}

module attributes {stable_mosaic.version = 11 : i64} {
  func.func @_mm_bn_act_kernel(%arg0: i32, %arg1: memref<128x8xbf16, #tpu.memory_space<vmem>>, %arg2: memref<8x32xbf16, #tpu.memory_space<vmem>>, %arg3: memref<1x32xf32, #tpu.memory_space<vmem>>, %arg4: memref<1x32xf32, #tpu.memory_space<vmem>>, %arg5: memref<128x32xbf16, #tpu.memory_space<vmem>>, %arg6: memref<128x32xbf16, #tpu.memory_space<vmem>>) attributes {dimension_semantics = [#tpu.dimension_semantics<parallel>], iteration_bounds = array<i64: 1>, scalar_prefetch = 0 : i64, scratch_operands = 0 : i64, tpu.core_type = #tpu.core_type<tc>, window_params = [{transform_indices = @transform_0, window_bounds = array<i64: 128, 8>}, {pipeline_mode = #tpu.pipeline_mode<synchronous>, transform_indices = @transform_1, window_bounds = array<i64: 8, 32>}, {pipeline_mode = #tpu.pipeline_mode<synchronous>, transform_indices = @transform_2, window_bounds = array<i64: 1, 32>}, {pipeline_mode = #tpu.pipeline_mode<synchronous>, transform_indices = @transform_3, window_bounds = array<i64: 1, 32>}, {transform_indices = @transform_4, window_bounds = array<i64: 128, 32>}, {transform_indices = @transform_5, window_bounds = array<i64: 128, 32>}]} {
    %c0 = arith.constant 0 : index
    %c0_0 = arith.constant 0 : index
    %0 = vector.load %arg1[%c0, %c0_0] : memref<128x8xbf16, #tpu.memory_space<vmem>>, vector<128x8xbf16>
    %c0_1 = arith.constant 0 : index
    %c0_2 = arith.constant 0 : index
    %1 = vector.load %arg2[%c0_1, %c0_2] : memref<8x32xbf16, #tpu.memory_space<vmem>>, vector<8x32xbf16>
    %cst = arith.constant dense<0.000000e+00> : vector<128x32xf32>
    %2 = tpu.matmul %0, %1, %cst {dimension_numbers = #tpu.dot_dimension_numbers<[1], [0], [0], [1], [0, 0, 1, 1], [], []>} : vector<128x8xbf16>, vector<8x32xbf16>, vector<128x32xf32> -> vector<128x32xf32>
    %c0_3 = arith.constant 0 : index
    %c0_4 = arith.constant 0 : index
    %3 = vector.load %arg3[%c0_3, %c0_4] : memref<1x32xf32, #tpu.memory_space<vmem>>, vector<1x32xf32>
    %4 = vector.broadcast %3 : vector<1x32xf32> to vector<128x32xf32>
    %5 = arith.mulf %2, %4 : vector<128x32xf32>
    %c0_5 = arith.constant 0 : index
    %c0_6 = arith.constant 0 : index
    %6 = vector.load %arg4[%c0_5, %c0_6] : memref<1x32xf32, #tpu.memory_space<vmem>>, vector<1x32xf32>
    %7 = vector.broadcast %6 : vector<1x32xf32> to vector<128x32xf32>
    %8 = arith.addf %5, %7 : vector<128x32xf32>
    %c0_7 = arith.constant 0 : index
    %c0_8 = arith.constant 0 : index
    %9 = vector.load %arg5[%c0_7, %c0_8] : memref<128x32xbf16, #tpu.memory_space<vmem>>, vector<128x32xbf16>
    %10 = arith.extf %9 : vector<128x32xbf16> to vector<128x32xf32>
    %11 = arith.addf %8, %10 : vector<128x32xf32>
    %cst_9 = arith.constant 0.000000e+00 : f32
    %12 = vector.broadcast %cst_9 : f32 to vector<128x32xf32>
    %13 = arith.maximumf %11, %12 : vector<128x32xf32>
    %14 = arith.truncf %13 : vector<128x32xf32> to vector<128x32xbf16>
    %c0_10 = arith.constant 0 : index
    %c0_11 = arith.constant 0 : index
    %15 = vector.load %arg6[%c0_10, %c0_11] : memref<128x32xbf16, #tpu.memory_space<vmem>>, vector<128x32xbf16>
    tpu.vector_store %arg6[%c0_10, %c0_11], %14 {strides = array<i32>} : memref<128x32xbf16, #tpu.memory_space<vmem>>, vector<128x32xbf16>,
    return
  }
  func.func @transform_0(%arg0: i32) -> (i32, i32) {
    %c0_i32 = arith.constant 0 : i32
    %c0_i32_0 = arith.constant 0 : i32
    return %arg0, %c0_i32 : i32, i32
  }
  func.func @transform_1(%arg0: i32) -> (i32, i32) {
    %c0_i32 = arith.constant 0 : i32
    %c0_i32_0 = arith.constant 0 : i32
    %c0_i32_1 = arith.constant 0 : i32
    return %c0_i32, %c0_i32_0 : i32, i32
  }
  func.func @transform_2(%arg0: i32) -> (i32, i32) {
    %c0_i32 = arith.constant 0 : i32
    %c0_i32_0 = arith.constant 0 : i32
    %c0_i32_1 = arith.constant 0 : i32
    return %c0_i32, %c0_i32_0 : i32, i32
  }
  func.func @transform_3(%arg0: i32) -> (i32, i32) {
    %c0_i32 = arith.constant 0 : i32
    %c0_i32_0 = arith.constant 0 : i32
    %c0_i32_1 = arith.constant 0 : i32
    return %c0_i32, %c0_i32_0 : i32, i32
  }
  func.func @transform_4(%arg0: i32) -> (i32, i32) {
    %c0_i32 = arith.constant 0 : i32
    %c0_i32_0 = arith.constant 0 : i32
    return %arg0, %c0_i32 : i32, i32
  }
  func.func @transform_5(%arg0: i32) -> (i32, i32) {
    %c0_i32 = arith.constant 0 : i32
    %c0_i32_0 = arith.constant 0 : i32
    return %arg0, %c0_i32 : i32, i32
  }
}

module attributes {stable_mosaic.version = 11 : i64} {
  func.func @_mm_bn_act_kernel(%arg0: i32, %arg1: memref<128x32xbf16, #tpu.memory_space<vmem>>, %arg2: memref<32x8xbf16, #tpu.memory_space<vmem>>, %arg3: memref<1x8xf32, #tpu.memory_space<vmem>>, %arg4: memref<1x8xf32, #tpu.memory_space<vmem>>, %arg5: memref<128x8xbf16, #tpu.memory_space<vmem>>) attributes {dimension_semantics = [#tpu.dimension_semantics<parallel>], iteration_bounds = array<i64: 1>, scalar_prefetch = 0 : i64, scratch_operands = 0 : i64, tpu.core_type = #tpu.core_type<tc>, window_params = [{transform_indices = @transform_0, window_bounds = array<i64: 128, 32>}, {pipeline_mode = #tpu.pipeline_mode<synchronous>, transform_indices = @transform_1, window_bounds = array<i64: 32, 8>}, {pipeline_mode = #tpu.pipeline_mode<synchronous>, transform_indices = @transform_2, window_bounds = array<i64: 1, 8>}, {pipeline_mode = #tpu.pipeline_mode<synchronous>, transform_indices = @transform_3, window_bounds = array<i64: 1, 8>}, {transform_indices = @transform_4, window_bounds = array<i64: 128, 8>}]} {
    %c0 = arith.constant 0 : index
    %c0_0 = arith.constant 0 : index
    %0 = vector.load %arg1[%c0, %c0_0] : memref<128x32xbf16, #tpu.memory_space<vmem>>, vector<128x32xbf16>
    %c0_1 = arith.constant 0 : index
    %c0_2 = arith.constant 0 : index
    %1 = vector.load %arg2[%c0_1, %c0_2] : memref<32x8xbf16, #tpu.memory_space<vmem>>, vector<32x8xbf16>
    %cst = arith.constant dense<0.000000e+00> : vector<128x8xf32>
    %2 = tpu.matmul %0, %1, %cst {dimension_numbers = #tpu.dot_dimension_numbers<[1], [0], [0], [1], [0, 0, 1, 1], [], []>} : vector<128x32xbf16>, vector<32x8xbf16>, vector<128x8xf32> -> vector<128x8xf32>
    %c0_3 = arith.constant 0 : index
    %c0_4 = arith.constant 0 : index
    %3 = vector.load %arg3[%c0_3, %c0_4] : memref<1x8xf32, #tpu.memory_space<vmem>>, vector<1x8xf32>
    %4 = vector.broadcast %3 : vector<1x8xf32> to vector<128x8xf32>
    %5 = arith.mulf %2, %4 : vector<128x8xf32>
    %c0_5 = arith.constant 0 : index
    %c0_6 = arith.constant 0 : index
    %6 = vector.load %arg4[%c0_5, %c0_6] : memref<1x8xf32, #tpu.memory_space<vmem>>, vector<1x8xf32>
    %7 = vector.broadcast %6 : vector<1x8xf32> to vector<128x8xf32>
    %8 = arith.addf %5, %7 : vector<128x8xf32>
    %cst_7 = arith.constant 0.000000e+00 : f32
    %9 = vector.broadcast %cst_7 : f32 to vector<128x8xf32>
    %10 = arith.maximumf %8, %9 : vector<128x8xf32>
    %11 = arith.truncf %10 : vector<128x8xf32> to vector<128x8xbf16>
    %c0_8 = arith.constant 0 : index
    %c0_9 = arith.constant 0 : index
    %12 = vector.load %arg5[%c0_8, %c0_9] : memref<128x8xbf16, #tpu.memory_space<vmem>>, vector<128x8xbf16>
    tpu.vector_store %arg5[%c0_8, %c0_9], %11 {strides = array<i32>} : memref<128x8xbf16, #tpu.memory_space<vmem>>, vector<128x8xbf16>,
    return
  }
  func.func @transform_0(%arg0: i32) -> (i32, i32) {
    %c0_i32 = arith.constant 0 : i32
    %c0_i32_0 = arith.constant 0 : i32
    return %arg0, %c0_i32 : i32, i32
  }
  func.func @transform_1(%arg0: i32) -> (i32, i32) {
    %c0_i32 = arith.constant 0 : i32
    %c0_i32_0 = arith.constant 0 : i32
    %c0_i32_1 = arith.constant 0 : i32
    return %c0_i32, %c0_i32_0 : i32, i32
  }
  func.func @transform_2(%arg0: i32) -> (i32, i32) {
    %c0_i32 = arith.constant 0 : i32
    %c0_i32_0 = arith.constant 0 : i32
    %c0_i32_1 = arith.constant 0 : i32
    return %c0_i32, %c0_i32_0 : i32, i32
  }
  func.func @transform_3(%arg0: i32) -> (i32, i32) {
    %c0_i32 = arith.constant 0 : i32
    %c0_i32_0 = arith.constant 0 : i32
    %c0_i32_1 = arith.constant 0 : i32
    return %c0_i32, %c0_i32_0 : i32, i32
  }
  func.func @transform_4(%arg0: i32) -> (i32, i32) {
    %c0_i32 = arith.constant 0 : i32
    %c0_i32_0 = arith.constant 0 : i32
    return %arg0, %c0_i32 : i32, i32
  }
}

module attributes {stable_mosaic.version = 11 : i64} {
  func.func @_mm_bn_act_kernel(%arg0: i32, %arg1: memref<128x32xbf16, #tpu.memory_space<vmem>>, %arg2: memref<32x16xbf16, #tpu.memory_space<vmem>>, %arg3: memref<1x16xf32, #tpu.memory_space<vmem>>, %arg4: memref<1x16xf32, #tpu.memory_space<vmem>>, %arg5: memref<128x16xbf16, #tpu.memory_space<vmem>>) attributes {dimension_semantics = [#tpu.dimension_semantics<parallel>], iteration_bounds = array<i64: 1>, scalar_prefetch = 0 : i64, scratch_operands = 0 : i64, tpu.core_type = #tpu.core_type<tc>, window_params = [{transform_indices = @transform_0, window_bounds = array<i64: 128, 32>}, {pipeline_mode = #tpu.pipeline_mode<synchronous>, transform_indices = @transform_1, window_bounds = array<i64: 32, 16>}, {pipeline_mode = #tpu.pipeline_mode<synchronous>, transform_indices = @transform_2, window_bounds = array<i64: 1, 16>}, {pipeline_mode = #tpu.pipeline_mode<synchronous>, transform_indices = @transform_3, window_bounds = array<i64: 1, 16>}, {transform_indices = @transform_4, window_bounds = array<i64: 128, 16>}]} {
    %c0 = arith.constant 0 : index
    %c0_0 = arith.constant 0 : index
    %0 = vector.load %arg1[%c0, %c0_0] : memref<128x32xbf16, #tpu.memory_space<vmem>>, vector<128x32xbf16>
    %c0_1 = arith.constant 0 : index
    %c0_2 = arith.constant 0 : index
    %1 = vector.load %arg2[%c0_1, %c0_2] : memref<32x16xbf16, #tpu.memory_space<vmem>>, vector<32x16xbf16>
    %cst = arith.constant dense<0.000000e+00> : vector<128x16xf32>
    %2 = tpu.matmul %0, %1, %cst {dimension_numbers = #tpu.dot_dimension_numbers<[1], [0], [0], [1], [0, 0, 1, 1], [], []>} : vector<128x32xbf16>, vector<32x16xbf16>, vector<128x16xf32> -> vector<128x16xf32>
    %c0_3 = arith.constant 0 : index
    %c0_4 = arith.constant 0 : index
    %3 = vector.load %arg3[%c0_3, %c0_4] : memref<1x16xf32, #tpu.memory_space<vmem>>, vector<1x16xf32>
    %4 = vector.broadcast %3 : vector<1x16xf32> to vector<128x16xf32>
    %5 = arith.mulf %2, %4 : vector<128x16xf32>
    %c0_5 = arith.constant 0 : index
    %c0_6 = arith.constant 0 : index
    %6 = vector.load %arg4[%c0_5, %c0_6] : memref<1x16xf32, #tpu.memory_space<vmem>>, vector<1x16xf32>
    %7 = vector.broadcast %6 : vector<1x16xf32> to vector<128x16xf32>
    %8 = arith.addf %5, %7 : vector<128x16xf32>
    %cst_7 = arith.constant 0.000000e+00 : f32
    %9 = vector.broadcast %cst_7 : f32 to vector<128x16xf32>
    %10 = arith.maximumf %8, %9 : vector<128x16xf32>
    %11 = arith.truncf %10 : vector<128x16xf32> to vector<128x16xbf16>
    %c0_8 = arith.constant 0 : index
    %c0_9 = arith.constant 0 : index
    %12 = vector.load %arg5[%c0_8, %c0_9] : memref<128x16xbf16, #tpu.memory_space<vmem>>, vector<128x16xbf16>
    tpu.vector_store %arg5[%c0_8, %c0_9], %11 {strides = array<i32>} : memref<128x16xbf16, #tpu.memory_space<vmem>>, vector<128x16xbf16>,
    return
  }
  func.func @transform_0(%arg0: i32) -> (i32, i32) {
    %c0_i32 = arith.constant 0 : i32
    %c0_i32_0 = arith.constant 0 : i32
    return %arg0, %c0_i32 : i32, i32
  }
  func.func @transform_1(%arg0: i32) -> (i32, i32) {
    %c0_i32 = arith.constant 0 : i32
    %c0_i32_0 = arith.constant 0 : i32
    %c0_i32_1 = arith.constant 0 : i32
    return %c0_i32, %c0_i32_0 : i32, i32
  }
  func.func @transform_2(%arg0: i32) -> (i32, i32) {
    %c0_i32 = arith.constant 0 : i32
    %c0_i32_0 = arith.constant 0 : i32
    %c0_i32_1 = arith.constant 0 : i32
    return %c0_i32, %c0_i32_0 : i32, i32
  }
  func.func @transform_3(%arg0: i32) -> (i32, i32) {
    %c0_i32 = arith.constant 0 : i32
    %c0_i32_0 = arith.constant 0 : i32
    %c0_i32_1 = arith.constant 0 : i32
    return %c0_i32, %c0_i32_0 : i32, i32
  }
  func.func @transform_4(%arg0: i32) -> (i32, i32) {
    %c0_i32 = arith.constant 0 : i32
    %c0_i32_0 = arith.constant 0 : i32
    return %arg0, %c0_i32 : i32, i32
  }
}

module attributes {stable_mosaic.version = 11 : i64} {
  func.func @_mm_bn_act_kernel(%arg0: i32, %arg1: memref<32x144xbf16, #tpu.memory_space<vmem>>, %arg2: memref<144x16xbf16, #tpu.memory_space<vmem>>, %arg3: memref<1x16xf32, #tpu.memory_space<vmem>>, %arg4: memref<1x16xf32, #tpu.memory_space<vmem>>, %arg5: memref<32x16xbf16, #tpu.memory_space<vmem>>) attributes {dimension_semantics = [#tpu.dimension_semantics<parallel>], iteration_bounds = array<i64: 1>, scalar_prefetch = 0 : i64, scratch_operands = 0 : i64, tpu.core_type = #tpu.core_type<tc>, window_params = [{transform_indices = @transform_0, window_bounds = array<i64: 32, 144>}, {pipeline_mode = #tpu.pipeline_mode<synchronous>, transform_indices = @transform_1, window_bounds = array<i64: 144, 16>}, {pipeline_mode = #tpu.pipeline_mode<synchronous>, transform_indices = @transform_2, window_bounds = array<i64: 1, 16>}, {pipeline_mode = #tpu.pipeline_mode<synchronous>, transform_indices = @transform_3, window_bounds = array<i64: 1, 16>}, {transform_indices = @transform_4, window_bounds = array<i64: 32, 16>}]} {
    %c0 = arith.constant 0 : index
    %c0_0 = arith.constant 0 : index
    %0 = vector.load %arg1[%c0, %c0_0] : memref<32x144xbf16, #tpu.memory_space<vmem>>, vector<32x144xbf16>
    %c0_1 = arith.constant 0 : index
    %c0_2 = arith.constant 0 : index
    %1 = vector.load %arg2[%c0_1, %c0_2] : memref<144x16xbf16, #tpu.memory_space<vmem>>, vector<144x16xbf16>
    %cst = arith.constant dense<0.000000e+00> : vector<32x16xf32>
    %2 = tpu.matmul %0, %1, %cst {dimension_numbers = #tpu.dot_dimension_numbers<[1], [0], [0], [1], [0, 0, 1, 1], [], []>} : vector<32x144xbf16>, vector<144x16xbf16>, vector<32x16xf32> -> vector<32x16xf32>
    %c0_3 = arith.constant 0 : index
    %c0_4 = arith.constant 0 : index
    %3 = vector.load %arg3[%c0_3, %c0_4] : memref<1x16xf32, #tpu.memory_space<vmem>>, vector<1x16xf32>
    %4 = vector.broadcast %3 : vector<1x16xf32> to vector<32x16xf32>
    %5 = arith.mulf %2, %4 : vector<32x16xf32>
    %c0_5 = arith.constant 0 : index
    %c0_6 = arith.constant 0 : index
    %6 = vector.load %arg4[%c0_5, %c0_6] : memref<1x16xf32, #tpu.memory_space<vmem>>, vector<1x16xf32>
    %7 = vector.broadcast %6 : vector<1x16xf32> to vector<32x16xf32>
    %8 = arith.addf %5, %7 : vector<32x16xf32>
    %cst_7 = arith.constant 0.000000e+00 : f32
    %9 = vector.broadcast %cst_7 : f32 to vector<32x16xf32>
    %10 = arith.maximumf %8, %9 : vector<32x16xf32>
    %11 = arith.truncf %10 : vector<32x16xf32> to vector<32x16xbf16>
    %c0_8 = arith.constant 0 : index
    %c0_9 = arith.constant 0 : index
    %12 = vector.load %arg5[%c0_8, %c0_9] : memref<32x16xbf16, #tpu.memory_space<vmem>>, vector<32x16xbf16>
    tpu.vector_store %arg5[%c0_8, %c0_9], %11 {strides = array<i32>} : memref<32x16xbf16, #tpu.memory_space<vmem>>, vector<32x16xbf16>,
    return
  }
  func.func @transform_0(%arg0: i32) -> (i32, i32) {
    %c0_i32 = arith.constant 0 : i32
    %c0_i32_0 = arith.constant 0 : i32
    return %arg0, %c0_i32 : i32, i32
  }
  func.func @transform_1(%arg0: i32) -> (i32, i32) {
    %c0_i32 = arith.constant 0 : i32
    %c0_i32_0 = arith.constant 0 : i32
    %c0_i32_1 = arith.constant 0 : i32
    return %c0_i32, %c0_i32_0 : i32, i32
  }
  func.func @transform_2(%arg0: i32) -> (i32, i32) {
    %c0_i32 = arith.constant 0 : i32
    %c0_i32_0 = arith.constant 0 : i32
    %c0_i32_1 = arith.constant 0 : i32
    return %c0_i32, %c0_i32_0 : i32, i32
  }
  func.func @transform_3(%arg0: i32) -> (i32, i32) {
    %c0_i32 = arith.constant 0 : i32
    %c0_i32_0 = arith.constant 0 : i32
    %c0_i32_1 = arith.constant 0 : i32
    return %c0_i32, %c0_i32_0 : i32, i32
  }
  func.func @transform_4(%arg0: i32) -> (i32, i32) {
    %c0_i32 = arith.constant 0 : i32
    %c0_i32_0 = arith.constant 0 : i32
    return %arg0, %c0_i32 : i32, i32
  }
}

module attributes {stable_mosaic.version = 11 : i64} {
  func.func @_mm_bn_act_kernel(%arg0: i32, %arg1: memref<32x16xbf16, #tpu.memory_space<vmem>>, %arg2: memref<16x64xbf16, #tpu.memory_space<vmem>>, %arg3: memref<1x64xf32, #tpu.memory_space<vmem>>, %arg4: memref<1x64xf32, #tpu.memory_space<vmem>>, %arg5: memref<32x64xbf16, #tpu.memory_space<vmem>>, %arg6: memref<32x64xbf16, #tpu.memory_space<vmem>>) attributes {dimension_semantics = [#tpu.dimension_semantics<parallel>], iteration_bounds = array<i64: 1>, scalar_prefetch = 0 : i64, scratch_operands = 0 : i64, tpu.core_type = #tpu.core_type<tc>, window_params = [{transform_indices = @transform_0, window_bounds = array<i64: 32, 16>}, {pipeline_mode = #tpu.pipeline_mode<synchronous>, transform_indices = @transform_1, window_bounds = array<i64: 16, 64>}, {pipeline_mode = #tpu.pipeline_mode<synchronous>, transform_indices = @transform_2, window_bounds = array<i64: 1, 64>}, {pipeline_mode = #tpu.pipeline_mode<synchronous>, transform_indices = @transform_3, window_bounds = array<i64: 1, 64>}, {transform_indices = @transform_4, window_bounds = array<i64: 32, 64>}, {transform_indices = @transform_5, window_bounds = array<i64: 32, 64>}]} {
    %c0 = arith.constant 0 : index
    %c0_0 = arith.constant 0 : index
    %0 = vector.load %arg1[%c0, %c0_0] : memref<32x16xbf16, #tpu.memory_space<vmem>>, vector<32x16xbf16>
    %c0_1 = arith.constant 0 : index
    %c0_2 = arith.constant 0 : index
    %1 = vector.load %arg2[%c0_1, %c0_2] : memref<16x64xbf16, #tpu.memory_space<vmem>>, vector<16x64xbf16>
    %cst = arith.constant dense<0.000000e+00> : vector<32x64xf32>
    %2 = tpu.matmul %0, %1, %cst {dimension_numbers = #tpu.dot_dimension_numbers<[1], [0], [0], [1], [0, 0, 1, 1], [], []>} : vector<32x16xbf16>, vector<16x64xbf16>, vector<32x64xf32> -> vector<32x64xf32>
    %c0_3 = arith.constant 0 : index
    %c0_4 = arith.constant 0 : index
    %3 = vector.load %arg3[%c0_3, %c0_4] : memref<1x64xf32, #tpu.memory_space<vmem>>, vector<1x64xf32>
    %4 = vector.broadcast %3 : vector<1x64xf32> to vector<32x64xf32>
    %5 = arith.mulf %2, %4 : vector<32x64xf32>
    %c0_5 = arith.constant 0 : index
    %c0_6 = arith.constant 0 : index
    %6 = vector.load %arg4[%c0_5, %c0_6] : memref<1x64xf32, #tpu.memory_space<vmem>>, vector<1x64xf32>
    %7 = vector.broadcast %6 : vector<1x64xf32> to vector<32x64xf32>
    %8 = arith.addf %5, %7 : vector<32x64xf32>
    %c0_7 = arith.constant 0 : index
    %c0_8 = arith.constant 0 : index
    %9 = vector.load %arg5[%c0_7, %c0_8] : memref<32x64xbf16, #tpu.memory_space<vmem>>, vector<32x64xbf16>
    %10 = arith.extf %9 : vector<32x64xbf16> to vector<32x64xf32>
    %11 = arith.addf %8, %10 : vector<32x64xf32>
    %cst_9 = arith.constant 0.000000e+00 : f32
    %12 = vector.broadcast %cst_9 : f32 to vector<32x64xf32>
    %13 = arith.maximumf %11, %12 : vector<32x64xf32>
    %14 = arith.truncf %13 : vector<32x64xf32> to vector<32x64xbf16>
    %c0_10 = arith.constant 0 : index
    %c0_11 = arith.constant 0 : index
    %15 = vector.load %arg6[%c0_10, %c0_11] : memref<32x64xbf16, #tpu.memory_space<vmem>>, vector<32x64xbf16>
    tpu.vector_store %arg6[%c0_10, %c0_11], %14 {strides = array<i32>} : memref<32x64xbf16, #tpu.memory_space<vmem>>, vector<32x64xbf16>,
    return
  }
  func.func @transform_0(%arg0: i32) -> (i32, i32) {
    %c0_i32 = arith.constant 0 : i32
    %c0_i32_0 = arith.constant 0 : i32
    return %arg0, %c0_i32 : i32, i32
  }
  func.func @transform_1(%arg0: i32) -> (i32, i32) {
    %c0_i32 = arith.constant 0 : i32
    %c0_i32_0 = arith.constant 0 : i32
    %c0_i32_1 = arith.constant 0 : i32
    return %c0_i32, %c0_i32_0 : i32, i32
  }
  func.func @transform_2(%arg0: i32) -> (i32, i32) {
    %c0_i32 = arith.constant 0 : i32
    %c0_i32_0 = arith.constant 0 : i32
    %c0_i32_1 = arith.constant 0 : i32
    return %c0_i32, %c0_i32_0 : i32, i32
  }
  func.func @transform_3(%arg0: i32) -> (i32, i32) {
    %c0_i32 = arith.constant 0 : i32
    %c0_i32_0 = arith.constant 0 : i32
    %c0_i32_1 = arith.constant 0 : i32
    return %c0_i32, %c0_i32_0 : i32, i32
  }
  func.func @transform_4(%arg0: i32) -> (i32, i32) {
    %c0_i32 = arith.constant 0 : i32
    %c0_i32_0 = arith.constant 0 : i32
    return %arg0, %c0_i32 : i32, i32
  }
  func.func @transform_5(%arg0: i32) -> (i32, i32) {
    %c0_i32 = arith.constant 0 : i32
    %c0_i32_0 = arith.constant 0 : i32
    return %arg0, %c0_i32 : i32, i32
  }
}

module attributes {stable_mosaic.version = 11 : i64} {
  func.func @_mm_bn_act_kernel(%arg0: i32, %arg1: memref<32x32xbf16, #tpu.memory_space<vmem>>, %arg2: memref<32x64xbf16, #tpu.memory_space<vmem>>, %arg3: memref<1x64xf32, #tpu.memory_space<vmem>>, %arg4: memref<1x64xf32, #tpu.memory_space<vmem>>, %arg5: memref<32x64xbf16, #tpu.memory_space<vmem>>) attributes {dimension_semantics = [#tpu.dimension_semantics<parallel>], iteration_bounds = array<i64: 1>, scalar_prefetch = 0 : i64, scratch_operands = 0 : i64, tpu.core_type = #tpu.core_type<tc>, window_params = [{transform_indices = @transform_0, window_bounds = array<i64: 32, 32>}, {pipeline_mode = #tpu.pipeline_mode<synchronous>, transform_indices = @transform_1, window_bounds = array<i64: 32, 64>}, {pipeline_mode = #tpu.pipeline_mode<synchronous>, transform_indices = @transform_2, window_bounds = array<i64: 1, 64>}, {pipeline_mode = #tpu.pipeline_mode<synchronous>, transform_indices = @transform_3, window_bounds = array<i64: 1, 64>}, {transform_indices = @transform_4, window_bounds = array<i64: 32, 64>}]} {
    %c0 = arith.constant 0 : index
    %c0_0 = arith.constant 0 : index
    %0 = vector.load %arg1[%c0, %c0_0] : memref<32x32xbf16, #tpu.memory_space<vmem>>, vector<32x32xbf16>
    %c0_1 = arith.constant 0 : index
    %c0_2 = arith.constant 0 : index
    %1 = vector.load %arg2[%c0_1, %c0_2] : memref<32x64xbf16, #tpu.memory_space<vmem>>, vector<32x64xbf16>
    %cst = arith.constant dense<0.000000e+00> : vector<32x64xf32>
    %2 = tpu.matmul %0, %1, %cst {dimension_numbers = #tpu.dot_dimension_numbers<[1], [0], [0], [1], [0, 0, 1, 1], [], []>} : vector<32x32xbf16>, vector<32x64xbf16>, vector<32x64xf32> -> vector<32x64xf32>
    %c0_3 = arith.constant 0 : index
    %c0_4 = arith.constant 0 : index
    %3 = vector.load %arg3[%c0_3, %c0_4] : memref<1x64xf32, #tpu.memory_space<vmem>>, vector<1x64xf32>
    %4 = vector.broadcast %3 : vector<1x64xf32> to vector<32x64xf32>
    %5 = arith.mulf %2, %4 : vector<32x64xf32>
    %c0_5 = arith.constant 0 : index
    %c0_6 = arith.constant 0 : index
    %6 = vector.load %arg4[%c0_5, %c0_6] : memref<1x64xf32, #tpu.memory_space<vmem>>, vector<1x64xf32>
    %7 = vector.broadcast %6 : vector<1x64xf32> to vector<32x64xf32>
    %8 = arith.addf %5, %7 : vector<32x64xf32>
    %9 = arith.truncf %8 : vector<32x64xf32> to vector<32x64xbf16>
    %c0_7 = arith.constant 0 : index
    %c0_8 = arith.constant 0 : index
    %10 = vector.load %arg5[%c0_7, %c0_8] : memref<32x64xbf16, #tpu.memory_space<vmem>>, vector<32x64xbf16>
    tpu.vector_store %arg5[%c0_7, %c0_8], %9 {strides = array<i32>} : memref<32x64xbf16, #tpu.memory_space<vmem>>, vector<32x64xbf16>,
    return
  }
  func.func @transform_0(%arg0: i32) -> (i32, i32) {
    %c0_i32 = arith.constant 0 : i32
    %c0_i32_0 = arith.constant 0 : i32
    return %arg0, %c0_i32 : i32, i32
  }
  func.func @transform_1(%arg0: i32) -> (i32, i32) {
    %c0_i32 = arith.constant 0 : i32
    %c0_i32_0 = arith.constant 0 : i32
    %c0_i32_1 = arith.constant 0 : i32
    return %c0_i32, %c0_i32_0 : i32, i32
  }
  func.func @transform_2(%arg0: i32) -> (i32, i32) {
    %c0_i32 = arith.constant 0 : i32
    %c0_i32_0 = arith.constant 0 : i32
    %c0_i32_1 = arith.constant 0 : i32
    return %c0_i32, %c0_i32_0 : i32, i32
  }
  func.func @transform_3(%arg0: i32) -> (i32, i32) {
    %c0_i32 = arith.constant 0 : i32
    %c0_i32_0 = arith.constant 0 : i32
    %c0_i32_1 = arith.constant 0 : i32
    return %c0_i32, %c0_i32_0 : i32, i32
  }
  func.func @transform_4(%arg0: i32) -> (i32, i32) {
    %c0_i32 = arith.constant 0 : i32
    %c0_i32_0 = arith.constant 0 : i32
    return %arg0, %c0_i32 : i32, i32
  }
}

module attributes {stable_mosaic.version = 11 : i64} {
  func.func @_mm_bn_act_kernel(%arg0: i32, %arg1: memref<32x64xbf16, #tpu.memory_space<vmem>>, %arg2: memref<64x16xbf16, #tpu.memory_space<vmem>>, %arg3: memref<1x16xf32, #tpu.memory_space<vmem>>, %arg4: memref<1x16xf32, #tpu.memory_space<vmem>>, %arg5: memref<32x16xbf16, #tpu.memory_space<vmem>>) attributes {dimension_semantics = [#tpu.dimension_semantics<parallel>], iteration_bounds = array<i64: 1>, scalar_prefetch = 0 : i64, scratch_operands = 0 : i64, tpu.core_type = #tpu.core_type<tc>, window_params = [{transform_indices = @transform_0, window_bounds = array<i64: 32, 64>}, {pipeline_mode = #tpu.pipeline_mode<synchronous>, transform_indices = @transform_1, window_bounds = array<i64: 64, 16>}, {pipeline_mode = #tpu.pipeline_mode<synchronous>, transform_indices = @transform_2, window_bounds = array<i64: 1, 16>}, {pipeline_mode = #tpu.pipeline_mode<synchronous>, transform_indices = @transform_3, window_bounds = array<i64: 1, 16>}, {transform_indices = @transform_4, window_bounds = array<i64: 32, 16>}]} {
    %c0 = arith.constant 0 : index
    %c0_0 = arith.constant 0 : index
    %0 = vector.load %arg1[%c0, %c0_0] : memref<32x64xbf16, #tpu.memory_space<vmem>>, vector<32x64xbf16>
    %c0_1 = arith.constant 0 : index
    %c0_2 = arith.constant 0 : index
    %1 = vector.load %arg2[%c0_1, %c0_2] : memref<64x16xbf16, #tpu.memory_space<vmem>>, vector<64x16xbf16>
    %cst = arith.constant dense<0.000000e+00> : vector<32x16xf32>
    %2 = tpu.matmul %0, %1, %cst {dimension_numbers = #tpu.dot_dimension_numbers<[1], [0], [0], [1], [0, 0, 1, 1], [], []>} : vector<32x64xbf16>, vector<64x16xbf16>, vector<32x16xf32> -> vector<32x16xf32>
    %c0_3 = arith.constant 0 : index
    %c0_4 = arith.constant 0 : index
    %3 = vector.load %arg3[%c0_3, %c0_4] : memref<1x16xf32, #tpu.memory_space<vmem>>, vector<1x16xf32>
    %4 = vector.broadcast %3 : vector<1x16xf32> to vector<32x16xf32>
    %5 = arith.mulf %2, %4 : vector<32x16xf32>
    %c0_5 = arith.constant 0 : index
    %c0_6 = arith.constant 0 : index
    %6 = vector.load %arg4[%c0_5, %c0_6] : memref<1x16xf32, #tpu.memory_space<vmem>>, vector<1x16xf32>
    %7 = vector.broadcast %6 : vector<1x16xf32> to vector<32x16xf32>
    %8 = arith.addf %5, %7 : vector<32x16xf32>
    %cst_7 = arith.constant 0.000000e+00 : f32
    %9 = vector.broadcast %cst_7 : f32 to vector<32x16xf32>
    %10 = arith.maximumf %8, %9 : vector<32x16xf32>
    %11 = arith.truncf %10 : vector<32x16xf32> to vector<32x16xbf16>
    %c0_8 = arith.constant 0 : index
    %c0_9 = arith.constant 0 : index
    %12 = vector.load %arg5[%c0_8, %c0_9] : memref<32x16xbf16, #tpu.memory_space<vmem>>, vector<32x16xbf16>
    tpu.vector_store %arg5[%c0_8, %c0_9], %11 {strides = array<i32>} : memref<32x16xbf16, #tpu.memory_space<vmem>>, vector<32x16xbf16>,
    return
  }
  func.func @transform_0(%arg0: i32) -> (i32, i32) {
    %c0_i32 = arith.constant 0 : i32
    %c0_i32_0 = arith.constant 0 : i32
    return %arg0, %c0_i32 : i32, i32
  }
  func.func @transform_1(%arg0: i32) -> (i32, i32) {
    %c0_i32 = arith.constant 0 : i32
    %c0_i32_0 = arith.constant 0 : i32
    %c0_i32_1 = arith.constant 0 : i32
    return %c0_i32, %c0_i32_0 : i32, i32
  }
  func.func @transform_2(%arg0: i32) -> (i32, i32) {
    %c0_i32 = arith.constant 0 : i32
    %c0_i32_0 = arith.constant 0 : i32
    %c0_i32_1 = arith.constant 0 : i32
    return %c0_i32, %c0_i32_0 : i32, i32
  }
  func.func @transform_3(%arg0: i32) -> (i32, i32) {
    %c0_i32 = arith.constant 0 : i32
    %c0_i32_0 = arith.constant 0 : i32
    %c0_i32_1 = arith.constant 0 : i32
    return %c0_i32, %c0_i32_0 : i32, i32
  }
  func.func @transform_4(%arg0: i32) -> (i32, i32) {
    %c0_i32 = arith.constant 0 : i32
    %c0_i32_0 = arith.constant 0 : i32
    return %arg0, %c0_i32 : i32, i32
  }
}

module attributes {stable_mosaic.version = 11 : i64} {
  func.func @_mm_bn_act_kernel(%arg0: i32, %arg1: memref<32x64xbf16, #tpu.memory_space<vmem>>, %arg2: memref<64x32xbf16, #tpu.memory_space<vmem>>, %arg3: memref<1x32xf32, #tpu.memory_space<vmem>>, %arg4: memref<1x32xf32, #tpu.memory_space<vmem>>, %arg5: memref<32x32xbf16, #tpu.memory_space<vmem>>) attributes {dimension_semantics = [#tpu.dimension_semantics<parallel>], iteration_bounds = array<i64: 1>, scalar_prefetch = 0 : i64, scratch_operands = 0 : i64, tpu.core_type = #tpu.core_type<tc>, window_params = [{transform_indices = @transform_0, window_bounds = array<i64: 32, 64>}, {pipeline_mode = #tpu.pipeline_mode<synchronous>, transform_indices = @transform_1, window_bounds = array<i64: 64, 32>}, {pipeline_mode = #tpu.pipeline_mode<synchronous>, transform_indices = @transform_2, window_bounds = array<i64: 1, 32>}, {pipeline_mode = #tpu.pipeline_mode<synchronous>, transform_indices = @transform_3, window_bounds = array<i64: 1, 32>}, {transform_indices = @transform_4, window_bounds = array<i64: 32, 32>}]} {
    %c0 = arith.constant 0 : index
    %c0_0 = arith.constant 0 : index
    %0 = vector.load %arg1[%c0, %c0_0] : memref<32x64xbf16, #tpu.memory_space<vmem>>, vector<32x64xbf16>
    %c0_1 = arith.constant 0 : index
    %c0_2 = arith.constant 0 : index
    %1 = vector.load %arg2[%c0_1, %c0_2] : memref<64x32xbf16, #tpu.memory_space<vmem>>, vector<64x32xbf16>
    %cst = arith.constant dense<0.000000e+00> : vector<32x32xf32>
    %2 = tpu.matmul %0, %1, %cst {dimension_numbers = #tpu.dot_dimension_numbers<[1], [0], [0], [1], [0, 0, 1, 1], [], []>} : vector<32x64xbf16>, vector<64x32xbf16>, vector<32x32xf32> -> vector<32x32xf32>
    %c0_3 = arith.constant 0 : index
    %c0_4 = arith.constant 0 : index
    %3 = vector.load %arg3[%c0_3, %c0_4] : memref<1x32xf32, #tpu.memory_space<vmem>>, vector<1x32xf32>
    %4 = vector.broadcast %3 : vector<1x32xf32> to vector<32x32xf32>
    %5 = arith.mulf %2, %4 : vector<32x32xf32>
    %c0_5 = arith.constant 0 : index
    %c0_6 = arith.constant 0 : index
    %6 = vector.load %arg4[%c0_5, %c0_6] : memref<1x32xf32, #tpu.memory_space<vmem>>, vector<1x32xf32>
    %7 = vector.broadcast %6 : vector<1x32xf32> to vector<32x32xf32>
    %8 = arith.addf %5, %7 : vector<32x32xf32>
    %cst_7 = arith.constant 0.000000e+00 : f32
    %9 = vector.broadcast %cst_7 : f32 to vector<32x32xf32>
    %10 = arith.maximumf %8, %9 : vector<32x32xf32>
    %11 = arith.truncf %10 : vector<32x32xf32> to vector<32x32xbf16>
    %c0_8 = arith.constant 0 : index
    %c0_9 = arith.constant 0 : index
    %12 = vector.load %arg5[%c0_8, %c0_9] : memref<32x32xbf16, #tpu.memory_space<vmem>>, vector<32x32xbf16>
    tpu.vector_store %arg5[%c0_8, %c0_9], %11 {strides = array<i32>} : memref<32x32xbf16, #tpu.memory_space<vmem>>, vector<32x32xbf16>,
    return
  }
  func.func @transform_0(%arg0: i32) -> (i32, i32) {
    %c0_i32 = arith.constant 0 : i32
    %c0_i32_0 = arith.constant 0 : i32
    return %arg0, %c0_i32 : i32, i32
  }
  func.func @transform_1(%arg0: i32) -> (i32, i32) {
    %c0_i32 = arith.constant 0 : i32
    %c0_i32_0 = arith.constant 0 : i32
    %c0_i32_1 = arith.constant 0 : i32
    return %c0_i32, %c0_i32_0 : i32, i32
  }
  func.func @transform_2(%arg0: i32) -> (i32, i32) {
    %c0_i32 = arith.constant 0 : i32
    %c0_i32_0 = arith.constant 0 : i32
    %c0_i32_1 = arith.constant 0 : i32
    return %c0_i32, %c0_i32_0 : i32, i32
  }
  func.func @transform_3(%arg0: i32) -> (i32, i32) {
    %c0_i32 = arith.constant 0 : i32
    %c0_i32_0 = arith.constant 0 : i32
    %c0_i32_1 = arith.constant 0 : i32
    return %c0_i32, %c0_i32_0 : i32, i32
  }
  func.func @transform_4(%arg0: i32) -> (i32, i32) {
    %c0_i32 = arith.constant 0 : i32
    %c0_i32_0 = arith.constant 0 : i32
    return %arg0, %c0_i32 : i32, i32
  }
}

module attributes {stable_mosaic.version = 11 : i64} {
  func.func @_mm_bn_act_kernel(%arg0: i32, %arg1: memref<32x16xbf16, #tpu.memory_space<vmem>>, %arg2: memref<16x64xbf16, #tpu.memory_space<vmem>>, %arg3: memref<1x64xf32, #tpu.memory_space<vmem>>, %arg4: memref<1x64xf32, #tpu.memory_space<vmem>>, %arg5: memref<32x64xbf16, #tpu.memory_space<vmem>>, %arg6: memref<32x64xbf16, #tpu.memory_space<vmem>>) attributes {dimension_semantics = [#tpu.dimension_semantics<parallel>], iteration_bounds = array<i64: 1>, scalar_prefetch = 0 : i64, scratch_operands = 0 : i64, tpu.core_type = #tpu.core_type<tc>, window_params = [{transform_indices = @transform_0, window_bounds = array<i64: 32, 16>}, {pipeline_mode = #tpu.pipeline_mode<synchronous>, transform_indices = @transform_1, window_bounds = array<i64: 16, 64>}, {pipeline_mode = #tpu.pipeline_mode<synchronous>, transform_indices = @transform_2, window_bounds = array<i64: 1, 64>}, {pipeline_mode = #tpu.pipeline_mode<synchronous>, transform_indices = @transform_3, window_bounds = array<i64: 1, 64>}, {transform_indices = @transform_4, window_bounds = array<i64: 32, 64>}, {transform_indices = @transform_5, window_bounds = array<i64: 32, 64>}]} {
    %c0 = arith.constant 0 : index
    %c0_0 = arith.constant 0 : index
    %0 = vector.load %arg1[%c0, %c0_0] : memref<32x16xbf16, #tpu.memory_space<vmem>>, vector<32x16xbf16>
    %c0_1 = arith.constant 0 : index
    %c0_2 = arith.constant 0 : index
    %1 = vector.load %arg2[%c0_1, %c0_2] : memref<16x64xbf16, #tpu.memory_space<vmem>>, vector<16x64xbf16>
    %cst = arith.constant dense<0.000000e+00> : vector<32x64xf32>
    %2 = tpu.matmul %0, %1, %cst {dimension_numbers = #tpu.dot_dimension_numbers<[1], [0], [0], [1], [0, 0, 1, 1], [], []>} : vector<32x16xbf16>, vector<16x64xbf16>, vector<32x64xf32> -> vector<32x64xf32>
    %c0_3 = arith.constant 0 : index
    %c0_4 = arith.constant 0 : index
    %3 = vector.load %arg3[%c0_3, %c0_4] : memref<1x64xf32, #tpu.memory_space<vmem>>, vector<1x64xf32>
    %4 = vector.broadcast %3 : vector<1x64xf32> to vector<32x64xf32>
    %5 = arith.mulf %2, %4 : vector<32x64xf32>
    %c0_5 = arith.constant 0 : index
    %c0_6 = arith.constant 0 : index
    %6 = vector.load %arg4[%c0_5, %c0_6] : memref<1x64xf32, #tpu.memory_space<vmem>>, vector<1x64xf32>
    %7 = vector.broadcast %6 : vector<1x64xf32> to vector<32x64xf32>
    %8 = arith.addf %5, %7 : vector<32x64xf32>
    %c0_7 = arith.constant 0 : index
    %c0_8 = arith.constant 0 : index
    %9 = vector.load %arg5[%c0_7, %c0_8] : memref<32x64xbf16, #tpu.memory_space<vmem>>, vector<32x64xbf16>
    %10 = arith.extf %9 : vector<32x64xbf16> to vector<32x64xf32>
    %11 = arith.addf %8, %10 : vector<32x64xf32>
    %cst_9 = arith.constant 0.000000e+00 : f32
    %12 = vector.broadcast %cst_9 : f32 to vector<32x64xf32>
    %13 = arith.maximumf %11, %12 : vector<32x64xf32>
    %14 = arith.truncf %13 : vector<32x64xf32> to vector<32x64xbf16>
    %c0_10 = arith.constant 0 : index
    %c0_11 = arith.constant 0 : index
    %15 = vector.load %arg6[%c0_10, %c0_11] : memref<32x64xbf16, #tpu.memory_space<vmem>>, vector<32x64xbf16>
    tpu.vector_store %arg6[%c0_10, %c0_11], %14 {strides = array<i32>} : memref<32x64xbf16, #tpu.memory_space<vmem>>, vector<32x64xbf16>,
    return
  }
  func.func @transform_0(%arg0: i32) -> (i32, i32) {
    %c0_i32 = arith.constant 0 : i32
    %c0_i32_0 = arith.constant 0 : i32
    return %arg0, %c0_i32 : i32, i32
  }
  func.func @transform_1(%arg0: i32) -> (i32, i32) {
    %c0_i32 = arith.constant 0 : i32
    %c0_i32_0 = arith.constant 0 : i32
    %c0_i32_1 = arith.constant 0 : i32
    return %c0_i32, %c0_i32_0 : i32, i32
  }
  func.func @transform_2(%arg0: i32) -> (i32, i32) {
    %c0_i32 = arith.constant 0 : i32
    %c0_i32_0 = arith.constant 0 : i32
    %c0_i32_1 = arith.constant 0 : i32
    return %c0_i32, %c0_i32_0 : i32, i32
  }
  func.func @transform_3(%arg0: i32) -> (i32, i32) {
    %c0_i32 = arith.constant 0 : i32
    %c0_i32_0 = arith.constant 0 : i32
    %c0_i32_1 = arith.constant 0 : i32
    return %c0_i32, %c0_i32_0 : i32, i32
  }
  func.func @transform_4(%arg0: i32) -> (i32, i32) {
    %c0_i32 = arith.constant 0 : i32
    %c0_i32_0 = arith.constant 0 : i32
    return %arg0, %c0_i32 : i32, i32
  }
  func.func @transform_5(%arg0: i32) -> (i32, i32) {
    %c0_i32 = arith.constant 0 : i32
    %c0_i32_0 = arith.constant 0 : i32
    return %arg0, %c0_i32 : i32, i32
  }
}

module attributes {stable_mosaic.version = 11 : i64} {
  func.func @_mm_bn_act_kernel(%arg0: i32, %arg1: memref<8x64xbf16, #tpu.memory_space<vmem>>, %arg2: memref<64x128xbf16, #tpu.memory_space<vmem>>, %arg3: memref<1x128xf32, #tpu.memory_space<vmem>>, %arg4: memref<1x128xf32, #tpu.memory_space<vmem>>, %arg5: memref<8x128xbf16, #tpu.memory_space<vmem>>) attributes {dimension_semantics = [#tpu.dimension_semantics<parallel>], iteration_bounds = array<i64: 1>, scalar_prefetch = 0 : i64, scratch_operands = 0 : i64, tpu.core_type = #tpu.core_type<tc>, window_params = [{transform_indices = @transform_0, window_bounds = array<i64: 8, 64>}, {pipeline_mode = #tpu.pipeline_mode<synchronous>, transform_indices = @transform_1, window_bounds = array<i64: 64, 128>}, {pipeline_mode = #tpu.pipeline_mode<synchronous>, transform_indices = @transform_2, window_bounds = array<i64: 1, 128>}, {pipeline_mode = #tpu.pipeline_mode<synchronous>, transform_indices = @transform_3, window_bounds = array<i64: 1, 128>}, {transform_indices = @transform_4, window_bounds = array<i64: 8, 128>}]} {
    %c0 = arith.constant 0 : index
    %c0_0 = arith.constant 0 : index
    %0 = vector.load %arg1[%c0, %c0_0] : memref<8x64xbf16, #tpu.memory_space<vmem>>, vector<8x64xbf16>
    %c0_1 = arith.constant 0 : index
    %c0_2 = arith.constant 0 : index
    %1 = vector.load %arg2[%c0_1, %c0_2] : memref<64x128xbf16, #tpu.memory_space<vmem>>, vector<64x128xbf16>
    %cst = arith.constant dense<0.000000e+00> : vector<8x128xf32>
    %2 = tpu.matmul %0, %1, %cst {dimension_numbers = #tpu.dot_dimension_numbers<[1], [0], [0], [1], [0, 0, 1, 1], [], []>} : vector<8x64xbf16>, vector<64x128xbf16>, vector<8x128xf32> -> vector<8x128xf32>
    %c0_3 = arith.constant 0 : index
    %c0_4 = arith.constant 0 : index
    %3 = vector.load %arg3[%c0_3, %c0_4] : memref<1x128xf32, #tpu.memory_space<vmem>>, vector<1x128xf32>
    %4 = vector.broadcast %3 : vector<1x128xf32> to vector<8x128xf32>
    %5 = arith.mulf %2, %4 : vector<8x128xf32>
    %c0_5 = arith.constant 0 : index
    %c0_6 = arith.constant 0 : index
    %6 = vector.load %arg4[%c0_5, %c0_6] : memref<1x128xf32, #tpu.memory_space<vmem>>, vector<1x128xf32>
    %7 = vector.broadcast %6 : vector<1x128xf32> to vector<8x128xf32>
    %8 = arith.addf %5, %7 : vector<8x128xf32>
    %9 = arith.truncf %8 : vector<8x128xf32> to vector<8x128xbf16>
    %c0_7 = arith.constant 0 : index
    %c0_8 = arith.constant 0 : index
    %10 = vector.load %arg5[%c0_7, %c0_8] : memref<8x128xbf16, #tpu.memory_space<vmem>>, vector<8x128xbf16>
    tpu.vector_store %arg5[%c0_7, %c0_8], %9 {strides = array<i32>} : memref<8x128xbf16, #tpu.memory_space<vmem>>, vector<8x128xbf16>,
    return
  }
  func.func @transform_0(%arg0: i32) -> (i32, i32) {
    %c0_i32 = arith.constant 0 : i32
    %c0_i32_0 = arith.constant 0 : i32
    return %arg0, %c0_i32 : i32, i32
  }
  func.func @transform_1(%arg0: i32) -> (i32, i32) {
    %c0_i32 = arith.constant 0 : i32
    %c0_i32_0 = arith.constant 0 : i32
    %c0_i32_1 = arith.constant 0 : i32
    return %c0_i32, %c0_i32_0 : i32, i32
  }
  func.func @transform_2(%arg0: i32) -> (i32, i32) {
    %c0_i32 = arith.constant 0 : i32
    %c0_i32_0 = arith.constant 0 : i32
    %c0_i32_1 = arith.constant 0 : i32
    return %c0_i32, %c0_i32_0 : i32, i32
  }
  func.func @transform_3(%arg0: i32) -> (i32, i32) {
    %c0_i32 = arith.constant 0 : i32
    %c0_i32_0 = arith.constant 0 : i32
    %c0_i32_1 = arith.constant 0 : i32
    return %c0_i32, %c0_i32_0 : i32, i32
  }
  func.func @transform_4(%arg0: i32) -> (i32, i32) {
    %c0_i32 = arith.constant 0 : i32
    %c0_i32_0 = arith.constant 0 : i32
    return %arg0, %c0_i32 : i32, i32
  }
}

module attributes {stable_mosaic.version = 11 : i64} {
  func.func @_mm_bn_act_kernel(%arg0: i32, %arg1: memref<8x288xbf16, #tpu.memory_space<vmem>>, %arg2: memref<288x32xbf16, #tpu.memory_space<vmem>>, %arg3: memref<1x32xf32, #tpu.memory_space<vmem>>, %arg4: memref<1x32xf32, #tpu.memory_space<vmem>>, %arg5: memref<8x32xbf16, #tpu.memory_space<vmem>>) attributes {dimension_semantics = [#tpu.dimension_semantics<parallel>], iteration_bounds = array<i64: 1>, scalar_prefetch = 0 : i64, scratch_operands = 0 : i64, tpu.core_type = #tpu.core_type<tc>, window_params = [{transform_indices = @transform_0, window_bounds = array<i64: 8, 288>}, {pipeline_mode = #tpu.pipeline_mode<synchronous>, transform_indices = @transform_1, window_bounds = array<i64: 288, 32>}, {pipeline_mode = #tpu.pipeline_mode<synchronous>, transform_indices = @transform_2, window_bounds = array<i64: 1, 32>}, {pipeline_mode = #tpu.pipeline_mode<synchronous>, transform_indices = @transform_3, window_bounds = array<i64: 1, 32>}, {transform_indices = @transform_4, window_bounds = array<i64: 8, 32>}]} {
    %c0 = arith.constant 0 : index
    %c0_0 = arith.constant 0 : index
    %0 = vector.load %arg1[%c0, %c0_0] : memref<8x288xbf16, #tpu.memory_space<vmem>>, vector<8x288xbf16>
    %c0_1 = arith.constant 0 : index
    %c0_2 = arith.constant 0 : index
    %1 = vector.load %arg2[%c0_1, %c0_2] : memref<288x32xbf16, #tpu.memory_space<vmem>>, vector<288x32xbf16>
    %cst = arith.constant dense<0.000000e+00> : vector<8x32xf32>
    %2 = tpu.matmul %0, %1, %cst {dimension_numbers = #tpu.dot_dimension_numbers<[1], [0], [0], [1], [0, 0, 1, 1], [], []>} : vector<8x288xbf16>, vector<288x32xbf16>, vector<8x32xf32> -> vector<8x32xf32>
    %c0_3 = arith.constant 0 : index
    %c0_4 = arith.constant 0 : index
    %3 = vector.load %arg3[%c0_3, %c0_4] : memref<1x32xf32, #tpu.memory_space<vmem>>, vector<1x32xf32>
    %4 = vector.broadcast %3 : vector<1x32xf32> to vector<8x32xf32>
    %5 = arith.mulf %2, %4 : vector<8x32xf32>
    %c0_5 = arith.constant 0 : index
    %c0_6 = arith.constant 0 : index
    %6 = vector.load %arg4[%c0_5, %c0_6] : memref<1x32xf32, #tpu.memory_space<vmem>>, vector<1x32xf32>
    %7 = vector.broadcast %6 : vector<1x32xf32> to vector<8x32xf32>
    %8 = arith.addf %5, %7 : vector<8x32xf32>
    %cst_7 = arith.constant 0.000000e+00 : f32
    %9 = vector.broadcast %cst_7 : f32 to vector<8x32xf32>
    %10 = arith.maximumf %8, %9 : vector<8x32xf32>
    %11 = arith.truncf %10 : vector<8x32xf32> to vector<8x32xbf16>
    %c0_8 = arith.constant 0 : index
    %c0_9 = arith.constant 0 : index
    %12 = vector.load %arg5[%c0_8, %c0_9] : memref<8x32xbf16, #tpu.memory_space<vmem>>, vector<8x32xbf16>
    tpu.vector_store %arg5[%c0_8, %c0_9], %11 {strides = array<i32>} : memref<8x32xbf16, #tpu.memory_space<vmem>>, vector<8x32xbf16>,
    return
  }
  func.func @transform_0(%arg0: i32) -> (i32, i32) {
    %c0_i32 = arith.constant 0 : i32
    %c0_i32_0 = arith.constant 0 : i32
    return %arg0, %c0_i32 : i32, i32
  }
  func.func @transform_1(%arg0: i32) -> (i32, i32) {
    %c0_i32 = arith.constant 0 : i32
    %c0_i32_0 = arith.constant 0 : i32
    %c0_i32_1 = arith.constant 0 : i32
    return %c0_i32, %c0_i32_0 : i32, i32
  }
  func.func @transform_2(%arg0: i32) -> (i32, i32) {
    %c0_i32 = arith.constant 0 : i32
    %c0_i32_0 = arith.constant 0 : i32
    %c0_i32_1 = arith.constant 0 : i32
    return %c0_i32, %c0_i32_0 : i32, i32
  }
  func.func @transform_3(%arg0: i32) -> (i32, i32) {
    %c0_i32 = arith.constant 0 : i32
    %c0_i32_0 = arith.constant 0 : i32
    %c0_i32_1 = arith.constant 0 : i32
    return %c0_i32, %c0_i32_0 : i32, i32
  }
  func.func @transform_4(%arg0: i32) -> (i32, i32) {
    %c0_i32 = arith.constant 0 : i32
    %c0_i32_0 = arith.constant 0 : i32
    return %arg0, %c0_i32 : i32, i32
  }
}

module attributes {stable_mosaic.version = 11 : i64} {
  func.func @_mm_bn_act_kernel(%arg0: i32, %arg1: memref<8x32xbf16, #tpu.memory_space<vmem>>, %arg2: memref<32x128xbf16, #tpu.memory_space<vmem>>, %arg3: memref<1x128xf32, #tpu.memory_space<vmem>>, %arg4: memref<1x128xf32, #tpu.memory_space<vmem>>, %arg5: memref<8x128xbf16, #tpu.memory_space<vmem>>, %arg6: memref<8x128xbf16, #tpu.memory_space<vmem>>) attributes {dimension_semantics = [#tpu.dimension_semantics<parallel>], iteration_bounds = array<i64: 1>, scalar_prefetch = 0 : i64, scratch_operands = 0 : i64, tpu.core_type = #tpu.core_type<tc>, window_params = [{transform_indices = @transform_0, window_bounds = array<i64: 8, 32>}, {pipeline_mode = #tpu.pipeline_mode<synchronous>, transform_indices = @transform_1, window_bounds = array<i64: 32, 128>}, {pipeline_mode = #tpu.pipeline_mode<synchronous>, transform_indices = @transform_2, window_bounds = array<i64: 1, 128>}, {pipeline_mode = #tpu.pipeline_mode<synchronous>, transform_indices = @transform_3, window_bounds = array<i64: 1, 128>}, {transform_indices = @transform_4, window_bounds = array<i64: 8, 128>}, {transform_indices = @transform_5, window_bounds = array<i64: 8, 128>}]} {
    %c0 = arith.constant 0 : index
    %c0_0 = arith.constant 0 : index
    %0 = vector.load %arg1[%c0, %c0_0] : memref<8x32xbf16, #tpu.memory_space<vmem>>, vector<8x32xbf16>
    %c0_1 = arith.constant 0 : index
    %c0_2 = arith.constant 0 : index
    %1 = vector.load %arg2[%c0_1, %c0_2] : memref<32x128xbf16, #tpu.memory_space<vmem>>, vector<32x128xbf16>
    %cst = arith.constant dense<0.000000e+00> : vector<8x128xf32>
    %2 = tpu.matmul %0, %1, %cst {dimension_numbers = #tpu.dot_dimension_numbers<[1], [0], [0], [1], [0, 0, 1, 1], [], []>} : vector<8x32xbf16>, vector<32x128xbf16>, vector<8x128xf32> -> vector<8x128xf32>
    %c0_3 = arith.constant 0 : index
    %c0_4 = arith.constant 0 : index
    %3 = vector.load %arg3[%c0_3, %c0_4] : memref<1x128xf32, #tpu.memory_space<vmem>>, vector<1x128xf32>
    %4 = vector.broadcast %3 : vector<1x128xf32> to vector<8x128xf32>
    %5 = arith.mulf %2, %4 : vector<8x128xf32>
    %c0_5 = arith.constant 0 : index
    %c0_6 = arith.constant 0 : index
    %6 = vector.load %arg4[%c0_5, %c0_6] : memref<1x128xf32, #tpu.memory_space<vmem>>, vector<1x128xf32>
    %7 = vector.broadcast %6 : vector<1x128xf32> to vector<8x128xf32>
    %8 = arith.addf %5, %7 : vector<8x128xf32>
    %c0_7 = arith.constant 0 : index
    %c0_8 = arith.constant 0 : index
    %9 = vector.load %arg5[%c0_7, %c0_8] : memref<8x128xbf16, #tpu.memory_space<vmem>>, vector<8x128xbf16>
    %10 = arith.extf %9 : vector<8x128xbf16> to vector<8x128xf32>
    %11 = arith.addf %8, %10 : vector<8x128xf32>
    %cst_9 = arith.constant 0.000000e+00 : f32
    %12 = vector.broadcast %cst_9 : f32 to vector<8x128xf32>
    %13 = arith.maximumf %11, %12 : vector<8x128xf32>
    %14 = arith.truncf %13 : vector<8x128xf32> to vector<8x128xbf16>
    %c0_10 = arith.constant 0 : index
    %c0_11 = arith.constant 0 : index
    %15 = vector.load %arg6[%c0_10, %c0_11] : memref<8x128xbf16, #tpu.memory_space<vmem>>, vector<8x128xbf16>
    tpu.vector_store %arg6[%c0_10, %c0_11], %14 {strides = array<i32>} : memref<8x128xbf16, #tpu.memory_space<vmem>>, vector<8x128xbf16>,
    return
  }
  func.func @transform_0(%arg0: i32) -> (i32, i32) {
    %c0_i32 = arith.constant 0 : i32
    %c0_i32_0 = arith.constant 0 : i32
    return %arg0, %c0_i32 : i32, i32
  }
  func.func @transform_1(%arg0: i32) -> (i32, i32) {
    %c0_i32 = arith.constant 0 : i32
    %c0_i32_0 = arith.constant 0 : i32
    %c0_i32_1 = arith.constant 0 : i32
    return %c0_i32, %c0_i32_0 : i32, i32
  }
  func.func @transform_2(%arg0: i32) -> (i32, i32) {
    %c0_i32 = arith.constant 0 : i32
    %c0_i32_0 = arith.constant 0 : i32
    %c0_i32_1 = arith.constant 0 : i32
    return %c0_i32, %c0_i32_0 : i32, i32
  }
  func.func @transform_3(%arg0: i32) -> (i32, i32) {
    %c0_i32 = arith.constant 0 : i32
    %c0_i32_0 = arith.constant 0 : i32
    %c0_i32_1 = arith.constant 0 : i32
    return %c0_i32, %c0_i32_0 : i32, i32
  }
  func.func @transform_4(%arg0: i32) -> (i32, i32) {
    %c0_i32 = arith.constant 0 : i32
    %c0_i32_0 = arith.constant 0 : i32
    return %arg0, %c0_i32 : i32, i32
  }
  func.func @transform_5(%arg0: i32) -> (i32, i32) {
    %c0_i32 = arith.constant 0 : i32
    %c0_i32_0 = arith.constant 0 : i32
    return %arg0, %c0_i32 : i32, i32
  }
}

module attributes {stable_mosaic.version = 11 : i64} {
  func.func @_mm_bn_act_kernel(%arg0: i32, %arg1: memref<8x128xbf16, #tpu.memory_space<vmem>>, %arg2: memref<128x32xbf16, #tpu.memory_space<vmem>>, %arg3: memref<1x32xf32, #tpu.memory_space<vmem>>, %arg4: memref<1x32xf32, #tpu.memory_space<vmem>>, %arg5: memref<8x32xbf16, #tpu.memory_space<vmem>>) attributes {dimension_semantics = [#tpu.dimension_semantics<parallel>], iteration_bounds = array<i64: 1>, scalar_prefetch = 0 : i64, scratch_operands = 0 : i64, tpu.core_type = #tpu.core_type<tc>, window_params = [{transform_indices = @transform_0, window_bounds = array<i64: 8, 128>}, {pipeline_mode = #tpu.pipeline_mode<synchronous>, transform_indices = @transform_1, window_bounds = array<i64: 128, 32>}, {pipeline_mode = #tpu.pipeline_mode<synchronous>, transform_indices = @transform_2, window_bounds = array<i64: 1, 32>}, {pipeline_mode = #tpu.pipeline_mode<synchronous>, transform_indices = @transform_3, window_bounds = array<i64: 1, 32>}, {transform_indices = @transform_4, window_bounds = array<i64: 8, 32>}]} {
    %c0 = arith.constant 0 : index
    %c0_0 = arith.constant 0 : index
    %0 = vector.load %arg1[%c0, %c0_0] : memref<8x128xbf16, #tpu.memory_space<vmem>>, vector<8x128xbf16>
    %c0_1 = arith.constant 0 : index
    %c0_2 = arith.constant 0 : index
    %1 = vector.load %arg2[%c0_1, %c0_2] : memref<128x32xbf16, #tpu.memory_space<vmem>>, vector<128x32xbf16>
    %cst = arith.constant dense<0.000000e+00> : vector<8x32xf32>
    %2 = tpu.matmul %0, %1, %cst {dimension_numbers = #tpu.dot_dimension_numbers<[1], [0], [0], [1], [0, 0, 1, 1], [], []>} : vector<8x128xbf16>, vector<128x32xbf16>, vector<8x32xf32> -> vector<8x32xf32>
    %c0_3 = arith.constant 0 : index
    %c0_4 = arith.constant 0 : index
    %3 = vector.load %arg3[%c0_3, %c0_4] : memref<1x32xf32, #tpu.memory_space<vmem>>, vector<1x32xf32>
    %4 = vector.broadcast %3 : vector<1x32xf32> to vector<8x32xf32>
    %5 = arith.mulf %2, %4 : vector<8x32xf32>
    %c0_5 = arith.constant 0 : index
    %c0_6 = arith.constant 0 : index
    %6 = vector.load %arg4[%c0_5, %c0_6] : memref<1x32xf32, #tpu.memory_space<vmem>>, vector<1x32xf32>
    %7 = vector.broadcast %6 : vector<1x32xf32> to vector<8x32xf32>
    %8 = arith.addf %5, %7 : vector<8x32xf32>
    %cst_7 = arith.constant 0.000000e+00 : f32
    %9 = vector.broadcast %cst_7 : f32 to vector<8x32xf32>
    %10 = arith.maximumf %8, %9 : vector<8x32xf32>
    %11 = arith.truncf %10 : vector<8x32xf32> to vector<8x32xbf16>
    %c0_8 = arith.constant 0 : index
    %c0_9 = arith.constant 0 : index
    %12 = vector.load %arg5[%c0_8, %c0_9] : memref<8x32xbf16, #tpu.memory_space<vmem>>, vector<8x32xbf16>
    tpu.vector_store %arg5[%c0_8, %c0_9], %11 {strides = array<i32>} : memref<8x32xbf16, #tpu.memory_space<vmem>>, vector<8x32xbf16>,
    return
  }
  func.func @transform_0(%arg0: i32) -> (i32, i32) {
    %c0_i32 = arith.constant 0 : i32
    %c0_i32_0 = arith.constant 0 : i32
    return %arg0, %c0_i32 : i32, i32
  }
  func.func @transform_1(%arg0: i32) -> (i32, i32) {
    %c0_i32 = arith.constant 0 : i32
    %c0_i32_0 = arith.constant 0 : i32
    %c0_i32_1 = arith.constant 0 : i32
    return %c0_i32, %c0_i32_0 : i32, i32
  }
  func.func @transform_2(%arg0: i32) -> (i32, i32) {
    %c0_i32 = arith.constant 0 : i32
    %c0_i32_0 = arith.constant 0 : i32
    %c0_i32_1 = arith.constant 0 : i32
    return %c0_i32, %c0_i32_0 : i32, i32
  }
  func.func @transform_3(%arg0: i32) -> (i32, i32) {
    %c0_i32 = arith.constant 0 : i32
    %c0_i32_0 = arith.constant 0 : i32
    %c0_i32_1 = arith.constant 0 : i32
    return %c0_i32, %c0_i32_0 : i32, i32
  }
  func.func @transform_4(%arg0: i32) -> (i32, i32) {
    %c0_i32 = arith.constant 0 : i32
    %c0_i32_0 = arith.constant 0 : i32
    return %arg0, %c0_i32 : i32, i32
  }
}

module attributes {stable_mosaic.version = 11 : i64} {
  func.func @_mm_bn_act_kernel(%arg0: i32, %arg1: memref<8x128xbf16, #tpu.memory_space<vmem>>, %arg2: memref<128x64xbf16, #tpu.memory_space<vmem>>, %arg3: memref<1x64xf32, #tpu.memory_space<vmem>>, %arg4: memref<1x64xf32, #tpu.memory_space<vmem>>, %arg5: memref<8x64xbf16, #tpu.memory_space<vmem>>) attributes {dimension_semantics = [#tpu.dimension_semantics<parallel>], iteration_bounds = array<i64: 1>, scalar_prefetch = 0 : i64, scratch_operands = 0 : i64, tpu.core_type = #tpu.core_type<tc>, window_params = [{transform_indices = @transform_0, window_bounds = array<i64: 8, 128>}, {pipeline_mode = #tpu.pipeline_mode<synchronous>, transform_indices = @transform_1, window_bounds = array<i64: 128, 64>}, {pipeline_mode = #tpu.pipeline_mode<synchronous>, transform_indices = @transform_2, window_bounds = array<i64: 1, 64>}, {pipeline_mode = #tpu.pipeline_mode<synchronous>, transform_indices = @transform_3, window_bounds = array<i64: 1, 64>}, {transform_indices = @transform_4, window_bounds = array<i64: 8, 64>}]} {
    %c0 = arith.constant 0 : index
    %c0_0 = arith.constant 0 : index
    %0 = vector.load %arg1[%c0, %c0_0] : memref<8x128xbf16, #tpu.memory_space<vmem>>, vector<8x128xbf16>
    %c0_1 = arith.constant 0 : index
    %c0_2 = arith.constant 0 : index
    %1 = vector.load %arg2[%c0_1, %c0_2] : memref<128x64xbf16, #tpu.memory_space<vmem>>, vector<128x64xbf16>
    %cst = arith.constant dense<0.000000e+00> : vector<8x64xf32>
    %2 = tpu.matmul %0, %1, %cst {dimension_numbers = #tpu.dot_dimension_numbers<[1], [0], [0], [1], [0, 0, 1, 1], [], []>} : vector<8x128xbf16>, vector<128x64xbf16>, vector<8x64xf32> -> vector<8x64xf32>
    %c0_3 = arith.constant 0 : index
    %c0_4 = arith.constant 0 : index
    %3 = vector.load %arg3[%c0_3, %c0_4] : memref<1x64xf32, #tpu.memory_space<vmem>>, vector<1x64xf32>
    %4 = vector.broadcast %3 : vector<1x64xf32> to vector<8x64xf32>
    %5 = arith.mulf %2, %4 : vector<8x64xf32>
    %c0_5 = arith.constant 0 : index
    %c0_6 = arith.constant 0 : index
    %6 = vector.load %arg4[%c0_5, %c0_6] : memref<1x64xf32, #tpu.memory_space<vmem>>, vector<1x64xf32>
    %7 = vector.broadcast %6 : vector<1x64xf32> to vector<8x64xf32>
    %8 = arith.addf %5, %7 : vector<8x64xf32>
    %cst_7 = arith.constant 0.000000e+00 : f32
    %9 = vector.broadcast %cst_7 : f32 to vector<8x64xf32>
    %10 = arith.maximumf %8, %9 : vector<8x64xf32>
    %11 = arith.truncf %10 : vector<8x64xf32> to vector<8x64xbf16>
    %c0_8 = arith.constant 0 : index
    %c0_9 = arith.constant 0 : index
    %12 = vector.load %arg5[%c0_8, %c0_9] : memref<8x64xbf16, #tpu.memory_space<vmem>>, vector<8x64xbf16>
    tpu.vector_store %arg5[%c0_8, %c0_9], %11 {strides = array<i32>} : memref<8x64xbf16, #tpu.memory_space<vmem>>, vector<8x64xbf16>,
    return
  }
  func.func @transform_0(%arg0: i32) -> (i32, i32) {
    %c0_i32 = arith.constant 0 : i32
    %c0_i32_0 = arith.constant 0 : i32
    return %arg0, %c0_i32 : i32, i32
  }
  func.func @transform_1(%arg0: i32) -> (i32, i32) {
    %c0_i32 = arith.constant 0 : i32
    %c0_i32_0 = arith.constant 0 : i32
    %c0_i32_1 = arith.constant 0 : i32
    return %c0_i32, %c0_i32_0 : i32, i32
  }
  func.func @transform_2(%arg0: i32) -> (i32, i32) {
    %c0_i32 = arith.constant 0 : i32
    %c0_i32_0 = arith.constant 0 : i32
    %c0_i32_1 = arith.constant 0 : i32
    return %c0_i32, %c0_i32_0 : i32, i32
  }
  func.func @transform_3(%arg0: i32) -> (i32, i32) {
    %c0_i32 = arith.constant 0 : i32
    %c0_i32_0 = arith.constant 0 : i32
    %c0_i32_1 = arith.constant 0 : i32
    return %c0_i32, %c0_i32_0 : i32, i32
  }
  func.func @transform_4(%arg0: i32) -> (i32, i32) {
    %c0_i32 = arith.constant 0 : i32
    %c0_i32_0 = arith.constant 0 : i32
    return %arg0, %c0_i32 : i32, i32
  }
}

module attributes {stable_mosaic.version = 11 : i64} {
  func.func @_mm_bn_act_kernel(%arg0: i32, %arg1: memref<8x32xbf16, #tpu.memory_space<vmem>>, %arg2: memref<32x128xbf16, #tpu.memory_space<vmem>>, %arg3: memref<1x128xf32, #tpu.memory_space<vmem>>, %arg4: memref<1x128xf32, #tpu.memory_space<vmem>>, %arg5: memref<8x128xbf16, #tpu.memory_space<vmem>>, %arg6: memref<8x128xbf16, #tpu.memory_space<vmem>>) attributes {dimension_semantics = [#tpu.dimension_semantics<parallel>], iteration_bounds = array<i64: 1>, scalar_prefetch = 0 : i64, scratch_operands = 0 : i64, tpu.core_type = #tpu.core_type<tc>, window_params = [{transform_indices = @transform_0, window_bounds = array<i64: 8, 32>}, {pipeline_mode = #tpu.pipeline_mode<synchronous>, transform_indices = @transform_1, window_bounds = array<i64: 32, 128>}, {pipeline_mode = #tpu.pipeline_mode<synchronous>, transform_indices = @transform_2, window_bounds = array<i64: 1, 128>}, {pipeline_mode = #tpu.pipeline_mode<synchronous>, transform_indices = @transform_3, window_bounds = array<i64: 1, 128>}, {transform_indices = @transform_4, window_bounds = array<i64: 8, 128>}, {transform_indices = @transform_5, window_bounds = array<i64: 8, 128>}]} {
    %c0 = arith.constant 0 : index
    %c0_0 = arith.constant 0 : index
    %0 = vector.load %arg1[%c0, %c0_0] : memref<8x32xbf16, #tpu.memory_space<vmem>>, vector<8x32xbf16>
    %c0_1 = arith.constant 0 : index
    %c0_2 = arith.constant 0 : index
    %1 = vector.load %arg2[%c0_1, %c0_2] : memref<32x128xbf16, #tpu.memory_space<vmem>>, vector<32x128xbf16>
    %cst = arith.constant dense<0.000000e+00> : vector<8x128xf32>
    %2 = tpu.matmul %0, %1, %cst {dimension_numbers = #tpu.dot_dimension_numbers<[1], [0], [0], [1], [0, 0, 1, 1], [], []>} : vector<8x32xbf16>, vector<32x128xbf16>, vector<8x128xf32> -> vector<8x128xf32>
    %c0_3 = arith.constant 0 : index
    %c0_4 = arith.constant 0 : index
    %3 = vector.load %arg3[%c0_3, %c0_4] : memref<1x128xf32, #tpu.memory_space<vmem>>, vector<1x128xf32>
    %4 = vector.broadcast %3 : vector<1x128xf32> to vector<8x128xf32>
    %5 = arith.mulf %2, %4 : vector<8x128xf32>
    %c0_5 = arith.constant 0 : index
    %c0_6 = arith.constant 0 : index
    %6 = vector.load %arg4[%c0_5, %c0_6] : memref<1x128xf32, #tpu.memory_space<vmem>>, vector<1x128xf32>
    %7 = vector.broadcast %6 : vector<1x128xf32> to vector<8x128xf32>
    %8 = arith.addf %5, %7 : vector<8x128xf32>
    %c0_7 = arith.constant 0 : index
    %c0_8 = arith.constant 0 : index
    %9 = vector.load %arg5[%c0_7, %c0_8] : memref<8x128xbf16, #tpu.memory_space<vmem>>, vector<8x128xbf16>
    %10 = arith.extf %9 : vector<8x128xbf16> to vector<8x128xf32>
    %11 = arith.addf %8, %10 : vector<8x128xf32>
    %cst_9 = arith.constant 0.000000e+00 : f32
    %12 = vector.broadcast %cst_9 : f32 to vector<8x128xf32>
    %13 = arith.maximumf %11, %12 : vector<8x128xf32>
    %14 = arith.truncf %13 : vector<8x128xf32> to vector<8x128xbf16>
    %c0_10 = arith.constant 0 : index
    %c0_11 = arith.constant 0 : index
    %15 = vector.load %arg6[%c0_10, %c0_11] : memref<8x128xbf16, #tpu.memory_space<vmem>>, vector<8x128xbf16>
    tpu.vector_store %arg6[%c0_10, %c0_11], %14 {strides = array<i32>} : memref<8x128xbf16, #tpu.memory_space<vmem>>, vector<8x128xbf16>,
    return
  }
  func.func @transform_0(%arg0: i32) -> (i32, i32) {
    %c0_i32 = arith.constant 0 : i32
    %c0_i32_0 = arith.constant 0 : i32
    return %arg0, %c0_i32 : i32, i32
  }
  func.func @transform_1(%arg0: i32) -> (i32, i32) {
    %c0_i32 = arith.constant 0 : i32
    %c0_i32_0 = arith.constant 0 : i32
    %c0_i32_1 = arith.constant 0 : i32
    return %c0_i32, %c0_i32_0 : i32, i32
  }
  func.func @transform_2(%arg0: i32) -> (i32, i32) {
    %c0_i32 = arith.constant 0 : i32
    %c0_i32_0 = arith.constant 0 : i32
    %c0_i32_1 = arith.constant 0 : i32
    return %c0_i32, %c0_i32_0 : i32, i32
  }
  func.func @transform_3(%arg0: i32) -> (i32, i32) {
    %c0_i32 = arith.constant 0 : i32
    %c0_i32_0 = arith.constant 0 : i32
    %c0_i32_1 = arith.constant 0 : i32
    return %c0_i32, %c0_i32_0 : i32, i32
  }
  func.func @transform_4(%arg0: i32) -> (i32, i32) {
    %c0_i32 = arith.constant 0 : i32
    %c0_i32_0 = arith.constant 0 : i32
    return %arg0, %c0_i32 : i32, i32
  }
  func.func @transform_5(%arg0: i32) -> (i32, i32) {
    %c0_i32 = arith.constant 0 : i32
    %c0_i32_0 = arith.constant 0 : i32
    return %arg0, %c0_i32 : i32, i32
  }
}

module attributes {stable_mosaic.version = 11 : i64} {
  func.func @_mm_bn_act_kernel(%arg0: i32, %arg1: memref<2x128xbf16, #tpu.memory_space<vmem>>, %arg2: memref<128x256xbf16, #tpu.memory_space<vmem>>, %arg3: memref<1x256xf32, #tpu.memory_space<vmem>>, %arg4: memref<1x256xf32, #tpu.memory_space<vmem>>, %arg5: memref<2x256xbf16, #tpu.memory_space<vmem>>) attributes {dimension_semantics = [#tpu.dimension_semantics<parallel>], iteration_bounds = array<i64: 1>, scalar_prefetch = 0 : i64, scratch_operands = 0 : i64, tpu.core_type = #tpu.core_type<tc>, window_params = [{transform_indices = @transform_0, window_bounds = array<i64: 2, 128>}, {pipeline_mode = #tpu.pipeline_mode<synchronous>, transform_indices = @transform_1, window_bounds = array<i64: 128, 256>}, {pipeline_mode = #tpu.pipeline_mode<synchronous>, transform_indices = @transform_2, window_bounds = array<i64: 1, 256>}, {pipeline_mode = #tpu.pipeline_mode<synchronous>, transform_indices = @transform_3, window_bounds = array<i64: 1, 256>}, {transform_indices = @transform_4, window_bounds = array<i64: 2, 256>}]} {
    %c0 = arith.constant 0 : index
    %c0_0 = arith.constant 0 : index
    %0 = vector.load %arg1[%c0, %c0_0] : memref<2x128xbf16, #tpu.memory_space<vmem>>, vector<2x128xbf16>
    %c0_1 = arith.constant 0 : index
    %c0_2 = arith.constant 0 : index
    %1 = vector.load %arg2[%c0_1, %c0_2] : memref<128x256xbf16, #tpu.memory_space<vmem>>, vector<128x256xbf16>
    %cst = arith.constant dense<0.000000e+00> : vector<2x256xf32>
    %2 = tpu.matmul %0, %1, %cst {dimension_numbers = #tpu.dot_dimension_numbers<[1], [0], [0], [1], [0, 0, 1, 1], [], []>} : vector<2x128xbf16>, vector<128x256xbf16>, vector<2x256xf32> -> vector<2x256xf32>
    %c0_3 = arith.constant 0 : index
    %c0_4 = arith.constant 0 : index
    %3 = vector.load %arg3[%c0_3, %c0_4] : memref<1x256xf32, #tpu.memory_space<vmem>>, vector<1x256xf32>
    %4 = vector.broadcast %3 : vector<1x256xf32> to vector<2x256xf32>
    %5 = arith.mulf %2, %4 : vector<2x256xf32>
    %c0_5 = arith.constant 0 : index
    %c0_6 = arith.constant 0 : index
    %6 = vector.load %arg4[%c0_5, %c0_6] : memref<1x256xf32, #tpu.memory_space<vmem>>, vector<1x256xf32>
    %7 = vector.broadcast %6 : vector<1x256xf32> to vector<2x256xf32>
    %8 = arith.addf %5, %7 : vector<2x256xf32>
    %9 = arith.truncf %8 : vector<2x256xf32> to vector<2x256xbf16>
    %c0_7 = arith.constant 0 : index
    %c0_8 = arith.constant 0 : index
    %10 = vector.load %arg5[%c0_7, %c0_8] : memref<2x256xbf16, #tpu.memory_space<vmem>>, vector<2x256xbf16>
    tpu.vector_store %arg5[%c0_7, %c0_8], %9 {strides = array<i32>} : memref<2x256xbf16, #tpu.memory_space<vmem>>, vector<2x256xbf16>,
    return
  }
  func.func @transform_0(%arg0: i32) -> (i32, i32) {
    %c0_i32 = arith.constant 0 : i32
    %c0_i32_0 = arith.constant 0 : i32
    return %arg0, %c0_i32 : i32, i32
  }
  func.func @transform_1(%arg0: i32) -> (i32, i32) {
    %c0_i32 = arith.constant 0 : i32
    %c0_i32_0 = arith.constant 0 : i32
    %c0_i32_1 = arith.constant 0 : i32
    return %c0_i32, %c0_i32_0 : i32, i32
  }
  func.func @transform_2(%arg0: i32) -> (i32, i32) {
    %c0_i32 = arith.constant 0 : i32
    %c0_i32_0 = arith.constant 0 : i32
    %c0_i32_1 = arith.constant 0 : i32
    return %c0_i32, %c0_i32_0 : i32, i32
  }
  func.func @transform_3(%arg0: i32) -> (i32, i32) {
    %c0_i32 = arith.constant 0 : i32
    %c0_i32_0 = arith.constant 0 : i32
    %c0_i32_1 = arith.constant 0 : i32
    return %c0_i32, %c0_i32_0 : i32, i32
  }
  func.func @transform_4(%arg0: i32) -> (i32, i32) {
    %c0_i32 = arith.constant 0 : i32
    %c0_i32_0 = arith.constant 0 : i32
    return %arg0, %c0_i32 : i32, i32
  }
}

module attributes {stable_mosaic.version = 11 : i64} {
  func.func @_mm_bn_act_kernel(%arg0: i32, %arg1: memref<2x576xbf16, #tpu.memory_space<vmem>>, %arg2: memref<576x64xbf16, #tpu.memory_space<vmem>>, %arg3: memref<1x64xf32, #tpu.memory_space<vmem>>, %arg4: memref<1x64xf32, #tpu.memory_space<vmem>>, %arg5: memref<2x64xbf16, #tpu.memory_space<vmem>>) attributes {dimension_semantics = [#tpu.dimension_semantics<parallel>], iteration_bounds = array<i64: 1>, scalar_prefetch = 0 : i64, scratch_operands = 0 : i64, tpu.core_type = #tpu.core_type<tc>, window_params = [{transform_indices = @transform_0, window_bounds = array<i64: 2, 576>}, {pipeline_mode = #tpu.pipeline_mode<synchronous>, transform_indices = @transform_1, window_bounds = array<i64: 576, 64>}, {pipeline_mode = #tpu.pipeline_mode<synchronous>, transform_indices = @transform_2, window_bounds = array<i64: 1, 64>}, {pipeline_mode = #tpu.pipeline_mode<synchronous>, transform_indices = @transform_3, window_bounds = array<i64: 1, 64>}, {transform_indices = @transform_4, window_bounds = array<i64: 2, 64>}]} {
    %c0 = arith.constant 0 : index
    %c0_0 = arith.constant 0 : index
    %0 = vector.load %arg1[%c0, %c0_0] : memref<2x576xbf16, #tpu.memory_space<vmem>>, vector<2x576xbf16>
    %c0_1 = arith.constant 0 : index
    %c0_2 = arith.constant 0 : index
    %1 = vector.load %arg2[%c0_1, %c0_2] : memref<576x64xbf16, #tpu.memory_space<vmem>>, vector<576x64xbf16>
    %cst = arith.constant dense<0.000000e+00> : vector<2x64xf32>
    %2 = tpu.matmul %0, %1, %cst {dimension_numbers = #tpu.dot_dimension_numbers<[1], [0], [0], [1], [0, 0, 1, 1], [], []>} : vector<2x576xbf16>, vector<576x64xbf16>, vector<2x64xf32> -> vector<2x64xf32>
    %c0_3 = arith.constant 0 : index
    %c0_4 = arith.constant 0 : index
    %3 = vector.load %arg3[%c0_3, %c0_4] : memref<1x64xf32, #tpu.memory_space<vmem>>, vector<1x64xf32>
    %4 = vector.broadcast %3 : vector<1x64xf32> to vector<2x64xf32>
    %5 = arith.mulf %2, %4 : vector<2x64xf32>
    %c0_5 = arith.constant 0 : index
    %c0_6 = arith.constant 0 : index
    %6 = vector.load %arg4[%c0_5, %c0_6] : memref<1x64xf32, #tpu.memory_space<vmem>>, vector<1x64xf32>
    %7 = vector.broadcast %6 : vector<1x64xf32> to vector<2x64xf32>
    %8 = arith.addf %5, %7 : vector<2x64xf32>
    %cst_7 = arith.constant 0.000000e+00 : f32
    %9 = vector.broadcast %cst_7 : f32 to vector<2x64xf32>
    %10 = arith.maximumf %8, %9 : vector<2x64xf32>
    %11 = arith.truncf %10 : vector<2x64xf32> to vector<2x64xbf16>
    %c0_8 = arith.constant 0 : index
    %c0_9 = arith.constant 0 : index
    %12 = vector.load %arg5[%c0_8, %c0_9] : memref<2x64xbf16, #tpu.memory_space<vmem>>, vector<2x64xbf16>
    tpu.vector_store %arg5[%c0_8, %c0_9], %11 {strides = array<i32>} : memref<2x64xbf16, #tpu.memory_space<vmem>>, vector<2x64xbf16>,
    return
  }
  func.func @transform_0(%arg0: i32) -> (i32, i32) {
    %c0_i32 = arith.constant 0 : i32
    %c0_i32_0 = arith.constant 0 : i32
    return %arg0, %c0_i32 : i32, i32
  }
  func.func @transform_1(%arg0: i32) -> (i32, i32) {
    %c0_i32 = arith.constant 0 : i32
    %c0_i32_0 = arith.constant 0 : i32
    %c0_i32_1 = arith.constant 0 : i32
    return %c0_i32, %c0_i32_0 : i32, i32
  }
  func.func @transform_2(%arg0: i32) -> (i32, i32) {
    %c0_i32 = arith.constant 0 : i32
    %c0_i32_0 = arith.constant 0 : i32
    %c0_i32_1 = arith.constant 0 : i32
    return %c0_i32, %c0_i32_0 : i32, i32
  }
  func.func @transform_3(%arg0: i32) -> (i32, i32) {
    %c0_i32 = arith.constant 0 : i32
    %c0_i32_0 = arith.constant 0 : i32
    %c0_i32_1 = arith.constant 0 : i32
    return %c0_i32, %c0_i32_0 : i32, i32
  }
  func.func @transform_4(%arg0: i32) -> (i32, i32) {
    %c0_i32 = arith.constant 0 : i32
    %c0_i32_0 = arith.constant 0 : i32
    return %arg0, %c0_i32 : i32, i32
  }
}

module attributes {stable_mosaic.version = 11 : i64} {
  func.func @_mm_bn_act_kernel(%arg0: i32, %arg1: memref<2x64xbf16, #tpu.memory_space<vmem>>, %arg2: memref<64x256xbf16, #tpu.memory_space<vmem>>, %arg3: memref<1x256xf32, #tpu.memory_space<vmem>>, %arg4: memref<1x256xf32, #tpu.memory_space<vmem>>, %arg5: memref<2x256xbf16, #tpu.memory_space<vmem>>, %arg6: memref<2x256xbf16, #tpu.memory_space<vmem>>) attributes {dimension_semantics = [#tpu.dimension_semantics<parallel>], iteration_bounds = array<i64: 1>, scalar_prefetch = 0 : i64, scratch_operands = 0 : i64, tpu.core_type = #tpu.core_type<tc>, window_params = [{transform_indices = @transform_0, window_bounds = array<i64: 2, 64>}, {pipeline_mode = #tpu.pipeline_mode<synchronous>, transform_indices = @transform_1, window_bounds = array<i64: 64, 256>}, {pipeline_mode = #tpu.pipeline_mode<synchronous>, transform_indices = @transform_2, window_bounds = array<i64: 1, 256>}, {pipeline_mode = #tpu.pipeline_mode<synchronous>, transform_indices = @transform_3, window_bounds = array<i64: 1, 256>}, {transform_indices = @transform_4, window_bounds = array<i64: 2, 256>}, {transform_indices = @transform_5, window_bounds = array<i64: 2, 256>}]} {
    %c0 = arith.constant 0 : index
    %c0_0 = arith.constant 0 : index
    %0 = vector.load %arg1[%c0, %c0_0] : memref<2x64xbf16, #tpu.memory_space<vmem>>, vector<2x64xbf16>
    %c0_1 = arith.constant 0 : index
    %c0_2 = arith.constant 0 : index
    %1 = vector.load %arg2[%c0_1, %c0_2] : memref<64x256xbf16, #tpu.memory_space<vmem>>, vector<64x256xbf16>
    %cst = arith.constant dense<0.000000e+00> : vector<2x256xf32>
    %2 = tpu.matmul %0, %1, %cst {dimension_numbers = #tpu.dot_dimension_numbers<[1], [0], [0], [1], [0, 0, 1, 1], [], []>} : vector<2x64xbf16>, vector<64x256xbf16>, vector<2x256xf32> -> vector<2x256xf32>
    %c0_3 = arith.constant 0 : index
    %c0_4 = arith.constant 0 : index
    %3 = vector.load %arg3[%c0_3, %c0_4] : memref<1x256xf32, #tpu.memory_space<vmem>>, vector<1x256xf32>
    %4 = vector.broadcast %3 : vector<1x256xf32> to vector<2x256xf32>
    %5 = arith.mulf %2, %4 : vector<2x256xf32>
    %c0_5 = arith.constant 0 : index
    %c0_6 = arith.constant 0 : index
    %6 = vector.load %arg4[%c0_5, %c0_6] : memref<1x256xf32, #tpu.memory_space<vmem>>, vector<1x256xf32>
    %7 = vector.broadcast %6 : vector<1x256xf32> to vector<2x256xf32>
    %8 = arith.addf %5, %7 : vector<2x256xf32>
    %c0_7 = arith.constant 0 : index
    %c0_8 = arith.constant 0 : index
    %9 = vector.load %arg5[%c0_7, %c0_8] : memref<2x256xbf16, #tpu.memory_space<vmem>>, vector<2x256xbf16>
    %10 = arith.extf %9 : vector<2x256xbf16> to vector<2x256xf32>
    %11 = arith.addf %8, %10 : vector<2x256xf32>
    %cst_9 = arith.constant 0.000000e+00 : f32
    %12 = vector.broadcast %cst_9 : f32 to vector<2x256xf32>
    %13 = arith.maximumf %11, %12 : vector<2x256xf32>
    %14 = arith.truncf %13 : vector<2x256xf32> to vector<2x256xbf16>
    %c0_10 = arith.constant 0 : index
    %c0_11 = arith.constant 0 : index
    %15 = vector.load %arg6[%c0_10, %c0_11] : memref<2x256xbf16, #tpu.memory_space<vmem>>, vector<2x256xbf16>
    tpu.vector_store %arg6[%c0_10, %c0_11], %14 {strides = array<i32>} : memref<2x256xbf16, #tpu.memory_space<vmem>>, vector<2x256xbf16>,
    return
  }
  func.func @transform_0(%arg0: i32) -> (i32, i32) {
    %c0_i32 = arith.constant 0 : i32
    %c0_i32_0 = arith.constant 0 : i32
    return %arg0, %c0_i32 : i32, i32
  }
  func.func @transform_1(%arg0: i32) -> (i32, i32) {
    %c0_i32 = arith.constant 0 : i32
    %c0_i32_0 = arith.constant 0 : i32
    %c0_i32_1 = arith.constant 0 : i32
    return %c0_i32, %c0_i32_0 : i32, i32
  }
  func.func @transform_2(%arg0: i32) -> (i32, i32) {
    %c0_i32 = arith.constant 0 : i32
    %c0_i32_0 = arith.constant 0 : i32
    %c0_i32_1 = arith.constant 0 : i32
    return %c0_i32, %c0_i32_0 : i32, i32
  }
  func.func @transform_3(%arg0: i32) -> (i32, i32) {
    %c0_i32 = arith.constant 0 : i32
    %c0_i32_0 = arith.constant 0 : i32
    %c0_i32_1 = arith.constant 0 : i32
    return %c0_i32, %c0_i32_0 : i32, i32
  }
  func.func @transform_4(%arg0: i32) -> (i32, i32) {
    %c0_i32 = arith.constant 0 : i32
    %c0_i32_0 = arith.constant 0 : i32
    return %arg0, %c0_i32 : i32, i32
  }
  func.func @transform_5(%arg0: i32) -> (i32, i32) {
    %c0_i32 = arith.constant 0 : i32
    %c0_i32_0 = arith.constant 0 : i32
    return %arg0, %c0_i32 : i32, i32
  }
}

module attributes {stable_mosaic.version = 11 : i64} {
  func.func @_mm_bn_act_kernel(%arg0: i32, %arg1: memref<2x256xbf16, #tpu.memory_space<vmem>>, %arg2: memref<256x64xbf16, #tpu.memory_space<vmem>>, %arg3: memref<1x64xf32, #tpu.memory_space<vmem>>, %arg4: memref<1x64xf32, #tpu.memory_space<vmem>>, %arg5: memref<2x64xbf16, #tpu.memory_space<vmem>>) attributes {dimension_semantics = [#tpu.dimension_semantics<parallel>], iteration_bounds = array<i64: 1>, scalar_prefetch = 0 : i64, scratch_operands = 0 : i64, tpu.core_type = #tpu.core_type<tc>, window_params = [{transform_indices = @transform_0, window_bounds = array<i64: 2, 256>}, {pipeline_mode = #tpu.pipeline_mode<synchronous>, transform_indices = @transform_1, window_bounds = array<i64: 256, 64>}, {pipeline_mode = #tpu.pipeline_mode<synchronous>, transform_indices = @transform_2, window_bounds = array<i64: 1, 64>}, {pipeline_mode = #tpu.pipeline_mode<synchronous>, transform_indices = @transform_3, window_bounds = array<i64: 1, 64>}, {transform_indices = @transform_4, window_bounds = array<i64: 2, 64>}]} {
    %c0 = arith.constant 0 : index
    %c0_0 = arith.constant 0 : index
    %0 = vector.load %arg1[%c0, %c0_0] : memref<2x256xbf16, #tpu.memory_space<vmem>>, vector<2x256xbf16>
    %c0_1 = arith.constant 0 : index
    %c0_2 = arith.constant 0 : index
    %1 = vector.load %arg2[%c0_1, %c0_2] : memref<256x64xbf16, #tpu.memory_space<vmem>>, vector<256x64xbf16>
    %cst = arith.constant dense<0.000000e+00> : vector<2x64xf32>
    %2 = tpu.matmul %0, %1, %cst {dimension_numbers = #tpu.dot_dimension_numbers<[1], [0], [0], [1], [0, 0, 1, 1], [], []>} : vector<2x256xbf16>, vector<256x64xbf16>, vector<2x64xf32> -> vector<2x64xf32>
    %c0_3 = arith.constant 0 : index
    %c0_4 = arith.constant 0 : index
    %3 = vector.load %arg3[%c0_3, %c0_4] : memref<1x64xf32, #tpu.memory_space<vmem>>, vector<1x64xf32>
    %4 = vector.broadcast %3 : vector<1x64xf32> to vector<2x64xf32>
    %5 = arith.mulf %2, %4 : vector<2x64xf32>
    %c0_5 = arith.constant 0 : index
    %c0_6 = arith.constant 0 : index
    %6 = vector.load %arg4[%c0_5, %c0_6] : memref<1x64xf32, #tpu.memory_space<vmem>>, vector<1x64xf32>
    %7 = vector.broadcast %6 : vector<1x64xf32> to vector<2x64xf32>
    %8 = arith.addf %5, %7 : vector<2x64xf32>
    %cst_7 = arith.constant 0.000000e+00 : f32
    %9 = vector.broadcast %cst_7 : f32 to vector<2x64xf32>
    %10 = arith.maximumf %8, %9 : vector<2x64xf32>
    %11 = arith.truncf %10 : vector<2x64xf32> to vector<2x64xbf16>
    %c0_8 = arith.constant 0 : index
    %c0_9 = arith.constant 0 : index
    %12 = vector.load %arg5[%c0_8, %c0_9] : memref<2x64xbf16, #tpu.memory_space<vmem>>, vector<2x64xbf16>
    tpu.vector_store %arg5[%c0_8, %c0_9], %11 {strides = array<i32>} : memref<2x64xbf16, #tpu.memory_space<vmem>>, vector<2x64xbf16>,
    return
  }
  func.func @transform_0(%arg0: i32) -> (i32, i32) {
    %c0_i32 = arith.constant 0 : i32
    %c0_i32_0 = arith.constant 0 : i32
    return %arg0, %c0_i32 : i32, i32
  }
  func.func @transform_1(%arg0: i32) -> (i32, i32) {
    %c0_i32 = arith.constant 0 : i32
    %c0_i32_0 = arith.constant 0 : i32
    %c0_i32_1 = arith.constant 0 : i32
    return %c0_i32, %c0_i32_0 : i32, i32
  }
  func.func @transform_2(%arg0: i32) -> (i32, i32) {
    %c0_i32 = arith.constant 0 : i32
    %c0_i32_0 = arith.constant 0 : i32
    %c0_i32_1 = arith.constant 0 : i32
    return %c0_i32, %c0_i32_0 : i32, i32
  }
  func.func @transform_3(%arg0: i32) -> (i32, i32) {
    %c0_i32 = arith.constant 0 : i32
    %c0_i32_0 = arith.constant 0 : i32
    %c0_i32_1 = arith.constant 0 : i32
    return %c0_i32, %c0_i32_0 : i32, i32
  }
  func.func @transform_4(%arg0: i32) -> (i32, i32) {
    %c0_i32 = arith.constant 0 : i32
    %c0_i32_0 = arith.constant 0 : i32
    return %arg0, %c0_i32 : i32, i32
  }
}

module attributes {stable_mosaic.version = 11 : i64} {
  func.func @_tail_kernel(%arg0: i32, %arg1: memref<2x1x256xbf16, #tpu.memory_space<vmem>>, %arg2: memref<256x64xbf16, #tpu.memory_space<vmem>>, %arg3: memref<1x64xf32, #tpu.memory_space<vmem>>, %arg4: memref<64x160xbf16, #tpu.memory_space<vmem>>, %arg5: memref<1x160xf32, #tpu.memory_space<vmem>>, %arg6: memref<5x2x32xf32, #tpu.memory_space<vmem>>, %arg7: memref<5x2x1xi32, #tpu.memory_space<vmem>>) attributes {dimension_semantics = [#tpu.dimension_semantics<parallel>], iteration_bounds = array<i64: 1>, scalar_prefetch = 0 : i64, scratch_operands = 0 : i64, tpu.core_type = #tpu.core_type<tc>, window_params = [{transform_indices = @transform_0, window_bounds = array<i64: 2, 1, 256>}, {pipeline_mode = #tpu.pipeline_mode<synchronous>, transform_indices = @transform_1, window_bounds = array<i64: 256, 64>}, {pipeline_mode = #tpu.pipeline_mode<synchronous>, transform_indices = @transform_2, window_bounds = array<i64: 1, 64>}, {pipeline_mode = #tpu.pipeline_mode<synchronous>, transform_indices = @transform_3, window_bounds = array<i64: 64, 160>}, {pipeline_mode = #tpu.pipeline_mode<synchronous>, transform_indices = @transform_4, window_bounds = array<i64: 1, 160>}, {transform_indices = @transform_5, window_bounds = array<i64: 5, 2, 32>}, {transform_indices = @transform_6, window_bounds = array<i64: 5, 2, 1>}]} {
    %c0 = arith.constant 0 : index
    %c0_0 = arith.constant 0 : index
    %c0_1 = arith.constant 0 : index
    %0 = vector.load %arg1[%c0, %c0_0, %c0_1] : memref<2x1x256xbf16, #tpu.memory_space<vmem>>, vector<2x1x256xbf16>
    %1 = arith.extf %0 : vector<2x1x256xbf16> to vector<2x1x256xf32>
    %cst = arith.constant dense<0.000000e+00> : vector<2x256xf32>
    %2 = vector.multi_reduction <add>, %1, %cst [1] : vector<2x1x256xf32> to vector<2x256xf32>
    %cst_2 = arith.constant 1.000000e+00 : f32
    %3 = vector.broadcast %cst_2 : f32 to vector<2x256xf32>
    %4 = arith.divf %2, %3 : vector<2x256xf32>
    %5 = arith.truncf %4 : vector<2x256xf32> to vector<2x256xbf16>
    %c0_3 = arith.constant 0 : index
    %c0_4 = arith.constant 0 : index
    %6 = vector.load %arg2[%c0_3, %c0_4] : memref<256x64xbf16, #tpu.memory_space<vmem>>, vector<256x64xbf16>
    %cst_5 = arith.constant dense<0.000000e+00> : vector<2x64xf32>
    %7 = tpu.matmul %5, %6, %cst_5 {dimension_numbers = #tpu.dot_dimension_numbers<[1], [0], [0], [1], [0, 0, 1, 1], [], []>} : vector<2x256xbf16>, vector<256x64xbf16>, vector<2x64xf32> -> vector<2x64xf32>
    %c0_6 = arith.constant 0 : index
    %c0_7 = arith.constant 0 : index
    %8 = vector.load %arg3[%c0_6, %c0_7] : memref<1x64xf32, #tpu.memory_space<vmem>>, vector<1x64xf32>
    %9 = vector.broadcast %8 : vector<1x64xf32> to vector<2x64xf32>
    %10 = arith.addf %7, %9 : vector<2x64xf32>
    %11 = arith.negf %10 : vector<2x64xf32>
    %12 = math.exp %11 : vector<2x64xf32>
    %cst_8 = arith.constant 1.000000e+00 : f32
    %13 = vector.broadcast %cst_8 : f32 to vector<2x64xf32>
    %14 = arith.addf %13, %12 : vector<2x64xf32>
    %15 = arith.divf %13, %14 : vector<2x64xf32>
    %16 = arith.mulf %10, %15 : vector<2x64xf32>
    %17 = arith.truncf %16 : vector<2x64xf32> to vector<2x64xbf16>
    %c0_9 = arith.constant 0 : index
    %c0_10 = arith.constant 0 : index
    %18 = vector.load %arg4[%c0_9, %c0_10] : memref<64x160xbf16, #tpu.memory_space<vmem>>, vector<64x160xbf16>
    %cst_11 = arith.constant dense<0.000000e+00> : vector<2x160xf32>
    %19 = tpu.matmul %17, %18, %cst_11 {dimension_numbers = #tpu.dot_dimension_numbers<[1], [0], [0], [1], [0, 0, 1, 1], [], []>} : vector<2x64xbf16>, vector<64x160xbf16>, vector<2x160xf32> -> vector<2x160xf32>
    %c0_12 = arith.constant 0 : index
    %c0_13 = arith.constant 0 : index
    %20 = vector.load %arg5[%c0_12, %c0_13] : memref<1x160xf32, #tpu.memory_space<vmem>>, vector<1x160xf32>
    %21 = vector.broadcast %20 : vector<1x160xf32> to vector<2x160xf32>
    %22 = arith.addf %19, %21 : vector<2x160xf32>
    %23 = vector.extract_strided_slice %22 {offsets = [0, 0], sizes = [2, 32], strides = [1, 1]} : vector<2x160xf32> to vector<2x32xf32>
    %cst_14 = arith.constant dense<0xFF800000> : vector<2xf32>
    %24 = vector.multi_reduction <maximumf>, %23, %cst_14 [1] : vector<2x32xf32> to vector<2xf32>
    %25 = vector.shape_cast %24 : vector<2xf32> to vector<2x1xf32>
    %26 = vector.broadcast %25 : vector<2x1xf32> to vector<2x32xf32>
    %27 = arith.subf %23, %26 : vector<2x32xf32>
    %28 = math.exp %27 : vector<2x32xf32>
    %cst_15 = arith.constant dense<0.000000e+00> : vector<2xf32>
    %29 = vector.multi_reduction <add>, %28, %cst_15 [1] : vector<2x32xf32> to vector<2xf32>
    %30 = vector.shape_cast %29 : vector<2xf32> to vector<2x1xf32>
    %31 = vector.broadcast %30 : vector<2x1xf32> to vector<2x32xf32>
    %32 = arith.divf %28, %31 : vector<2x32xf32>
    %c0_16 = arith.constant 0 : index
    %c0_17 = arith.constant 0 : index
    %c0_18 = arith.constant 0 : index
    %33 = vector.load %arg6[%c0_16, %c0_17, %c0_18] : memref<5x2x32xf32, #tpu.memory_space<vmem>>, vector<1x2x32xf32>
    %34 = vector.shape_cast %33 : vector<1x2x32xf32> to vector<2x32xf32>
    %35 = vector.shape_cast %32 : vector<2x32xf32> to vector<1x2x32xf32>
    tpu.vector_store %arg6[%c0_16, %c0_17, %c0_18], %35 {strides = array<i32>} : memref<5x2x32xf32, #tpu.memory_space<vmem>>, vector<1x2x32xf32>,
    %36 = tpu.iota {dimensions = array<i32: 1>} : vector<2x32xi32>
    %37 = vector.broadcast %25 : vector<2x1xf32> to vector<2x32xf32>
    %38 = arith.cmpf oge, %23, %37 : vector<2x32xf32>
    %c32_i32 = arith.constant 32 : i32
    %39 = vector.broadcast %c32_i32 : i32 to vector<2x32xi32>
    %40 = arith.select %38, %36, %39 : vector<2x32xi1>, vector<2x32xi32>
    %cst_19 = arith.constant dense<2147483647> : vector<2xi32>
    %41 = vector.multi_reduction <minsi>, %40, %cst_19 [1] : vector<2x32xi32> to vector<2xi32>
    %42 = vector.shape_cast %41 : vector<2xi32> to vector<2x1xi32>
    %c0_20 = arith.constant 0 : index
    %c0_21 = arith.constant 0 : index
    %c0_22 = arith.constant 0 : index
    %43 = vector.load %arg7[%c0_20, %c0_21, %c0_22] : memref<5x2x1xi32, #tpu.memory_space<vmem>>, vector<1x2x1xi32>
    %44 = vector.shape_cast %43 : vector<1x2x1xi32> to vector<2x1xi32>
    %45 = vector.shape_cast %42 : vector<2x1xi32> to vector<1x2x1xi32>
    tpu.vector_store %arg7[%c0_20, %c0_21, %c0_22], %45 {strides = array<i32>} : memref<5x2x1xi32, #tpu.memory_space<vmem>>, vector<1x2x1xi32>,
    %46 = vector.extract_strided_slice %22 {offsets = [0, 32], sizes = [2, 32], strides = [1, 1]} : vector<2x160xf32> to vector<2x32xf32>
    %cst_23 = arith.constant dense<0xFF800000> : vector<2xf32>
    %47 = vector.multi_reduction <maximumf>, %46, %cst_23 [1] : vector<2x32xf32> to vector<2xf32>
    %48 = vector.shape_cast %47 : vector<2xf32> to vector<2x1xf32>
    %49 = vector.broadcast %48 : vector<2x1xf32> to vector<2x32xf32>
    %50 = arith.subf %46, %49 : vector<2x32xf32>
    %51 = math.exp %50 : vector<2x32xf32>
    %cst_24 = arith.constant dense<0.000000e+00> : vector<2xf32>
    %52 = vector.multi_reduction <add>, %51, %cst_24 [1] : vector<2x32xf32> to vector<2xf32>
    %53 = vector.shape_cast %52 : vector<2xf32> to vector<2x1xf32>
    %54 = vector.broadcast %53 : vector<2x1xf32> to vector<2x32xf32>
    %55 = arith.divf %51, %54 : vector<2x32xf32>
    %c1 = arith.constant 1 : index
    %c0_25 = arith.constant 0 : index
    %c0_26 = arith.constant 0 : index
    %56 = vector.load %arg6[%c1, %c0_25, %c0_26] : memref<5x2x32xf32, #tpu.memory_space<vmem>>, vector<1x2x32xf32>
    %57 = vector.shape_cast %56 : vector<1x2x32xf32> to vector<2x32xf32>
    %58 = vector.shape_cast %55 : vector<2x32xf32> to vector<1x2x32xf32>
    tpu.vector_store %arg6[%c1, %c0_25, %c0_26], %58 {strides = array<i32>} : memref<5x2x32xf32, #tpu.memory_space<vmem>>, vector<1x2x32xf32>,
    %59 = tpu.iota {dimensions = array<i32: 1>} : vector<2x32xi32>
    %60 = vector.broadcast %48 : vector<2x1xf32> to vector<2x32xf32>
    %61 = arith.cmpf oge, %46, %60 : vector<2x32xf32>
    %c32_i32_27 = arith.constant 32 : i32
    %62 = vector.broadcast %c32_i32_27 : i32 to vector<2x32xi32>
    %63 = arith.select %61, %59, %62 : vector<2x32xi1>, vector<2x32xi32>
    %cst_28 = arith.constant dense<2147483647> : vector<2xi32>
    %64 = vector.multi_reduction <minsi>, %63, %cst_28 [1] : vector<2x32xi32> to vector<2xi32>
    %65 = vector.shape_cast %64 : vector<2xi32> to vector<2x1xi32>
    %c1_29 = arith.constant 1 : index
    %c0_30 = arith.constant 0 : index
    %c0_31 = arith.constant 0 : index
    %66 = vector.load %arg7[%c1_29, %c0_30, %c0_31] : memref<5x2x1xi32, #tpu.memory_space<vmem>>, vector<1x2x1xi32>
    %67 = vector.shape_cast %66 : vector<1x2x1xi32> to vector<2x1xi32>
    %68 = vector.shape_cast %65 : vector<2x1xi32> to vector<1x2x1xi32>
    tpu.vector_store %arg7[%c1_29, %c0_30, %c0_31], %68 {strides = array<i32>} : memref<5x2x1xi32, #tpu.memory_space<vmem>>, vector<1x2x1xi32>,
    %69 = vector.extract_strided_slice %22 {offsets = [0, 64], sizes = [2, 32], strides = [1, 1]} : vector<2x160xf32> to vector<2x32xf32>
    %cst_32 = arith.constant dense<0xFF800000> : vector<2xf32>
    %70 = vector.multi_reduction <maximumf>, %69, %cst_32 [1] : vector<2x32xf32> to vector<2xf32>
    %71 = vector.shape_cast %70 : vector<2xf32> to vector<2x1xf32>
    %72 = vector.broadcast %71 : vector<2x1xf32> to vector<2x32xf32>
    %73 = arith.subf %69, %72 : vector<2x32xf32>
    %74 = math.exp %73 : vector<2x32xf32>
    %cst_33 = arith.constant dense<0.000000e+00> : vector<2xf32>
    %75 = vector.multi_reduction <add>, %74, %cst_33 [1] : vector<2x32xf32> to vector<2xf32>
    %76 = vector.shape_cast %75 : vector<2xf32> to vector<2x1xf32>
    %77 = vector.broadcast %76 : vector<2x1xf32> to vector<2x32xf32>
    %78 = arith.divf %74, %77 : vector<2x32xf32>
    %c2 = arith.constant 2 : index
    %c0_34 = arith.constant 0 : index
    %c0_35 = arith.constant 0 : index
    %79 = vector.load %arg6[%c2, %c0_34, %c0_35] : memref<5x2x32xf32, #tpu.memory_space<vmem>>, vector<1x2x32xf32>
    %80 = vector.shape_cast %79 : vector<1x2x32xf32> to vector<2x32xf32>
    %81 = vector.shape_cast %78 : vector<2x32xf32> to vector<1x2x32xf32>
    tpu.vector_store %arg6[%c2, %c0_34, %c0_35], %81 {strides = array<i32>} : memref<5x2x32xf32, #tpu.memory_space<vmem>>, vector<1x2x32xf32>,
    %82 = tpu.iota {dimensions = array<i32: 1>} : vector<2x32xi32>
    %83 = vector.broadcast %71 : vector<2x1xf32> to vector<2x32xf32>
    %84 = arith.cmpf oge, %69, %83 : vector<2x32xf32>
    %c32_i32_36 = arith.constant 32 : i32
    %85 = vector.broadcast %c32_i32_36 : i32 to vector<2x32xi32>
    %86 = arith.select %84, %82, %85 : vector<2x32xi1>, vector<2x32xi32>
    %cst_37 = arith.constant dense<2147483647> : vector<2xi32>
    %87 = vector.multi_reduction <minsi>, %86, %cst_37 [1] : vector<2x32xi32> to vector<2xi32>
    %88 = vector.shape_cast %87 : vector<2xi32> to vector<2x1xi32>
    %c2_38 = arith.constant 2 : index
    %c0_39 = arith.constant 0 : index
    %c0_40 = arith.constant 0 : index
    %89 = vector.load %arg7[%c2_38, %c0_39, %c0_40] : memref<5x2x1xi32, #tpu.memory_space<vmem>>, vector<1x2x1xi32>
    %90 = vector.shape_cast %89 : vector<1x2x1xi32> to vector<2x1xi32>
    %91 = vector.shape_cast %88 : vector<2x1xi32> to vector<1x2x1xi32>
    tpu.vector_store %arg7[%c2_38, %c0_39, %c0_40], %91 {strides = array<i32>} : memref<5x2x1xi32, #tpu.memory_space<vmem>>, vector<1x2x1xi32>,
    %92 = vector.extract_strided_slice %22 {offsets = [0, 96], sizes = [2, 32], strides = [1, 1]} : vector<2x160xf32> to vector<2x32xf32>
    %cst_41 = arith.constant dense<0xFF800000> : vector<2xf32>
    %93 = vector.multi_reduction <maximumf>, %92, %cst_41 [1] : vector<2x32xf32> to vector<2xf32>
    %94 = vector.shape_cast %93 : vector<2xf32> to vector<2x1xf32>
    %95 = vector.broadcast %94 : vector<2x1xf32> to vector<2x32xf32>
    %96 = arith.subf %92, %95 : vector<2x32xf32>
    %97 = math.exp %96 : vector<2x32xf32>
    %cst_42 = arith.constant dense<0.000000e+00> : vector<2xf32>
    %98 = vector.multi_reduction <add>, %97, %cst_42 [1] : vector<2x32xf32> to vector<2xf32>
    %99 = vector.shape_cast %98 : vector<2xf32> to vector<2x1xf32>
    %100 = vector.broadcast %99 : vector<2x1xf32> to vector<2x32xf32>
    %101 = arith.divf %97, %100 : vector<2x32xf32>
    %c3 = arith.constant 3 : index
    %c0_43 = arith.constant 0 : index
    %c0_44 = arith.constant 0 : index
    %102 = vector.load %arg6[%c3, %c0_43, %c0_44] : memref<5x2x32xf32, #tpu.memory_space<vmem>>, vector<1x2x32xf32>
    %103 = vector.shape_cast %102 : vector<1x2x32xf32> to vector<2x32xf32>
    %104 = vector.shape_cast %101 : vector<2x32xf32> to vector<1x2x32xf32>
    tpu.vector_store %arg6[%c3, %c0_43, %c0_44], %104 {strides = array<i32>} : memref<5x2x32xf32, #tpu.memory_space<vmem>>, vector<1x2x32xf32>,
    %105 = tpu.iota {dimensions = array<i32: 1>} : vector<2x32xi32>
    %106 = vector.broadcast %94 : vector<2x1xf32> to vector<2x32xf32>
    %107 = arith.cmpf oge, %92, %106 : vector<2x32xf32>
    %c32_i32_45 = arith.constant 32 : i32
    %108 = vector.broadcast %c32_i32_45 : i32 to vector<2x32xi32>
    %109 = arith.select %107, %105, %108 : vector<2x32xi1>, vector<2x32xi32>
    %cst_46 = arith.constant dense<2147483647> : vector<2xi32>
    %110 = vector.multi_reduction <minsi>, %109, %cst_46 [1] : vector<2x32xi32> to vector<2xi32>
    %111 = vector.shape_cast %110 : vector<2xi32> to vector<2x1xi32>
    %c3_47 = arith.constant 3 : index
    %c0_48 = arith.constant 0 : index
    %c0_49 = arith.constant 0 : index
    %112 = vector.load %arg7[%c3_47, %c0_48, %c0_49] : memref<5x2x1xi32, #tpu.memory_space<vmem>>, vector<1x2x1xi32>
    %113 = vector.shape_cast %112 : vector<1x2x1xi32> to vector<2x1xi32>
    %114 = vector.shape_cast %111 : vector<2x1xi32> to vector<1x2x1xi32>
    tpu.vector_store %arg7[%c3_47, %c0_48, %c0_49], %114 {strides = array<i32>} : memref<5x2x1xi32, #tpu.memory_space<vmem>>, vector<1x2x1xi32>,
    %115 = vector.extract_strided_slice %22 {offsets = [0, 128], sizes = [2, 32], strides = [1, 1]} : vector<2x160xf32> to vector<2x32xf32>
    %cst_50 = arith.constant dense<0xFF800000> : vector<2xf32>
    %116 = vector.multi_reduction <maximumf>, %115, %cst_50 [1] : vector<2x32xf32> to vector<2xf32>
    %117 = vector.shape_cast %116 : vector<2xf32> to vector<2x1xf32>
    %118 = vector.broadcast %117 : vector<2x1xf32> to vector<2x32xf32>
    %119 = arith.subf %115, %118 : vector<2x32xf32>
    %120 = math.exp %119 : vector<2x32xf32>
    %cst_51 = arith.constant dense<0.000000e+00> : vector<2xf32>
    %121 = vector.multi_reduction <add>, %120, %cst_51 [1] : vector<2x32xf32> to vector<2xf32>
    %122 = vector.shape_cast %121 : vector<2xf32> to vector<2x1xf32>
    %123 = vector.broadcast %122 : vector<2x1xf32> to vector<2x32xf32>
    %124 = arith.divf %120, %123 : vector<2x32xf32>
    %c4 = arith.constant 4 : index
    %c0_52 = arith.constant 0 : index
    %c0_53 = arith.constant 0 : index
    %125 = vector.load %arg6[%c4, %c0_52, %c0_53] : memref<5x2x32xf32, #tpu.memory_space<vmem>>, vector<1x2x32xf32>
    %126 = vector.shape_cast %125 : vector<1x2x32xf32> to vector<2x32xf32>
    %127 = vector.shape_cast %124 : vector<2x32xf32> to vector<1x2x32xf32>
    tpu.vector_store %arg6[%c4, %c0_52, %c0_53], %127 {strides = array<i32>} : memref<5x2x32xf32, #tpu.memory_space<vmem>>, vector<1x2x32xf32>,
    %128 = tpu.iota {dimensions = array<i32: 1>} : vector<2x32xi32>
    %129 = vector.broadcast %117 : vector<2x1xf32> to vector<2x32xf32>
    %130 = arith.cmpf oge, %115, %129 : vector<2x32xf32>
    %c32_i32_54 = arith.constant 32 : i32
    %131 = vector.broadcast %c32_i32_54 : i32 to vector<2x32xi32>
    %132 = arith.select %130, %128, %131 : vector<2x32xi1>, vector<2x32xi32>
    %cst_55 = arith.constant dense<2147483647> : vector<2xi32>
    %133 = vector.multi_reduction <minsi>, %132, %cst_55 [1] : vector<2x32xi32> to vector<2xi32>
    %134 = vector.shape_cast %133 : vector<2xi32> to vector<2x1xi32>
    %c4_56 = arith.constant 4 : index
    %c0_57 = arith.constant 0 : index
    %c0_58 = arith.constant 0 : index
    %135 = vector.load %arg7[%c4_56, %c0_57, %c0_58] : memref<5x2x1xi32, #tpu.memory_space<vmem>>, vector<1x2x1xi32>
    %136 = vector.shape_cast %135 : vector<1x2x1xi32> to vector<2x1xi32>
    %137 = vector.shape_cast %134 : vector<2x1xi32> to vector<1x2x1xi32>
    tpu.vector_store %arg7[%c4_56, %c0_57, %c0_58], %137 {strides = array<i32>} : memref<5x2x1xi32, #tpu.memory_space<vmem>>, vector<1x2x1xi32>,
    return
  }
  func.func @transform_0(%arg0: i32) -> (i32, i32, i32) {
    %c0_i32 = arith.constant 0 : i32
    %c0_i32_0 = arith.constant 0 : i32
    %c0_i32_1 = arith.constant 0 : i32
    return %arg0, %c0_i32, %c0_i32_0 : i32, i32, i32
  }
  func.func @transform_1(%arg0: i32) -> (i32, i32) {
    %c0_i32 = arith.constant 0 : i32
    %c0_i32_0 = arith.constant 0 : i32
    %c0_i32_1 = arith.constant 0 : i32
    return %c0_i32, %c0_i32_0 : i32, i32
  }
  func.func @transform_2(%arg0: i32) -> (i32, i32) {
    %c0_i32 = arith.constant 0 : i32
    %c0_i32_0 = arith.constant 0 : i32
    %c0_i32_1 = arith.constant 0 : i32
    return %c0_i32, %c0_i32_0 : i32, i32
  }
  func.func @transform_3(%arg0: i32) -> (i32, i32) {
    %c0_i32 = arith.constant 0 : i32
    %c0_i32_0 = arith.constant 0 : i32
    %c0_i32_1 = arith.constant 0 : i32
    return %c0_i32, %c0_i32_0 : i32, i32
  }
  func.func @transform_4(%arg0: i32) -> (i32, i32) {
    %c0_i32 = arith.constant 0 : i32
    %c0_i32_0 = arith.constant 0 : i32
    %c0_i32_1 = arith.constant 0 : i32
    return %c0_i32, %c0_i32_0 : i32, i32
  }
  func.func @transform_5(%arg0: i32) -> (i32, i32, i32) {
    %c0_i32 = arith.constant 0 : i32
    %c0_i32_0 = arith.constant 0 : i32
    %c0_i32_1 = arith.constant 0 : i32
    return %c0_i32, %arg0, %c0_i32_0 : i32, i32, i32
  }
  func.func @transform_6(%arg0: i32) -> (i32, i32, i32) {
    %c0_i32 = arith.constant 0 : i32
    %c0_i32_0 = arith.constant 0 : i32
    %c0_i32_1 = arith.constant 0 : i32
    return %c0_i32, %arg0, %c0_i32_0 : i32, i32, i32
  }
}

</mosaic_0001>

<bundles_post_ra>
// kernel: _lambda_.57
= control target key start
LH: loop header
LB: loop body
LE: loop exit
PB: predicated region body
PF: predicated region fallthrough
CT: control target
= control target key end

     0   :  { %s1261_s15 = smov 0   ;;  %s1502_s0 = inlined_call_operand.vmem [shape: bf16[512,147], index: 0, kind: input, shape index: {}]   ;;  %s1503_s1 = inlined_call_operand.vmem [shape: bf16[147,8], index: 1, kind: input, shape index: {}]   ;;  %s1504_s2 = inlined_call_operand.vmem [shape: f32[1,8], index: 2, kind: input, shape index: {}]   ;;  %s1505_s3 = inlined_call_operand.vmem [shape: f32[1,8], index: 3, kind: input, shape index: {}]   ;;  %s1506_s4 = inlined_call_operand.vmem [shape: bf16[512,8], index: 4, kind: output, shape index: {}]  }
   0x1 LB: > { %s1001_s16 = sadd.s32 4294967295, %s1232_s15   ;;  %p1005_p0 = scmp.ge.s32.totalorder %s1232_s15, 1  ;;  %s1232_s15 = sphi %s1261_s15, %s14_s15  }
   0x2   : > { %p164_p1 = scmp.lt.s32.totalorder %s1232_s15, 3 }
   0x4   : > { %p165_p2 = pnand %p1005_p0, %p164_p1 }
   0x5   : > { %v1168_v0 = vld [vmem:[%s1503_s1] sm:$0xff] (!%p165_p2)   ;;  %v1234_v1 = vmov (!%p165_p2), 0   ;;  %v1169_v2 = vld [vmem:[%s1503_s1 + $0x8] sm:$0xff] (!%p165_p2)   ;;  %v1170_v3 = vld [vmem:[%s1503_s1 + $0x10] sm:$0xff] (!%p165_p2)   ;;  %s1006_s23 = sshll.u32 (!%p165_p2), %s1001_s16, 5  ;;  %vm457_vm0 = vcmask (!%p165_p2), 154624  }
   0x6   : > { %168 = sbr.rel (%p165_p2) target bundleno = 325 (0x145), region = 36  ;;  %513 = vmatprep.subr.bf16.mxu0 (!%p165_p2), %v1234_v1  ;;  %1138 = vmatprep.subr.bf16.mxu1 (!%p165_p2), %v1234_v1  ;;  %p192_p3 = scmp.lt.s32.totalorder (!%p165_p2), %s1006_s23, 63  ;;  %v1171_v4 = vld [vmem:[%s1503_s1 + $0x18] sm:$0xff] (!%p165_p2)   ;;  %v1172_v5 = vld [vmem:[%s1503_s1 + $0x20] sm:$0xff] (!%p165_p2)   ;;  %v1173_v8 = vld [vmem:[%s1503_s1 + $0x28] sm:$0xff] (!%p165_p2)   ;;  %vm506_vm1 = vcmask (!%p165_p2), 1040384  }
   0x7   : > { %514 = vmatpush1.bf16.msra.mxu0 (!%p165_p2), %v1168_v0  ;;  %1148 = vmatpush1.bf16.msra.mxu1 (!%p165_p2), %v1168_v0  ;;  %v1174_v9 = vld [vmem:[%s1503_s1 + $0x30] sm:$0xff] (!%p165_p2)   ;;  %v1175_v10 = vld [vmem:[%s1503_s1 + $0x38] sm:$0xff] (!%p165_p2)   ;;  %vm507_vm2 = vcmask (!%p165_p2), 1041408   ;;  %v1235_v11 = vmov (!%p165_p2), 65535   ;;  %v1176_v13 = vld [vmem:[%s1503_s1 + $0x40] sm:$0xff] (!%p165_p2)   ;;  %vm912_vm3 = vcmask (!%p165_p2), 60416  }
   0x8   : > { %515 = vmatprep.subr.bf16.mxu0 (!%p165_p2), %v1234_v1  ;;  %1139 = vmatprep.subr.bf16.mxu1 (!%p165_p2), %v1234_v1  ;;  %v508_v12 = vsel (!%p165_p2), %vm506_vm1, 4294967295, %v1235_v11  ;;  %v1177_v14 = vld [vmem:[%s1503_s1 + $0x48] ss:$0 sps:$4 sm:$0x33] (!%p165_p2)   ;;  %v1358_v47 = vld [vmem:[%s1504_s2] ss:$0 sm:$0xff] (!%p165_p2) }
   0x9   : > { %v509_v15 = vsel (!%p165_p2), %vm507_vm2, %v508_v12, 0  ;;  %v1363_v49 = vld [vmem:[%s1505_s3] ss:$0 sm:$0xff] (!%p165_p2) }
   0xa   : > { %v511_v16 = vand.u32 (!%p165_p2), %v1177_v14, %v509_v15 }
   0xb   : > { %516 = vmatpush1.bf16.msra.mxu0 (!%p165_p2), %v1169_v2  ;;  %1149 = vmatpush1.bf16.msra.mxu1 (!%p165_p2), %v1169_v2 }
   0xc   : > { %517 = vmatprep.subr.bf16.mxu0 (!%p165_p2), %v1234_v1  ;;  %1140 = vmatprep.subr.bf16.mxu1 (!%p165_p2), %v1234_v1 }
   0xd   : > { %s1508_s23 = smov (!%p192_p3, %s1006_s23), 63 }
   0xe   : > { %s1105_s26 = sshll.u32 %s1508_s23, 3  ;;  %s1010_s21 = sshll.u32 %s1508_s23, 2 }
   0xf   : > { %518 = vmatpush1.bf16.msra.mxu0 %v1170_v3  ;;  %1150 = vmatpush1.bf16.msra.mxu1 %v1170_v3  ;;  %s1287_s29 = scalar_lea.vmem %s1502_s0, %s1105_s26  ;;  %s1377_s23 = scalar_lea.vmem %s1506_s4, %s1010_s21 }
  0x10   : > { %519 = vmatprep.subr.bf16.mxu0 %v1234_v1  ;;  %1141 = vmatprep.subr.bf16.mxu1 %v1234_v1  ;;  %v1180_v6 = vld [vmem:[%s1287_s29 + $0x4] ss:$8 sps:$4 sm:$0xff]   ;;  %v1178_v17 = vld [vmem:[%s1287_s29] ss:$8 sps:$4 sm:$0xff]   ;;  %v1184_v19 = vld [vmem:[%s1287_s29 + $0x14] ss:$8 sps:$4 sm:$0xff]  }
  0x11   : > { %v1183_v7 = vld [vmem:[%s1287_s29 + $0x84] ss:$8 sps:$4 sm:$0xff]   ;;  %1053 = vmatprep.mubr.msk.bf16.mxu0 %vm457_vm0, %v1180_v6  ;;  %v1181_v18 = vld [vmem:[%s1287_s29 + $0x80] ss:$8 sps:$4 sm:$0xff]   ;;  %v1186_v20 = vld [vmem:[%s1287_s29 + $0x94] ss:$8 sps:$4 sm:$0xff]  }
  0x12   : > { %1061 = vmatprep.mubr.msk.bf16.mxu1 %vm457_vm0, %v1183_v7  ;;  %v1188_v21 = vld [vmem:[%s1287_s29 + $0x10] ss:$8 sps:$4 sm:$0xff]   ;;  %v1190_v23 = vld [vmem:[%s1287_s29 + $0x24] ss:$8 sps:$4 sm:$0xff]   ;;  %v1194_v25 = vld [vmem:[%s1287_s29 + $0x20] ss:$8 sps:$4 sm:$0xff]  }
  0x13   : > { %520 = vmatpush1.bf16.msra.mxu0 %v1171_v4  ;;  %1151 = vmatpush1.bf16.msra.mxu1 %v1171_v4  ;;  %v1189_v22 = vld [vmem:[%s1287_s29 + $0x90] ss:$8 sps:$4 sm:$0xff]   ;;  %v1192_v24 = vld [vmem:[%s1287_s29 + $0xa4] ss:$8 sps:$4 sm:$0xff]   ;;  %v1195_v26 = vld [vmem:[%s1287_s29 + $0xa0] ss:$8 sps:$4 sm:$0xff]  }
  0x14   : > { %521 = vmatprep.subr.bf16.mxu0 %v1234_v1  ;;  %1142 = vmatprep.subr.bf16.mxu1 %v1234_v1  ;;  %v1196_v27 = vld [vmem:[%s1287_s29 + $0x34] ss:$8 sps:$4 sm:$0xff]   ;;  %v1200_v29 = vld [vmem:[%s1287_s29 + $0x30] ss:$8 sps:$4 sm:$0xff]   ;;  %v1202_v31 = vld [vmem:[%s1287_s29 + $0x44] ss:$8 sps:$4 sm:$0xff]  }
  0x15   : > { %v1198_v28 = vld [vmem:[%s1287_s29 + $0xb4] ss:$8 sps:$4 sm:$0xff]   ;;  %v1201_v30 = vld [vmem:[%s1287_s29 + $0xb0] ss:$8 sps:$4 sm:$0xff]   ;;  %v1204_v32 = vld [vmem:[%s1287_s29 + $0xc4] ss:$8 sps:$4 sm:$0xff]  }
  0x16   : > { %v1206_v33 = vld [vmem:[%s1287_s29 + $0x40] ss:$8 sps:$4 sm:$0xff]   ;;  %v1208_v35 = vld [vmem:[%s1287_s29 + $0x54] ss:$8 sps:$4 sm:$0xff]   ;;  %v1212_v37 = vld [vmem:[%s1287_s29 + $0x50] ss:$8 sps:$4 sm:$0xff]  }
  0x17   : > { %522 = vmatpush1.bf16.msra.mxu0 %v1172_v5  ;;  %1152 = vmatpush1.bf16.msra.mxu1 %v1172_v5  ;;  %v1207_v34 = vld [vmem:[%s1287_s29 + $0xc0] ss:$8 sps:$4 sm:$0xff]   ;;  %v1210_v36 = vld [vmem:[%s1287_s29 + $0xd4] ss:$8 sps:$4 sm:$0xff]   ;;  %v1213_v38 = vld [vmem:[%s1287_s29 + $0xd0] ss:$8 sps:$4 sm:$0xff]  }
  0x18   : > { %523 = vmatprep.subr.bf16.mxu0 %v1234_v1  ;;  %1143 = vmatprep.subr.bf16.mxu1 %v1234_v1  ;;  %v1214_v39 = vld [vmem:[%s1287_s29 + $0x64] ss:$8 sps:$4 sm:$0xff]   ;;  %v1218_v41 = vld [vmem:[%s1287_s29 + $0x60] ss:$8 sps:$4 sm:$0xff]   ;;  %v1220_v43 = vld [vmem:[%s1287_s29 + $0x74] ss:$8 sps:$4 sm:$0xff]  }
  0x19   : > { %v1216_v40 = vld [vmem:[%s1287_s29 + $0xe4] ss:$8 sps:$4 sm:$0xff]   ;;  %v1219_v42 = vld [vmem:[%s1287_s29 + $0xe0] ss:$8 sps:$4 sm:$0xff]   ;;  %v1222_v44 = vld [vmem:[%s1287_s29 + $0xf4] ss:$8 sps:$4 sm:$0xff]  }
  0x1a   : > { %v1224_v45 = vld [vmem:[%s1287_s29 + $0x70] ss:$8 sps:$4 sm:$0xff]  }
  0x1b   : > { %524 = vmatpush1.bf16.msra.mxu0 %v1173_v8  ;;  %1153 = vmatpush1.bf16.msra.mxu1 %v1173_v8  ;;  %v1225_v46 = vld [vmem:[%s1287_s29 + $0xf0] ss:$8 sps:$4 sm:$0xff]  }
  0x1c   : > { %525 = vmatprep.subr.bf16.mxu0 %v1234_v1  ;;  %1144 = vmatprep.subr.bf16.mxu1 %v1234_v1 }
  0x1f   : > { %526 = vmatpush1.bf16.msra.mxu0 %v1174_v9  ;;  %1154 = vmatpush1.bf16.msra.mxu1 %v1174_v9 }
  0x20   : > { %527 = vmatprep.subr.bf16.mxu0 %v1234_v1  ;;  %1145 = vmatprep.subr.bf16.mxu1 %v1234_v1 }
  0x23   : > { %528 = vmatpush1.bf16.msra.mxu0 %v1175_v10  ;;  %1155 = vmatpush1.bf16.msra.mxu1 %v1175_v10 }
  0x24   : > { %529 = vmatprep.subr.bf16.mxu0 %v1234_v1  ;;  %1146 = vmatprep.subr.bf16.mxu1 %v1234_v1 }
  0x27   : > { %530 = vmatpush1.bf16.msra.mxu0 %v1176_v13  ;;  %1156 = vmatpush1.bf16.msra.mxu1 %v1176_v13 }
  0x28   : > { %531 = vmatprep.subr.bf16.mxu0 %v1234_v1  ;;  %1147 = vmatprep.subr.bf16.mxu1 %v1234_v1 }
  0x2b   : > { %532 = vmatpush1.bf16.msra.mxu0 %v511_v16  ;;  %1157 = vmatpush1.bf16.msra.mxu1 %v511_v16 }
  0x2e   : > { %546 = vmatmul.mubr.bf16.vlgmr.msra.gmra.mrb[0].mxu0 %v1178_v17  ;;  %610 = vmatmul.mubr.bf16.vlgmr.msra.gmra.mrb[0].mxu1 %v1181_v18 }
  0x2f   : > { %1054 = vmatprep.mubr.msk.bf16.mxu0 %vm457_vm0, %v1184_v19  ;;  %1062 = vmatprep.mubr.msk.bf16.mxu1 %vm457_vm0, %v1186_v20 }
  0x36   : > { %554 = vmatmul.mubr.bf16.gmra.mrb[4].mxu0 %v1188_v21  ;;  %618 = vmatmul.mubr.bf16.gmra.mrb[4].mxu1 %v1189_v22 }
  0x37   : > { %1055 = vmatprep.mubr.msk.bf16.mxu0 %vm457_vm0, %v1190_v23  ;;  %1063 = vmatprep.mubr.msk.bf16.mxu1 %vm457_vm0, %v1192_v24 }
  0x3e   : > { %562 = vmatmul.mubr.bf16.gmra.mrb[8].mxu0 %v1194_v25  ;;  %626 = vmatmul.mubr.bf16.gmra.mrb[8].mxu1 %v1195_v26 }
  0x3f   : > { %1056 = vmatprep.mubr.msk.bf16.mxu0 %vm457_vm0, %v1196_v27  ;;  %1064 = vmatprep.mubr.msk.bf16.mxu1 %vm457_vm0, %v1198_v28 }
  0x46   : > { %570 = vmatmul.mubr.bf16.gmra.mrb[12].mxu0 %v1200_v29  ;;  %634 = vmatmul.mubr.bf16.gmra.mrb[12].mxu1 %v1201_v30 }
  0x47   : > { %1057 = vmatprep.mubr.msk.bf16.mxu0 %vm457_vm0, %v1202_v31  ;;  %1065 = vmatprep.mubr.msk.bf16.mxu1 %vm457_vm0, %v1204_v32 }
  0x4e   : > { %578 = vmatmul.mubr.bf16.gmra.mrb[16].mxu0 %v1206_v33  ;;  %642 = vmatmul.mubr.bf16.gmra.mrb[16].mxu1 %v1207_v34 }
  0x4f   : > { %1058 = vmatprep.mubr.msk.bf16.mxu0 %vm457_vm0, %v1208_v35  ;;  %1066 = vmatprep.mubr.msk.bf16.mxu1 %vm457_vm0, %v1210_v36 }
  0x56   : > { %586 = vmatmul.mubr.bf16.gmra.mrb[20].mxu0 %v1212_v37  ;;  %650 = vmatmul.mubr.bf16.gmra.mrb[20].mxu1 %v1213_v38 }
  0x57   : > { %1059 = vmatprep.mubr.msk.bf16.mxu0 %vm457_vm0, %v1214_v39  ;;  %1067 = vmatprep.mubr.msk.bf16.mxu1 %vm457_vm0, %v1216_v40 }
  0x5e   : > { %594 = vmatmul.mubr.bf16.gmra.mrb[24].mxu0 %v1218_v41  ;;  %658 = vmatmul.mubr.bf16.gmra.mrb[24].mxu1 %v1219_v42 }
  0x5f   : > { %1060 = vmatprep.mubr.msk.bf16.mxu0 %vm457_vm0, %v1220_v43  ;;  %1068 = vmatprep.mubr.msk.bf16.mxu1 %vm457_vm0, %v1222_v44 }
  0x66   : > { %602 = vmatmul.mubr.bf16.gmra.mrb[28].mxu0 %v1224_v45  ;;  %666 = vmatmul.mubr.bf16.gmra.mrb[28].mxu1 %v1225_v46 }
 0x101   : > { %v547_v48 = vpop.f32.mrb[0].mxu0  ;;  %v611_v50 = vpop.f32.mrb[0].mxu1 }
 0x102   : > { %v681_v51 = vmul.f32 %v1358_v47, %v547_v48  ;;  %v697_v52 = vmul.f32 %v1358_v47, %v611_v50  ;;  %v549_v53 = vpop.f32.mrb[1].mxu0  ;;  %v613_v54 = vpop.f32.mrb[1].mxu1 }
 0x103   : > { %v550_v55 = vpop.f32.mrb[2].mxu0  ;;  %v614_v56 = vpop.f32.mrb[2].mxu1 }
 0x104   : > { %v720_v57 = vadd.f32 %v1363_v49, %v681_v51  ;;  %v736_v58 = vadd.f32 %v1363_v49, %v697_v52  ;;  %v682_v59 = vmul.f32 %v1358_v47, %v550_v55  ;;  %v698_v60 = vmul.f32 %v1358_v47, %v614_v56  ;;  %v552_v61 = vpop.f32.mrb[3].mxu0  ;;  %v616_v62 = vpop.f32.mrb[3].mxu1 }
 0x106   : > { %v752_v63 = vmax.f32 %v720_v57, 0.0  ;;  %v768_v0 = vmax.f32 %v736_v58, 0.0  ;;  %v721_v1 = vadd.f32 %v1363_v49, %v682_v59  ;;  %v737_v2 = vadd.f32 %v1363_v49, %v698_v60 }
 0x108   : > { %v1106_v3 = vpack.c.bf16 %v752_v63, %v752_v63  ;;  %v1122_v4 = vpack.c.bf16 %v768_v0, %v768_v0  ;;  %v753_v5 = vmax.f32 %v721_v1, 0.0  ;;  %v769_v6 = vmax.f32 %v737_v2, 0.0 }
 0x109   : > { %v555_v7 = vpop.f32.mrb[4].mxu0  ;;  %v619_v8 = vpop.f32.mrb[4].mxu1 }
 0x10a   : > { %913 = vst.msk [vmem:[%s1377_s23] sm:$0xf] %vm912_vm3, %v1106_v3  ;;  %929 = vst.msk [vmem:[%s1377_s23 + $0x40] sm:$0xf] %vm912_vm3, %v1122_v4  ;;  %v1107_v9 = vpack.c.bf16 %v753_v5, %v753_v5  ;;  %v1123_v10 = vpack.c.bf16 %v769_v6, %v769_v6  ;;  %v683_v11 = vmul.f32 %v1358_v47, %v555_v7  ;;  %v557_v13 = vpop.f32.mrb[5].mxu0  ;;  %v621_v14 = vpop.f32.mrb[5].mxu1 }
 0x10b   : > { %v699_v12 = vmul.f32 %v1358_v47, %v619_v8  ;;  %v558_v15 = vpop.f32.mrb[6].mxu0  ;;  %v622_v16 = vpop.f32.mrb[6].mxu1 }
 0x10c   : > { %914 = vst.msk [vmem:[%s1377_s23 + $0x4] sm:$0xf] %vm912_vm3, %v1107_v9  ;;  %930 = vst.msk [vmem:[%s1377_s23 + $0x44] sm:$0xf] %vm912_vm3, %v1123_v10  ;;  %v722_v17 = vadd.f32 %v1363_v49, %v683_v11  ;;  %v684_v19 = vmul.f32 %v1358_v47, %v558_v15  ;;  %v700_v20 = vmul.f32 %v1358_v47, %v622_v16  ;;  %v560_v21 = vpop.f32.mrb[7].mxu0  ;;  %v624_v22 = vpop.f32.mrb[7].mxu1 }
 0x10d   : > { %v738_v18 = vadd.f32 %v1363_v49, %v699_v12 }
 0x10e   : > { %v754_v23 = vmax.f32 %v722_v17, 0.0  ;;  %v723_v25 = vadd.f32 %v1363_v49, %v684_v19  ;;  %v739_v26 = vadd.f32 %v1363_v49, %v700_v20 }
 0x10f   : > { %v770_v24 = vmax.f32 %v738_v18, 0.0 }
 0x110   : > { %v1108_v27 = vpack.c.bf16 %v754_v23, %v754_v23  ;;  %v755_v29 = vmax.f32 %v723_v25, 0.0  ;;  %v771_v30 = vmax.f32 %v739_v26, 0.0 }
 0x111   : > { %v1124_v28 = vpack.c.bf16 %v770_v24, %v770_v24  ;;  %v563_v31 = vpop.f32.mrb[8].mxu0  ;;  %v627_v32 = vpop.f32.mrb[8].mxu1 }
 0x112   : > { %915 = vst.msk [vmem:[%s1377_s23 + $0x8] sm:$0xf] %vm912_vm3, %v1108_v27  ;;  %v1109_v33 = vpack.c.bf16 %v755_v29, %v755_v29  ;;  %v1125_v34 = vpack.c.bf16 %v771_v30, %v771_v30  ;;  %v685_v35 = vmul.f32 %v1358_v47, %v563_v31  ;;  %v701_v36 = vmul.f32 %v1358_v47, %v627_v32  ;;  %v565_v37 = vpop.f32.mrb[9].mxu0  ;;  %v629_v38 = vpop.f32.mrb[9].mxu1 }
 0x113   : > { %931 = vst.msk [vmem:[%s1377_s23 + $0x48] sm:$0xf] %vm912_vm3, %v1124_v28  ;;  %v566_v39 = vpop.f32.mrb[10].mxu0  ;;  %v630_v40 = vpop.f32.mrb[10].mxu1 }
 0x114   : > { %916 = vst.msk [vmem:[%s1377_s23 + $0xc] sm:$0xf] %vm912_vm3, %v1109_v33  ;;  %932 = vst.msk [vmem:[%s1377_s23 + $0x4c] sm:$0xf] %vm912_vm3, %v1125_v34  ;;  %v724_v41 = vadd.f32 %v1363_v49, %v685_v35  ;;  %v740_v42 = vadd.f32 %v1363_v49, %v701_v36  ;;  %v686_v43 = vmul.f32 %v1358_v47, %v566_v39  ;;  %v568_v45 = vpop.f32.mrb[11].mxu0  ;;  %v632_v46 = vpop.f32.mrb[11].mxu1 }
 0x115   : > { %v702_v44 = vmul.f32 %v1358_v47, %v630_v40 }
 0x116   : > { %v756_v48 = vmax.f32 %v724_v41, 0.0  ;;  %v772_v50 = vmax.f32 %v740_v42, 0.0  ;;  %v725_v51 = vadd.f32 %v1363_v49, %v686_v43 }
 0x117   : > { %v741_v52 = vadd.f32 %v1363_v49, %v702_v44 }
 0x118   : > { %v1110_v53 = vpack.c.bf16 %v756_v48, %v756_v48  ;;  %v1126_v54 = vpack.c.bf16 %v772_v50, %v772_v50  ;;  %v757_v55 = vmax.f32 %v725_v51, 0.0 }
 0x119   : > { %v773_v56 = vmax.f32 %v741_v52, 0.0  ;;  %v571_v57 = vpop.f32.mrb[12].mxu0  ;;  %v635_v58 = vpop.f32.mrb[12].mxu1 }
 0x11a   : > { %917 = vst.msk [vmem:[%s1377_s23 + $0x10] sm:$0xf] %vm912_vm3, %v1110_v53  ;;  %933 = vst.msk [vmem:[%s1377_s23 + $0x50] sm:$0xf] %vm912_vm3, %v1126_v54  ;;  %v1111_v59 = vpack.c.bf16 %v757_v55, %v757_v55  ;;  %v687_v61 = vmul.f32 %v1358_v47, %v571_v57  ;;  %v703_v62 = vmul.f32 %v1358_v47, %v635_v58  ;;  %v573_v63 = vpop.f32.mrb[13].mxu0  ;;  %v637_v0 = vpop.f32.mrb[13].mxu1 }
 0x11b   : > { %v1127_v60 = vpack.c.bf16 %v773_v56, %v773_v56  ;;  %v574_v1 = vpop.f32.mrb[14].mxu0  ;;  %v638_v2 = vpop.f32.mrb[14].mxu1 }
 0x11c   : > { %918 = vst.msk [vmem:[%s1377_s23 + $0x14] sm:$0xf] %vm912_vm3, %v1111_v59  ;;  %v726_v3 = vadd.f32 %v1363_v49, %v687_v61  ;;  %v742_v4 = vadd.f32 %v1363_v49, %v703_v62  ;;  %v688_v5 = vmul.f32 %v1358_v47, %v574_v1  ;;  %v704_v6 = vmul.f32 %v1358_v47, %v638_v2  ;;  %v576_v7 = vpop.f32.mrb[15].mxu0  ;;  %v640_v8 = vpop.f32.mrb[15].mxu1 }
 0x11d   : > { %934 = vst.msk [vmem:[%s1377_s23 + $0x54] sm:$0xf] %vm912_vm3, %v1127_v60 }
 0x11e   : > { %v758_v9 = vmax.f32 %v726_v3, 0.0  ;;  %v774_v10 = vmax.f32 %v742_v4, 0.0  ;;  %v727_v11 = vadd.f32 %v1363_v49, %v688_v5  ;;  %v743_v12 = vadd.f32 %v1363_v49, %v704_v6 }
 0x120   : > { %v1112_v13 = vpack.c.bf16 %v758_v9, %v758_v9  ;;  %v1128_v14 = vpack.c.bf16 %v774_v10, %v774_v10  ;;  %v759_v15 = vmax.f32 %v727_v11, 0.0  ;;  %v775_v16 = vmax.f32 %v743_v12, 0.0 }
 0x121   : > { %v579_v17 = vpop.f32.mrb[16].mxu0  ;;  %v643_v18 = vpop.f32.mrb[16].mxu1 }
 0x122   : > { %919 = vst.msk [vmem:[%s1377_s23 + $0x18] sm:$0xf] %vm912_vm3, %v1112_v13  ;;  %935 = vst.msk [vmem:[%s1377_s23 + $0x58] sm:$0xf] %vm912_vm3, %v1128_v14  ;;  %v1113_v19 = vpack.c.bf16 %v759_v15, %v759_v15  ;;  %v1129_v20 = vpack.c.bf16 %v775_v16, %v775_v16  ;;  %v689_v21 = vmul.f32 %v1358_v47, %v579_v17  ;;  %v581_v23 = vpop.f32.mrb[17].mxu0  ;;  %v645_v24 = vpop.f32.mrb[17].mxu1 }
 0x123   : > { %v705_v22 = vmul.f32 %v1358_v47, %v643_v18  ;;  %v582_v25 = vpop.f32.mrb[18].mxu0  ;;  %v646_v26 = vpop.f32.mrb[18].mxu1 }
 0x124   : > { %920 = vst.msk [vmem:[%s1377_s23 + $0x1c] sm:$0xf] %vm912_vm3, %v1113_v19  ;;  %936 = vst.msk [vmem:[%s1377_s23 + $0x5c] sm:$0xf] %vm912_vm3, %v1129_v20  ;;  %v728_v27 = vadd.f32 %v1363_v49, %v689_v21  ;;  %v690_v29 = vmul.f32 %v1358_v47, %v582_v25  ;;  %v706_v30 = vmul.f32 %v1358_v47, %v646_v26  ;;  %v584_v31 = vpop.f32.mrb[19].mxu0  ;;  %v648_v32 = vpop.f32.mrb[19].mxu1 }
 0x125   : > { %v744_v28 = vadd.f32 %v1363_v49, %v705_v22 }
 0x126   : > { %v760_v33 = vmax.f32 %v728_v27, 0.0  ;;  %v729_v35 = vadd.f32 %v1363_v49, %v690_v29  ;;  %v745_v36 = vadd.f32 %v1363_v49, %v706_v30 }
 0x127   : > { %v776_v34 = vmax.f32 %v744_v28, 0.0 }
 0x128   : > { %v1114_v37 = vpack.c.bf16 %v760_v33, %v760_v33  ;;  %v761_v39 = vmax.f32 %v729_v35, 0.0  ;;  %v777_v40 = vmax.f32 %v745_v36, 0.0 }
 0x129   : > { %v1130_v38 = vpack.c.bf16 %v776_v34, %v776_v34  ;;  %v587_v41 = vpop.f32.mrb[20].mxu0  ;;  %v651_v42 = vpop.f32.mrb[20].mxu1 }
 0x12a   : > { %921 = vst.msk [vmem:[%s1377_s23 + $0x20] sm:$0xf] %vm912_vm3, %v1114_v37  ;;  %v1115_v43 = vpack.c.bf16 %v761_v39, %v761_v39  ;;  %v1131_v44 = vpack.c.bf16 %v777_v40, %v777_v40  ;;  %v691_v45 = vmul.f32 %v1358_v47, %v587_v41  ;;  %v707_v46 = vmul.f32 %v1358_v47, %v651_v42  ;;  %v589_v48 = vpop.f32.mrb[21].mxu0  ;;  %v653_v50 = vpop.f32.mrb[21].mxu1 }
 0x12b   : > { %937 = vst.msk [vmem:[%s1377_s23 + $0x60] sm:$0xf] %vm912_vm3, %v1130_v38  ;;  %v590_v51 = vpop.f32.mrb[22].mxu0  ;;  %v654_v52 = vpop.f32.mrb[22].mxu1 }
 0x12c   : > { %922 = vst.msk [vmem:[%s1377_s23 + $0x24] sm:$0xf] %vm912_vm3, %v1115_v43  ;;  %938 = vst.msk [vmem:[%s1377_s23 + $0x64] sm:$0xf] %vm912_vm3, %v1131_v44  ;;  %v730_v53 = vadd.f32 %v1363_v49, %v691_v45  ;;  %v746_v54 = vadd.f32 %v1363_v49, %v707_v46  ;;  %v692_v55 = vmul.f32 %v1358_v47, %v590_v51  ;;  %v592_v57 = vpop.f32.mrb[23].mxu0  ;;  %v656_v58 = vpop.f32.mrb[23].mxu1 }
 0x12d   : > { %v708_v56 = vmul.f32 %v1358_v47, %v654_v52 }
 0x12e   : > { %v762_v59 = vmax.f32 %v730_v53, 0.0  ;;  %v778_v60 = vmax.f32 %v746_v54, 0.0  ;;  %v731_v61 = vadd.f32 %v1363_v49, %v692_v55 }
 0x12f   : > { %v747_v62 = vadd.f32 %v1363_v49, %v708_v56 }
 0x130   : > { %v1116_v63 = vpack.c.bf16 %v762_v59, %v762_v59  ;;  %v1132_v0 = vpack.c.bf16 %v778_v60, %v778_v60  ;;  %v763_v1 = vmax.f32 %v731_v61, 0.0 }
 0x131   : > { %v779_v2 = vmax.f32 %v747_v62, 0.0  ;;  %v595_v3 = vpop.f32.mrb[24].mxu0  ;;  %v659_v4 = vpop.f32.mrb[24].mxu1 }
 0x132   : > { %923 = vst.msk [vmem:[%s1377_s23 + $0x28] sm:$0xf] %vm912_vm3, %v1116_v63  ;;  %939 = vst.msk [vmem:[%s1377_s23 + $0x68] sm:$0xf] %vm912_vm3, %v1132_v0  ;;  %v1117_v5 = vpack.c.bf16 %v763_v1, %v763_v1  ;;  %v693_v7 = vmul.f32 %v1358_v47, %v595_v3  ;;  %v709_v8 = vmul.f32 %v1358_v47, %v659_v4  ;;  %v597_v9 = vpop.f32.mrb[25].mxu0  ;;  %v661_v10 = vpop.f32.mrb[25].mxu1 }
 0x133   : > { %v1133_v6 = vpack.c.bf16 %v779_v2, %v779_v2  ;;  %v598_v11 = vpop.f32.mrb[26].mxu0  ;;  %v662_v12 = vpop.f32.mrb[26].mxu1 }
 0x134   : > { %924 = vst.msk [vmem:[%s1377_s23 + $0x2c] sm:$0xf] %vm912_vm3, %v1117_v5  ;;  %v732_v13 = vadd.f32 %v1363_v49, %v693_v7  ;;  %v748_v14 = vadd.f32 %v1363_v49, %v709_v8  ;;  %v694_v15 = vmul.f32 %v1358_v47, %v598_v11  ;;  %v710_v16 = vmul.f32 %v1358_v47, %v662_v12  ;;  %v600_v17 = vpop.f32.mrb[27].mxu0  ;;  %v664_v18 = vpop.f32.mrb[27].mxu1 }
 0x135   : > { %940 = vst.msk [vmem:[%s1377_s23 + $0x6c] sm:$0xf] %vm912_vm3, %v1133_v6 }
 0x136   : > { %v764_v19 = vmax.f32 %v732_v13, 0.0  ;;  %v780_v20 = vmax.f32 %v748_v14, 0.0  ;;  %v733_v21 = vadd.f32 %v1363_v49, %v694_v15  ;;  %v749_v22 = vadd.f32 %v1363_v49, %v710_v16 }
 0x138   : > { %v1118_v23 = vpack.c.bf16 %v764_v19, %v764_v19  ;;  %v1134_v24 = vpack.c.bf16 %v780_v20, %v780_v20  ;;  %v765_v25 = vmax.f32 %v733_v21, 0.0  ;;  %v781_v26 = vmax.f32 %v749_v22, 0.0 }
 0x139   : > { %v603_v27 = vpop.f32.mrb[28].mxu0  ;;  %v667_v28 = vpop.f32.mrb[28].mxu1 }
 0x13a   : > { %925 = vst.msk [vmem:[%s1377_s23 + $0x30] sm:$0xf] %vm912_vm3, %v1118_v23  ;;  %941 = vst.msk [vmem:[%s1377_s23 + $0x70] sm:$0xf] %vm912_vm3, %v1134_v24  ;;  %v1119_v29 = vpack.c.bf16 %v765_v25, %v765_v25  ;;  %v1135_v30 = vpack.c.bf16 %v781_v26, %v781_v26  ;;  %v695_v31 = vmul.f32 %v1358_v47, %v603_v27  ;;  %v605_v33 = vpop.f32.mrb[29].mxu0  ;;  %v669_v34 = vpop.f32.mrb[29].mxu1 }
 0x13b   : > { %v711_v32 = vmul.f32 %v1358_v47, %v667_v28  ;;  %v606_v35 = vpop.f32.mrb[30].mxu0  ;;  %v670_v36 = vpop.f32.mrb[30].mxu1 }
 0x13c   : > { %926 = vst.msk [vmem:[%s1377_s23 + $0x34] sm:$0xf] %vm912_vm3, %v1119_v29  ;;  %942 = vst.msk [vmem:[%s1377_s23 + $0x74] sm:$0xf] %vm912_vm3, %v1135_v30  ;;  %v734_v37 = vadd.f32 %v1363_v49, %v695_v31  ;;  %v696_v39 = vmul.f32 %v1358_v47, %v606_v35  ;;  %v712_v40 = vmul.f32 %v1358_v47, %v670_v36  ;;  %v608_v41 = vpop.f32.mrb[31].mxu0  ;;  %v672_v42 = vpop.f32.mrb[31].mxu1 }
 0x13d   : > { %v750_v38 = vadd.f32 %v1363_v49, %v711_v32 }
 0x13e   : > { %v766_v43 = vmax.f32 %v734_v37, 0.0  ;;  %v735_v45 = vadd.f32 %v1363_v49, %v696_v39  ;;  %v751_v46 = vadd.f32 %v1363_v49, %v712_v40 }
 0x13f   : > { %v782_v44 = vmax.f32 %v750_v38, 0.0 }
 0x140   : > { %v1120_v48 = vpack.c.bf16 %v766_v43, %v766_v43  ;;  %v767_v51 = vmax.f32 %v735_v45, 0.0  ;;  %v783_v52 = vmax.f32 %v751_v46, 0.0 }
 0x141   : > { %v1136_v50 = vpack.c.bf16 %v782_v44, %v782_v44 }
 0x142   : > { %927 = vst.msk [vmem:[%s1377_s23 + $0x38] sm:$0xf] %vm912_vm3, %v1120_v48  ;;  %v1121_v53 = vpack.c.bf16 %v767_v51, %v767_v51  ;;  %v1137_v54 = vpack.c.bf16 %v783_v52, %v783_v52 }
 0x143   : > { %943 = vst.msk [vmem:[%s1377_s23 + $0x78] sm:$0xf] %vm912_vm3, %v1136_v50 }
 0x144   : > { %928 = vst.msk [vmem:[%s1377_s23 + $0x3c] sm:$0xf] %vm912_vm3, %v1121_v53  ;;  %944 = vst.msk [vmem:[%s1377_s23 + $0x7c] sm:$0xf] %vm912_vm3, %v1137_v54 }
 0x145 PF: > { %s14_s15 = sadd.s32 1, %s1232_s15  }
 0x146   : > { %p11_p4 = scmp.ge.s32.totalorder %s14_s15, 4  }
 0x148   :  { %13 = sbr.rel (!%p11_p4) target bundleno = 1 (0x1), region = 66 }

// kernel: _lambda_.59
= control target key start
LH: loop header
LB: loop body
LE: loop exit
PB: predicated region body
PF: predicated region fallthrough
CT: control target
= control target key end

     0   :  { %vm100_vm0 = vcmask 1043456   ;;  %vm75_vm1 = vcmask 64512   ;;  %vm327_vm2 = vcmask 60416   ;;  %s603_s1 = inlined_call_operand.vmem [shape: bf16[8,8], index: 1, kind: input, shape index: {}]   ;;  %s604_s0 = inlined_call_operand.vmem [shape: bf16[128,8], index: 0, kind: input, shape index: {}]   ;;  %s605_s2 = inlined_call_operand.vmem [shape: f32[1,8], index: 2, kind: input, shape index: {}]   ;;  %s606_s3 = inlined_call_operand.vmem [shape: f32[1,8], index: 3, kind: input, shape index: {}]   ;;  %s607_s4 = inlined_call_operand.vmem [shape: bf16[128,8], index: 4, kind: output, shape index: {}]  }
   0x1   :  { %v34_v0 = vld [vmem:[%s603_s1] sm:$0xf]  ;;  %v431_v4 = vld [vmem:[%s604_s0 + $0x8] sm:$0xff]   ;;  %v433_v6 = vld [vmem:[%s604_s0 + $0x10] sm:$0xff]  }
   0x2   :  { %427 = vmatprep.subr.msk.bf16.mxu0 %vm100_vm0, %v34_v0  ;;  %428 = vmatprep.subr.msk.bf16.mxu1 %vm100_vm0, %v34_v0  ;;  %v102_v1 = vsel %vm100_vm0, %v34_v0, 0  ;;  %v429_v2 = vld [vmem:[%s604_s0] sm:$0xff]   ;;  %v432_v5 = vld [vmem:[%s604_s0 + $0x28] sm:$0xff]   ;;  %v434_v7 = vld [vmem:[%s604_s0 + $0x30] sm:$0xff]  }
   0x3   :  { %408 = vmatpush3.bf16.msra.mxu0 %v102_v1  ;;  %426 = vmatpush3.bf16.msra.mxu1 %v102_v1  ;;  %v430_v3 = vld [vmem:[%s604_s0 + $0x20] sm:$0xff]   ;;  %v435_v8 = vld [vmem:[%s604_s0 + $0x18] sm:$0xff]  }
   0x4   :  { %409 = vmatprep.mubr.msk.bf16.mxu0 %vm75_vm1, %v429_v2  ;;  %417 = vmatprep.mubr.msk.bf16.mxu1 %vm75_vm1, %v430_v3  ;;  %v436_v9 = vld [vmem:[%s604_s0 + $0x38] sm:$0xff]   ;;  %v500_v10 = vld [vmem:[%s605_s2] ss:$0 sm:$0xff] }
   0x5   :  { %v505_v12 = vld [vmem:[%s606_s3] ss:$0 sm:$0xff] }
   0x6   :  { %410 = vmatmul.mubr.msk.bf16.vlgmr.msra.gmra.mrb[0].mxu0 %vm75_vm1, %v431_v4  ;;  %418 = vmatmul.mubr.msk.bf16.vlgmr.msra.gmra.mrb[0].mxu1 %vm75_vm1, %v432_v5 }
   0x7   :  { %413 = vmatprep.mubr.msk.bf16.mxu0 %vm75_vm1, %v433_v6  ;;  %421 = vmatprep.mubr.msk.bf16.mxu1 %vm75_vm1, %v434_v7 }
   0xe   :  { %414 = vmatmul.mubr.msk.bf16.gmra.mrb[4].mxu0 %vm75_vm1, %v435_v8  ;;  %422 = vmatmul.mubr.msk.bf16.gmra.mrb[4].mxu1 %vm75_vm1, %v436_v9 }
  0xd9   :  { %v411_v11 = vpop.f32.mrb[0].mxu0  ;;  %v419_v14 = vpop.f32.mrb[0].mxu1 }
  0xda   :  { %v210_v13 = vmul.f32 %v411_v11, %v500_v10  ;;  %v138_v15 = vpop.f32.mrb[1].mxu0  ;;  %v218_v16 = vmul.f32 %v419_v14, %v500_v10  ;;  %v170_v18 = vpop.f32.mrb[1].mxu1 }
  0xdb   :  { %v208_v17 = vmul.f32 %v500_v10, %v138_v15  ;;  %v412_v19 = vpop.f32.mrb[2].mxu0  ;;  %v216_v21 = vmul.f32 %v500_v10, %v170_v18  ;;  %v420_v23 = vpop.f32.mrb[2].mxu1 }
  0xdc   :  { %v233_v20 = vadd.f32 %v505_v12, %v210_v13  ;;  %v211_v22 = vmul.f32 %v412_v19, %v500_v10  ;;  %v141_v24 = vpop.f32.mrb[3].mxu0  ;;  %v241_v25 = vadd.f32 %v505_v12, %v218_v16  ;;  %v219_v27 = vmul.f32 %v420_v23, %v500_v10  ;;  %v173_v29 = vpop.f32.mrb[3].mxu1 }
  0xdd   :  { %v231_v26 = vadd.f32 %v505_v12, %v208_v17  ;;  %v209_v28 = vmul.f32 %v500_v10, %v141_v24  ;;  %v239_v31 = vadd.f32 %v505_v12, %v216_v21  ;;  %v217_v33 = vmul.f32 %v500_v10, %v173_v29 }
  0xde   :  { %v249_v30 = vmax.f32 %v233_v20, 0.0  ;;  %v234_v32 = vadd.f32 %v505_v12, %v211_v22  ;;  %v257_v34 = vmax.f32 %v241_v25, 0.0  ;;  %v242_v36 = vadd.f32 %v505_v12, %v219_v27 }
  0xdf   :  { %v247_v35 = vmax.f32 %v231_v26, 0.0  ;;  %v232_v37 = vadd.f32 %v505_v12, %v209_v28  ;;  %v255_v39 = vmax.f32 %v239_v31, 0.0  ;;  %v240_v41 = vadd.f32 %v505_v12, %v217_v33 }
  0xe0   :  { %v384_v38 = vpack.c.bf16 %v249_v30, %v249_v30  ;;  %v250_v40 = vmax.f32 %v234_v32, 0.0  ;;  %v392_v42 = vpack.c.bf16 %v257_v34, %v257_v34  ;;  %v258_v44 = vmax.f32 %v242_v36, 0.0 }
  0xe1   :  { %v382_v43 = vpack.c.bf16 %v247_v35, %v247_v35  ;;  %v248_v45 = vmax.f32 %v232_v37, 0.0  ;;  %v415_v46 = vpop.f32.mrb[4].mxu0  ;;  %v390_v47 = vpack.c.bf16 %v255_v39, %v255_v39  ;;  %v256_v49 = vmax.f32 %v240_v41, 0.0  ;;  %v423_v51 = vpop.f32.mrb[4].mxu1 }
  0xe2   :  { %330 = vst.msk [vmem:[%s607_s4 + $0x8] sm:$0xf] %vm327_vm2, %v384_v38  ;;  %v385_v48 = vpack.c.bf16 %v250_v40, %v250_v40  ;;  %v214_v50 = vmul.f32 %v415_v46, %v500_v10  ;;  %v154_v52 = vpop.f32.mrb[5].mxu0  ;;  %338 = vst.msk [vmem:[%s607_s4 + $0x28] sm:$0xf] %vm327_vm2, %v392_v42  ;;  %v393_v53 = vpack.c.bf16 %v258_v44, %v258_v44  ;;  %v186_v57 = vpop.f32.mrb[5].mxu1 }
  0xe3   :  { %328 = vst.msk [vmem:[%s607_s4] sm:$0xf] %vm327_vm2, %v382_v43  ;;  %v383_v54 = vpack.c.bf16 %v248_v45, %v248_v45  ;;  %v222_v55 = vmul.f32 %v423_v51, %v500_v10  ;;  %v212_v56 = vmul.f32 %v500_v10, %v154_v52  ;;  %v416_v58 = vpop.f32.mrb[6].mxu0  ;;  %336 = vst.msk [vmem:[%s607_s4 + $0x20] sm:$0xf] %vm327_vm2, %v390_v47  ;;  %v424_v63 = vpop.f32.mrb[6].mxu1 }
  0xe4   :  { %331 = vst.msk [vmem:[%s607_s4 + $0xc] sm:$0xf] %vm327_vm2, %v385_v48  ;;  %v391_v59 = vpack.c.bf16 %v256_v49, %v256_v49  ;;  %v237_v60 = vadd.f32 %v505_v12, %v214_v50  ;;  %v220_v61 = vmul.f32 %v500_v10, %v186_v57  ;;  %v215_v62 = vmul.f32 %v416_v58, %v500_v10  ;;  %v157_v0 = vpop.f32.mrb[7].mxu0  ;;  %v189_v5 = vpop.f32.mrb[7].mxu1 }
  0xe5   :  { %339 = vst.msk [vmem:[%s607_s4 + $0x2c] sm:$0xf] %vm327_vm2, %v393_v53  ;;  %329 = vst.msk [vmem:[%s607_s4 + $0x4] sm:$0xf] %vm327_vm2, %v383_v54  ;;  %v245_v1 = vadd.f32 %v505_v12, %v222_v55  ;;  %v235_v2 = vadd.f32 %v505_v12, %v212_v56  ;;  %v223_v3 = vmul.f32 %v424_v63, %v500_v10 }
  0xe6   :  { %v213_v4 = vmul.f32 %v500_v10, %v157_v0  ;;  %337 = vst.msk [vmem:[%s607_s4 + $0x24] sm:$0xf] %vm327_vm2, %v391_v59  ;;  %v253_v6 = vmax.f32 %v237_v60, 0.0  ;;  %v243_v7 = vadd.f32 %v505_v12, %v220_v61  ;;  %v238_v8 = vadd.f32 %v505_v12, %v215_v62 }
  0xe7   :  { %v221_v9 = vmul.f32 %v500_v10, %v189_v5  ;;  %v261_v11 = vmax.f32 %v245_v1, 0.0  ;;  %v251_v13 = vmax.f32 %v235_v2, 0.0  ;;  %v246_v14 = vadd.f32 %v505_v12, %v223_v3 }
  0xe8   :  { %v236_v15 = vadd.f32 %v505_v12, %v213_v4  ;;  %v388_v16 = vpack.c.bf16 %v253_v6, %v253_v6  ;;  %v259_v17 = vmax.f32 %v243_v7, 0.0  ;;  %v254_v18 = vmax.f32 %v238_v8, 0.0 }
  0xe9   :  { %v244_v19 = vadd.f32 %v505_v12, %v221_v9  ;;  %v396_v20 = vpack.c.bf16 %v261_v11, %v261_v11  ;;  %v386_v21 = vpack.c.bf16 %v251_v13, %v251_v13  ;;  %v262_v22 = vmax.f32 %v246_v14, 0.0 }
  0xea   :  { %v252_v23 = vmax.f32 %v236_v15, 0.0  ;;  %334 = vst.msk [vmem:[%s607_s4 + $0x18] sm:$0xf] %vm327_vm2, %v388_v16  ;;  %v394_v10 = vpack.c.bf16 %v259_v17, %v259_v17  ;;  %v389_v24 = vpack.c.bf16 %v254_v18, %v254_v18 }
  0xeb   :  { %v260_v25 = vmax.f32 %v244_v19, 0.0  ;;  %342 = vst.msk [vmem:[%s607_s4 + $0x38] sm:$0xf] %vm327_vm2, %v396_v20  ;;  %332 = vst.msk [vmem:[%s607_s4 + $0x10] sm:$0xf] %vm327_vm2, %v386_v21  ;;  %v397_v12 = vpack.c.bf16 %v262_v22, %v262_v22 }
  0xec   :  { %v387_v26 = vpack.c.bf16 %v252_v23, %v252_v23  ;;  %340 = vst.msk [vmem:[%s607_s4 + $0x30] sm:$0xf] %vm327_vm2, %v394_v10  ;;  %335 = vst.msk [vmem:[%s607_s4 + $0x1c] sm:$0xf] %vm327_vm2, %v389_v24 }
  0xed   :  { %v395_v27 = vpack.c.bf16 %v260_v25, %v260_v25  ;;  %343 = vst.msk [vmem:[%s607_s4 + $0x3c] sm:$0xf] %vm327_vm2, %v397_v12 }
  0xee   :  { %333 = vst.msk [vmem:[%s607_s4 + $0x14] sm:$0xf] %vm327_vm2, %v387_v26 }
  0xef   :  { %341 = vst.msk [vmem:[%s607_s4 + $0x34] sm:$0xf] %vm327_vm2, %v395_v27 }

// kernel: _lambda_.58
= control target key start
LH: loop header
LB: loop body
LE: loop exit
PB: predicated region body
PF: predicated region fallthrough
CT: control target
= control target key end

     0   :  { %vm1033_vm0 = vcmask 61440   ;;  %vm1034_vm1 = vsmask.f32 4352  ;;  %vm2956_vm3 = vcmask 1041409   ;;  %vm2958_vm4 = vcmask 1042434   ;;  %s5658_s0 = inlined_call_operand.vmem [shape: bf16[128,9,8], index: 0, kind: input, shape index: {}]   ;;  %s5659_s1 = inlined_call_operand.vmem [shape: bf16[128,8], index: 1, kind: output, shape index: {}]  }
   0x1   :  { %v3384_v0 = vld [vmem:[%s5658_s0] sm:$0x1f]   ;;  %v3385_v1 = vld [vmem:[%s5658_s0 + $0x8] sm:$0x1f]   ;;  %v3386_v2 = vld [vmem:[%s5658_s0 + $0x10] sm:$0x1f]  }
   0x2   :  { %v3387_v3 = vld [vmem:[%s5658_s0 + $0x18] sm:$0x1f]   ;;  %v3388_v4 = vld [vmem:[%s5658_s0 + $0x20] sm:$0x1f]   ;;  %v3389_v5 = vld [vmem:[%s5658_s0 + $0x28] sm:$0x1f]  }
   0x3   :  { %vm3540_vm2 = vmand %vm1033_vm0, %vm1034_vm1  ;;  %v3390_v14 = vld [vmem:[%s5658_s0 + $0x30] sm:$0x1f]   ;;  %v3391_v27 = vld [vmem:[%s5658_s0 + $0x38] sm:$0x1f]   ;;  %vm2960_vm5 = vcmask 1043459   ;;  %vm2962_vm6 = vcmask 1044484  }
   0x4   :  { %v1036_v7 = vsel %vm3540_vm2, %v3384_v0, 4286644096  ;;  %v1047_v8 = vsel %vm3540_vm2, %v3385_v1, 4286644096  ;;  %v1058_v9 = vsel %vm3540_vm2, %v3386_v2, 4286644096 }
   0x5   :  { %v1037_v10 = vunpack.i.l.bf16 %v1036_v7  ;;  %v1038_v11 = vunpack.i.h.bf16 %v1036_v7  ;;  %v1048_v12 = vunpack.i.l.bf16 %v1047_v8  ;;  %v1049_v13 = vunpack.i.h.bf16 %v1047_v8 }
   0x6   :  { %v1059_v15 = vunpack.i.l.bf16 %v1058_v9  ;;  %v1060_v16 = vunpack.i.h.bf16 %v1058_v9  ;;  %v1069_v17 = vsel %vm3540_vm2, %v3387_v3, 4286644096  ;;  %v1080_v18 = vsel %vm3540_vm2, %v3388_v4, 4286644096  ;;  %v3392_v4 = vld [vmem:[%s5658_s0 + $0x40] sm:$0x1f]  }
   0x7   :  { %v1039_v19 = vmax.f32 %v1037_v10, %v1038_v11  ;;  %v1050_v20 = vmax.f32 %v1048_v12, %v1049_v13  ;;  %v1070_v21 = vunpack.i.l.bf16 %v1069_v17  ;;  %v1071_v22 = vunpack.i.h.bf16 %v1069_v17 }
   0x8   :  { %v1061_v23 = vmax.f32 %v1059_v15, %v1060_v16  ;;  %v1081_v24 = vunpack.i.l.bf16 %v1080_v18  ;;  %v1082_v25 = vunpack.i.h.bf16 %v1080_v18  ;;  %v1091_v26 = vsel %vm3540_vm2, %v3389_v5, 4286644096  ;;  %v3393_v5 = vld [vmem:[%s5658_s0 + $0x48] sm:$0x1f]  }
   0x9   :  { %v1040_v28 = vrot.slane %v1039_v19, 4  ;;  %v1051_v29 = vrot.slane %v1050_v20, 4  ;;  %v1072_v30 = vmax.f32 %v1070_v21, %v1071_v22  ;;  %v1092_v31 = vunpack.i.l.bf16 %v1091_v26 }
   0xa   :  { %v1062_v32 = vrot.slane %v1061_v23, 4  ;;  %v1083_v33 = vmax.f32 %v1081_v24, %v1082_v25  ;;  %v1093_v34 = vunpack.i.h.bf16 %v1091_v26  ;;  %v1102_v35 = vsel %vm3540_vm2, %v3390_v14, 4286644096 }
   0xb   :  { %v1041_v36 = vmax.f32 %v1039_v19, %v1040_v28  ;;  %v1052_v37 = vmax.f32 %v1050_v20, %v1051_v29  ;;  %v1073_v38 = vrot.slane %v1072_v30, 4  ;;  %v1103_v39 = vunpack.i.l.bf16 %v1102_v35  ;;  %v3394_v19 = vld [vmem:[%s5658_s0 + $0x50] sm:$0x1f]   ;;  %v3395_v20 = vld [vmem:[%s5658_s0 + $0x58] sm:$0x1f]  }
   0xc   :  { %v1063_v40 = vmax.f32 %v1061_v23, %v1062_v32  ;;  %v1084_v41 = vrot.slane %v1083_v33, 4  ;;  %v1094_v42 = vmax.f32 %v1092_v31, %v1093_v34  ;;  %v1104_v43 = vunpack.i.h.bf16 %v1102_v35 }
   0xd   :  { %v1042_v44 = vrot.slane %v1041_v36, 2  ;;  %v1053_v45 = vrot.slane %v1052_v37, 2  ;;  %v1074_v46 = vmax.f32 %v1072_v30, %v1073_v38  ;;  %v1113_v47 = vsel %vm3540_vm2, %v3391_v27, 4286644096 }
   0xe   :  { %v1064_v48 = vrot.slane %v1063_v40, 2  ;;  %v1085_v49 = vmax.f32 %v1083_v33, %v1084_v41  ;;  %v1095_v50 = vrot.slane %v1094_v42, 4  ;;  %v1105_v51 = vmax.f32 %v1103_v39, %v1104_v43  ;;  %v3396_v33 = vld [vmem:[%s5658_s0 + $0x60] sm:$0x1f]  }
   0xf   :  { %v1043_v52 = vmax.f32 %v1041_v36, %v1042_v44  ;;  %v1054_v53 = vmax.f32 %v1052_v37, %v1053_v45  ;;  %v1075_v54 = vrot.slane %v1074_v46, 2  ;;  %v1114_v55 = vunpack.i.l.bf16 %v1113_v47 }
  0x10   :  { %v1065_v56 = vmax.f32 %v1063_v40, %v1064_v48  ;;  %v1086_v57 = vrot.slane %v1085_v49, 2  ;;  %v1096_v58 = vmax.f32 %v1094_v42, %v1095_v50  ;;  %v1106_v59 = vrot.slane %v1105_v51, 4  ;;  %v3397_v42 = vld [vmem:[%s5658_s0 + $0x68] sm:$0x1f]  }
  0x11   :  { %v1044_v60 = vrot.slane %v1043_v52, 1  ;;  %v1055_v61 = vrot.slane %v1054_v53, 1  ;;  %v1076_v62 = vmax.f32 %v1074_v46, %v1075_v54  ;;  %v1115_v63 = vunpack.i.h.bf16 %v1113_v47 }
  0x12   :  { %v1066_v0 = vrot.slane %v1065_v56, 1  ;;  %v1087_v1 = vmax.f32 %v1085_v49, %v1086_v57  ;;  %v1097_v2 = vrot.slane %v1096_v58, 2  ;;  %v1107_v3 = vmax.f32 %v1105_v51, %v1106_v59 }
  0x13   :  { %v1045_v7 = vmax.f32 %v1043_v52, %v1044_v60  ;;  %v1056_v8 = vmax.f32 %v1054_v53, %v1055_v61  ;;  %v1077_v9 = vrot.slane %v1076_v62, 1  ;;  %v1116_v10 = vmax.f32 %v1114_v55, %v1115_v63  ;;  %v3398_v55 = vld [vmem:[%s5658_s0 + $0x70] sm:$0x1f]  }
  0x14   :  { %v1067_v11 = vmax.f32 %v1065_v56, %v1066_v0  ;;  %v1088_v12 = vrot.slane %v1087_v1, 1  ;;  %v1098_v13 = vmax.f32 %v1096_v58, %v1097_v2  ;;  %v1108_v14 = vrot.slane %v1107_v3, 2 }
  0x15   :  { %v3572_v15 = vpack.i.bf16 %v1045_v7, %v1045_v7  ;;  %v3574_v16 = vpack.i.bf16 %v1056_v8, %v1056_v8  ;;  %v1078_v17 = vmax.f32 %v1076_v62, %v1077_v9  ;;  %v1117_v18 = vrot.slane %v1116_v10, 4 }
  0x16   :  { %v3582_v21 = vpack.i.bf16 %v1067_v11, %v1067_v11  ;;  %v1089_v22 = vmax.f32 %v1087_v1, %v1088_v12  ;;  %v1099_v23 = vrot.slane %v1098_v13, 1  ;;  %v1109_v24 = vmax.f32 %v1107_v3, %v1108_v14 }
  0x17   :  { %v3584_v25 = vpack.i.bf16 %v1078_v17, %v1078_v17  ;;  %v1118_v26 = vmax.f32 %v1116_v10, %v1117_v18  ;;  %v1124_v27 = vsel %vm3540_vm2, %v3392_v4, 4286644096  ;;  %v1135_v28 = vsel %vm3540_vm2, %v3393_v5, 4286644096  ;;  %v3399_v4 = vld [vmem:[%s5658_s0 + $0x78] sm:$0x1f]  }
  0x18   :  { %v3590_v29 = vpack.i.bf16 %v1089_v22, %v1089_v22  ;;  %v1100_v30 = vmax.f32 %v1098_v13, %v1099_v23  ;;  %v1110_v31 = vrot.slane %v1109_v24, 1  ;;  %v1125_v32 = vunpack.i.l.bf16 %v1124_v27 }
  0x19   :  { %v1119_v34 = vrot.slane %v1118_v26, 2  ;;  %v1126_v35 = vunpack.i.h.bf16 %v1124_v27  ;;  %v1136_v36 = vunpack.i.l.bf16 %v1135_v28  ;;  %v1137_v37 = vunpack.i.h.bf16 %v1135_v28 }
  0x1a   :  { %v3595_v38 = vpack.i.bf16 %v1100_v30, %v1100_v30  ;;  %v1111_v39 = vmax.f32 %v1109_v24, %v1110_v31  ;;  %v1146_v40 = vsel %vm3540_vm2, %v3394_v19, 4286644096  ;;  %v1157_v41 = vsel %vm3540_vm2, %v3395_v20, 4286644096 }
  0x1b   :  { %v1120_v43 = vmax.f32 %v1118_v26, %v1119_v34  ;;  %v1127_v44 = vmax.f32 %v1125_v32, %v1126_v35  ;;  %v1138_v45 = vmax.f32 %v1136_v36, %v1137_v37  ;;  %v1147_v46 = vunpack.i.l.bf16 %v1146_v40  ;;  %v3400_v35 = vld [vmem:[%s5658_s0 + $0x80] sm:$0x1f]   ;;  %v3401_v36 = vld [vmem:[%s5658_s0 + $0x88] sm:$0x1f]  }
  0x1c   :  { %v3604_v47 = vpack.i.bf16 %v1111_v39, %v1111_v39  ;;  %v1148_v48 = vunpack.i.h.bf16 %v1146_v40  ;;  %v1158_v49 = vunpack.i.l.bf16 %v1157_v41  ;;  %v1159_v50 = vunpack.i.h.bf16 %v1157_v41 }
  0x1d   :  { %v1121_v51 = vrot.slane %v1120_v43, 1  ;;  %v1128_v52 = vrot.slane %v1127_v44, 4  ;;  %v1139_v53 = vrot.slane %v1138_v45, 4  ;;  %v1168_v54 = vsel %vm3540_vm2, %v3396_v33, 4286644096 }
  0x1e   :  { %v1149_v56 = vmax.f32 %v1147_v46, %v1148_v48  ;;  %v1160_v57 = vmax.f32 %v1158_v49, %v1159_v50  ;;  %v1169_v58 = vunpack.i.l.bf16 %v1168_v54  ;;  %v1170_v59 = vunpack.i.h.bf16 %v1168_v54 }
  0x1f   :  { %v1122_v60 = vmax.f32 %v1120_v43, %v1121_v51  ;;  %v1129_v61 = vmax.f32 %v1127_v44, %v1128_v52  ;;  %v1140_v62 = vmax.f32 %v1138_v45, %v1139_v53  ;;  %v1179_v63 = vsel %vm3540_vm2, %v3397_v42, 4286644096 }
  0x20   :  { %v1150_v0 = vrot.slane %v1149_v56, 4  ;;  %v1161_v1 = vrot.slane %v1160_v57, 4  ;;  %v1171_v2 = vmax.f32 %v1169_v58, %v1170_v59  ;;  %v1180_v3 = vunpack.i.l.bf16 %v1179_v63 }
  0x21   :  { %v3616_v5 = vpack.i.bf16 %v1122_v60, %v1122_v60  ;;  %v1130_v7 = vrot.slane %v1129_v61, 2  ;;  %v1141_v8 = vrot.slane %v1140_v62, 2  ;;  %v1181_v9 = vunpack.i.h.bf16 %v1179_v63 }
  0x22   :  { %v1151_v10 = vmax.f32 %v1149_v56, %v1150_v0  ;;  %v1162_v11 = vmax.f32 %v1160_v57, %v1161_v1  ;;  %v1172_v12 = vrot.slane %v1171_v2, 4  ;;  %v1190_v13 = vsel %vm3540_vm2, %v3398_v55, 4286644096  ;;  %v3402_v55 = vld [vmem:[%s5658_s0 + $0x90] sm:$0x1f]  }
  0x23   :  { %v1131_v14 = vmax.f32 %v1129_v61, %v1130_v7  ;;  %v1142_v17 = vmax.f32 %v1140_v62, %v1141_v8  ;;  %v1182_v18 = vmax.f32 %v1180_v3, %v1181_v9  ;;  %v1191_v19 = vunpack.i.l.bf16 %v1190_v13  ;;  %v3403_v0 = vld [vmem:[%s5658_s0 + $0x98] sm:$0x1f]  }
  0x24   :  { %v1152_v20 = vrot.slane %v1151_v10, 2  ;;  %v1163_v22 = vrot.slane %v1162_v11, 2  ;;  %v1173_v23 = vmax.f32 %v1171_v2, %v1172_v12  ;;  %v1192_v24 = vunpack.i.h.bf16 %v1190_v13 }
  0x25   :  { %v1132_v26 = vrot.slane %v1131_v14, 1  ;;  %v1143_v27 = vrot.slane %v1142_v17, 1  ;;  %v1183_v28 = vrot.slane %v1182_v18, 4  ;;  %v1201_v30 = vsel %vm3540_vm2, %v3399_v4, 4286644096 }
  0x26   :  { %v1153_v31 = vmax.f32 %v1151_v10, %v1152_v20  ;;  %v1164_v32 = vmax.f32 %v1162_v11, %v1163_v22  ;;  %v1174_v33 = vrot.slane %v1173_v23, 2  ;;  %v1193_v34 = vmax.f32 %v1191_v19, %v1192_v24  ;;  %v3404_v11 = vld [vmem:[%s5658_s0 + $0xa0] sm:$0x1f]  }
  0x27   :  { %v1133_v37 = vmax.f32 %v1131_v14, %v1132_v26  ;;  %v1144_v39 = vmax.f32 %v1142_v17, %v1143_v27  ;;  %v1184_v40 = vmax.f32 %v1182_v18, %v1183_v28  ;;  %v1202_v41 = vunpack.i.l.bf16 %v1201_v30  ;;  %v3405_v28 = vld [vmem:[%s5658_s0 + $0xa8] sm:$0x1f]  }
  0x28   :  { %v1154_v42 = vrot.slane %v1153_v31, 1  ;;  %v1165_v43 = vrot.slane %v1164_v32, 1  ;;  %v1175_v44 = vmax.f32 %v1173_v23, %v1174_v33  ;;  %v1194_v45 = vrot.slane %v1193_v34, 4 }
  0x29   :  { %v3628_v46 = vpack.i.bf16 %v1133_v37, %v1133_v37  ;;  %v3630_v48 = vpack.i.bf16 %v1144_v39, %v1144_v39  ;;  %v1185_v49 = vrot.slane %v1184_v40, 2  ;;  %v1203_v50 = vunpack.i.h.bf16 %v1201_v30  ;;  %v3406_v30 = vld [vmem:[%s5658_s0 + $0xb0] sm:$0x1f]  }
  0x2a   :  { %v1155_v51 = vmax.f32 %v1153_v31, %v1154_v42  ;;  %v1166_v52 = vmax.f32 %v1164_v32, %v1165_v43  ;;  %v1176_v53 = vrot.slane %v1175_v44, 1  ;;  %v1195_v54 = vmax.f32 %v1193_v34, %v1194_v45 }
  0x2b   :  { %v1186_v56 = vmax.f32 %v1184_v40, %v1185_v49  ;;  %v1204_v57 = vmax.f32 %v1202_v41, %v1203_v50  ;;  %v1212_v58 = vsel %vm3540_vm2, %v3400_v35, 4286644096  ;;  %v1223_v59 = vsel %vm3540_vm2, %v3401_v36, 4286644096 }
  0x2c   :  { %v3639_v60 = vpack.i.bf16 %v1155_v51, %v1155_v51  ;;  %v3641_v61 = vpack.i.bf16 %v1166_v52, %v1166_v52  ;;  %v1177_v62 = vmax.f32 %v1175_v44, %v1176_v53  ;;  %v1196_v63 = vrot.slane %v1195_v54, 2 }
  0x2d   :  { %v1187_v1 = vrot.slane %v1186_v56, 1  ;;  %v1205_v2 = vrot.slane %v1204_v57, 4  ;;  %v1213_v3 = vunpack.i.l.bf16 %v1212_v58  ;;  %v1214_v4 = vunpack.i.h.bf16 %v1212_v58 }
  0x2e   :  { %v3646_v7 = vpack.i.bf16 %v1177_v62, %v1177_v62  ;;  %v1197_v8 = vmax.f32 %v1195_v54, %v1196_v63  ;;  %v1224_v9 = vunpack.i.l.bf16 %v1223_v59  ;;  %v1225_v10 = vunpack.i.h.bf16 %v1223_v59  ;;  %v3407_v59 = vld [vmem:[%s5658_s0 + $0xb8] sm:$0x1f]  }
  0x2f   :  { %v1188_v12 = vmax.f32 %v1186_v56, %v1187_v1  ;;  %v1206_v13 = vmax.f32 %v1204_v57, %v1205_v2  ;;  %v1215_v14 = vmax.f32 %v1213_v3, %v1214_v4  ;;  %v1234_v17 = vsel %vm3540_vm2, %v3402_v55, 4286644096 }
  0x30   :  { %v1198_v18 = vrot.slane %v1197_v8, 1  ;;  %v1226_v19 = vmax.f32 %v1224_v9, %v1225_v10  ;;  %v1235_v20 = vunpack.i.l.bf16 %v1234_v17  ;;  %v1236_v22 = vunpack.i.h.bf16 %v1234_v17 }
  0x31   :  { %v3653_v23 = vpack.i.bf16 %v1188_v12, %v1188_v12  ;;  %v1207_v24 = vrot.slane %v1206_v13, 2  ;;  %v1216_v26 = vrot.slane %v1215_v14, 4  ;;  %v1245_v27 = vsel %vm3540_vm2, %v3403_v0, 4286644096 }
  0x32   :  { %v1199_v31 = vmax.f32 %v1197_v8, %v1198_v18  ;;  %v1227_v32 = vrot.slane %v1226_v19, 4  ;;  %v1237_v33 = vmax.f32 %v1235_v20, %v1236_v22  ;;  %v1246_v34 = vunpack.i.l.bf16 %v1245_v27  ;;  %v3409_v20 = vld [vmem:[%s5658_s0 + $0xc8] sm:$0x1f]  }
  0x33   :  { %v1208_v35 = vmax.f32 %v1206_v13, %v1207_v24  ;;  %v1217_v36 = vmax.f32 %v1215_v14, %v1216_v26  ;;  %v1247_v37 = vunpack.i.h.bf16 %v1245_v27  ;;  %v1256_v39 = vsel %vm3540_vm2, %v3404_v11, 4286644096  ;;  %v3408_v13 = vld [vmem:[%s5658_s0 + $0xc0] sm:$0x1f]  }
  0x34   :  { %v3665_v40 = vpack.i.bf16 %v1199_v31, %v1199_v31  ;;  %v1228_v41 = vmax.f32 %v1226_v19, %v1227_v32  ;;  %v1238_v42 = vrot.slane %v1237_v33, 4  ;;  %v1257_v43 = vunpack.i.l.bf16 %v1256_v39 }
  0x35   :  { %v1209_v44 = vrot.slane %v1208_v35, 1  ;;  %v1218_v45 = vrot.slane %v1217_v36, 2  ;;  %v1248_v49 = vmax.f32 %v1246_v34, %v1247_v37  ;;  %v1258_v50 = vunpack.i.h.bf16 %v1256_v39  ;;  %v3410_v37 = vld [vmem:[%s5658_s0 + $0xd0] sm:$0x1f]  }
  0x36   :  { %v1229_v51 = vrot.slane %v1228_v41, 2  ;;  %v1239_v52 = vmax.f32 %v1237_v33, %v1238_v42  ;;  %v1267_v53 = vsel %vm3540_vm2, %v3405_v28, 4286644096  ;;  %v1278_v54 = vsel %vm3540_vm2, %v3406_v30, 4286644096 }
  0x37   :  { %v1210_v55 = vmax.f32 %v1208_v35, %v1209_v44  ;;  %v1219_v56 = vmax.f32 %v1217_v36, %v1218_v45  ;;  %v1249_v57 = vrot.slane %v1248_v49, 4  ;;  %v1259_v58 = vmax.f32 %v1257_v43, %v1258_v50 }
  0x38   :  { %v1230_v62 = vmax.f32 %v1228_v41, %v1229_v51  ;;  %v1240_v63 = vrot.slane %v1239_v52, 2  ;;  %v1268_v0 = vunpack.i.l.bf16 %v1267_v53  ;;  %v1269_v1 = vunpack.i.h.bf16 %v1267_v53 }
  0x39   :  { %v3674_v2 = vpack.i.bf16 %v1210_v55, %v1210_v55  ;;  %v1220_v3 = vrot.slane %v1219_v56, 1  ;;  %v1250_v4 = vmax.f32 %v1248_v49, %v1249_v57  ;;  %v1260_v8 = vrot.slane %v1259_v58, 4 }
  0x3a   :  { %v1231_v9 = vrot.slane %v1230_v62, 1  ;;  %v1241_v10 = vmax.f32 %v1239_v52, %v1240_v63  ;;  %v1270_v11 = vmax.f32 %v1268_v0, %v1269_v1  ;;  %v1279_v12 = vunpack.i.l.bf16 %v1278_v54 }
  0x3b   :  { %v1221_v14 = vmax.f32 %v1219_v56, %v1220_v3  ;;  %v1251_v17 = vrot.slane %v1250_v4, 2  ;;  %v1261_v18 = vmax.f32 %v1259_v58, %v1260_v8  ;;  %v1280_v19 = vunpack.i.h.bf16 %v1278_v54 }
  0x3c   :  { %v1232_v22 = vmax.f32 %v1230_v62, %v1231_v9  ;;  %v1242_v24 = vrot.slane %v1241_v10, 1  ;;  %v1271_v26 = vrot.slane %v1270_v11, 4  ;;  %v1289_v27 = vsel %vm3540_vm2, %v3407_v59, 4286644096  ;;  %v3411_v59 = vld [vmem:[%s5658_s0 + $0xd8] sm:$0x1f]  }
  0x3d   :  { %v3684_v28 = vpack.i.bf16 %v1221_v14, %v1221_v14  ;;  %v1252_v30 = vmax.f32 %v1250_v4, %v1251_v17  ;;  %v1262_v31 = vrot.slane %v1261_v18, 2  ;;  %v1281_v32 = vmax.f32 %v1279_v12, %v1280_v19  ;;  %v3412_v62 = vld [vmem:[%s5658_s0 + $0xe0] sm:$0x1f]  }
  0x3e   :  { %v3686_v33 = vpack.i.bf16 %v1232_v22, %v1232_v22  ;;  %v1243_v34 = vmax.f32 %v1241_v10, %v1242_v24  ;;  %v1272_v35 = vmax.f32 %v1270_v11, %v1271_v26  ;;  %v1290_v36 = vunpack.i.l.bf16 %v1289_v27 }
  0x3f   :  { %v1253_v39 = vrot.slane %v1252_v30, 1  ;;  %v1263_v41 = vmax.f32 %v1261_v18, %v1262_v31  ;;  %v1282_v42 = vrot.slane %v1281_v32, 4  ;;  %v1291_v43 = vunpack.i.h.bf16 %v1289_v27 }
  0x40   :  { %v3691_v44 = vpack.i.bf16 %v1243_v34, %v1243_v34  ;;  %v1273_v45 = vrot.slane %v1272_v35, 2  ;;  %v1300_v49 = vsel %vm3540_vm2, %v3408_v13, 4286644096  ;;  %v1311_v50 = vsel %vm3540_vm2, %v3409_v20, 4286644096 }
  0x41   :  { %v1254_v51 = vmax.f32 %v1252_v30, %v1253_v39  ;;  %v1264_v52 = vrot.slane %v1263_v41, 1  ;;  %v1283_v53 = vmax.f32 %v1281_v32, %v1282_v42  ;;  %v1292_v54 = vmax.f32 %v1290_v36, %v1291_v43  ;;  %v3413_v30 = vld [vmem:[%s5658_s0 + $0xe8] sm:$0x1f]  }
  0x42   :  { %v1274_v55 = vmax.f32 %v1272_v35, %v1273_v45  ;;  %v1301_v56 = vunpack.i.l.bf16 %v1300_v49  ;;  %v1302_v57 = vunpack.i.h.bf16 %v1300_v49  ;;  %v1312_v58 = vunpack.i.l.bf16 %v1311_v50 }
  0x43   :  { %v3703_v63 = vpack.i.bf16 %v1254_v51, %v1254_v51  ;;  %v1265_v0 = vmax.f32 %v1263_v41, %v1264_v52  ;;  %v1284_v1 = vrot.slane %v1283_v53, 2  ;;  %v1293_v3 = vrot.slane %v1292_v54, 4 }
  0x44   :  { %v1275_v4 = vrot.slane %v1274_v55, 1  ;;  %v1303_v8 = vmax.f32 %v1301_v56, %v1302_v57  ;;  %v1313_v9 = vunpack.i.h.bf16 %v1311_v50  ;;  %v1322_v10 = vsel %vm3540_vm2, %v3410_v37, 4286644096  ;;  %v3414_v50 = vld [vmem:[%s5658_s0 + $0xf0] sm:$0x1f]  }
  0x45   :  { %v3707_v11 = vpack.i.bf16 %v1265_v0, %v1265_v0  ;;  %v1285_v12 = vmax.f32 %v1283_v53, %v1284_v1  ;;  %v1294_v13 = vmax.f32 %v1292_v54, %v1293_v3  ;;  %v1323_v14 = vunpack.i.l.bf16 %v1322_v10 }
  0x46   :  { %v1276_v17 = vmax.f32 %v1274_v55, %v1275_v4  ;;  %v1304_v18 = vrot.slane %v1303_v8, 4  ;;  %v1314_v19 = vmax.f32 %v1312_v58, %v1313_v9  ;;  %v1324_v20 = vunpack.i.h.bf16 %v1322_v10  ;;  %v3415_v10 = vld [vmem:[%s5658_s0 + $0xf8] sm:$0x1f]  }
  0x47   :  { %v1286_v22 = vrot.slane %v1285_v12, 1  ;;  %v1295_v24 = vrot.slane %v1294_v13, 2  ;;  %v1333_v26 = vsel %vm3540_vm2, %v3411_v59, 4286644096  ;;  %v1344_v27 = vsel %vm3540_vm2, %v3412_v62, 4286644096 }
  0x48   :  { %v3716_v31 = vpack.i.bf16 %v1276_v17, %v1276_v17  ;;  %v1305_v32 = vmax.f32 %v1303_v8, %v1304_v18  ;;  %v1315_v34 = vrot.slane %v1314_v19, 4  ;;  %v1325_v35 = vmax.f32 %v1323_v14, %v1324_v20 }
  0x49   :  { %v1287_v36 = vmax.f32 %v1285_v12, %v1286_v22  ;;  %v1296_v37 = vmax.f32 %v1294_v13, %v1295_v24  ;;  %v1334_v39 = vunpack.i.l.bf16 %v1333_v26  ;;  %v1335_v41 = vunpack.i.h.bf16 %v1333_v26 }
  0x4a   :  { %v1306_v42 = vrot.slane %v1305_v32, 2  ;;  %v1316_v43 = vmax.f32 %v1314_v19, %v1315_v34  ;;  %v1326_v45 = vrot.slane %v1325_v35, 4  ;;  %v1345_v49 = vunpack.i.l.bf16 %v1344_v27  ;;  %v3417_v34 = vld [vmem:[%s5658_s0 + $0x108] sm:$0x1f]  }
  0x4b   :  { %v3721_v51 = vpack.i.bf16 %v1287_v36, %v1287_v36  ;;  %v1297_v52 = vrot.slane %v1296_v37, 1  ;;  %v1336_v53 = vmax.f32 %v1334_v39, %v1335_v41  ;;  %v1346_v54 = vunpack.i.h.bf16 %v1344_v27 }
  0x4c   :  { %v1307_v55 = vmax.f32 %v1305_v32, %v1306_v42  ;;  %v1317_v56 = vrot.slane %v1316_v43, 2  ;;  %v1327_v57 = vmax.f32 %v1325_v35, %v1326_v45  ;;  %v1355_v58 = vsel %vm3540_vm2, %v3413_v30, 4286644096  ;;  %v3416_v32 = vld [vmem:[%s5658_s0 + $0x100] sm:$0x1f]  }
  0x4d   :  { %v1298_v59 = vmax.f32 %v1296_v37, %v1297_v52  ;;  %v1337_v62 = vrot.slane %v1336_v53, 4  ;;  %v1347_v0 = vmax.f32 %v1345_v49, %v1346_v54  ;;  %v1356_v1 = vunpack.i.l.bf16 %v1355_v58  ;;  %v3418_v54 = vld [vmem:[%s5658_s0 + $0x110] sm:$0x1f]  }
  0x4e   :  { %v1308_v3 = vrot.slane %v1307_v55, 1  ;;  %v1318_v4 = vmax.f32 %v1316_v43, %v1317_v56  ;;  %v1328_v8 = vrot.slane %v1327_v57, 2  ;;  %v1357_v9 = vunpack.i.h.bf16 %v1355_v58 }
  0x4f   :  { %v3728_v12 = vpack.i.bf16 %v1298_v59, %v1298_v59  ;;  %v1338_v13 = vmax.f32 %v1336_v53, %v1337_v62  ;;  %v1348_v14 = vrot.slane %v1347_v0, 4  ;;  %v1366_v17 = vsel %vm3540_vm2, %v3414_v50, 4286644096 }
  0x50   :  { %v1309_v18 = vmax.f32 %v1307_v55, %v1308_v3  ;;  %v1319_v19 = vrot.slane %v1318_v4, 1  ;;  %v1329_v20 = vmax.f32 %v1327_v57, %v1328_v8  ;;  %v1358_v22 = vmax.f32 %v1356_v1, %v1357_v9 }
  0x51   :  { %v1339_v24 = vrot.slane %v1338_v13, 2  ;;  %v1349_v26 = vmax.f32 %v1347_v0, %v1348_v14  ;;  %v1367_v27 = vunpack.i.l.bf16 %v1366_v17  ;;  %v1368_v30 = vunpack.i.h.bf16 %v1366_v17 }
  0x52   :  { %v3738_v35 = vpack.i.bf16 %v1309_v18, %v1309_v18  ;;  %v1320_v36 = vmax.f32 %v1318_v4, %v1319_v19  ;;  %v1330_v37 = vrot.slane %v1329_v20, 1  ;;  %v1359_v39 = vrot.slane %v1358_v22, 4  ;;  %v3419_v18 = vld [vmem:[%s5658_s0 + $0x118] sm:$0x1f]   ;;  %v3420_v19 = vld [vmem:[%s5658_s0 + $0x120] sm:$0x1f]  }
  0x53   :  { %v1340_v41 = vmax.f32 %v1338_v13, %v1339_v24  ;;  %v1350_v42 = vrot.slane %v1349_v26, 2  ;;  %v1369_v43 = vmax.f32 %v1367_v27, %v1368_v30  ;;  %v1377_v45 = vsel %vm3540_vm2, %v3415_v10, 4286644096 }
  0x54   :  { %v3742_v49 = vpack.i.bf16 %v1320_v36, %v1320_v36  ;;  %v1331_v50 = vmax.f32 %v1329_v20, %v1330_v37  ;;  %v1360_v52 = vmax.f32 %v1358_v22, %v1359_v39  ;;  %v1378_v53 = vunpack.i.l.bf16 %v1377_v45 }
  0x55   :  { %v1341_v55 = vrot.slane %v1340_v41, 1  ;;  %v1351_v56 = vmax.f32 %v1349_v26, %v1350_v42  ;;  %v1370_v57 = vrot.slane %v1369_v43, 4  ;;  %v1379_v58 = vunpack.i.h.bf16 %v1377_v45 }
  0x56   :  { %v3747_v59 = vpack.i.bf16 %v1331_v50, %v1331_v50  ;;  %v1361_v62 = vrot.slane %v1360_v52, 2  ;;  %v1388_v0 = vsel %vm3540_vm2, %v3416_v32, 4286644096  ;;  %v1399_v1 = vsel %vm3540_vm2, %v3417_v34, 4286644096 }
  0x57   :  { %v1342_v3 = vmax.f32 %v1340_v41, %v1341_v55  ;;  %v1352_v4 = vrot.slane %v1351_v56, 1  ;;  %v1371_v8 = vmax.f32 %v1369_v43, %v1370_v57  ;;  %v1380_v9 = vmax.f32 %v1378_v53, %v1379_v58 }
  0x58   :  { %v1362_v10 = vmax.f32 %v1360_v52, %v1361_v62  ;;  %v1389_v13 = vunpack.i.l.bf16 %v1388_v0  ;;  %v1390_v14 = vunpack.i.h.bf16 %v1388_v0  ;;  %v1400_v17 = vunpack.i.l.bf16 %v1399_v1 }
  0x59   :  { %v3759_v20 = vpack.i.bf16 %v1342_v3, %v1342_v3  ;;  %v1353_v22 = vmax.f32 %v1351_v56, %v1352_v4  ;;  %v1372_v24 = vrot.slane %v1371_v8, 2  ;;  %v1381_v26 = vrot.slane %v1380_v9, 4 }
  0x5a   :  { %v1363_v27 = vrot.slane %v1362_v10, 1  ;;  %v1391_v30 = vmax.f32 %v1389_v13, %v1390_v14  ;;  %v1401_v32 = vunpack.i.h.bf16 %v1399_v1  ;;  %v1410_v34 = vsel %vm3540_vm2, %v3418_v54, 4286644096  ;;  %v3421_v54 = vld [vmem:[%s5658_s0 + $0x128] sm:$0x1f]  }
  0x5b   :  { %v3763_v36 = vpack.i.bf16 %v1353_v22, %v1353_v22  ;;  %v1373_v37 = vmax.f32 %v1371_v8, %v1372_v24  ;;  %v1382_v39 = vmax.f32 %v1380_v9, %v1381_v26  ;;  %v1411_v41 = vunpack.i.l.bf16 %v1410_v34 }
  0x5c   :  { %v1364_v42 = vmax.f32 %v1362_v10, %v1363_v27  ;;  %v1392_v43 = vrot.slane %v1391_v30, 4  ;;  %v1402_v45 = vmax.f32 %v1400_v17, %v1401_v32  ;;  %v1412_v50 = vunpack.i.h.bf16 %v1410_v34  ;;  %v3422_v17 = vld [vmem:[%s5658_s0 + $0x130] sm:$0x1f]  }
  0x5d   :  { %v1374_v52 = vrot.slane %v1373_v37, 1  ;;  %v1383_v53 = vrot.slane %v1382_v39, 2  ;;  %v1421_v55 = vsel %vm3540_vm2, %v3419_v18, 4286644096  ;;  %v1432_v56 = vsel %vm3540_vm2, %v3420_v19, 4286644096 }
  0x5e   :  { %v3772_v57 = vpack.i.bf16 %v1364_v42, %v1364_v42  ;;  %v1393_v58 = vmax.f32 %v1391_v30, %v1392_v43  ;;  %v1403_v62 = vrot.slane %v1402_v45, 4  ;;  %v1413_v0 = vmax.f32 %v1411_v41, %v1412_v50 }
  0x5f   :  { %v1375_v1 = vmax.f32 %v1373_v37, %v1374_v52  ;;  %v1384_v3 = vmax.f32 %v1382_v39, %v1383_v53  ;;  %v1422_v4 = vunpack.i.l.bf16 %v1421_v55  ;;  %v1423_v8 = vunpack.i.h.bf16 %v1421_v55  ;;  %v3423_v52 = vld [vmem:[%s5658_s0 + $0x138] sm:$0x1f]  }
  0x60   :  { %v1394_v9 = vrot.slane %v1393_v58, 2  ;;  %v1404_v10 = vmax.f32 %v1402_v45, %v1403_v62  ;;  %v1414_v13 = vrot.slane %v1413_v0, 4  ;;  %v1433_v14 = vunpack.i.l.bf16 %v1432_v56 }
  0x61   :  { %v3777_v18 = vpack.i.bf16 %v1375_v1, %v1375_v1  ;;  %v1385_v19 = vrot.slane %v1384_v3, 1  ;;  %v1424_v22 = vmax.f32 %v1422_v4, %v1423_v8  ;;  %v1434_v24 = vunpack.i.h.bf16 %v1432_v56 }
  0x62   :  { %v1395_v26 = vmax.f32 %v1393_v58, %v1394_v9  ;;  %v1405_v27 = vrot.slane %v1404_v10, 2  ;;  %v1415_v30 = vmax.f32 %v1413_v0, %v1414_v13  ;;  %v1443_v32 = vsel %vm3540_vm2, %v3421_v54, 4286644096  ;;  %v3425_v13 = vld [vmem:[%s5658_s0 + $0x148] sm:$0x1f]  }
  0x63   :  { %v1386_v34 = vmax.f32 %v1384_v3, %v1385_v19  ;;  %v1425_v37 = vrot.slane %v1424_v22, 4  ;;  %v1435_v39 = vmax.f32 %v1433_v14, %v1434_v24  ;;  %v1444_v41 = vunpack.i.l.bf16 %v1443_v32 }
  0x64   :  { %v1396_v42 = vrot.slane %v1395_v26, 1  ;;  %v1406_v43 = vmax.f32 %v1404_v10, %v1405_v27  ;;  %v1416_v45 = vrot.slane %v1415_v30, 2  ;;  %v1445_v50 = vunpack.i.h.bf16 %v1443_v32  ;;  %v3424_v10 = vld [vmem:[%s5658_s0 + $0x140] sm:$0x1f]  }
  0x65   :  { %v3784_v53 = vpack.i.bf16 %v1386_v34, %v1386_v34  ;;  %v1426_v55 = vmax.f32 %v1424_v22, %v1425_v37  ;;  %v1436_v56 = vrot.slane %v1435_v39, 4  ;;  %v1454_v58 = vsel %vm3540_vm2, %v3422_v17, 4286644096 }
  0x66   :  { %v1397_v54 = vmax.f32 %v1395_v26, %v1396_v42  ;;  %v1407_v62 = vrot.slane %v1406_v43, 1  ;;  %v1417_v0 = vmax.f32 %v1415_v30, %v1416_v45  ;;  %v1446_v1 = vmax.f32 %v1444_v41, %v1445_v50  ;;  %v3426_v41 = vld [vmem:[%s5658_s0 + $0x150] sm:$0x1f]  }
  0x67   :  { %v1427_v3 = vrot.slane %v1426_v55, 2  ;;  %v1437_v4 = vmax.f32 %v1435_v39, %v1436_v56  ;;  %v1455_v8 = vunpack.i.l.bf16 %v1454_v58  ;;  %v1456_v9 = vunpack.i.h.bf16 %v1454_v58 }
  0x68   :  { %v3794_v14 = vpack.i.bf16 %v1397_v54, %v1397_v54  ;;  %v1408_v19 = vmax.f32 %v1406_v43, %v1407_v62  ;;  %v1418_v17 = vrot.slane %v1417_v0, 1  ;;  %v1447_v22 = vrot.slane %v1446_v1, 4 }
  0x69   :  { %v1428_v24 = vmax.f32 %v1426_v55, %v1427_v3  ;;  %v1438_v26 = vrot.slane %v1437_v4, 2  ;;  %v1457_v27 = vmax.f32 %v1455_v8, %v1456_v9  ;;  %v1465_v30 = vsel %vm3540_vm2, %v3423_v52, 4286644096 }
  0x6a   :  { %v3798_v32 = vpack.i.bf16 %v1408_v19, %v1408_v19  ;;  %v1419_v34 = vmax.f32 %v1417_v0, %v1418_v17  ;;  %v1448_v37 = vmax.f32 %v1446_v1, %v1447_v22  ;;  %v1466_v39 = vunpack.i.l.bf16 %v1465_v30  ;;  %v3428_v17 = vld [vmem:[%s5658_s0 + $0x160] sm:$0x1f]  }
  0x6b   :  { %v1429_v42 = vrot.slane %v1428_v24, 1  ;;  %v1439_v45 = vmax.f32 %v1437_v4, %v1438_v26  ;;  %v1458_v43 = vrot.slane %v1457_v27, 4  ;;  %v1467_v50 = vunpack.i.h.bf16 %v1465_v30  ;;  %v3427_v4 = vld [vmem:[%s5658_s0 + $0x158] sm:$0x1f]  }
  0x6c   :  { %v3803_v56 = vpack.i.bf16 %v1419_v34, %v1419_v34  ;;  %v1449_v55 = vrot.slane %v1448_v37, 2  ;;  %v1476_v58 = vsel %vm3540_vm2, %v3424_v10, 4286644096  ;;  %v1487_v52 = vsel %vm3540_vm2, %v3425_v13, 4286644096 }
  0x6d   :  { %v1430_v54 = vmax.f32 %v1428_v24, %v1429_v42  ;;  %v1440_v62 = vrot.slane %v1439_v45, 1  ;;  %v1459_v0 = vmax.f32 %v1457_v27, %v1458_v43  ;;  %v1468_v1 = vmax.f32 %v1466_v39, %v1467_v50 }
  0x6e   :  { %5752 = vst [vmem:[#allocation2_spill] sm:$0xff] %v3803_v56  ;;  %v1450_v3 = vmax.f32 %v1448_v37, %v1449_v55  ;;  %v1477_v8 = vunpack.i.l.bf16 %v1476_v58  ;;  %v1478_v9 = vunpack.i.h.bf16 %v1476_v58  ;;  %v1488_v19 = vunpack.i.l.bf16 %v1487_v52 }
  0x6f   :  { %v3815_v10 = vpack.i.bf16 %v1430_v54, %v1430_v54  ;;  %v1441_v22 = vmax.f32 %v1439_v45, %v1440_v62  ;;  %v1460_v13 = vrot.slane %v1459_v0, 2  ;;  %v1469_v24 = vrot.slane %v1468_v1, 4 }
  0x70   :  { %v1451_v26 = vrot.slane %v1450_v3, 1  ;;  %v1479_v27 = vmax.f32 %v1477_v8, %v1478_v9  ;;  %v1489_v30 = vunpack.i.h.bf16 %v1487_v52  ;;  %v1498_v34 = vsel %vm3540_vm2, %v3426_v41, 4286644096  ;;  %v3429_v41 = vld [vmem:[%s5658_s0 + $0x168] sm:$0x1f]  }
  0x71   :  { %5753 = vst [vmem:[#allocation3_spill] sm:$0xff] %v3815_v10  ;;  %v3819_v37 = vpack.i.bf16 %v1441_v22, %v1441_v22  ;;  %v1461_v39 = vmax.f32 %v1459_v0, %v1460_v13  ;;  %v1470_v42 = vmax.f32 %v1468_v1, %v1469_v24  ;;  %v1499_v43 = vunpack.i.l.bf16 %v1498_v34 }
  0x72   :  { %v1452_v50 = vmax.f32 %v1450_v3, %v1451_v26  ;;  %v1480_v55 = vrot.slane %v1479_v27, 4  ;;  %v1490_v58 = vmax.f32 %v1488_v19, %v1489_v30  ;;  %v1500_v56 = vunpack.i.h.bf16 %v1498_v34 }
  0x73   :  { %5754 = vst [vmem:[#allocation4_spill] sm:$0xff] %v3819_v37  ;;  %v1462_v54 = vrot.slane %v1461_v39, 1  ;;  %v1471_v10 = vrot.slane %v1470_v42, 2  ;;  %v1509_v45 = vsel %vm3540_vm2, %v3427_v4, 4286644096  ;;  %vm2964_vm7 = vcmask 1045509  }
  0x74   :  { %v1520_v52 = vsel %vm3540_vm2, %v3428_v17, 4286644096  ;;  %v3828_v62 = vpack.i.bf16 %v1452_v50, %v1452_v50  ;;  %v1481_v0 = vmax.f32 %v1479_v27, %v1480_v55  ;;  %v1491_v1 = vrot.slane %v1490_v58, 4  ;;  %v3430_v17 = vld [vmem:[%s5658_s0 + $0x170] sm:$0x1f]  }
  0x75   :  { %v1501_v3 = vmax.f32 %v1499_v43, %v1500_v56  ;;  %v1463_v8 = vmax.f32 %v1461_v39, %v1462_v54  ;;  %v1472_v9 = vmax.f32 %v1470_v42, %v1471_v10  ;;  %v1510_v19 = vunpack.i.l.bf16 %v1509_v45 }
  0x76   :  { %5755 = vst [vmem:[#allocation5_spill] sm:$0xff] %v3828_v62  ;;  %v1511_v22 = vunpack.i.h.bf16 %v1509_v45  ;;  %v1482_v13 = vrot.slane %v1481_v0, 2  ;;  %v1492_v24 = vmax.f32 %v1490_v58, %v1491_v1  ;;  %v1521_v4 = vunpack.i.l.bf16 %v1520_v52 }
  0x77   :  { %v1502_v26 = vrot.slane %v1501_v3, 4  ;;  %v3833_v30 = vpack.i.bf16 %v1463_v8, %v1463_v8  ;;  %v1473_v34 = vrot.slane %v1472_v9, 1  ;;  %v1522_v62 = vunpack.i.h.bf16 %v1520_v52  ;;  %v3431_v8 = vld [vmem:[%s5658_s0 + $0x178] sm:$0x1f]  }
  0x78   :  { %v1512_v50 = vmax.f32 %v1510_v19, %v1511_v22  ;;  %v1483_v27 = vmax.f32 %v1481_v0, %v1482_v13  ;;  %v1493_v55 = vrot.slane %v1492_v24, 2  ;;  %v1531_v10 = vsel %vm3540_vm2, %v3429_v41, 4286644096 }
  0x79   :  { %5756 = vst [vmem:[#allocation6_spill] sm:$0xff] %v3833_v30  ;;  %v1503_v56 = vmax.f32 %v1501_v3, %v1502_v26  ;;  %v1474_v39 = vmax.f32 %v1472_v9, %v1473_v34  ;;  %v1523_v43 = vmax.f32 %v1521_v4, %v1522_v62  ;;  %v1532_v58 = vunpack.i.l.bf16 %v1531_v10  ;;  %v3432_v34 = vld [vmem:[%s5658_s0 + $0x180] sm:$0x1f]  }
  0x7a   :  { %v1513_v42 = vrot.slane %v1512_v50, 4  ;;  %v1484_v54 = vrot.slane %v1483_v27, 1  ;;  %v1494_v45 = vmax.f32 %v1492_v24, %v1493_v55  ;;  %v1533_v37 = vunpack.i.h.bf16 %v1531_v10 }
  0x7b   :  { %v1504_v1 = vrot.slane %v1503_v56, 2  ;;  %v3840_v19 = vpack.i.bf16 %v1474_v39, %v1474_v39  ;;  %v1524_v0 = vrot.slane %v1523_v43, 4  ;;  %v1542_v3 = vsel %vm3540_vm2, %v3430_v17, 4286644096 }
  0x7c   :  { %v1514_v52 = vmax.f32 %v1512_v50, %v1513_v42  ;;  %v1485_v41 = vmax.f32 %v1483_v27, %v1484_v54  ;;  %v1495_v9 = vrot.slane %v1494_v45, 1  ;;  %v1534_v62 = vmax.f32 %v1532_v58, %v1533_v37  ;;  %v3433_v50 = vld [vmem:[%s5658_s0 + $0x188] sm:$0x1f]  }
  0x7d   :  { %5757 = vst [vmem:[#allocation7_spill] sm:$0xff] %v3840_v19  ;;  %v1505_v22 = vmax.f32 %v1503_v56, %v1504_v1  ;;  %v1525_v26 = vmax.f32 %v1523_v43, %v1524_v0  ;;  %v1543_v24 = vunpack.i.l.bf16 %v1542_v3  ;;  %v1544_v4 = vunpack.i.h.bf16 %v1542_v3  ;;  %v3434_v0 = vld [vmem:[%s5658_s0 + $0x190] sm:$0x1f]  }
  0x7e   :  { %v1515_v13 = vrot.slane %v1514_v52, 2  ;;  %v3850_v55 = vpack.i.bf16 %v1485_v41, %v1485_v41  ;;  %v1496_v10 = vmax.f32 %v1494_v45, %v1495_v9  ;;  %v1535_v27 = vrot.slane %v1534_v62, 4 }
  0x7f   :  { %v1506_v17 = vrot.slane %v1505_v22, 1  ;;  %v1526_v56 = vrot.slane %v1525_v26, 2  ;;  %v1545_v37 = vmax.f32 %v1543_v24, %v1544_v4  ;;  %v1553_v42 = vsel %vm3540_vm2, %v3431_v8, 4286644096 }
  0x80   :  { %5758 = vst [vmem:[#allocation8_spill] sm:$0xff] %v3850_v55  ;;  %v1516_v39 = vmax.f32 %v1514_v52, %v1515_v13  ;;  %v3854_v43 = vpack.i.bf16 %v1496_v10, %v1496_v10  ;;  %v1536_v54 = vmax.f32 %v1534_v62, %v1535_v27  ;;  %v1554_v1 = vunpack.i.l.bf16 %v1553_v42 }
  0x81   :  { %v1507_v58 = vmax.f32 %v1505_v22, %v1506_v17  ;;  %v1527_v41 = vmax.f32 %v1525_v26, %v1526_v56  ;;  %v1546_v45 = vrot.slane %v1545_v37, 4  ;;  %v1555_v9 = vunpack.i.h.bf16 %v1553_v42  ;;  %v3435_v26 = vld [vmem:[%s5658_s0 + $0x198] sm:$0x1f]   ;;  %v3436_v56 = vld [vmem:[%s5658_s0 + $0x1a0] sm:$0x1f]  }
  0x82   :  { %5759 = vst [vmem:[#allocation9_spill] sm:$0xff] %v3854_v43  ;;  %v1517_v3 = vrot.slane %v1516_v39, 1  ;;  %v1537_v52 = vrot.slane %v1536_v54, 2  ;;  %v1564_v13 = vsel %vm3540_vm2, %v3432_v34, 4286644096  ;;  %vm2966_vm8 = vcmask 1046534  }
  0x83   :  { %v3859_v55 = vpack.i.bf16 %v1507_v58, %v1507_v58  ;;  %v1575_v8 = vsel %vm3540_vm2, %v3433_v50, 4286644096  ;;  %v1528_v62 = vrot.slane %v1527_v41, 1  ;;  %v1547_v24 = vmax.f32 %v1545_v37, %v1546_v45 }
  0x84   :  { %v1518_v22 = vmax.f32 %v1516_v39, %v1517_v3  ;;  %v1556_v4 = vmax.f32 %v1554_v1, %v1555_v9  ;;  %v1538_v10 = vmax.f32 %v1536_v54, %v1537_v52  ;;  %v1565_v17 = vunpack.i.l.bf16 %v1564_v13 }
  0x85   :  { %5760 = vst [vmem:[#allocation10_spill] sm:$0xff] %v3859_v55  ;;  %v1566_v27 = vunpack.i.h.bf16 %v1564_v13  ;;  %v1576_v43 = vunpack.i.l.bf16 %v1575_v8  ;;  %v1529_v42 = vmax.f32 %v1527_v41, %v1528_v62  ;;  %v1548_v50 = vrot.slane %v1547_v24, 2 }
  0x86   :  { %v3871_v34 = vpack.i.bf16 %v1518_v22, %v1518_v22  ;;  %v1557_v39 = vrot.slane %v1556_v4, 4  ;;  %v1539_v58 = vrot.slane %v1538_v10, 1  ;;  %v1577_v1 = vunpack.i.h.bf16 %v1575_v8 }
  0x87   :  { %v1567_v37 = vmax.f32 %v1565_v17, %v1566_v27  ;;  %v1586_v54 = vsel %vm3540_vm2, %v3434_v0, 4286644096  ;;  %v3875_v3 = vpack.i.bf16 %v1529_v42, %v1529_v42  ;;  %v1549_v45 = vmax.f32 %v1547_v24, %v1548_v50  ;;  %v3437_v0 = vld [vmem:[%s5658_s0 + $0x1a8] sm:$0x1f]  }
  0x88   :  { %5761 = vst [vmem:[#allocation11_spill] sm:$0xff] %v3871_v34  ;;  %v1558_v9 = vmax.f32 %v1556_v4, %v1557_v39  ;;  %v1587_v52 = vunpack.i.l.bf16 %v1586_v54  ;;  %v1540_v13 = vmax.f32 %v1538_v10, %v1539_v58  ;;  %v1578_v19 = vmax.f32 %v1576_v43, %v1577_v1 }
  0x89   :  { %5762 = vst [vmem:[#allocation12_spill] sm:$0xff] %v3875_v3  ;;  %v1568_v55 = vrot.slane %v1567_v37, 4  ;;  %v1588_v30 = vunpack.i.h.bf16 %v1586_v54  ;;  %v1550_v22 = vrot.slane %v1549_v45, 1  ;;  %v1597_v41 = vsel %vm3540_vm2, %v3435_v26, 4286644096 }
  0x8a   :  { %v1559_v34 = vrot.slane %v1558_v9, 2  ;;  %v1608_v8 = vsel %vm3540_vm2, %v3436_v56, 4286644096  ;;  %v3884_v62 = vpack.i.bf16 %v1540_v13, %v1540_v13  ;;  %v1579_v4 = vrot.slane %v1578_v19, 4  ;;  %v3438_v56 = vld [vmem:[%s5658_s0 + $0x1b0] sm:$0x1f]  }
  0x8b   :  { %v1569_v24 = vmax.f32 %v1567_v37, %v1568_v55  ;;  %v1589_v10 = vmax.f32 %v1587_v52, %v1588_v30  ;;  %v1551_v17 = vmax.f32 %v1549_v45, %v1550_v22  ;;  %v1598_v27 = vunpack.i.l.bf16 %v1597_v41 }
  0x8c   :  { %5763 = vst [vmem:[#allocation13_spill] sm:$0xff] %v3884_v62  ;;  %v1560_v43 = vmax.f32 %v1558_v9, %v1559_v34  ;;  %v1599_v42 = vunpack.i.h.bf16 %v1597_v41  ;;  %v1580_v39 = vmax.f32 %v1578_v19, %v1579_v4  ;;  %v1609_v26 = vunpack.i.l.bf16 %v1608_v8 }
  0x8d   :  { %v1570_v50 = vrot.slane %v1569_v24, 2  ;;  %v1590_v58 = vrot.slane %v1589_v10, 4  ;;  %v3889_v1 = vpack.i.bf16 %v1551_v17, %v1551_v17  ;;  %v1610_v62 = vunpack.i.h.bf16 %v1608_v8  ;;  %v3439_v17 = vld [vmem:[%s5658_s0 + $0x1b8] sm:$0x1f]  }
  0x8e   :  { %v1561_v54 = vrot.slane %v1560_v43, 1  ;;  %v1600_v13 = vmax.f32 %v1598_v27, %v1599_v42  ;;  %v1581_v37 = vrot.slane %v1580_v39, 2  ;;  %v1619_v34 = vsel %vm3540_vm2, %v3437_v0, 4286644096 }
  0x8f   :  { %5764 = vst [vmem:[#allocation14_spill] sm:$0xff] %v3889_v1  ;;  %v1571_v55 = vmax.f32 %v1569_v24, %v1570_v50  ;;  %v1591_v30 = vmax.f32 %v1589_v10, %v1590_v58  ;;  %v1611_v19 = vmax.f32 %v1609_v26, %v1610_v62  ;;  %v1620_v52 = vunpack.i.l.bf16 %v1619_v34 }
  0x90   :  { %v1562_v45 = vmax.f32 %v1560_v43, %v1561_v54  ;;  %v1601_v9 = vrot.slane %v1600_v13, 4  ;;  %v1582_v41 = vmax.f32 %v1580_v39, %v1581_v37  ;;  %v1621_v3 = vunpack.i.h.bf16 %v1619_v34  ;;  %v3440_v54 = vld [vmem:[%s5658_s0 + $0x1c0] sm:$0x1f]  }
  0x91   :  { %v1572_v22 = vrot.slane %v1571_v55, 1  ;;  %v1592_v4 = vrot.slane %v1591_v30, 2  ;;  %v1612_v24 = vrot.slane %v1611_v19, 4  ;;  %v1630_v10 = vsel %vm3540_vm2, %v3438_v56, 4286644096 }
  0x92   :  { %v3896_v27 = vpack.i.bf16 %v1562_v45, %v1562_v45  ;;  %v1602_v8 = vmax.f32 %v1600_v13, %v1601_v9  ;;  %v1583_v43 = vrot.slane %v1582_v41, 1  ;;  %v1622_v62 = vmax.f32 %v1620_v52, %v1621_v3  ;;  %v3441_v13 = vld [vmem:[%s5658_s0 + $0x1c8] sm:$0x1f]  }
  0x93   :  { %v1573_v0 = vmax.f32 %v1571_v55, %v1572_v22  ;;  %v1593_v42 = vmax.f32 %v1591_v30, %v1592_v4  ;;  %v1613_v58 = vmax.f32 %v1611_v19, %v1612_v24  ;;  %v1631_v39 = vunpack.i.l.bf16 %v1630_v10  ;;  %v3442_v24 = vld [vmem:[%s5658_s0 + $0x1d0] sm:$0x1f]  }
  0x94   :  { %5765 = vst [vmem:[#allocation15_spill] sm:$0xff] %v3896_v27  ;;  %v1603_v50 = vrot.slane %v1602_v8, 2  ;;  %v1632_v26 = vunpack.i.h.bf16 %v1630_v10  ;;  %v1584_v34 = vmax.f32 %v1582_v41, %v1583_v43  ;;  %v1623_v55 = vrot.slane %v1622_v62, 4 }
  0x95   :  { %v3906_v37 = vpack.i.bf16 %v1573_v0, %v1573_v0  ;;  %v1594_v56 = vrot.slane %v1593_v42, 1  ;;  %v1614_v30 = vrot.slane %v1613_v58, 2  ;;  %v1641_v9 = vsel %vm3540_vm2, %v3439_v17, 4286644096 }
  0x96   :  { %v1604_v45 = vmax.f32 %v1602_v8, %v1603_v50  ;;  %v1633_v3 = vmax.f32 %v1631_v39, %v1632_v26  ;;  %v3910_v19 = vpack.i.bf16 %v1584_v34, %v1584_v34  ;;  %v1624_v22 = vmax.f32 %v1622_v62, %v1623_v55 }
  0x97   :  { %5766 = vst [vmem:[#allocation16_spill] sm:$0xff] %v3906_v37  ;;  %v1595_v52 = vmax.f32 %v1593_v42, %v1594_v56  ;;  %v1642_v4 = vunpack.i.l.bf16 %v1641_v9  ;;  %v1615_v0 = vmax.f32 %v1613_v58, %v1614_v30  ;;  %v1643_v43 = vunpack.i.h.bf16 %v1641_v9  ;;  %v3443_v58 = vld [vmem:[%s5658_s0 + $0x1d8] sm:$0x1f]   ;;  %v3444_v30 = vld [vmem:[%s5658_s0 + $0x1e0] sm:$0x1f]  }
  0x98   :  { %5767 = vst [vmem:[#allocation17_spill] sm:$0xff] %v3910_v19  ;;  %v1605_v10 = vrot.slane %v1604_v45, 1  ;;  %v1634_v41 = vrot.slane %v1633_v3, 4  ;;  %v1625_v8 = vrot.slane %v1624_v22, 2  ;;  %v1652_v50 = vsel %vm3540_vm2, %v3440_v54, 4286644096 }
  0x99   :  { %v3915_v37 = vpack.i.bf16 %v1595_v52, %v1595_v52  ;;  %v1663_v17 = vsel %vm3540_vm2, %v3441_v13, 4286644096  ;;  %v1616_v62 = vrot.slane %v1615_v0, 1  ;;  %v1644_v26 = vmax.f32 %v1642_v4, %v1643_v43 }
  0x9a   :  { %v1606_v42 = vmax.f32 %v1604_v45, %v1605_v10  ;;  %v1635_v39 = vmax.f32 %v1633_v3, %v1634_v41  ;;  %v1626_v34 = vmax.f32 %v1624_v22, %v1625_v8  ;;  %v1653_v56 = vunpack.i.l.bf16 %v1652_v50 }
  0x9b   :  { %5768 = vst [vmem:[#allocation18_spill] sm:$0xff] %v3915_v37  ;;  %v1654_v55 = vunpack.i.h.bf16 %v1652_v50  ;;  %v1664_v19 = vunpack.i.l.bf16 %v1663_v17  ;;  %v1617_v9 = vmax.f32 %v1615_v0, %v1616_v62  ;;  %v1645_v45 = vrot.slane %v1644_v26, 4 }
  0x9c   :  { %v3927_v54 = vpack.i.bf16 %v1606_v42, %v1606_v42  ;;  %v1636_v13 = vrot.slane %v1635_v39, 2  ;;  %v1627_v52 = vrot.slane %v1626_v34, 1  ;;  %v1665_v4 = vunpack.i.h.bf16 %v1663_v17 }
  0x9d   :  { %v1655_v3 = vmax.f32 %v1653_v56, %v1654_v55  ;;  %v1674_v22 = vsel %vm3540_vm2, %v3442_v24, 4286644096  ;;  %v3931_v10 = vpack.i.bf16 %v1617_v9, %v1617_v9  ;;  %v1646_v43 = vmax.f32 %v1644_v26, %v1645_v45  ;;  %v3445_v24 = vld [vmem:[%s5658_s0 + $0x1e8] sm:$0x1f]  }
  0x9e   :  { %5769 = vst [vmem:[#allocation19_spill] sm:$0xff] %v3927_v54  ;;  %v1637_v41 = vmax.f32 %v1635_v39, %v1636_v13  ;;  %v1675_v8 = vunpack.i.l.bf16 %v1674_v22  ;;  %v1628_v50 = vmax.f32 %v1626_v34, %v1627_v52  ;;  %v1666_v27 = vmax.f32 %v1664_v19, %v1665_v4 }
  0x9f   :  { %5770 = vst [vmem:[#allocation20_spill] sm:$0xff] %v3931_v10  ;;  %v1656_v37 = vrot.slane %v1655_v3, 4  ;;  %v1676_v1 = vunpack.i.h.bf16 %v1674_v22  ;;  %v1647_v54 = vrot.slane %v1646_v43, 2  ;;  %v1685_v0 = vsel %vm3540_vm2, %v3443_v58, 4286644096 }
  0xa0   :  { %v1638_v42 = vrot.slane %v1637_v41, 1  ;;  %v1696_v17 = vsel %vm3540_vm2, %v3444_v30, 4286644096  ;;  %v3940_v62 = vpack.i.bf16 %v1628_v50, %v1628_v50  ;;  %v1667_v26 = vrot.slane %v1666_v27, 4  ;;  %v3446_v30 = vld [vmem:[%s5658_s0 + $0x1f0] sm:$0x1f]  }
  0xa1   :  { %v1657_v39 = vmax.f32 %v1655_v3, %v1656_v37  ;;  %v1677_v34 = vmax.f32 %v1675_v8, %v1676_v1  ;;  %v1648_v19 = vmax.f32 %v1646_v43, %v1647_v54  ;;  %v1686_v55 = vunpack.i.l.bf16 %v1685_v0 }
  0xa2   :  { %5771 = vst [vmem:[#allocation21_spill] sm:$0xff] %v3940_v62  ;;  %v1639_v56 = vmax.f32 %v1637_v41, %v1638_v42  ;;  %v1687_v9 = vunpack.i.h.bf16 %v1685_v0  ;;  %v1668_v45 = vmax.f32 %v1666_v27, %v1667_v26  ;;  %v1697_v58 = vunpack.i.l.bf16 %v1696_v17 }
  0xa3   :  { %v1658_v13 = vrot.slane %v1657_v39, 2  ;;  %v1678_v52 = vrot.slane %v1677_v34, 4  ;;  %v1649_v22 = vrot.slane %v1648_v19, 1  ;;  %v1698_v62 = vunpack.i.h.bf16 %v1696_v17 }
  0xa4   :  { %v3945_v4 = vpack.i.bf16 %v1639_v56, %v1639_v56  ;;  %v1688_v50 = vmax.f32 %v1686_v55, %v1687_v9  ;;  %v1669_v3 = vrot.slane %v1668_v45, 2  ;;  %v1707_v54 = vsel %vm3540_vm2, %v3445_v24, 4286644096  ;;  %v3447_v56 = vld [vmem:[%s5658_s0 + $0x1f8] sm:$0x1f]  }
  0xa5   :  { %v1659_v37 = vmax.f32 %v1657_v39, %v1658_v13  ;;  %v1679_v1 = vmax.f32 %v1677_v34, %v1678_v52  ;;  %v1650_v41 = vmax.f32 %v1648_v19, %v1649_v22  ;;  %v1699_v27 = vmax.f32 %v1697_v58, %v1698_v62  ;;  %v3448_v22 = vld [vmem:[%s5658_s0 + $0x200] sm:$0x1f]  }
  0xa6   :  { %5772 = vst [vmem:[#allocation22_spill] sm:$0xff] %v3945_v4  ;;  %v1689_v43 = vrot.slane %v1688_v50, 4  ;;  %v1708_v8 = vunpack.i.l.bf16 %v1707_v54  ;;  %v1670_v0 = vmax.f32 %v1668_v45, %v1669_v3  ;;  %v1709_v10 = vunpack.i.h.bf16 %v1707_v54 }
  0xa7   :  { %v1660_v42 = vrot.slane %v1659_v37, 1  ;;  %v1680_v26 = vrot.slane %v1679_v1, 2  ;;  %v3952_v55 = vpack.i.bf16 %v1650_v41, %v1650_v41  ;;  %v1700_v39 = vrot.slane %v1699_v27, 4 }
  0xa8   :  { %v1690_v17 = vmax.f32 %v1688_v50, %v1689_v43  ;;  %v1718_v34 = vsel %vm3540_vm2, %v3446_v30, 4286644096  ;;  %v1671_v19 = vrot.slane %v1670_v0, 1  ;;  %v1710_v62 = vmax.f32 %v1708_v8, %v1709_v10  ;;  %v3449_v50 = vld [vmem:[%s5658_s0 + $0x208] sm:$0x1f]  }
  0xa9   :  { %5773 = vst [vmem:[#allocation23_spill] sm:$0xff] %v3952_v55  ;;  %v1661_v24 = vmax.f32 %v1659_v37, %v1660_v42  ;;  %v1681_v9 = vmax.f32 %v1679_v1, %v1680_v26  ;;  %v1701_v52 = vmax.f32 %v1699_v27, %v1700_v39  ;;  %v1719_v45 = vunpack.i.l.bf16 %v1718_v34  ;;  %v3450_v39 = vld [vmem:[%s5658_s0 + $0x210] sm:$0x1f]  }
  0xaa   :  { %v1691_v13 = vrot.slane %v1690_v17, 2  ;;  %v1720_v58 = vunpack.i.h.bf16 %v1718_v34  ;;  %v1672_v54 = vmax.f32 %v1670_v0, %v1671_v19  ;;  %v1711_v37 = vrot.slane %v1710_v62, 4 }
  0xab   :  { %v3962_v3 = vpack.i.bf16 %v1661_v24, %v1661_v24  ;;  %v1682_v30 = vrot.slane %v1681_v9, 1  ;;  %v1702_v1 = vrot.slane %v1701_v52, 2  ;;  %v1729_v43 = vsel %vm3540_vm2, %v3447_v56, 4286644096 }
  0xac   :  { %v1692_v41 = vmax.f32 %v1690_v17, %v1691_v13  ;;  %v1721_v10 = vmax.f32 %v1719_v45, %v1720_v58  ;;  %v3966_v27 = vpack.i.bf16 %v1672_v54, %v1672_v54  ;;  %v1712_v42 = vmax.f32 %v1710_v62, %v1711_v37 }
  0xad   :  { %5774 = vst [vmem:[#allocation24_spill] sm:$0xff] %v3962_v3  ;;  %v1683_v8 = vmax.f32 %v1681_v9, %v1682_v30  ;;  %v1730_v26 = vunpack.i.l.bf16 %v1729_v43  ;;  %v1703_v24 = vmax.f32 %v1701_v52, %v1702_v1  ;;  %v1731_v19 = vunpack.i.h.bf16 %v1729_v43  ;;  %v3451_v52 = vld [vmem:[%s5658_s0 + $0x218] sm:$0x1f]   ;;  %v3452_v1 = vld [vmem:[%s5658_s0 + $0x220] sm:$0x1f]  }
  0xae   :  { %5775 = vst [vmem:[#allocation25_spill] sm:$0xff] %v3966_v27  ;;  %v1693_v34 = vrot.slane %v1692_v41, 1  ;;  %v1722_v0 = vrot.slane %v1721_v10, 4  ;;  %v1713_v17 = vrot.slane %v1712_v42, 2  ;;  %v1740_v13 = vsel %vm3540_vm2, %v3448_v22, 4286644096 }
  0xaf   :  { %v3971_v3 = vpack.i.bf16 %v1683_v8, %v1683_v8  ;;  %v1751_v56 = vsel %vm3540_vm2, %v3449_v50, 4286644096  ;;  %v1704_v62 = vrot.slane %v1703_v24, 1  ;;  %v1732_v58 = vmax.f32 %v1730_v26, %v1731_v19 }
  0xb0   :  { %v1694_v9 = vmax.f32 %v1692_v41, %v1693_v34  ;;  %v1723_v45 = vmax.f32 %v1721_v10, %v1722_v0  ;;  %v1714_v54 = vmax.f32 %v1712_v42, %v1713_v17  ;;  %v1741_v30 = vunpack.i.l.bf16 %v1740_v13 }
  0xb1   :  { %5776 = vst [vmem:[#allocation26_spill] sm:$0xff] %v3971_v3  ;;  %v1742_v37 = vunpack.i.h.bf16 %v1740_v13  ;;  %v1752_v27 = vunpack.i.l.bf16 %v1751_v56  ;;  %v1705_v43 = vmax.f32 %v1703_v24, %v1704_v62  ;;  %v1733_v41 = vrot.slane %v1732_v58, 4 }
  0xb2   :  { %v3983_v22 = vpack.i.bf16 %v1694_v9, %v1694_v9  ;;  %v1724_v50 = vrot.slane %v1723_v45, 2  ;;  %v1715_v8 = vrot.slane %v1714_v54, 1  ;;  %v1753_v26 = vunpack.i.h.bf16 %v1751_v56 }
  0xb3   :  { %v1743_v10 = vmax.f32 %v1741_v30, %v1742_v37  ;;  %v1762_v42 = vsel %vm3540_vm2, %v3450_v39, 4286644096  ;;  %v3987_v34 = vpack.i.bf16 %v1705_v43, %v1705_v43  ;;  %v1734_v19 = vmax.f32 %v1732_v58, %v1733_v41  ;;  %v3453_v39 = vld [vmem:[%s5658_s0 + $0x228] sm:$0x1f]  }
  0xb4   :  { %5777 = vst [vmem:[#allocation27_spill] sm:$0xff] %v3983_v22  ;;  %v1725_v0 = vmax.f32 %v1723_v45, %v1724_v50  ;;  %v1763_v17 = vunpack.i.l.bf16 %v1762_v42  ;;  %v1716_v13 = vmax.f32 %v1714_v54, %v1715_v8  ;;  %v1754_v55 = vmax.f32 %v1752_v27, %v1753_v26 }
  0xb5   :  { %5778 = vst [vmem:[#allocation28_spill] sm:$0xff] %v3987_v34  ;;  %v1744_v3 = vrot.slane %v1743_v10, 4  ;;  %v1764_v4 = vunpack.i.h.bf16 %v1762_v42  ;;  %v1735_v22 = vrot.slane %v1734_v19, 2  ;;  %v1773_v24 = vsel %vm3540_vm2, %v3451_v52, 4286644096 }
  0xb6   :  { %v1726_v9 = vrot.slane %v1725_v0, 1  ;;  %v1784_v56 = vsel %vm3540_vm2, %v3452_v1, 4286644096  ;;  %v3996_v62 = vpack.i.bf16 %v1716_v13, %v1716_v13  ;;  %v1755_v58 = vrot.slane %v1754_v55, 4  ;;  %v3454_v1 = vld [vmem:[%s5658_s0 + $0x230] sm:$0x1f]  }
  0xb7   :  { %v1745_v45 = vmax.f32 %v1743_v10, %v1744_v3  ;;  %v1765_v54 = vmax.f32 %v1763_v17, %v1764_v4  ;;  %v1736_v27 = vmax.f32 %v1734_v19, %v1735_v22  ;;  %v1774_v37 = vunpack.i.l.bf16 %v1773_v24 }
  0xb8   :  { %5779 = vst [vmem:[#allocation29_spill] sm:$0xff] %v3996_v62  ;;  %v1727_v30 = vmax.f32 %v1725_v0, %v1726_v9  ;;  %v1775_v43 = vunpack.i.h.bf16 %v1773_v24  ;;  %v1756_v41 = vmax.f32 %v1754_v55, %v1755_v58  ;;  %v1785_v52 = vunpack.i.l.bf16 %v1784_v56 }
  0xb9   :  { %v1746_v50 = vrot.slane %v1745_v45, 2  ;;  %v1766_v8 = vrot.slane %v1765_v54, 4  ;;  %v1737_v42 = vrot.slane %v1736_v27, 1  ;;  %v1786_v62 = vunpack.i.h.bf16 %v1784_v56 }
  0xba   :  { %v4001_v26 = vpack.i.bf16 %v1727_v30, %v1727_v30  ;;  %v1776_v13 = vmax.f32 %v1774_v37, %v1775_v43  ;;  %v1757_v10 = vrot.slane %v1756_v41, 2  ;;  %v1795_v22 = vsel %vm3540_vm2, %v3453_v39, 4286644096  ;;  %v3455_v30 = vld [vmem:[%s5658_s0 + $0x238] sm:$0x1f]  }
  0xbb   :  { %v1747_v3 = vmax.f32 %v1745_v45, %v1746_v50  ;;  %v1767_v4 = vmax.f32 %v1765_v54, %v1766_v8  ;;  %v1738_v0 = vmax.f32 %v1736_v27, %v1737_v42  ;;  %v1787_v55 = vmax.f32 %v1785_v52, %v1786_v62  ;;  %v3456_v42 = vld [vmem:[%s5658_s0 + $0x240] sm:$0x1f]  }
  0xbc   :  { %5780 = vst [vmem:[#allocation30_spill] sm:$0xff] %v4001_v26  ;;  %v1777_v19 = vrot.slane %v1776_v13, 4  ;;  %v1796_v17 = vunpack.i.l.bf16 %v1795_v22  ;;  %v1758_v24 = vmax.f32 %v1756_v41, %v1757_v10  ;;  %v1797_v34 = vunpack.i.h.bf16 %v1795_v22 }
  0xbd   :  { %v1748_v9 = vrot.slane %v1747_v3, 1  ;;  %v1768_v58 = vrot.slane %v1767_v4, 2  ;;  %v4008_v37 = vpack.i.bf16 %v1738_v0, %v1738_v0  ;;  %v1788_v45 = vrot.slane %v1787_v55, 4 }
  0xbe   :  { %v1778_v56 = vmax.f32 %v1776_v13, %v1777_v19  ;;  %v1806_v54 = vsel %vm3540_vm2, %v3454_v1, 4286644096  ;;  %v1759_v27 = vrot.slane %v1758_v24, 1  ;;  %v1798_v62 = vmax.f32 %v1796_v17, %v1797_v34  ;;  %v3457_v13 = vld [vmem:[%s5658_s0 + $0x248] sm:$0x1f]  }
  0xbf   :  { %5781 = vst [vmem:[#allocation31_spill] sm:$0xff] %v4008_v37  ;;  %v1749_v39 = vmax.f32 %v1747_v3, %v1748_v9  ;;  %v1769_v43 = vmax.f32 %v1767_v4, %v1768_v58  ;;  %v1789_v8 = vmax.f32 %v1787_v55, %v1788_v45  ;;  %v1807_v41 = vunpack.i.l.bf16 %v1806_v54  ;;  %v3458_v45 = vld [vmem:[%s5658_s0 + $0x250] sm:$0x1f]  }
  0xc0   :  { %v1779_v50 = vrot.slane %v1778_v56, 2  ;;  %v1808_v52 = vunpack.i.h.bf16 %v1806_v54  ;;  %v1760_v22 = vmax.f32 %v1758_v24, %v1759_v27  ;;  %v1799_v3 = vrot.slane %v1798_v62, 4 }
  0xc1   :  { %v4018_v10 = vpack.i.bf16 %v1749_v39, %v1749_v39  ;;  %v1770_v1 = vrot.slane %v1769_v43, 1  ;;  %v1790_v4 = vrot.slane %v1789_v8, 2  ;;  %v1817_v19 = vsel %vm3540_vm2, %v3455_v30, 4286644096 }
  0xc2   :  { %v1780_v0 = vmax.f32 %v1778_v56, %v1779_v50  ;;  %v1809_v34 = vmax.f32 %v1807_v41, %v1808_v52  ;;  %v4022_v55 = vpack.i.bf16 %v1760_v22, %v1760_v22  ;;  %v1800_v9 = vmax.f32 %v1798_v62, %v1799_v3 }
  0xc3   :  { %5782 = vst [vmem:[#allocation32_spill] sm:$0xff] %v4018_v10  ;;  %v1771_v17 = vmax.f32 %v1769_v43, %v1770_v1  ;;  %v1818_v58 = vunpack.i.l.bf16 %v1817_v19  ;;  %v1791_v39 = vmax.f32 %v1789_v8, %v1790_v4  ;;  %v1819_v27 = vunpack.i.h.bf16 %v1817_v19  ;;  %v3459_v8 = vld [vmem:[%s5658_s0 + $0x258] sm:$0x1f]   ;;  %v3460_v4 = vld [vmem:[%s5658_s0 + $0x260] sm:$0x1f]  }
  0xc4   :  { %5783 = vst [vmem:[#allocation33_spill] sm:$0xff] %v4022_v55  ;;  %v1781_v54 = vrot.slane %v1780_v0, 1  ;;  %v1810_v24 = vrot.slane %v1809_v34, 4  ;;  %v1801_v56 = vrot.slane %v1800_v9, 2  ;;  %v1828_v50 = vsel %vm3540_vm2, %v3456_v42, 4286644096 }
  0xc5   :  { %v4027_v10 = vpack.i.bf16 %v1771_v17, %v1771_v17  ;;  %v1839_v30 = vsel %vm3540_vm2, %v3457_v13, 4286644096  ;;  %v1792_v62 = vrot.slane %v1791_v39, 1  ;;  %v1820_v52 = vmax.f32 %v1818_v58, %v1819_v27 }
  0xc6   :  { %v1782_v43 = vmax.f32 %v1780_v0, %v1781_v54  ;;  %v1811_v41 = vmax.f32 %v1809_v34, %v1810_v24  ;;  %v1802_v22 = vmax.f32 %v1800_v9, %v1801_v56  ;;  %v1829_v1 = vunpack.i.l.bf16 %v1828_v50 }
  0xc7   :  { %5784 = vst [vmem:[#allocation34_spill] sm:$0xff] %v4027_v10  ;;  %v1830_v3 = vunpack.i.h.bf16 %v1828_v50  ;;  %v1840_v55 = vunpack.i.l.bf16 %v1839_v30  ;;  %v1793_v19 = vmax.f32 %v1791_v39, %v1792_v62  ;;  %v1821_v0 = vrot.slane %v1820_v52, 4 }
  0xc8   :  { %v4039_v42 = vpack.i.bf16 %v1782_v43, %v1782_v43  ;;  %v1812_v13 = vrot.slane %v1811_v41, 2  ;;  %v1803_v17 = vrot.slane %v1802_v22, 1  ;;  %v1841_v58 = vunpack.i.h.bf16 %v1839_v30 }
  0xc9   :  { %v1831_v34 = vmax.f32 %v1829_v1, %v1830_v3  ;;  %v1850_v9 = vsel %vm3540_vm2, %v3458_v45, 4286644096  ;;  %v4043_v54 = vpack.i.bf16 %v1793_v19, %v1793_v19  ;;  %v1822_v27 = vmax.f32 %v1820_v52, %v1821_v0  ;;  %v3461_v45 = vld [vmem:[%s5658_s0 + $0x268] sm:$0x1f]  }
  0xca   :  { %5785 = vst [vmem:[#allocation35_spill] sm:$0xff] %v4039_v42  ;;  %v1813_v24 = vmax.f32 %v1811_v41, %v1812_v13  ;;  %v1851_v56 = vunpack.i.l.bf16 %v1850_v9  ;;  %v1804_v50 = vmax.f32 %v1802_v22, %v1803_v17  ;;  %v1842_v37 = vmax.f32 %v1840_v55, %v1841_v58 }
  0xcb   :  { %5786 = vst [vmem:[#allocation36_spill] sm:$0xff] %v4043_v54  ;;  %v1832_v10 = vrot.slane %v1831_v34, 4  ;;  %v1852_v26 = vunpack.i.h.bf16 %v1850_v9  ;;  %v1823_v42 = vrot.slane %v1822_v27, 2  ;;  %v1861_v39 = vsel %vm3540_vm2, %v3459_v8, 4286644096 }
  0xcc   :  { %v1814_v43 = vrot.slane %v1813_v24, 1  ;;  %v1872_v30 = vsel %vm3540_vm2, %v3460_v4, 4286644096  ;;  %v4052_v62 = vpack.i.bf16 %v1804_v50, %v1804_v50  ;;  %v1843_v52 = vrot.slane %v1842_v37, 4  ;;  %v3462_v4 = vld [vmem:[%s5658_s0 + $0x270] sm:$0x1f]  }
  0xcd   :  { %v1833_v41 = vmax.f32 %v1831_v34, %v1832_v10  ;;  %v1853_v22 = vmax.f32 %v1851_v56, %v1852_v26  ;;  %v1824_v55 = vmax.f32 %v1822_v27, %v1823_v42  ;;  %v1862_v3 = vunpack.i.l.bf16 %v1861_v39 }
  0xce   :  { %5787 = vst [vmem:[#allocation37_spill] sm:$0xff] %v4052_v62  ;;  %v1815_v1 = vmax.f32 %v1813_v24, %v1814_v43  ;;  %v1863_v19 = vunpack.i.h.bf16 %v1861_v39  ;;  %v1844_v0 = vmax.f32 %v1842_v37, %v1843_v52  ;;  %v1873_v8 = vunpack.i.l.bf16 %v1872_v30 }
  0xcf   :  { %v1834_v13 = vrot.slane %v1833_v41, 2  ;;  %v1854_v17 = vrot.slane %v1853_v22, 4  ;;  %v1825_v9 = vrot.slane %v1824_v55, 1  ;;  %v1874_v62 = vunpack.i.h.bf16 %v1872_v30 }
  0xd0   :  { %v4057_v58 = vpack.i.bf16 %v1815_v1, %v1815_v1  ;;  %v1864_v50 = vmax.f32 %v1862_v3, %v1863_v19  ;;  %v1845_v34 = vrot.slane %v1844_v0, 2  ;;  %v1883_v42 = vsel %vm3540_vm2, %v3461_v45, 4286644096  ;;  %v3463_v1 = vld [vmem:[%s5658_s0 + $0x278] sm:$0x1f]  }
  0xd1   :  { %v1835_v10 = vmax.f32 %v1833_v41, %v1834_v13  ;;  %v1855_v26 = vmax.f32 %v1853_v22, %v1854_v17  ;;  %v1826_v24 = vmax.f32 %v1824_v55, %v1825_v9  ;;  %v1875_v37 = vmax.f32 %v1873_v8, %v1874_v62  ;;  %v3464_v9 = vld [vmem:[%s5658_s0 + $0x280] sm:$0x1f]  }
  0xd2   :  { %5788 = vst [vmem:[#allocation38_spill] sm:$0xff] %v4057_v58  ;;  %v1865_v27 = vrot.slane %v1864_v50, 4  ;;  %v1884_v56 = vunpack.i.l.bf16 %v1883_v42  ;;  %v1846_v39 = vmax.f32 %v1844_v0, %v1845_v34  ;;  %v1885_v54 = vunpack.i.h.bf16 %v1883_v42 }
  0xd3   :  { %v1836_v43 = vrot.slane %v1835_v10, 1  ;;  %v1856_v52 = vrot.slane %v1855_v26, 2  ;;  %v4064_v3 = vpack.i.bf16 %v1826_v24, %v1826_v24  ;;  %v1876_v41 = vrot.slane %v1875_v37, 4 }
  0xd4   :  { %v1866_v30 = vmax.f32 %v1864_v50, %v1865_v27  ;;  %v1894_v22 = vsel %vm3540_vm2, %v3462_v4, 4286644096  ;;  %v1847_v55 = vrot.slane %v1846_v39, 1  ;;  %v1886_v62 = vmax.f32 %v1884_v56, %v1885_v54  ;;  %v3465_v50 = vld [vmem:[%s5658_s0 + $0x288] sm:$0x1f]  }
  0xd5   :  { %5789 = vst [vmem:[#allocation39_spill] sm:$0xff] %v4064_v3  ;;  %v1837_v45 = vmax.f32 %v1835_v10, %v1836_v43  ;;  %v1857_v19 = vmax.f32 %v1855_v26, %v1856_v52  ;;  %v1877_v17 = vmax.f32 %v1875_v37, %v1876_v41  ;;  %v1895_v0 = vunpack.i.l.bf16 %v1894_v22  ;;  %v3466_v41 = vld [vmem:[%s5658_s0 + $0x290] sm:$0x1f]  }
  0xd6   :  { %v1867_v13 = vrot.slane %v1866_v30, 2  ;;  %v1896_v8 = vunpack.i.h.bf16 %v1894_v22  ;;  %v1848_v42 = vmax.f32 %v1846_v39, %v1847_v55  ;;  %v1887_v10 = vrot.slane %v1886_v62, 4 }
  0xd7   :  { %v4074_v34 = vpack.i.bf16 %v1837_v45, %v1837_v45  ;;  %v1858_v4 = vrot.slane %v1857_v19, 1  ;;  %v1878_v26 = vrot.slane %v1877_v17, 2  ;;  %v1905_v27 = vsel %vm3540_vm2, %v3463_v1, 4286644096 }
  0xd8   :  { %v1868_v24 = vmax.f32 %v1866_v30, %v1867_v13  ;;  %v1897_v54 = vmax.f32 %v1895_v0, %v1896_v8  ;;  %v4078_v37 = vpack.i.bf16 %v1848_v42, %v1848_v42  ;;  %v1888_v43 = vmax.f32 %v1886_v62, %v1887_v10 }
  0xd9   :  { %5790 = vst [vmem:[#allocation40_spill] sm:$0xff] %v4074_v34  ;;  %v1859_v56 = vmax.f32 %v1857_v19, %v1858_v4  ;;  %v1906_v52 = vunpack.i.l.bf16 %v1905_v27  ;;  %v1879_v45 = vmax.f32 %v1877_v17, %v1878_v26  ;;  %v1907_v55 = vunpack.i.h.bf16 %v1905_v27  ;;  %v3467_v17 = vld [vmem:[%s5658_s0 + $0x298] sm:$0x1f]   ;;  %v3468_v26 = vld [vmem:[%s5658_s0 + $0x2a0] sm:$0x1f]  }
  0xda   :  { %5791 = vst [vmem:[#allocation41_spill] sm:$0xff] %v4078_v37  ;;  %v1869_v22 = vrot.slane %v1868_v24, 1  ;;  %v1898_v39 = vrot.slane %v1897_v54, 4  ;;  %v1889_v30 = vrot.slane %v1888_v43, 2  ;;  %v1916_v13 = vsel %vm3540_vm2, %v3464_v9, 4286644096 }
  0xdb   :  { %v4083_v34 = vpack.i.bf16 %v1859_v56, %v1859_v56  ;;  %v1927_v1 = vsel %vm3540_vm2, %v3465_v50, 4286644096  ;;  %v1880_v62 = vrot.slane %v1879_v45, 1  ;;  %v1908_v8 = vmax.f32 %v1906_v52, %v1907_v55 }
  0xdc   :  { %v1870_v19 = vmax.f32 %v1868_v24, %v1869_v22  ;;  %v1899_v0 = vmax.f32 %v1897_v54, %v1898_v39  ;;  %v1890_v42 = vmax.f32 %v1888_v43, %v1889_v30  ;;  %v1917_v4 = vunpack.i.l.bf16 %v1916_v13 }
  0xdd   :  { %5792 = vst [vmem:[#allocation42_spill] sm:$0xff] %v4083_v34  ;;  %v1918_v10 = vunpack.i.h.bf16 %v1916_v13  ;;  %v1928_v37 = vunpack.i.l.bf16 %v1927_v1  ;;  %v1881_v27 = vmax.f32 %v1879_v45, %v1880_v62  ;;  %v1909_v24 = vrot.slane %v1908_v8, 4 }
  0xde   :  { %v4095_v9 = vpack.i.bf16 %v1870_v19, %v1870_v19  ;;  %v1900_v50 = vrot.slane %v1899_v0, 2  ;;  %v1891_v56 = vrot.slane %v1890_v42, 1  ;;  %v1929_v52 = vunpack.i.h.bf16 %v1927_v1 }
  0xdf   :  { %v1919_v54 = vmax.f32 %v1917_v4, %v1918_v10  ;;  %v1938_v43 = vsel %vm3540_vm2, %v3466_v41, 4286644096  ;;  %v4099_v22 = vpack.i.bf16 %v1881_v27, %v1881_v27  ;;  %v1910_v55 = vmax.f32 %v1908_v8, %v1909_v24  ;;  %v3469_v41 = vld [vmem:[%s5658_s0 + $0x2a8] sm:$0x1f]  }
  0xe0   :  { %5793 = vst [vmem:[#allocation43_spill] sm:$0xff] %v4095_v9  ;;  %v1901_v39 = vmax.f32 %v1899_v0, %v1900_v50  ;;  %v1939_v30 = vunpack.i.l.bf16 %v1938_v43  ;;  %v1892_v13 = vmax.f32 %v1890_v42, %v1891_v56  ;;  %v1930_v3 = vmax.f32 %v1928_v37, %v1929_v52 }
  0xe1   :  { %5794 = vst [vmem:[#allocation44_spill] sm:$0xff] %v4099_v22  ;;  %v1920_v34 = vrot.slane %v1919_v54, 4  ;;  %v1940_v58 = vunpack.i.h.bf16 %v1938_v43  ;;  %v1911_v9 = vrot.slane %v1910_v55, 2  ;;  %v1949_v45 = vsel %vm3540_vm2, %v3467_v17, 4286644096 }
  0xe2   :  { %v1902_v19 = vrot.slane %v1901_v39, 1  ;;  %v1960_v1 = vsel %vm3540_vm2, %v3468_v26, 4286644096  ;;  %v4108_v62 = vpack.i.bf16 %v1892_v13, %v1892_v13  ;;  %v1931_v8 = vrot.slane %v1930_v3, 4  ;;  %v3470_v26 = vld [vmem:[%s5658_s0 + $0x2b0] sm:$0x1f]  }
  0xe3   :  { %v1921_v0 = vmax.f32 %v1919_v54, %v1920_v34  ;;  %v1941_v42 = vmax.f32 %v1939_v30, %v1940_v58  ;;  %v1912_v37 = vmax.f32 %v1910_v55, %v1911_v9  ;;  %v1950_v10 = vunpack.i.l.bf16 %v1949_v45 }
  0xe4   :  { %5795 = vst [vmem:[#allocation45_spill] sm:$0xff] %v4108_v62  ;;  %v1903_v4 = vmax.f32 %v1901_v39, %v1902_v19  ;;  %v1951_v27 = vunpack.i.h.bf16 %v1949_v45  ;;  %v1932_v24 = vmax.f32 %v1930_v3, %v1931_v8  ;;  %v1961_v17 = vunpack.i.l.bf16 %v1960_v1 }
  0xe5   :  { %v1922_v50 = vrot.slane %v1921_v0, 2  ;;  %v1942_v56 = vrot.slane %v1941_v42, 4  ;;  %v1913_v43 = vrot.slane %v1912_v37, 1  ;;  %v1962_v62 = vunpack.i.h.bf16 %v1960_v1 }
  0xe6   :  { %v4113_v52 = vpack.i.bf16 %v1903_v4, %v1903_v4  ;;  %v1952_v13 = vmax.f32 %v1950_v10, %v1951_v27  ;;  %v1933_v54 = vrot.slane %v1932_v24, 2  ;;  %v1971_v9 = vsel %vm3540_vm2, %v3469_v41, 4286644096  ;;  %v3471_v4 = vld [vmem:[%s5658_s0 + $0x2b8] sm:$0x1f]  }
  0xe7   :  { %v1923_v34 = vmax.f32 %v1921_v0, %v1922_v50  ;;  %v1943_v58 = vmax.f32 %v1941_v42, %v1942_v56  ;;  %v1914_v39 = vmax.f32 %v1912_v37, %v1913_v43  ;;  %v1963_v3 = vmax.f32 %v1961_v17, %v1962_v62  ;;  %v3472_v43 = vld [vmem:[%s5658_s0 + $0x2c0] sm:$0x1f]  }
  0xe8   :  { %5796 = vst [vmem:[#allocation46_spill] sm:$0xff] %v4113_v52  ;;  %v1953_v55 = vrot.slane %v1952_v13, 4  ;;  %v1972_v30 = vunpack.i.l.bf16 %v1971_v9  ;;  %v1934_v45 = vmax.f32 %v1932_v24, %v1933_v54  ;;  %v1973_v22 = vunpack.i.h.bf16 %v1971_v9 }
  0xe9   :  { %v1924_v19 = vrot.slane %v1923_v34, 1  ;;  %v1944_v8 = vrot.slane %v1943_v58, 2  ;;  %v4120_v10 = vpack.i.bf16 %v1914_v39, %v1914_v39  ;;  %v1964_v0 = vrot.slane %v1963_v3, 4 }
  0xea   :  { %v1954_v1 = vmax.f32 %v1952_v13, %v1953_v55  ;;  %v1982_v42 = vsel %vm3540_vm2, %v3470_v26, 4286644096  ;;  %v1935_v37 = vrot.slane %v1934_v45, 1  ;;  %v1974_v62 = vmax.f32 %v1972_v30, %v1973_v22  ;;  %v3473_v13 = vld [vmem:[%s5658_s0 + $0x2c8] sm:$0x1f]  }
  0xeb   :  { %5797 = vst [vmem:[#allocation47_spill] sm:$0xff] %v4120_v10  ;;  %v1925_v41 = vmax.f32 %v1923_v34, %v1924_v19  ;;  %v1945_v27 = vmax.f32 %v1943_v58, %v1944_v8  ;;  %v1965_v56 = vmax.f32 %v1963_v3, %v1964_v0  ;;  %v1983_v24 = vunpack.i.l.bf16 %v1982_v42  ;;  %v3474_v0 = vld [vmem:[%s5658_s0 + $0x2d0] sm:$0x1f]  }
  0xec   :  { %v1955_v50 = vrot.slane %v1954_v1, 2  ;;  %v1984_v17 = vunpack.i.h.bf16 %v1982_v42  ;;  %v1936_v9 = vmax.f32 %v1934_v45, %v1935_v37  ;;  %v1975_v34 = vrot.slane %v1974_v62, 4 }
  0xed   :  { %v4130_v54 = vpack.i.bf16 %v1925_v41, %v1925_v41  ;;  %v1946_v26 = vrot.slane %v1945_v27, 1  ;;  %v1966_v58 = vrot.slane %v1965_v56, 2  ;;  %v1993_v55 = vsel %vm3540_vm2, %v3471_v4, 4286644096 }
  0xee   :  { %v1956_v39 = vmax.f32 %v1954_v1, %v1955_v50  ;;  %v1985_v22 = vmax.f32 %v1983_v24, %v1984_v17  ;;  %v4134_v3 = vpack.i.bf16 %v1936_v9, %v1936_v9  ;;  %v1976_v19 = vmax.f32 %v1974_v62, %v1975_v34 }
  0xef   :  { %5798 = vst [vmem:[#allocation48_spill] sm:$0xff] %v4130_v54  ;;  %v1947_v30 = vmax.f32 %v1945_v27, %v1946_v26  ;;  %v1994_v8 = vunpack.i.l.bf16 %v1993_v55  ;;  %v1967_v41 = vmax.f32 %v1965_v56, %v1966_v58  ;;  %v1995_v37 = vunpack.i.h.bf16 %v1993_v55  ;;  %v3475_v56 = vld [vmem:[%s5658_s0 + $0x2d8] sm:$0x1f]   ;;  %v3476_v58 = vld [vmem:[%s5658_s0 + $0x2e0] sm:$0x1f]  }
  0xf0   :  { %5799 = vst [vmem:[#allocation49_spill] sm:$0xff] %v4134_v3  ;;  %v1957_v42 = vrot.slane %v1956_v39, 1  ;;  %v1986_v45 = vrot.slane %v1985_v22, 4  ;;  %v1977_v1 = vrot.slane %v1976_v19, 2  ;;  %v2004_v50 = vsel %vm3540_vm2, %v3472_v43, 4286644096 }
  0xf1   :  { %v4139_v54 = vpack.i.bf16 %v1947_v30, %v1947_v30  ;;  %v2015_v4 = vsel %vm3540_vm2, %v3473_v13, 4286644096  ;;  %v1968_v62 = vrot.slane %v1967_v41, 1  ;;  %v1996_v17 = vmax.f32 %v1994_v8, %v1995_v37 }
  0xf2   :  { %v1958_v27 = vmax.f32 %v1956_v39, %v1957_v42  ;;  %v1987_v24 = vmax.f32 %v1985_v22, %v1986_v45  ;;  %v1978_v9 = vmax.f32 %v1976_v19, %v1977_v1  ;;  %v2005_v26 = vunpack.i.l.bf16 %v2004_v50 }
  0xf3   :  { %5800 = vst [vmem:[#allocation50_spill] sm:$0xff] %v4139_v54  ;;  %v2006_v34 = vunpack.i.h.bf16 %v2004_v50  ;;  %v2016_v3 = vunpack.i.l.bf16 %v2015_v4  ;;  %v1969_v55 = vmax.f32 %v1967_v41, %v1968_v62  ;;  %v1997_v39 = vrot.slane %v1996_v17, 4 }
  0xf4   :  { %v4151_v43 = vpack.i.bf16 %v1958_v27, %v1958_v27  ;;  %v1988_v13 = vrot.slane %v1987_v24, 2  ;;  %v1979_v30 = vrot.slane %v1978_v9, 1  ;;  %v2017_v8 = vunpack.i.h.bf16 %v2015_v4 }
  0xf5   :  { %v2007_v22 = vmax.f32 %v2005_v26, %v2006_v34  ;;  %v2026_v19 = vsel %vm3540_vm2, %v3474_v0, 4286644096  ;;  %v4155_v42 = vpack.i.bf16 %v1969_v55, %v1969_v55  ;;  %v1998_v37 = vmax.f32 %v1996_v17, %v1997_v39  ;;  %v3477_v0 = vld [vmem:[%s5658_s0 + $0x2e8] sm:$0x1f]  }
  0xf6   :  { %5801 = vst [vmem:[#allocation51_spill] sm:$0xff] %v4151_v43  ;;  %v1989_v45 = vmax.f32 %v1987_v24, %v1988_v13  ;;  %v2027_v1 = vunpack.i.l.bf16 %v2026_v19  ;;  %v1980_v50 = vmax.f32 %v1978_v9, %v1979_v30  ;;  %v2018_v10 = vmax.f32 %v2016_v3, %v2017_v8 }
  0xf7   :  { %5802 = vst [vmem:[#allocation52_spill] sm:$0xff] %v4155_v42  ;;  %v2008_v54 = vrot.slane %v2007_v22, 4  ;;  %v2028_v52 = vunpack.i.h.bf16 %v2026_v19  ;;  %v1999_v43 = vrot.slane %v1998_v37, 2  ;;  %v2037_v41 = vsel %vm3540_vm2, %v3475_v56, 4286644096 }
  0xf8   :  { %v1990_v27 = vrot.slane %v1989_v45, 1  ;;  %v2048_v4 = vsel %vm3540_vm2, %v3476_v58, 4286644096  ;;  %v4164_v62 = vpack.i.bf16 %v1980_v50, %v1980_v50  ;;  %v2019_v17 = vrot.slane %v2018_v10, 4  ;;  %v3478_v58 = vld [vmem:[%s5658_s0 + $0x2f0] sm:$0x1f]  }
  0xf9   :  { %v2009_v24 = vmax.f32 %v2007_v22, %v2008_v54  ;;  %v2029_v9 = vmax.f32 %v2027_v1, %v2028_v52  ;;  %v2000_v3 = vmax.f32 %v1998_v37, %v1999_v43  ;;  %v2038_v34 = vunpack.i.l.bf16 %v2037_v41 }
  0xfa   :  { %5803 = vst [vmem:[#allocation53_spill] sm:$0xff] %v4164_v62  ;;  %v1991_v26 = vmax.f32 %v1989_v45, %v1990_v27  ;;  %v2039_v55 = vunpack.i.h.bf16 %v2037_v41  ;;  %v2020_v39 = vmax.f32 %v2018_v10, %v2019_v17  ;;  %v2049_v56 = vunpack.i.l.bf16 %v2048_v4 }
  0xfb   :  { %v2010_v13 = vrot.slane %v2009_v24, 2  ;;  %v2030_v30 = vrot.slane %v2029_v9, 4  ;;  %v2001_v19 = vrot.slane %v2000_v3, 1  ;;  %v2050_v62 = vunpack.i.h.bf16 %v2048_v4 }
  0xfc   :  { %v4169_v8 = vpack.i.bf16 %v1991_v26, %v1991_v26  ;;  %v2040_v50 = vmax.f32 %v2038_v34, %v2039_v55  ;;  %v2021_v22 = vrot.slane %v2020_v39, 2  ;;  %v2059_v43 = vsel %vm3540_vm2, %v3477_v0, 4286644096  ;;  %v3479_v26 = vld [vmem:[%s5658_s0 + $0x2f8] sm:$0x1f]  }
  0xfd   :  { %v2011_v54 = vmax.f32 %v2009_v24, %v2010_v13  ;;  %v2031_v52 = vmax.f32 %v2029_v9, %v2030_v30  ;;  %v2002_v45 = vmax.f32 %v2000_v3, %v2001_v19  ;;  %v2051_v10 = vmax.f32 %v2049_v56, %v2050_v62  ;;  %v3480_v19 = vld [vmem:[%s5658_s0 + $0x300] sm:$0x1f]  }
  0xfe   :  { %5804 = vst [vmem:[#allocation54_spill] sm:$0xff] %v4169_v8  ;;  %v2041_v37 = vrot.slane %v2040_v50, 4  ;;  %v2060_v1 = vunpack.i.l.bf16 %v2059_v43  ;;  %v2022_v41 = vmax.f32 %v2020_v39, %v2021_v22  ;;  %v2061_v42 = vunpack.i.h.bf16 %v2059_v43 }
  0xff   :  { %v2012_v27 = vrot.slane %v2011_v54, 1  ;;  %v2032_v17 = vrot.slane %v2031_v52, 2  ;;  %v4176_v34 = vpack.i.bf16 %v2002_v45, %v2002_v45  ;;  %v2052_v24 = vrot.slane %v2051_v10, 4 }
 0x100   :  { %v2042_v4 = vmax.f32 %v2040_v50, %v2041_v37  ;;  %v2070_v9 = vsel %vm3540_vm2, %v3478_v58, 4286644096  ;;  %v2023_v3 = vrot.slane %v2022_v41, 1  ;;  %v2062_v62 = vmax.f32 %v2060_v1, %v2061_v42  ;;  %v3481_v50 = vld [vmem:[%s5658_s0 + $0x308] sm:$0x1f]  }
 0x101   :  { %5805 = vst [vmem:[#allocation55_spill] sm:$0xff] %v4176_v34  ;;  %v2013_v0 = vmax.f32 %v2011_v54, %v2012_v27  ;;  %v2033_v55 = vmax.f32 %v2031_v52, %v2032_v17  ;;  %v2053_v30 = vmax.f32 %v2051_v10, %v2052_v24  ;;  %v2071_v39 = vunpack.i.l.bf16 %v2070_v9  ;;  %v3482_v24 = vld [vmem:[%s5658_s0 + $0x310] sm:$0x1f]  }
 0x102   :  { %v2043_v13 = vrot.slane %v2042_v4, 2  ;;  %v2072_v56 = vunpack.i.h.bf16 %v2070_v9  ;;  %v2024_v43 = vmax.f32 %v2022_v41, %v2023_v3  ;;  %v2063_v54 = vrot.slane %v2062_v62, 4 }
 0x103   :  { %v4186_v22 = vpack.i.bf16 %v2013_v0, %v2013_v0  ;;  %v2034_v58 = vrot.slane %v2033_v55, 1  ;;  %v2054_v52 = vrot.slane %v2053_v30, 2  ;;  %v2081_v37 = vsel %vm3540_vm2, %v3479_v26, 4286644096 }
 0x104   :  { %v2044_v45 = vmax.f32 %v2042_v4, %v2043_v13  ;;  %v2073_v42 = vmax.f32 %v2071_v39, %v2072_v56  ;;  %v4190_v10 = vpack.i.bf16 %v2024_v43, %v2024_v43  ;;  %v2064_v27 = vmax.f32 %v2062_v62, %v2063_v54 }
 0x105   :  { %5806 = vst [vmem:[#allocation56_spill] sm:$0xff] %v4186_v22  ;;  %v2035_v1 = vmax.f32 %v2033_v55, %v2034_v58  ;;  %v2082_v17 = vunpack.i.l.bf16 %v2081_v37  ;;  %v2055_v0 = vmax.f32 %v2053_v30, %v2054_v52  ;;  %v2083_v3 = vunpack.i.h.bf16 %v2081_v37  ;;  %v3483_v30 = vld [vmem:[%s5658_s0 + $0x318] sm:$0x1f]   ;;  %v3484_v52 = vld [vmem:[%s5658_s0 + $0x320] sm:$0x1f]  }
 0x106   :  { %5807 = vst [vmem:[#allocation57_spill] sm:$0xff] %v4190_v10  ;;  %v2045_v9 = vrot.slane %v2044_v45, 1  ;;  %v2074_v41 = vrot.slane %v2073_v42, 4  ;;  %v2065_v4 = vrot.slane %v2064_v27, 2  ;;  %v2092_v13 = vsel %vm3540_vm2, %v3480_v19, 4286644096 }
 0x107   :  { %v4195_v22 = vpack.i.bf16 %v2035_v1, %v2035_v1  ;;  %v2103_v26 = vsel %vm3540_vm2, %v3481_v50, 4286644096  ;;  %v2056_v62 = vrot.slane %v2055_v0, 1  ;;  %v2084_v56 = vmax.f32 %v2082_v17, %v2083_v3 }
 0x108   :  { %v2046_v55 = vmax.f32 %v2044_v45, %v2045_v9  ;;  %v2075_v39 = vmax.f32 %v2073_v42, %v2074_v41  ;;  %v2066_v43 = vmax.f32 %v2064_v27, %v2065_v4  ;;  %v2093_v58 = vunpack.i.l.bf16 %v2092_v13 }
 0x109   :  { %5808 = vst [vmem:[#allocation58_spill] sm:$0xff] %v4195_v22  ;;  %v2094_v54 = vunpack.i.h.bf16 %v2092_v13  ;;  %v2104_v10 = vunpack.i.l.bf16 %v2103_v26  ;;  %v2057_v37 = vmax.f32 %v2055_v0, %v2056_v62  ;;  %v2085_v45 = vrot.slane %v2084_v56, 4 }
 0x10a   :  { %v4207_v19 = vpack.i.bf16 %v2046_v55, %v2046_v55  ;;  %v2076_v50 = vrot.slane %v2075_v39, 2  ;;  %v2067_v1 = vrot.slane %v2066_v43, 1  ;;  %v2105_v17 = vunpack.i.h.bf16 %v2103_v26 }
 0x10b   :  { %v2095_v42 = vmax.f32 %v2093_v58, %v2094_v54  ;;  %v2114_v27 = vsel %vm3540_vm2, %v3482_v24, 4286644096  ;;  %v4211_v9 = vpack.i.bf16 %v2057_v37, %v2057_v37  ;;  %v2086_v3 = vmax.f32 %v2084_v56, %v2085_v45  ;;  %v3485_v24 = vld [vmem:[%s5658_s0 + $0x328] sm:$0x1f]  }
 0x10c   :  { %5809 = vst [vmem:[#allocation59_spill] sm:$0xff] %v4207_v19  ;;  %v2077_v41 = vmax.f32 %v2075_v39, %v2076_v50  ;;  %v2115_v4 = vunpack.i.l.bf16 %v2114_v27  ;;  %v2068_v13 = vmax.f32 %v2066_v43, %v2067_v1  ;;  %v2106_v34 = vmax.f32 %v2104_v10, %v2105_v17 }
 0x10d   :  { %5810 = vst [vmem:[#allocation60_spill] sm:$0xff] %v4211_v9  ;;  %v2096_v22 = vrot.slane %v2095_v42, 4  ;;  %v2116_v8 = vunpack.i.h.bf16 %v2114_v27  ;;  %v2087_v19 = vrot.slane %v2086_v3, 2  ;;  %v2125_v0 = vsel %vm3540_vm2, %v3483_v30, 4286644096 }
 0x10e   :  { %v2078_v55 = vrot.slane %v2077_v41, 1  ;;  %v2136_v26 = vsel %vm3540_vm2, %v3484_v52, 4286644096  ;;  %v4220_v62 = vpack.i.bf16 %v2068_v13, %v2068_v13  ;;  %v2107_v56 = vrot.slane %v2106_v34, 4  ;;  %v3486_v52 = vld [vmem:[%s5658_s0 + $0x330] sm:$0x1f]  }
 0x10f   :  { %v2097_v39 = vmax.f32 %v2095_v42, %v2096_v22  ;;  %v2117_v43 = vmax.f32 %v2115_v4, %v2116_v8  ;;  %v2088_v10 = vmax.f32 %v2086_v3, %v2087_v19  ;;  %v2126_v54 = vunpack.i.l.bf16 %v2125_v0 }
 0x110   :  { %5811 = vst [vmem:[#allocation61_spill] sm:$0xff] %v4220_v62  ;;  %v2079_v58 = vmax.f32 %v2077_v41, %v2078_v55  ;;  %v2127_v37 = vunpack.i.h.bf16 %v2125_v0  ;;  %v2108_v45 = vmax.f32 %v2106_v34, %v2107_v56  ;;  %v2137_v30 = vunpack.i.l.bf16 %v2136_v26 }
 0x111   :  { %v2098_v50 = vrot.slane %v2097_v39, 2  ;;  %v2118_v1 = vrot.slane %v2117_v43, 4  ;;  %v2089_v27 = vrot.slane %v2088_v10, 1  ;;  %v2138_v62 = vunpack.i.h.bf16 %v2136_v26 }
 0x112   :  { %v4225_v17 = vpack.i.bf16 %v2079_v58, %v2079_v58  ;;  %v2128_v13 = vmax.f32 %v2126_v54, %v2127_v37  ;;  %v2109_v42 = vrot.slane %v2108_v45, 2  ;;  %v2147_v19 = vsel %vm3540_vm2, %v3485_v24, 4286644096  ;;  %v3487_v58 = vld [vmem:[%s5658_s0 + $0x338] sm:$0x1f]  }
 0x113   :  { %v2099_v22 = vmax.f32 %v2097_v39, %v2098_v50  ;;  %v2119_v8 = vmax.f32 %v2117_v43, %v2118_v1  ;;  %v2090_v41 = vmax.f32 %v2088_v10, %v2089_v27  ;;  %v2139_v34 = vmax.f32 %v2137_v30, %v2138_v62  ;;  %v3488_v27 = vld [vmem:[%s5658_s0 + $0x340] sm:$0x1f]  }
 0x114   :  { %5812 = vst [vmem:[#allocation62_spill] sm:$0xff] %v4225_v17  ;;  %v2129_v3 = vrot.slane %v2128_v13, 4  ;;  %v2148_v4 = vunpack.i.l.bf16 %v2147_v19  ;;  %v2110_v0 = vmax.f32 %v2108_v45, %v2109_v42  ;;  %v2149_v9 = vunpack.i.h.bf16 %v2147_v19 }
 0x115   :  { %v2100_v55 = vrot.slane %v2099_v22, 1  ;;  %v2120_v56 = vrot.slane %v2119_v8, 2  ;;  %v4232_v54 = vpack.i.bf16 %v2090_v41, %v2090_v41  ;;  %v2140_v39 = vrot.slane %v2139_v34, 4 }
 0x116   :  { %v2130_v26 = vmax.f32 %v2128_v13, %v2129_v3  ;;  %v2158_v43 = vsel %vm3540_vm2, %v3486_v52, 4286644096  ;;  %v2111_v10 = vrot.slane %v2110_v0, 1  ;;  %v2150_v62 = vmax.f32 %v2148_v4, %v2149_v9  ;;  %v3489_v13 = vld [vmem:[%s5658_s0 + $0x348] sm:$0x1f]  }
 0x117   :  { %5813 = vst [vmem:[#allocation63_spill] sm:$0xff] %v4232_v54  ;;  %v2101_v24 = vmax.f32 %v2099_v22, %v2100_v55  ;;  %v2121_v37 = vmax.f32 %v2119_v8, %v2120_v56  ;;  %v2141_v1 = vmax.f32 %v2139_v34, %v2140_v39  ;;  %v2159_v45 = vunpack.i.l.bf16 %v2158_v43  ;;  %v3490_v39 = vld [vmem:[%s5658_s0 + $0x350] sm:$0x1f]  }
 0x118   :  { %v2131_v50 = vrot.slane %v2130_v26, 2  ;;  %v2160_v30 = vunpack.i.h.bf16 %v2158_v43  ;;  %v2112_v19 = vmax.f32 %v2110_v0, %v2111_v10  ;;  %v2151_v22 = vrot.slane %v2150_v62, 4 }
 0x119   :  { %v4242_v42 = vpack.i.bf16 %v2101_v24, %v2101_v24  ;;  %v2122_v52 = vrot.slane %v2121_v37, 1  ;;  %v2142_v8 = vrot.slane %v2141_v1, 2  ;;  %v2169_v3 = vsel %vm3540_vm2, %v3487_v58, 4286644096 }
 0x11a   :  { %v2132_v41 = vmax.f32 %v2130_v26, %v2131_v50  ;;  %v2161_v9 = vmax.f32 %v2159_v45, %v2160_v30  ;;  %v4246_v34 = vpack.i.bf16 %v2112_v19, %v2112_v19  ;;  %v2152_v55 = vmax.f32 %v2150_v62, %v2151_v22 }
 0x11b   :  { %5814 = vst [vmem:[#allocation64_spill] sm:$0xff] %v4242_v42  ;;  %v2123_v4 = vmax.f32 %v2121_v37, %v2122_v52  ;;  %v2170_v56 = vunpack.i.l.bf16 %v2169_v3  ;;  %v2143_v24 = vmax.f32 %v2141_v1, %v2142_v8  ;;  %v2171_v10 = vunpack.i.h.bf16 %v2169_v3  ;;  %v3491_v1 = vld [vmem:[%s5658_s0 + $0x358] sm:$0x1f]   ;;  %v3492_v8 = vld [vmem:[%s5658_s0 + $0x360] sm:$0x1f]  }
 0x11c   :  { %5815 = vst [vmem:[#allocation65_spill] sm:$0xff] %v4246_v34  ;;  %v2133_v43 = vrot.slane %v2132_v41, 1  ;;  %v2162_v0 = vrot.slane %v2161_v9, 4  ;;  %v2153_v26 = vrot.slane %v2152_v55, 2  ;;  %v2180_v50 = vsel %vm3540_vm2, %v3488_v27, 4286644096 }
 0x11d   :  { %v4251_v42 = vpack.i.bf16 %v2123_v4, %v2123_v4  ;;  %v2191_v58 = vsel %vm3540_vm2, %v3489_v13, 4286644096  ;;  %v2144_v62 = vrot.slane %v2143_v24, 1  ;;  %v2172_v30 = vmax.f32 %v2170_v56, %v2171_v10 }
 0x11e   :  { %v2134_v37 = vmax.f32 %v2132_v41, %v2133_v43  ;;  %v2163_v45 = vmax.f32 %v2161_v9, %v2162_v0  ;;  %v2154_v19 = vmax.f32 %v2152_v55, %v2153_v26  ;;  %v2181_v52 = vunpack.i.l.bf16 %v2180_v50 }
 0x11f   :  { %5816 = vst [vmem:[#allocation66_spill] sm:$0xff] %v4251_v42  ;;  %v2182_v22 = vunpack.i.h.bf16 %v2180_v50  ;;  %v2192_v34 = vunpack.i.l.bf16 %v2191_v58  ;;  %v2145_v3 = vmax.f32 %v2143_v24, %v2144_v62  ;;  %v2173_v41 = vrot.slane %v2172_v30, 4 }
 0x120   :  { %v4263_v27 = vpack.i.bf16 %v2134_v37, %v2134_v37  ;;  %v2164_v13 = vrot.slane %v2163_v45, 2  ;;  %v2155_v4 = vrot.slane %v2154_v19, 1  ;;  %v2193_v56 = vunpack.i.h.bf16 %v2191_v58 }
 0x121   :  { %v2183_v9 = vmax.f32 %v2181_v52, %v2182_v22  ;;  %v2202_v55 = vsel %vm3540_vm2, %v3490_v39, 4286644096  ;;  %v4267_v43 = vpack.i.bf16 %v2145_v3, %v2145_v3  ;;  %v2174_v10 = vmax.f32 %v2172_v30, %v2173_v41  ;;  %v3493_v39 = vld [vmem:[%s5658_s0 + $0x368] sm:$0x1f]  }
 0x122   :  { %5817 = vst [vmem:[#allocation67_spill] sm:$0xff] %v4263_v27  ;;  %v2165_v0 = vmax.f32 %v2163_v45, %v2164_v13  ;;  %v2203_v26 = vunpack.i.l.bf16 %v2202_v55  ;;  %v2156_v50 = vmax.f32 %v2154_v19, %v2155_v4  ;;  %v2194_v54 = vmax.f32 %v2192_v34, %v2193_v56 }
 0x123   :  { %5818 = vst [vmem:[#allocation68_spill] sm:$0xff] %v4267_v43  ;;  %v2184_v42 = vrot.slane %v2183_v9, 4  ;;  %v2204_v17 = vunpack.i.h.bf16 %v2202_v55  ;;  %v2175_v27 = vrot.slane %v2174_v10, 2  ;;  %v2213_v24 = vsel %vm3540_vm2, %v3491_v1, 4286644096 }
 0x124   :  { %v2166_v37 = vrot.slane %v2165_v0, 1  ;;  %v2224_v58 = vsel %vm3540_vm2, %v3492_v8, 4286644096  ;;  %v4276_v62 = vpack.i.bf16 %v2156_v50, %v2156_v50  ;;  %v2195_v30 = vrot.slane %v2194_v54, 4  ;;  %v3494_v8 = vld [vmem:[%s5658_s0 + $0x370] sm:$0x1f]  }
 0x125   :  { %v2185_v45 = vmax.f32 %v2183_v9, %v2184_v42  ;;  %v2205_v19 = vmax.f32 %v2203_v26, %v2204_v17  ;;  %v2176_v34 = vmax.f32 %v2174_v10, %v2175_v27  ;;  %v2214_v22 = vunpack.i.l.bf16 %v2213_v24 }
 0x126   :  { %5819 = vst [vmem:[#allocation69_spill] sm:$0xff] %v4276_v62  ;;  %v2167_v52 = vmax.f32 %v2165_v0, %v2166_v37  ;;  %v2215_v3 = vunpack.i.h.bf16 %v2213_v24  ;;  %v2196_v41 = vmax.f32 %v2194_v54, %v2195_v30  ;;  %v2225_v1 = vunpack.i.l.bf16 %v2224_v58 }
 0x127   :  { %v2186_v13 = vrot.slane %v2185_v45, 2  ;;  %v2206_v4 = vrot.slane %v2205_v19, 4  ;;  %v2177_v55 = vrot.slane %v2176_v34, 1  ;;  %v2226_v62 = vunpack.i.h.bf16 %v2224_v58 }
 0x128   :  { %v4281_v56 = vpack.i.bf16 %v2167_v52, %v2167_v52  ;;  %v2216_v50 = vmax.f32 %v2214_v22, %v2215_v3  ;;  %v2197_v9 = vrot.slane %v2196_v41, 2  ;;  %v2235_v27 = vsel %vm3540_vm2, %v3493_v39, 4286644096  ;;  %v3495_v52 = vld [vmem:[%s5658_s0 + $0x378] sm:$0x1f]  }
 0x129   :  { %v2187_v42 = vmax.f32 %v2185_v45, %v2186_v13  ;;  %v2207_v17 = vmax.f32 %v2205_v19, %v2206_v4  ;;  %v2178_v0 = vmax.f32 %v2176_v34, %v2177_v55  ;;  %v2227_v54 = vmax.f32 %v2225_v1, %v2226_v62  ;;  %v3496_v55 = vld [vmem:[%s5658_s0 + $0x380] sm:$0x1f]  }
 0x12a   :  { %5820 = vst [vmem:[#allocation70_spill] sm:$0xff] %v4281_v56  ;;  %v2217_v10 = vrot.slane %v2216_v50, 4  ;;  %v2236_v26 = vunpack.i.l.bf16 %v2235_v27  ;;  %v2198_v24 = vmax.f32 %v2196_v41, %v2197_v9  ;;  %v2237_v43 = vunpack.i.h.bf16 %v2235_v27 }
 0x12b   :  { %v2188_v37 = vrot.slane %v2187_v42, 1  ;;  %v2208_v30 = vrot.slane %v2207_v17, 2  ;;  %v4288_v22 = vpack.i.bf16 %v2178_v0, %v2178_v0  ;;  %v2228_v45 = vrot.slane %v2227_v54, 4 }
 0x12c   :  { %v2218_v58 = vmax.f32 %v2216_v50, %v2217_v10  ;;  %v2246_v19 = vsel %vm3540_vm2, %v3494_v8, 4286644096  ;;  %v2199_v34 = vrot.slane %v2198_v24, 1  ;;  %v2238_v62 = vmax.f32 %v2236_v26, %v2237_v43  ;;  %v3497_v50 = vld [vmem:[%s5658_s0 + $0x388] sm:$0x1f]  }
 0x12d   :  { %5821 = vst [vmem:[#allocation71_spill] sm:$0xff] %v4288_v22  ;;  %v2189_v39 = vmax.f32 %v2187_v42, %v2188_v37  ;;  %v2209_v3 = vmax.f32 %v2207_v17, %v2208_v30  ;;  %v2229_v4 = vmax.f32 %v2227_v54, %v2228_v45  ;;  %v2247_v41 = vunpack.i.l.bf16 %v2246_v19  ;;  %v3498_v45 = vld [vmem:[%s5658_s0 + $0x390] sm:$0x1f]  }
 0x12e   :  { %v2219_v13 = vrot.slane %v2218_v58, 2  ;;  %v2248_v1 = vunpack.i.h.bf16 %v2246_v19  ;;  %v2200_v27 = vmax.f32 %v2198_v24, %v2199_v34  ;;  %v2239_v42 = vrot.slane %v2238_v62, 4 }
 0x12f   :  { %v4298_v9 = vpack.i.bf16 %v2189_v39, %v2189_v39  ;;  %v2210_v8 = vrot.slane %v2209_v3, 1  ;;  %v2230_v17 = vrot.slane %v2229_v4, 2  ;;  %v2257_v10 = vsel %vm3540_vm2, %v3495_v52, 4286644096 }
 0x130   :  { %v2220_v0 = vmax.f32 %v2218_v58, %v2219_v13  ;;  %v2249_v43 = vmax.f32 %v2247_v41, %v2248_v1  ;;  %v4302_v54 = vpack.i.bf16 %v2200_v27, %v2200_v27  ;;  %v2240_v37 = vmax.f32 %v2238_v62, %v2239_v42 }
 0x131   :  { %5822 = vst [vmem:[#allocation72_spill] sm:$0xff] %v4298_v9  ;;  %v2211_v26 = vmax.f32 %v2209_v3, %v2210_v8  ;;  %v2258_v30 = vunpack.i.l.bf16 %v2257_v10  ;;  %v2231_v39 = vmax.f32 %v2229_v4, %v2230_v17  ;;  %v2259_v34 = vunpack.i.h.bf16 %v2257_v10  ;;  %v3499_v4 = vld [vmem:[%s5658_s0 + $0x398] sm:$0x1f]   ;;  %v3500_v17 = vld [vmem:[%s5658_s0 + $0x3a0] sm:$0x1f]  }
 0x132   :  { %5823 = vst [vmem:[#allocation73_spill] sm:$0xff] %v4302_v54  ;;  %v2221_v19 = vrot.slane %v2220_v0, 1  ;;  %v2250_v24 = vrot.slane %v2249_v43, 4  ;;  %v2241_v58 = vrot.slane %v2240_v37, 2  ;;  %v2268_v13 = vsel %vm3540_vm2, %v3496_v55, 4286644096 }
 0x133   :  { %v4307_v9 = vpack.i.bf16 %v2211_v26, %v2211_v26  ;;  %v2279_v52 = vsel %vm3540_vm2, %v3497_v50, 4286644096  ;;  %v2232_v62 = vrot.slane %v2231_v39, 1  ;;  %v2260_v1 = vmax.f32 %v2258_v30, %v2259_v34 }
 0x134   :  { %v2222_v3 = vmax.f32 %v2220_v0, %v2221_v19  ;;  %v2251_v41 = vmax.f32 %v2249_v43, %v2250_v24  ;;  %v2242_v27 = vmax.f32 %v2240_v37, %v2241_v58  ;;  %v2269_v8 = vunpack.i.l.bf16 %v2268_v13 }
 0x135   :  { %5824 = vst [vmem:[#allocation74_spill] sm:$0xff] %v4307_v9  ;;  %v2270_v42 = vunpack.i.h.bf16 %v2268_v13  ;;  %v2280_v54 = vunpack.i.l.bf16 %v2279_v52  ;;  %v2233_v10 = vmax.f32 %v2231_v39, %v2232_v62  ;;  %v2261_v0 = vrot.slane %v2260_v1, 4 }
 0x136   :  { %v4319_v55 = vpack.i.bf16 %v2222_v3, %v2222_v3  ;;  %v2252_v50 = vrot.slane %v2251_v41, 2  ;;  %v2243_v26 = vrot.slane %v2242_v27, 1  ;;  %v2281_v30 = vunpack.i.h.bf16 %v2279_v52 }
 0x137   :  { %v2271_v43 = vmax.f32 %v2269_v8, %v2270_v42  ;;  %v2290_v37 = vsel %vm3540_vm2, %v3498_v45, 4286644096  ;;  %v4323_v19 = vpack.i.bf16 %v2233_v10, %v2233_v10  ;;  %v2262_v34 = vmax.f32 %v2260_v1, %v2261_v0  ;;  %v3501_v45 = vld [vmem:[%s5658_s0 + $0x3a8] sm:$0x1f]  }
 0x138   :  { %5825 = vst [vmem:[#allocation75_spill] sm:$0xff] %v4319_v55  ;;  %v2253_v24 = vmax.f32 %v2251_v41, %v2252_v50  ;;  %v2291_v58 = vunpack.i.l.bf16 %v2290_v37  ;;  %v2244_v13 = vmax.f32 %v2242_v27, %v2243_v26  ;;  %v2282_v22 = vmax.f32 %v2280_v54, %v2281_v30 }
 0x139   :  { %5826 = vst [vmem:[#allocation76_spill] sm:$0xff] %v4323_v19  ;;  %v2272_v9 = vrot.slane %v2271_v43, 4  ;;  %v2292_v56 = vunpack.i.h.bf16 %v2290_v37  ;;  %v2263_v55 = vrot.slane %v2262_v34, 2  ;;  %v2301_v39 = vsel %vm3540_vm2, %v3499_v4, 4286644096 }
 0x13a   :  { %v2254_v3 = vrot.slane %v2253_v24, 1  ;;  %v2312_v52 = vsel %vm3540_vm2, %v3500_v17, 4286644096  ;;  %v4332_v62 = vpack.i.bf16 %v2244_v13, %v2244_v13  ;;  %v2283_v1 = vrot.slane %v2282_v22, 4  ;;  %v3502_v17 = vld [vmem:[%s5658_s0 + $0x3b0] sm:$0x1f]  }
 0x13b   :  { %v2273_v41 = vmax.f32 %v2271_v43, %v2272_v9  ;;  %v2293_v27 = vmax.f32 %v2291_v58, %v2292_v56  ;;  %v2264_v54 = vmax.f32 %v2262_v34, %v2263_v55  ;;  %v2302_v42 = vunpack.i.l.bf16 %v2301_v39 }
 0x13c   :  { %5827 = vst [vmem:[#allocation77_spill] sm:$0xff] %v4332_v62  ;;  %v2255_v8 = vmax.f32 %v2253_v24, %v2254_v3  ;;  %v2303_v10 = vunpack.i.h.bf16 %v2301_v39  ;;  %v2284_v0 = vmax.f32 %v2282_v22, %v2283_v1  ;;  %v2313_v4 = vunpack.i.l.bf16 %v2312_v52 }
 0x13d   :  { %v2274_v50 = vrot.slane %v2273_v41, 2  ;;  %v2294_v26 = vrot.slane %v2293_v27, 4  ;;  %v2265_v37 = vrot.slane %v2264_v54, 1  ;;  %v2314_v62 = vunpack.i.h.bf16 %v2312_v52 }
 0x13e   :  { %v4337_v30 = vpack.i.bf16 %v2255_v8, %v2255_v8  ;;  %v2304_v13 = vmax.f32 %v2302_v42, %v2303_v10  ;;  %v2285_v43 = vrot.slane %v2284_v0, 2  ;;  %v2323_v55 = vsel %vm3540_vm2, %v3501_v45, 4286644096  ;;  %v3503_v8 = vld [vmem:[%s5658_s0 + $0x3b8] sm:$0x1f]  }
 0x13f   :  { %v2275_v9 = vmax.f32 %v2273_v41, %v2274_v50  ;;  %v2295_v56 = vmax.f32 %v2293_v27, %v2294_v26  ;;  %v2266_v24 = vmax.f32 %v2264_v54, %v2265_v37  ;;  %v2315_v22 = vmax.f32 %v2313_v4, %v2314_v62  ;;  %v3504_v37 = vld [vmem:[%s5658_s0 + $0x3c0] sm:$0x1f]  }
 0x140   :  { %5828 = vst [vmem:[#allocation78_spill] sm:$0xff] %v4337_v30  ;;  %v2305_v34 = vrot.slane %v2304_v13, 4  ;;  %v2324_v58 = vunpack.i.l.bf16 %v2323_v55  ;;  %v2286_v39 = vmax.f32 %v2284_v0, %v2285_v43  ;;  %v2325_v19 = vunpack.i.h.bf16 %v2323_v55 }
 0x141   :  { %v2276_v3 = vrot.slane %v2275_v9, 1  ;;  %v2296_v1 = vrot.slane %v2295_v56, 2  ;;  %v4344_v42 = vpack.i.bf16 %v2266_v24, %v2266_v24  ;;  %v2316_v41 = vrot.slane %v2315_v22, 4 }
 0x142   :  { %v2306_v52 = vmax.f32 %v2304_v13, %v2305_v34  ;;  %v2334_v27 = vsel %vm3540_vm2, %v3502_v17, 4286644096  ;;  %v2287_v54 = vrot.slane %v2286_v39, 1  ;;  %v2326_v62 = vmax.f32 %v2324_v58, %v2325_v19  ;;  %v3505_v13 = vld [vmem:[%s5658_s0 + $0x3c8] sm:$0x1f]  }
 0x143   :  { %5829 = vst [vmem:[#allocation79_spill] sm:$0xff] %v4344_v42  ;;  %v2277_v45 = vmax.f32 %v2275_v9, %v2276_v3  ;;  %v2297_v10 = vmax.f32 %v2295_v56, %v2296_v1  ;;  %v2317_v26 = vmax.f32 %v2315_v22, %v2316_v41  ;;  %v2335_v0 = vunpack.i.l.bf16 %v2334_v27  ;;  %v3506_v41 = vld [vmem:[%s5658_s0 + $0x3d0] sm:$0x1f]  }
 0x144   :  { %v2307_v50 = vrot.slane %v2306_v52, 2  ;;  %v2336_v4 = vunpack.i.h.bf16 %v2334_v27  ;;  %v2288_v55 = vmax.f32 %v2286_v39, %v2287_v54  ;;  %v2327_v9 = vrot.slane %v2326_v62, 4 }
 0x145   :  { %v4354_v43 = vpack.i.bf16 %v2277_v45, %v2277_v45  ;;  %v2298_v17 = vrot.slane %v2297_v10, 1  ;;  %v2318_v56 = vrot.slane %v2317_v26, 2  ;;  %v2345_v34 = vsel %vm3540_vm2, %v3503_v8, 4286644096 }
 0x146   :  { %v2308_v24 = vmax.f32 %v2306_v52, %v2307_v50  ;;  %v2337_v19 = vmax.f32 %v2335_v0, %v2336_v4  ;;  %v4358_v22 = vpack.i.bf16 %v2288_v55, %v2288_v55  ;;  %v2328_v3 = vmax.f32 %v2326_v62, %v2327_v9 }
 0x147   :  { %5830 = vst [vmem:[#allocation80_spill] sm:$0xff] %v4354_v43  ;;  %v2299_v58 = vmax.f32 %v2297_v10, %v2298_v17  ;;  %v2346_v1 = vunpack.i.l.bf16 %v2345_v34  ;;  %v2319_v45 = vmax.f32 %v2317_v26, %v2318_v56  ;;  %v2347_v54 = vunpack.i.h.bf16 %v2345_v34  ;;  %v3507_v26 = vld [vmem:[%s5658_s0 + $0x3d8] sm:$0x1f]   ;;  %v3508_v56 = vld [vmem:[%s5658_s0 + $0x3e0] sm:$0x1f]  }
 0x148   :  { %5831 = vst [vmem:[#allocation81_spill] sm:$0xff] %v4358_v22  ;;  %v2309_v27 = vrot.slane %v2308_v24, 1  ;;  %v2338_v39 = vrot.slane %v2337_v19, 4  ;;  %v2329_v52 = vrot.slane %v2328_v3, 2  ;;  %v2356_v50 = vsel %vm3540_vm2, %v3504_v37, 4286644096 }
 0x149   :  { %v4363_v43 = vpack.i.bf16 %v2299_v58, %v2299_v58  ;;  %v2367_v8 = vsel %vm3540_vm2, %v3505_v13, 4286644096  ;;  %v2320_v62 = vrot.slane %v2319_v45, 1  ;;  %v2348_v4 = vmax.f32 %v2346_v1, %v2347_v54 }
 0x14a   :  { %v2310_v10 = vmax.f32 %v2308_v24, %v2309_v27  ;;  %v2339_v0 = vmax.f32 %v2337_v19, %v2338_v39  ;;  %v2330_v55 = vmax.f32 %v2328_v3, %v2329_v52  ;;  %v2357_v17 = vunpack.i.l.bf16 %v2356_v50 }
 0x14b   :  { %5832 = vst [vmem:[#allocation82_spill] sm:$0xff] %v4363_v43  ;;  %v2358_v9 = vunpack.i.h.bf16 %v2356_v50  ;;  %v2368_v22 = vunpack.i.l.bf16 %v2367_v8  ;;  %v2321_v34 = vmax.f32 %v2319_v45, %v2320_v62  ;;  %v2349_v24 = vrot.slane %v2348_v4, 4 }
 0x14c   :  { %v4375_v37 = vpack.i.bf16 %v2310_v10, %v2310_v10  ;;  %v2340_v13 = vrot.slane %v2339_v0, 2  ;;  %v2331_v58 = vrot.slane %v2330_v55, 1  ;;  %v2369_v1 = vunpack.i.h.bf16 %v2367_v8 }
 0x14d   :  { %v2359_v19 = vmax.f32 %v2357_v17, %v2358_v9  ;;  %v2378_v3 = vsel %vm3540_vm2, %v3506_v41, 4286644096  ;;  %v4379_v27 = vpack.i.bf16 %v2321_v34, %v2321_v34  ;;  %v2350_v54 = vmax.f32 %v2348_v4, %v2349_v24  ;;  %v3509_v41 = vld [vmem:[%s5658_s0 + $0x3e8] sm:$0x1f]  }
 0x14e   :  { %5833 = vst [vmem:[#allocation83_spill] sm:$0xff] %v4375_v37  ;;  %v2341_v39 = vmax.f32 %v2339_v0, %v2340_v13  ;;  %v2379_v52 = vunpack.i.l.bf16 %v2378_v3  ;;  %v2332_v50 = vmax.f32 %v2330_v55, %v2331_v58  ;;  %v2370_v42 = vmax.f32 %v2368_v22, %v2369_v1 }
 0x14f   :  { %5834 = vst [vmem:[#allocation84_spill] sm:$0xff] %v4379_v27  ;;  %v2360_v43 = vrot.slane %v2359_v19, 4  ;;  %v2380_v30 = vunpack.i.h.bf16 %v2378_v3  ;;  %v2351_v37 = vrot.slane %v2350_v54, 2  ;;  %v2389_v45 = vsel %vm3540_vm2, %v3507_v26, 4286644096 }
 0x150   :  { %v2342_v10 = vrot.slane %v2341_v39, 1  ;;  %v2400_v8 = vsel %vm3540_vm2, %v3508_v56, 4286644096  ;;  %v4388_v62 = vpack.i.bf16 %v2332_v50, %v2332_v50  ;;  %v2371_v4 = vrot.slane %v2370_v42, 4  ;;  %v3510_v56 = vld [vmem:[%s5658_s0 + $0x3f0] sm:$0x1f]  }
 0x151   :  { %v2361_v0 = vmax.f32 %v2359_v19, %v2360_v43  ;;  %v2381_v55 = vmax.f32 %v2379_v52, %v2380_v30  ;;  %v2352_v22 = vmax.f32 %v2350_v54, %v2351_v37  ;;  %v2390_v9 = vunpack.i.l.bf16 %v2389_v45 }
 0x152   :  { %5835 = vst [vmem:[#allocation85_spill] sm:$0xff] %v4388_v62  ;;  %v2343_v17 = vmax.f32 %v2341_v39, %v2342_v10  ;;  %v2391_v34 = vunpack.i.h.bf16 %v2389_v45  ;;  %v2372_v24 = vmax.f32 %v2370_v42, %v2371_v4  ;;  %v2401_v26 = vunpack.i.l.bf16 %v2400_v8 }
 0x153   :  { %v2362_v13 = vrot.slane %v2361_v0, 2  ;;  %v2382_v58 = vrot.slane %v2381_v55, 4  ;;  %v2353_v3 = vrot.slane %v2352_v22, 1  ;;  %v2402_v62 = vunpack.i.h.bf16 %v2400_v8 }
 0x154   :  { %v4393_v1 = vpack.i.bf16 %v2343_v17, %v2343_v17  ;;  %v2392_v50 = vmax.f32 %v2390_v9, %v2391_v34  ;;  %v2373_v19 = vrot.slane %v2372_v24, 2  ;;  %v2411_v37 = vsel %vm3540_vm2, %v3509_v41, 4286644096  ;;  %v3511_v17 = vld [vmem:[%s5658_s0 + $0x3f8] sm:$0x1f]  }
 0x155   :  { %v2363_v43 = vmax.f32 %v2361_v0, %v2362_v13  ;;  %v2383_v30 = vmax.f32 %v2381_v55, %v2382_v58  ;;  %v2354_v39 = vmax.f32 %v2352_v22, %v2353_v3  ;;  %v2403_v42 = vmax.f32 %v2401_v26, %v2402_v62 }
 0x156   :  { %5836 = vst [vmem:[#allocation86_spill] sm:$0xff] %v4393_v1  ;;  %v2393_v54 = vrot.slane %v2392_v50, 4  ;;  %v2412_v52 = vunpack.i.l.bf16 %v2411_v37  ;;  %v2374_v45 = vmax.f32 %v2372_v24, %v2373_v19  ;;  %v2413_v27 = vunpack.i.h.bf16 %v2411_v37 }
 0x157   :  { %v2364_v10 = vrot.slane %v2363_v43, 1  ;;  %v2384_v4 = vrot.slane %v2383_v30, 2  ;;  %v4400_v9 = vpack.i.bf16 %v2354_v39, %v2354_v39  ;;  %v2404_v0 = vrot.slane %v2403_v42, 4 }
 0x158   :  { %v2394_v8 = vmax.f32 %v2392_v50, %v2393_v54  ;;  %v2422_v55 = vsel %vm3540_vm2, %v3510_v56, 4286644096  ;;  %v2375_v22 = vrot.slane %v2374_v45, 1  ;;  %v2414_v62 = vmax.f32 %v2412_v52, %v2413_v27 }
 0x159   :  { %5837 = vst [vmem:[#allocation87_spill] sm:$0xff] %v4400_v9  ;;  %v2365_v41 = vmax.f32 %v2363_v43, %v2364_v10  ;;  %v2385_v34 = vmax.f32 %v2383_v30, %v2384_v4  ;;  %v2405_v58 = vmax.f32 %v2403_v42, %v2404_v0  ;;  %v2423_v24 = vunpack.i.l.bf16 %v2422_v55 }
 0x15a   :  { %v2395_v13 = vrot.slane %v2394_v8, 2  ;;  %v2424_v26 = vunpack.i.h.bf16 %v2422_v55  ;;  %v2376_v19 = vmax.f32 %v2374_v45, %v2375_v22  ;;  %v2415_v1 = vrot.slane %v2414_v62, 4 }
 0x15b   :  { %v4404_v3 = vpack.i.bf16 %v2365_v41, %v2365_v41  ;;  %v2386_v37 = vrot.slane %v2385_v34, 1  ;;  %v2406_v9 = vrot.slane %v2405_v58, 2  ;;  %v2433_v54 = vsel %vm3540_vm2, %v3511_v17, 4286644096 }
 0x15c   :  { %v2396_v39 = vmax.f32 %v2394_v8, %v2395_v13  ;;  %v2425_v50 = vmax.f32 %v2423_v24, %v2424_v26  ;;  %v4408_v56 = vpack.i.bf16 %v2376_v19, %v2376_v19  ;;  %v2416_v30 = vmax.f32 %v2414_v62, %v2415_v1  ;;  %v5918_v8 = vld [vmem:[#allocation80_spill] sm:$0xff] }
 0x15d   :  { %v2387_v43 = vmax.f32 %v2385_v34, %v2386_v37  ;;  %v2434_v27 = vunpack.i.l.bf16 %v2433_v54  ;;  %v2407_v42 = vmax.f32 %v2405_v58, %v2406_v9  ;;  %v2435_v4 = vunpack.i.h.bf16 %v2433_v54  ;;  %v5921_v37 = vld [vmem:[#allocation83_spill] sm:$0xff]  ;;  %v5922_v62 = vld [vmem:[#allocation84_spill] sm:$0xff]  ;;  %v5923_v9 = vld [vmem:[#allocation85_spill] sm:$0xff] }
 0x15e   :  { %5838 = vst [vmem:[#allocation88_spill] sm:$0xff] %v4408_v56  ;;  %v2397_v52 = vrot.slane %v2396_v39, 1  ;;  %v2426_v10 = vrot.slane %v2425_v50, 4  ;;  %v2417_v45 = vrot.slane %v2416_v30, 2  ;;  %v5924_v1 = vld [vmem:[#allocation86_spill] sm:$0xff]  ;;  %vm2968_vm9 = vcmask 1047559  }
 0x15f   :  { %v4410_v0 = vpack.i.bf16 %v2387_v43, %v2387_v43  ;;  %v2408_v17 = vrot.slane %v2407_v42, 1  ;;  %v2436_v22 = vmax.f32 %v2434_v27, %v2435_v4  ;;  %v5846_v27 = vld [vmem:[#allocation8_spill] sm:$0xff]  ;;  %v5928_v4 = vcombine.low %v3582_v21, %v3582_v21 }
 0x160   :  { %v2398_v6 = vmax.f32 %v2396_v39, %v2397_v52  ;;  %v2427_v41 = vmax.f32 %v2425_v50, %v2426_v10  ;;  %v2418_v34 = vmax.f32 %v2416_v30, %v2417_v45  ;;  %v5844_v10 = vld [vmem:[#allocation6_spill] sm:$0xff]  ;;  %v5919_v50 = vld [vmem:[#allocation81_spill] sm:$0xff]  ;;  %v5925_v55 = vld [vmem:[#allocation87_spill] sm:$0xff]  ;;  %v5929_v39 = vcombine.low %v3584_v25, %v3584_v25 }
 0x161   :  { %v2409_v58 = vmax.f32 %v2407_v42, %v2408_v17  ;;  %v2437_v26 = vrot.slane %v2436_v22, 4  ;;  %v5842_v17 = vld [vmem:[#allocation4_spill] sm:$0xff]  ;;  %v5845_v42 = vld [vmem:[#allocation7_spill] sm:$0xff]  ;;  %v5932_v21 = vcombine.low %v3604_v47, %v3604_v47  ;;  %v5933_v25 = vcombine.low %v3616_v5, %v3616_v5 }
 0x162   :  { %v4422_v13 = vpack.i.bf16 %v2398_v6, %v2398_v6  ;;  %v2428_v24 = vrot.slane %v2427_v41, 2  ;;  %v2419_v19 = vrot.slane %v2418_v34, 1  ;;  %v5936_v47 = vcombine.low %v3639_v60, %v3639_v60 }
 0x163   :  { %v4430_v54 = vpack.i.bf16 %v2409_v58, %v2409_v58  ;;  %v2438_v30 = vmax.f32 %v2436_v22, %v2437_v26  ;;  %v5840_v58 = vld [vmem:[#allocation2_spill] sm:$0xff]  ;;  %v5937_v5 = vcombine.low %v3641_v61, %v3641_v61  ;;  %v5940_v60 = vcombine.low %v3665_v40, %v3665_v40 }
 0x164   :  { %v2429_v43 = vmax.f32 %v2427_v41, %v2428_v24  ;;  %v2420_v52 = vmax.f32 %v2418_v34, %v2419_v19  ;;  %v5843_v41 = vld [vmem:[#allocation5_spill] sm:$0xff]  ;;  %v5927_v34 = vcombine.low %v3574_v16, %v3574_v16  ;;  %v5931_v16 = vcombine.low %v3595_v38, %v3595_v38 }
 0x165   :  { %v2439_v6 = vrot.slane %v2438_v30, 2  ;;  %v5935_v38 = vcombine.low %v3630_v48, %v3630_v48  ;;  %v5939_v48 = vcombine.low %v3653_v23, %v3653_v23  ;;  %v5941_v61 = vcombine.low %v3674_v2, %v3674_v2 }
 0x166   :  { %v2430_v45 = vrot.slane %v2429_v43, 1  ;;  %v4444_v22 = vpack.i.bf16 %v2420_v52, %v2420_v52  ;;  %v4686_v52 = vunpack.c.l.b16 %v5927_v34  ;;  %v4706_v34 = vunpack.c.l.b16 %v5931_v16 }
 0x167   :  { %v2440_v19 = vmax.f32 %v2438_v30, %v2439_v6  ;;  %v5926_v6 = vcombine.low %v3572_v15, %v3572_v15  ;;  %v5930_v15 = vcombine.low %v3590_v29, %v3590_v29  ;;  %v5934_v29 = vcombine.low %v3628_v46, %v3628_v46 }
 0x168   :  { %v2431_v26 = vmax.f32 %v2429_v43, %v2430_v45  ;;  %v4726_v16 = vunpack.c.l.b16 %v5935_v38  ;;  %v5938_v46 = vcombine.low %v3646_v7, %v3646_v7  ;;  %v4746_v38 = vunpack.c.l.b16 %v5939_v48  ;;  %v5972_v45 = vld [vmem:[#allocation9_spill] sm:$0xff] }
 0x169   :  { %v2441_v30 = vrot.slane %v2440_v19, 1  ;;  %v4681_v56 = vunpack.c.l.b16 %v5926_v6  ;;  %v4701_v6 = vunpack.c.l.b16 %v5930_v15  ;;  %v4721_v15 = vunpack.c.l.b16 %v5934_v29 }
 0x16a   :  { %v4464_v43 = vpack.i.bf16 %v2431_v26, %v2431_v26  ;;  %v5841_v26 = vld [vmem:[#allocation3_spill] sm:$0xff]  ;;  %v4741_v29 = vunpack.c.l.b16 %v5938_v46  ;;  %v5942_v7 = vcombine.low %v3684_v28, %v3684_v28  ;;  %v5943_v23 = vcombine.low %v3686_v33, %v3686_v33 }
 0x16b   :  { %v2442_v24 = vmax.f32 %v2440_v19, %v2441_v30  ;;  %v4691_v19 = vunpack.c.l.b16 %v5928_v4  ;;  %v4711_v4 = vunpack.c.l.b16 %v5932_v21  ;;  %v4731_v21 = vunpack.c.l.b16 %v5936_v47 }
 0x16c   :  { %5839 = vst [vmem:[#allocation89_spill] sm:$0xff] %v4464_v43  ;;  %v4696_v43 = vunpack.c.l.b16 %v5929_v39  ;;  %v4716_v39 = vunpack.c.l.b16 %v5933_v25  ;;  %v4736_v25 = vunpack.c.l.b16 %v5937_v5  ;;  %v4751_v47 = vunpack.c.l.b16 %v5940_v60 }
 0x16d   :  { %v4492_v30 = vpack.i.bf16 %v2442_v24, %v2442_v24  ;;  %v5920_v24 = vld [vmem:[#allocation82_spill] sm:$0xff]  ;;  %v4756_v5 = vunpack.c.l.b16 %v5941_v61  ;;  %v4761_v46 = vunpack.c.l.b16 %v5942_v7  ;;  %v4766_v48 = vunpack.c.l.b16 %v5943_v23 }
 0x16e   :  { %v5944_v40 = vcombine.low %v3691_v44, %v3691_v44  ;;  %v5945_v2 = vcombine.low %v3703_v63, %v3703_v63  ;;  %v5946_v28 = vcombine.low %v3707_v11, %v3707_v11  ;;  %v5947_v33 = vcombine.low %v3716_v31, %v3716_v31 }
 0x16f   :  { %v5948_v44 = vcombine.low %v3721_v51, %v3721_v51  ;;  %v5949_v63 = vcombine.low %v3728_v12, %v3728_v12  ;;  %v5950_v11 = vcombine.low %v3738_v35, %v3738_v35  ;;  %v5951_v31 = vcombine.low %v3742_v49, %v3742_v49 }
 0x170   :  { %v4771_v60 = vunpack.c.l.b16 %v5944_v40  ;;  %v4776_v61 = vunpack.c.l.b16 %v5945_v2  ;;  %v4781_v7 = vunpack.c.l.b16 %v5946_v28  ;;  %v4786_v23 = vunpack.c.l.b16 %v5947_v33 }
 0x171   :  { %v4791_v40 = vunpack.c.l.b16 %v5948_v44  ;;  %v4796_v2 = vunpack.c.l.b16 %v5949_v63  ;;  %v4801_v28 = vunpack.c.l.b16 %v5950_v11  ;;  %v4806_v33 = vunpack.c.l.b16 %v5951_v31 }
 0x172   :  { %v5952_v51 = vcombine.low %v3747_v59, %v3747_v59  ;;  %v5953_v12 = vcombine.low %v3759_v20, %v3759_v20  ;;  %v5954_v35 = vcombine.low %v3763_v36, %v3763_v36  ;;  %v5955_v49 = vcombine.low %v3772_v57, %v3772_v57 }
 0x173   :  { %v5956_v59 = vcombine.low %v3777_v18, %v3777_v18  ;;  %v5957_v20 = vcombine.low %v3784_v53, %v3784_v53  ;;  %v5958_v36 = vcombine.low %v3794_v14, %v3794_v14  ;;  %v5959_v57 = vcombine.low %v3798_v32, %v3798_v32 }
 0x174   :  { %v4811_v44 = vunpack.c.l.b16 %v5952_v51  ;;  %v4816_v63 = vunpack.c.l.b16 %v5953_v12  ;;  %v4821_v11 = vunpack.c.l.b16 %v5954_v35  ;;  %v4826_v31 = vunpack.c.l.b16 %v5955_v49 }
 0x175   :  { %v4831_v51 = vunpack.c.l.b16 %v5956_v59  ;;  %v4836_v12 = vunpack.c.l.b16 %v5957_v20  ;;  %v4841_v35 = vunpack.c.l.b16 %v5958_v36  ;;  %v4846_v49 = vunpack.c.l.b16 %v5959_v57 }
 0x176   :  { %v5960_v18 = vcombine.low %v5840_v58, %v5840_v58  ;;  %v5961_v53 = vcombine.low %v5841_v26, %v5841_v26  ;;  %v5963_v14 = vcombine.low %v5842_v17, %v5842_v17  ;;  %v5965_v32 = vcombine.low %v5843_v41, %v5843_v41 }
 0x177   :  { %v5967_v58 = vcombine.low %v5844_v10, %v5844_v10  ;;  %v5969_v26 = vcombine.low %v5845_v42, %v5845_v42  ;;  %v5971_v17 = vcombine.low %v5846_v27, %v5846_v27  ;;  %v5973_v41 = vcombine.low %v5972_v45, %v5972_v45 }
 0x178   :  { %v4851_v59 = vunpack.c.l.b16 %v5960_v18  ;;  %v4856_v20 = vunpack.c.l.b16 %v5961_v53  ;;  %v4861_v36 = vunpack.c.l.b16 %v5963_v14  ;;  %v4866_v57 = vunpack.c.l.b16 %v5965_v32 }
 0x179   :  { %v4871_v18 = vunpack.c.l.b16 %v5967_v58  ;;  %v4876_v53 = vunpack.c.l.b16 %v5969_v26  ;;  %v4881_v14 = vunpack.c.l.b16 %v5971_v17  ;;  %v4886_v32 = vunpack.c.l.b16 %v5973_v41 }
 0x17a   :  { %5962 = vst [vmem:[#allocation2_spill] sm:$0xff] %v4856_v20  ;;  %5964 = vst [vmem:[#allocation3_spill] sm:$0xff] %v4861_v36  ;;  %v5983_v36 = vld [vmem:[#allocation13_spill] sm:$0xff]  ;;  %v5986_v20 = vld [vmem:[#allocation14_spill] sm:$0xff]  ;;  %vm3107_vm10 = vcmask 60416  }
 0x17b   :  { %5966 = vst [vmem:[#allocation4_spill] sm:$0xff] %v4866_v57  ;;  %5968 = vst [vmem:[#allocation5_spill] sm:$0xff] %v4871_v18  ;;  %v5974_v57 = vld [vmem:[#allocation10_spill] sm:$0xff]  ;;  %v5977_v18 = vld [vmem:[#allocation11_spill] sm:$0xff]  ;;  %v5984_v45 = vcombine.low %v5983_v36, %v5983_v36 }
 0x17c   :  { %5970 = vst [vmem:[#allocation6_spill] sm:$0xff] %v4876_v53  ;;  %v5975_v10 = vcombine.low %v5974_v57, %v5974_v57  ;;  %v5978_v42 = vcombine.low %v5977_v18, %v5977_v18  ;;  %v5980_v53 = vld [vmem:[#allocation12_spill] sm:$0xff]  ;;  %v5987_v57 = vcombine.low %v5986_v20, %v5986_v20 }
 0x17d   :  { %v5981_v27 = vcombine.low %v5980_v53, %v5980_v53  ;;  %v4906_v41 = vunpack.c.l.b16 %v5984_v45 }
 0x17e   :  { %v4891_v58 = vunpack.c.l.b16 %v5975_v10  ;;  %v4896_v26 = vunpack.c.l.b16 %v5978_v42  ;;  %v4911_v10 = vunpack.c.l.b16 %v5987_v57 }
 0x17f   :  { %v4901_v17 = vunpack.c.l.b16 %v5981_v27  ;;  %5985 = vst [vmem:[#allocation81_spill] sm:$0xff] %v4906_v41  ;;  %v5998_v41 = vld [vmem:[#allocation18_spill] sm:$0xff] }
 0x180   :  { %5976 = vst [vmem:[#allocation7_spill] sm:$0xff] %v4891_v58  ;;  %5979 = vst [vmem:[#allocation8_spill] sm:$0xff] %v4896_v26  ;;  %v5989_v58 = vld [vmem:[#allocation15_spill] sm:$0xff]  ;;  %v5992_v26 = vld [vmem:[#allocation16_spill] sm:$0xff]  ;;  %v5999_v20 = vcombine.low %v5998_v41, %v5998_v41 }
 0x181   :  { %5982 = vst [vmem:[#allocation80_spill] sm:$0xff] %v4901_v17  ;;  %5988 = vst [vmem:[#allocation82_spill] sm:$0xff] %v4911_v10  ;;  %v5990_v18 = vcombine.low %v5989_v58, %v5989_v58  ;;  %v5993_v53 = vcombine.low %v5992_v26, %v5992_v26  ;;  %v5995_v17 = vld [vmem:[#allocation17_spill] sm:$0xff]  ;;  %v6001_v10 = vld [vmem:[#allocation19_spill] sm:$0xff] }
 0x182   :  { %v5996_v36 = vcombine.low %v5995_v17, %v5995_v17  ;;  %v4931_v57 = vunpack.c.l.b16 %v5999_v20  ;;  %v6002_v58 = vcombine.low %v6001_v10, %v6001_v10 }
 0x183   :  { %v4916_v42 = vunpack.c.l.b16 %v5990_v18  ;;  %v4921_v27 = vunpack.c.l.b16 %v5993_v53 }
 0x184   :  { %v4926_v45 = vunpack.c.l.b16 %v5996_v36  ;;  %6000 = vst [vmem:[#allocation86_spill] sm:$0xff] %v4931_v57  ;;  %v4936_v18 = vunpack.c.l.b16 %v6002_v58  ;;  %v6013_v57 = vld [vmem:[#allocation23_spill] sm:$0xff] }
 0x185   :  { %5991 = vst [vmem:[#allocation83_spill] sm:$0xff] %v4916_v42  ;;  %5994 = vst [vmem:[#allocation84_spill] sm:$0xff] %v4921_v27  ;;  %v6004_v42 = vld [vmem:[#allocation20_spill] sm:$0xff]  ;;  %v6007_v27 = vld [vmem:[#allocation21_spill] sm:$0xff]  ;;  %v6014_v10 = vcombine.low %v6013_v57, %v6013_v57 }
 0x186   :  { %5997 = vst [vmem:[#allocation85_spill] sm:$0xff] %v4926_v45  ;;  %6003 = vst [vmem:[#allocation87_spill] sm:$0xff] %v4936_v18  ;;  %v6005_v26 = vcombine.low %v6004_v42, %v6004_v42  ;;  %v6008_v17 = vcombine.low %v6007_v27, %v6007_v27  ;;  %v6010_v45 = vld [vmem:[#allocation22_spill] sm:$0xff]  ;;  %v6016_v18 = vld [vmem:[#allocation24_spill] sm:$0xff] }
 0x187   :  { %v6011_v41 = vcombine.low %v6010_v45, %v6010_v45  ;;  %v4956_v58 = vunpack.c.l.b16 %v6014_v10  ;;  %v6017_v42 = vcombine.low %v6016_v18, %v6016_v18 }
 0x188   :  { %v4941_v53 = vunpack.c.l.b16 %v6005_v26  ;;  %v4946_v36 = vunpack.c.l.b16 %v6008_v17 }
 0x189   :  { %v4951_v20 = vunpack.c.l.b16 %v6011_v41  ;;  %6015 = vst [vmem:[#allocation12_spill] sm:$0xff] %v4956_v58  ;;  %v4961_v26 = vunpack.c.l.b16 %v6017_v42  ;;  %v6028_v58 = vld [vmem:[#allocation28_spill] sm:$0xff] }
 0x18a   :  { %6006 = vst [vmem:[#allocation9_spill] sm:$0xff] %v4941_v53  ;;  %6009 = vst [vmem:[#allocation10_spill] sm:$0xff] %v4946_v36  ;;  %v6019_v53 = vld [vmem:[#allocation25_spill] sm:$0xff]  ;;  %v6022_v36 = vld [vmem:[#allocation26_spill] sm:$0xff]  ;;  %v6029_v18 = vcombine.low %v6028_v58, %v6028_v58 }
 0x18b   :  { %6012 = vst [vmem:[#allocation11_spill] sm:$0xff] %v4951_v20  ;;  %6018 = vst [vmem:[#allocation13_spill] sm:$0xff] %v4961_v26  ;;  %v6020_v27 = vcombine.low %v6019_v53, %v6019_v53  ;;  %v6023_v45 = vcombine.low %v6022_v36, %v6022_v36  ;;  %v6025_v20 = vld [vmem:[#allocation27_spill] sm:$0xff]  ;;  %v6031_v26 = vld [vmem:[#allocation29_spill] sm:$0xff] }
 0x18c   :  { %v6026_v57 = vcombine.low %v6025_v20, %v6025_v20  ;;  %v4981_v42 = vunpack.c.l.b16 %v6029_v18  ;;  %v6032_v53 = vcombine.low %v6031_v26, %v6031_v26 }
 0x18d   :  { %v4966_v17 = vunpack.c.l.b16 %v6020_v27  ;;  %v4971_v41 = vunpack.c.l.b16 %v6023_v45 }
 0x18e   :  { %v4976_v10 = vunpack.c.l.b16 %v6026_v57  ;;  %6030 = vst [vmem:[#allocation17_spill] sm:$0xff] %v4981_v42  ;;  %v4986_v27 = vunpack.c.l.b16 %v6032_v53  ;;  %v6043_v42 = vld [vmem:[#allocation33_spill] sm:$0xff] }
 0x18f   :  { %6021 = vst [vmem:[#allocation14_spill] sm:$0xff] %v4966_v17  ;;  %6024 = vst [vmem:[#allocation15_spill] sm:$0xff] %v4971_v41  ;;  %v6034_v17 = vld [vmem:[#allocation30_spill] sm:$0xff]  ;;  %v6037_v41 = vld [vmem:[#allocation31_spill] sm:$0xff]  ;;  %v6044_v26 = vcombine.low %v6043_v42, %v6043_v42 }
 0x190   :  { %6027 = vst [vmem:[#allocation16_spill] sm:$0xff] %v4976_v10  ;;  %6033 = vst [vmem:[#allocation18_spill] sm:$0xff] %v4986_v27  ;;  %v6035_v36 = vcombine.low %v6034_v17, %v6034_v17  ;;  %v6038_v20 = vcombine.low %v6037_v41, %v6037_v41  ;;  %v6040_v10 = vld [vmem:[#allocation32_spill] sm:$0xff]  ;;  %v6046_v27 = vld [vmem:[#allocation34_spill] sm:$0xff] }
 0x191   :  { %v6041_v58 = vcombine.low %v6040_v10, %v6040_v10  ;;  %v5006_v53 = vunpack.c.l.b16 %v6044_v26  ;;  %v6047_v17 = vcombine.low %v6046_v27, %v6046_v27 }
 0x192   :  { %v4991_v45 = vunpack.c.l.b16 %v6035_v36  ;;  %v4996_v57 = vunpack.c.l.b16 %v6038_v20 }
 0x193   :  { %v5001_v18 = vunpack.c.l.b16 %v6041_v58  ;;  %6045 = vst [vmem:[#allocation22_spill] sm:$0xff] %v5006_v53  ;;  %v5011_v36 = vunpack.c.l.b16 %v6047_v17  ;;  %v6058_v53 = vld [vmem:[#allocation38_spill] sm:$0xff] }
 0x194   :  { %6036 = vst [vmem:[#allocation19_spill] sm:$0xff] %v4991_v45  ;;  %6039 = vst [vmem:[#allocation20_spill] sm:$0xff] %v4996_v57  ;;  %v6049_v45 = vld [vmem:[#allocation35_spill] sm:$0xff]  ;;  %v6052_v57 = vld [vmem:[#allocation36_spill] sm:$0xff]  ;;  %v6059_v27 = vcombine.low %v6058_v53, %v6058_v53 }
 0x195   :  { %6042 = vst [vmem:[#allocation21_spill] sm:$0xff] %v5001_v18  ;;  %6048 = vst [vmem:[#allocation23_spill] sm:$0xff] %v5011_v36  ;;  %v6050_v41 = vcombine.low %v6049_v45, %v6049_v45  ;;  %v6053_v10 = vcombine.low %v6052_v57, %v6052_v57  ;;  %v6055_v18 = vld [vmem:[#allocation37_spill] sm:$0xff]  ;;  %v6061_v36 = vld [vmem:[#allocation39_spill] sm:$0xff] }
 0x196   :  { %v6056_v42 = vcombine.low %v6055_v18, %v6055_v18  ;;  %v5031_v17 = vunpack.c.l.b16 %v6059_v27  ;;  %v6062_v45 = vcombine.low %v6061_v36, %v6061_v36 }
 0x197   :  { %v5016_v20 = vunpack.c.l.b16 %v6050_v41  ;;  %v5021_v58 = vunpack.c.l.b16 %v6053_v10 }
 0x198   :  { %v5026_v26 = vunpack.c.l.b16 %v6056_v42  ;;  %6060 = vst [vmem:[#allocation27_spill] sm:$0xff] %v5031_v17  ;;  %v5036_v41 = vunpack.c.l.b16 %v6062_v45  ;;  %v6073_v17 = vld [vmem:[#allocation43_spill] sm:$0xff] }
 0x199   :  { %6051 = vst [vmem:[#allocation24_spill] sm:$0xff] %v5016_v20  ;;  %6054 = vst [vmem:[#allocation25_spill] sm:$0xff] %v5021_v58  ;;  %v6064_v20 = vld [vmem:[#allocation40_spill] sm:$0xff]  ;;  %v6067_v58 = vld [vmem:[#allocation41_spill] sm:$0xff]  ;;  %v6074_v36 = vcombine.low %v6073_v17, %v6073_v17 }
 0x19a   :  { %6057 = vst [vmem:[#allocation26_spill] sm:$0xff] %v5026_v26  ;;  %6063 = vst [vmem:[#allocation28_spill] sm:$0xff] %v5036_v41  ;;  %v6065_v57 = vcombine.low %v6064_v20, %v6064_v20  ;;  %v6068_v18 = vcombine.low %v6067_v58, %v6067_v58  ;;  %v6070_v26 = vld [vmem:[#allocation42_spill] sm:$0xff]  ;;  %v6076_v41 = vld [vmem:[#allocation44_spill] sm:$0xff] }
 0x19b   :  { %v6071_v53 = vcombine.low %v6070_v26, %v6070_v26  ;;  %v5056_v45 = vunpack.c.l.b16 %v6074_v36  ;;  %v6077_v20 = vcombine.low %v6076_v41, %v6076_v41 }
 0x19c   :  { %v5041_v10 = vunpack.c.l.b16 %v6065_v57  ;;  %v5046_v42 = vunpack.c.l.b16 %v6068_v18 }
 0x19d   :  { %v5051_v27 = vunpack.c.l.b16 %v6071_v53  ;;  %6075 = vst [vmem:[#allocation32_spill] sm:$0xff] %v5056_v45  ;;  %v5061_v57 = vunpack.c.l.b16 %v6077_v20  ;;  %v6088_v45 = vld [vmem:[#allocation48_spill] sm:$0xff] }
 0x19e   :  { %6066 = vst [vmem:[#allocation29_spill] sm:$0xff] %v5041_v10  ;;  %6069 = vst [vmem:[#allocation30_spill] sm:$0xff] %v5046_v42  ;;  %v6079_v10 = vld [vmem:[#allocation45_spill] sm:$0xff]  ;;  %v6082_v42 = vld [vmem:[#allocation46_spill] sm:$0xff]  ;;  %v6089_v41 = vcombine.low %v6088_v45, %v6088_v45 }
 0x19f   :  { %6072 = vst [vmem:[#allocation31_spill] sm:$0xff] %v5051_v27  ;;  %6078 = vst [vmem:[#allocation33_spill] sm:$0xff] %v5061_v57  ;;  %v6080_v58 = vcombine.low %v6079_v10, %v6079_v10  ;;  %v6083_v26 = vcombine.low %v6082_v42, %v6082_v42  ;;  %v6085_v27 = vld [vmem:[#allocation47_spill] sm:$0xff]  ;;  %v6091_v57 = vld [vmem:[#allocation49_spill] sm:$0xff] }
 0x1a0   :  { %v6086_v17 = vcombine.low %v6085_v27, %v6085_v27  ;;  %v5081_v20 = vunpack.c.l.b16 %v6089_v41  ;;  %v6092_v10 = vcombine.low %v6091_v57, %v6091_v57 }
 0x1a1   :  { %v5066_v18 = vunpack.c.l.b16 %v6080_v58  ;;  %v5071_v53 = vunpack.c.l.b16 %v6083_v26 }
 0x1a2   :  { %v5076_v36 = vunpack.c.l.b16 %v6086_v17  ;;  %6090 = vst [vmem:[#allocation37_spill] sm:$0xff] %v5081_v20  ;;  %v5086_v58 = vunpack.c.l.b16 %v6092_v10  ;;  %v6103_v20 = vld [vmem:[#allocation53_spill] sm:$0xff] }
 0x1a3   :  { %6081 = vst [vmem:[#allocation34_spill] sm:$0xff] %v5066_v18  ;;  %6084 = vst [vmem:[#allocation35_spill] sm:$0xff] %v5071_v53  ;;  %v6094_v18 = vld [vmem:[#allocation50_spill] sm:$0xff]  ;;  %v6097_v53 = vld [vmem:[#allocation51_spill] sm:$0xff]  ;;  %v6104_v57 = vcombine.low %v6103_v20, %v6103_v20 }
 0x1a4   :  { %6087 = vst [vmem:[#allocation36_spill] sm:$0xff] %v5076_v36  ;;  %6093 = vst [vmem:[#allocation38_spill] sm:$0xff] %v5086_v58  ;;  %v6095_v42 = vcombine.low %v6094_v18, %v6094_v18  ;;  %v6098_v27 = vcombine.low %v6097_v53, %v6097_v53  ;;  %v6100_v36 = vld [vmem:[#allocation52_spill] sm:$0xff]  ;;  %v6106_v58 = vld [vmem:[#allocation54_spill] sm:$0xff] }
 0x1a5   :  { %v6101_v45 = vcombine.low %v6100_v36, %v6100_v36  ;;  %v5106_v10 = vunpack.c.l.b16 %v6104_v57  ;;  %v6107_v18 = vcombine.low %v6106_v58, %v6106_v58 }
 0x1a6   :  { %v5091_v26 = vunpack.c.l.b16 %v6095_v42  ;;  %v5096_v17 = vunpack.c.l.b16 %v6098_v27 }
 0x1a7   :  { %v5101_v41 = vunpack.c.l.b16 %v6101_v45  ;;  %6105 = vst [vmem:[#allocation42_spill] sm:$0xff] %v5106_v10  ;;  %v5111_v42 = vunpack.c.l.b16 %v6107_v18  ;;  %v6118_v10 = vld [vmem:[#allocation58_spill] sm:$0xff] }
 0x1a8   :  { %6096 = vst [vmem:[#allocation39_spill] sm:$0xff] %v5091_v26  ;;  %6099 = vst [vmem:[#allocation40_spill] sm:$0xff] %v5096_v17  ;;  %v6109_v26 = vld [vmem:[#allocation55_spill] sm:$0xff]  ;;  %v6112_v17 = vld [vmem:[#allocation56_spill] sm:$0xff]  ;;  %v6119_v58 = vcombine.low %v6118_v10, %v6118_v10 }
 0x1a9   :  { %6102 = vst [vmem:[#allocation41_spill] sm:$0xff] %v5101_v41  ;;  %6108 = vst [vmem:[#allocation43_spill] sm:$0xff] %v5111_v42  ;;  %v6110_v53 = vcombine.low %v6109_v26, %v6109_v26  ;;  %v6113_v36 = vcombine.low %v6112_v17, %v6112_v17  ;;  %v6115_v41 = vld [vmem:[#allocation57_spill] sm:$0xff]  ;;  %v6121_v42 = vld [vmem:[#allocation59_spill] sm:$0xff] }
 0x1aa   :  { %v6116_v20 = vcombine.low %v6115_v41, %v6115_v41  ;;  %v5131_v18 = vunpack.c.l.b16 %v6119_v58  ;;  %v6122_v26 = vcombine.low %v6121_v42, %v6121_v42 }
 0x1ab   :  { %v5116_v27 = vunpack.c.l.b16 %v6110_v53  ;;  %v5121_v45 = vunpack.c.l.b16 %v6113_v36 }
 0x1ac   :  { %v5126_v57 = vunpack.c.l.b16 %v6116_v20  ;;  %6120 = vst [vmem:[#allocation47_spill] sm:$0xff] %v5131_v18  ;;  %v5136_v53 = vunpack.c.l.b16 %v6122_v26  ;;  %v6133_v18 = vld [vmem:[#allocation63_spill] sm:$0xff] }
 0x1ad   :  { %6111 = vst [vmem:[#allocation44_spill] sm:$0xff] %v5116_v27  ;;  %6114 = vst [vmem:[#allocation45_spill] sm:$0xff] %v5121_v45  ;;  %v6124_v27 = vld [vmem:[#allocation60_spill] sm:$0xff]  ;;  %v6127_v45 = vld [vmem:[#allocation61_spill] sm:$0xff]  ;;  %v6134_v42 = vcombine.low %v6133_v18, %v6133_v18 }
 0x1ae   :  { %6117 = vst [vmem:[#allocation46_spill] sm:$0xff] %v5126_v57  ;;  %6123 = vst [vmem:[#allocation48_spill] sm:$0xff] %v5136_v53  ;;  %v6125_v17 = vcombine.low %v6124_v27, %v6124_v27  ;;  %v6128_v41 = vcombine.low %v6127_v45, %v6127_v45  ;;  %v6130_v57 = vld [vmem:[#allocation62_spill] sm:$0xff]  ;;  %v6136_v53 = vld [vmem:[#allocation64_spill] sm:$0xff] }
 0x1af   :  { %v6131_v10 = vcombine.low %v6130_v57, %v6130_v57  ;;  %v5156_v26 = vunpack.c.l.b16 %v6134_v42  ;;  %v6137_v27 = vcombine.low %v6136_v53, %v6136_v53 }
 0x1b0   :  { %v5141_v36 = vunpack.c.l.b16 %v6125_v17  ;;  %v5146_v20 = vunpack.c.l.b16 %v6128_v41 }
 0x1b1   :  { %v5151_v58 = vunpack.c.l.b16 %v6131_v10  ;;  %6135 = vst [vmem:[#allocation52_spill] sm:$0xff] %v5156_v26  ;;  %v5161_v17 = vunpack.c.l.b16 %v6137_v27  ;;  %v6148_v26 = vld [vmem:[#allocation68_spill] sm:$0xff] }
 0x1b2   :  { %6126 = vst [vmem:[#allocation49_spill] sm:$0xff] %v5141_v36  ;;  %6129 = vst [vmem:[#allocation50_spill] sm:$0xff] %v5146_v20  ;;  %v6139_v36 = vld [vmem:[#allocation65_spill] sm:$0xff]  ;;  %v6142_v20 = vld [vmem:[#allocation66_spill] sm:$0xff]  ;;  %v6149_v53 = vcombine.low %v6148_v26, %v6148_v26 }
 0x1b3   :  { %6132 = vst [vmem:[#allocation51_spill] sm:$0xff] %v5151_v58  ;;  %6138 = vst [vmem:[#allocation53_spill] sm:$0xff] %v5161_v17  ;;  %v6140_v45 = vcombine.low %v6139_v36, %v6139_v36  ;;  %v6143_v57 = vcombine.low %v6142_v20, %v6142_v20  ;;  %v6145_v58 = vld [vmem:[#allocation67_spill] sm:$0xff]  ;;  %v6151_v17 = vld [vmem:[#allocation69_spill] sm:$0xff] }
 0x1b4   :  { %v6146_v18 = vcombine.low %v6145_v58, %v6145_v58  ;;  %v5181_v27 = vunpack.c.l.b16 %v6149_v53  ;;  %v6152_v36 = vcombine.low %v6151_v17, %v6151_v17 }
 0x1b5   :  { %v5166_v41 = vunpack.c.l.b16 %v6140_v45  ;;  %v5171_v10 = vunpack.c.l.b16 %v6143_v57 }
 0x1b6   :  { %v5176_v42 = vunpack.c.l.b16 %v6146_v18  ;;  %6150 = vst [vmem:[#allocation57_spill] sm:$0xff] %v5181_v27  ;;  %v5186_v45 = vunpack.c.l.b16 %v6152_v36  ;;  %v6163_v27 = vld [vmem:[#allocation73_spill] sm:$0xff] }
 0x1b7   :  { %6141 = vst [vmem:[#allocation54_spill] sm:$0xff] %v5166_v41  ;;  %6144 = vst [vmem:[#allocation55_spill] sm:$0xff] %v5171_v10  ;;  %v6154_v41 = vld [vmem:[#allocation70_spill] sm:$0xff]  ;;  %v6157_v10 = vld [vmem:[#allocation71_spill] sm:$0xff]  ;;  %v6164_v17 = vcombine.low %v6163_v27, %v6163_v27 }
 0x1b8   :  { %6147 = vst [vmem:[#allocation56_spill] sm:$0xff] %v5176_v42  ;;  %6153 = vst [vmem:[#allocation58_spill] sm:$0xff] %v5186_v45  ;;  %v6155_v20 = vcombine.low %v6154_v41, %v6154_v41  ;;  %v6158_v58 = vcombine.low %v6157_v10, %v6157_v10  ;;  %v6160_v42 = vld [vmem:[#allocation72_spill] sm:$0xff]  ;;  %v6166_v45 = vld [vmem:[#allocation74_spill] sm:$0xff] }
 0x1b9   :  { %v6161_v26 = vcombine.low %v6160_v42, %v6160_v42  ;;  %v5206_v36 = vunpack.c.l.b16 %v6164_v17  ;;  %v6167_v41 = vcombine.low %v6166_v45, %v6166_v45 }
 0x1ba   :  { %v5191_v57 = vunpack.c.l.b16 %v6155_v20  ;;  %v5196_v18 = vunpack.c.l.b16 %v6158_v58 }
 0x1bb   :  { %v5201_v53 = vunpack.c.l.b16 %v6161_v26  ;;  %6165 = vst [vmem:[#allocation62_spill] sm:$0xff] %v5206_v36  ;;  %v5211_v20 = vunpack.c.l.b16 %v6167_v41  ;;  %v6175_v36 = vld [vmem:[#allocation78_spill] sm:$0xff] }
 0x1bc   :  { %6156 = vst [vmem:[#allocation59_spill] sm:$0xff] %v5191_v57  ;;  %6159 = vst [vmem:[#allocation60_spill] sm:$0xff] %v5196_v18  ;;  %v6169_v57 = vld [vmem:[#allocation75_spill] sm:$0xff]  ;;  %v6171_v18 = vld [vmem:[#allocation76_spill] sm:$0xff]  ;;  %v6176_v45 = vcombine.low %v6175_v36, %v6175_v36  ;;  %v6182_v36 = vcombine.low %v5920_v24, %v5920_v24  ;;  %v6186_v24 = vcombine.low %v5924_v1, %v5924_v1 }
 0x1bd   :  { %6162 = vst [vmem:[#allocation61_spill] sm:$0xff] %v5201_v53  ;;  %6168 = vst [vmem:[#allocation63_spill] sm:$0xff] %v5211_v20  ;;  %v6170_v10 = vcombine.low %v6169_v57, %v6169_v57  ;;  %v6172_v42 = vcombine.low %v6171_v18, %v6171_v18  ;;  %v6173_v53 = vld [vmem:[#allocation77_spill] sm:$0xff]  ;;  %v6177_v20 = vld [vmem:[#allocation79_spill] sm:$0xff]  ;;  %v6180_v18 = vcombine.low %v5918_v8, %v5918_v8 }
 0x1be   :  { %v6174_v27 = vcombine.low %v6173_v53, %v6173_v53  ;;  %v5231_v41 = vunpack.c.l.b16 %v6176_v45  ;;  %v6178_v57 = vcombine.low %v6177_v20, %v6177_v20  ;;  %v6181_v53 = vcombine.low %v5919_v50, %v5919_v50 }
 0x1bf   :  { %v5216_v58 = vunpack.c.l.b16 %v6170_v10  ;;  %v5221_v26 = vunpack.c.l.b16 %v6172_v42  ;;  %v5241_v42 = vunpack.c.l.b16 %v6180_v18  ;;  %v5251_v45 = vunpack.c.l.b16 %v6182_v36 }
 0x1c0   :  { %v5226_v17 = vunpack.c.l.b16 %v6174_v27  ;;  %v5236_v10 = vunpack.c.l.b16 %v6178_v57  ;;  %v5246_v27 = vunpack.c.l.b16 %v6181_v53  ;;  %v6183_v20 = vcombine.low %v5921_v37, %v5921_v37 }
 0x1c1   :  { %v6184_v8 = vcombine.low %v5922_v62, %v5922_v62  ;;  %v6185_v50 = vcombine.low %v5923_v9, %v5923_v9  ;;  %v5271_v36 = vunpack.c.l.b16 %v6186_v24  ;;  %v6187_v37 = vcombine.low %v5925_v55, %v5925_v55 }
 0x1c2   :  { %6179 = vst [vmem:[#allocation64_spill] sm:$0xff] %v5236_v10  ;;  %v5256_v57 = vunpack.c.l.b16 %v6183_v20  ;;  %v6189_v62 = vcombine.low %v4404_v3, %v4404_v3  ;;  %v6190_v10 = vld [vmem:[#allocation88_spill] sm:$0xff]  ;;  %v6192_v1 = vcombine.low %v4410_v0, %v4410_v0  ;;  %v6193_v55 = vcombine.low %v4422_v13, %v4422_v13 }
 0x1c3   :  { %v5261_v18 = vunpack.c.l.b16 %v6184_v8  ;;  %v5266_v53 = vunpack.c.l.b16 %v6185_v50  ;;  %v5276_v20 = vunpack.c.l.b16 %v6187_v37  ;;  %v6191_v9 = vcombine.low %v6190_v10, %v6190_v10 }
 0x1c4   :  { %v5281_v8 = vunpack.c.l.b16 %v6189_v62  ;;  %v5291_v24 = vunpack.c.l.b16 %v6192_v1  ;;  %v5296_v37 = vunpack.c.l.b16 %v6193_v55  ;;  %v6194_v3 = vcombine.low %v4430_v54, %v4430_v54 }
 0x1c5   :  { %6188 = vst [vmem:[#allocation65_spill] sm:$0xff] %v5276_v20  ;;  %v5286_v50 = vunpack.c.l.b16 %v6191_v9  ;;  %v6195_v10 = vcombine.low %v4444_v22, %v4444_v22  ;;  %v6196_v20 = vld [vmem:[#allocation89_spill] sm:$0xff]  ;;  %v6198_v13 = vcombine.low %v4492_v30, %v4492_v30  ;;  %v2957_v54 = vsel %vm2956_vm3, %v4686_v52, %v4681_v56 }
 0x1c6   :  { %v5301_v62 = vunpack.c.l.b16 %v6194_v3  ;;  %v6197_v0 = vcombine.low %v6196_v20, %v6196_v20  ;;  %v2959_v22 = vsel %vm2958_vm4, %v4691_v19, %v2957_v54  ;;  %v2970_v30 = vsel %vm2956_vm3, %v4726_v16, %v4721_v15  ;;  %v6206_v54 = vld [vmem:[#allocation3_spill] sm:$0xff] }
 0x1c7   :  { %v5306_v9 = vunpack.c.l.b16 %v6195_v10  ;;  %v5316_v55 = vunpack.c.l.b16 %v6198_v13  ;;  %v2977_v20 = vsel %vm2956_vm3, %v4766_v48, %v4761_v46  ;;  %v2961_v3 = vsel %vm2960_vm5, %v4696_v43, %v2959_v22  ;;  %v6202_v10 = vld [vmem:[#allocation7_spill] sm:$0xff]  ;;  %v6205_v13 = vld [vmem:[#allocation14_spill] sm:$0xff] }
 0x1c8   :  { %v5311_v1 = vunpack.c.l.b16 %v6197_v0  ;;  %v2971_v56 = vsel %vm2958_vm4, %v4731_v21, %v2970_v30  ;;  %v2978_v52 = vsel %vm2958_vm4, %v4771_v60, %v2977_v20  ;;  %v2984_v19 = vsel %vm2956_vm3, %v4806_v33, %v4801_v28  ;;  %v6204_v0 = vld [vmem:[#allocation13_spill] sm:$0xff]  ;;  %v6208_v30 = vld [vmem:[#allocation87_spill] sm:$0xff] }
 0x1c9   :  { %v2963_v15 = vsel %vm2962_vm6, %v4701_v6, %v2961_v3  ;;  %v2972_v16 = vsel %vm2960_vm5, %v4736_v25, %v2971_v56  ;;  %v2979_v46 = vsel %vm2960_vm5, %v4776_v61, %v2978_v52  ;;  %v2985_v43 = vsel %vm2958_vm4, %v4811_v44, %v2984_v19  ;;  %v6209_v3 = vld [vmem:[#allocation15_spill] sm:$0xff]  ;;  %v6210_v52 = vld [vmem:[#allocation4_spill] sm:$0xff] }
 0x1ca   :  { %v2965_v21 = vsel %vm2964_vm7, %v4706_v34, %v2963_v15  ;;  %v2973_v48 = vsel %vm2962_vm6, %v4741_v29, %v2972_v16  ;;  %v2980_v60 = vsel %vm2962_vm6, %v4781_v7, %v2979_v46  ;;  %v2986_v6 = vsel %vm2960_vm5, %v4816_v63, %v2985_v43  ;;  %v6200_v63 = vld [vmem:[#allocation85_spill] sm:$0xff]  ;;  %v6211_v15 = vld [vmem:[#allocation80_spill] sm:$0xff] }
 0x1cb   :  { %v2967_v25 = vsel %vm2966_vm8, %v4711_v4, %v2965_v21  ;;  %v2974_v61 = vsel %vm2964_vm7, %v4746_v38, %v2973_v48  ;;  %v2981_v28 = vsel %vm2964_vm7, %v4786_v23, %v2980_v60  ;;  %v2987_v34 = vsel %vm2962_vm6, %v4821_v11, %v2986_v6  ;;  %v6212_v46 = vld [vmem:[#allocation9_spill] sm:$0xff]  ;;  %v6213_v21 = vld [vmem:[#allocation16_spill] sm:$0xff] }
 0x1cc   :  { %v5364_v29 = vsel %vm2968_vm9, %v4716_v39, %v2967_v25  ;;  %v2975_v7 = vsel %vm2966_vm8, %v4751_v47, %v2974_v61  ;;  %v2982_v33 = vsel %vm2966_vm8, %v4791_v40, %v2981_v28  ;;  %v2988_v4 = vsel %vm2964_vm7, %v4826_v31, %v2987_v34  ;;  %v6201_v31 = vld [vmem:[#allocation2_spill] sm:$0xff]  ;;  %v6214_v60 = vld [vmem:[#allocation5_spill] sm:$0xff] }
 0x1cd   :  { %v5374_v38 = vsel %vm2968_vm9, %v4756_v5, %v2975_v7  ;;  %v5378_v23 = vsel %vm2968_vm9, %v4796_v2, %v2982_v33  ;;  %v2989_v39 = vsel %vm2966_vm8, %v4831_v51, %v2988_v4  ;;  %v2991_v47 = vsel %vm2956_vm3, %v4846_v49, %v4841_v35  ;;  %v6199_v2 = vld [vmem:[#allocation84_spill] sm:$0xff]  ;;  %v6203_v49 = vld [vmem:[#allocation86_spill] sm:$0xff]  ;;  %v6215_v25 = vld [vmem:[#allocation81_spill] sm:$0xff] }
 0x1ce   :  { %v5387_v40 = vsel %vm2968_vm9, %v4836_v12, %v2989_v39  ;;  %v2992_v44 = vsel %vm2958_vm4, %v4851_v59, %v2991_v47  ;;  %v2998_v5 = vsel %vm2956_vm3, %v4886_v32, %v4881_v14  ;;  %v3005_v11 = vsel %vm2956_vm3, %v6200_v63, %v6199_v2  ;;  %v6207_v32 = vld [vmem:[#allocation8_spill] sm:$0xff]  ;;  %v6216_v28 = vld [vmem:[#allocation10_spill] sm:$0xff]  ;;  %v6217_v7 = vld [vmem:[#allocation17_spill] sm:$0xff] }
 0x1cf   :  { %v2993_v51 = vsel %vm2960_vm5, %v6201_v31, %v2992_v44  ;;  %v2999_v35 = vsel %vm2958_vm4, %v6202_v10, %v2998_v5  ;;  %v3006_v12 = vsel %vm2958_vm4, %v6203_v49, %v3005_v11  ;;  %v3012_v59 = vsel %vm2956_vm3, %v6205_v13, %v6204_v0  ;;  %v6218_v4 = vld [vmem:[#allocation6_spill] sm:$0xff]  ;;  %v6220_v5 = vld [vmem:[#allocation11_spill] sm:$0xff]  ;;  %v6223_v10 = vld [vmem:[#allocation12_spill] sm:$0xff] }
 0x1d0   :  { %v2994_v14 = vsel %vm2962_vm6, %v6206_v54, %v2993_v51  ;;  %v3000_v22 = vsel %vm2960_vm5, %v6207_v32, %v2999_v35  ;;  %v3007_v20 = vsel %vm2960_vm5, %v6208_v30, %v3006_v12  ;;  %v3013_v56 = vsel %vm2958_vm4, %v6209_v3, %v3012_v59  ;;  %v6219_v47 = vld [vmem:[#allocation82_spill] sm:$0xff]  ;;  %v6222_v31 = vld [vmem:[#allocation83_spill] sm:$0xff]  ;;  %v6225_v0 = vld [vmem:[#allocation21_spill] sm:$0xff] }
 0x1d1   :  { %v2995_v19 = vsel %vm2964_vm7, %v6210_v52, %v2994_v14  ;;  %v3001_v16 = vsel %vm2962_vm6, %v6211_v15, %v3000_v22  ;;  %v3008_v43 = vsel %vm2962_vm6, %v6212_v46, %v3007_v20  ;;  %v3014_v48 = vsel %vm2960_vm5, %v6213_v21, %v3013_v56  ;;  %v6221_v63 = vld [vmem:[#allocation18_spill] sm:$0xff]  ;;  %v6224_v49 = vld [vmem:[#allocation19_spill] sm:$0xff]  ;;  %v6227_v54 = vld [vmem:[#allocation20_spill] sm:$0xff] }
 0x1d2   :  { %v2996_v6 = vsel %vm2966_vm8, %v6214_v60, %v2995_v19  ;;  %v3002_v61 = vsel %vm2964_vm7, %v6215_v25, %v3001_v16  ;;  %v3009_v34 = vsel %vm2964_vm7, %v6216_v28, %v3008_v43  ;;  %v3015_v33 = vsel %vm2962_vm6, %v6217_v7, %v3014_v48  ;;  %v6226_v13 = vld [vmem:[#allocation22_spill] sm:$0xff]  ;;  %v6228_v32 = vld [vmem:[#allocation23_spill] sm:$0xff]  ;;  %v6229_v30 = vld [vmem:[#allocation29_spill] sm:$0xff] }
 0x1d3   :  { %v5432_v39 = vsel %vm2968_vm9, %v6218_v4, %v2996_v6  ;;  %v3003_v44 = vsel %vm2966_vm8, %v6219_v47, %v3002_v61  ;;  %v3010_v2 = vsel %vm2966_vm8, %v6220_v5, %v3009_v34  ;;  %v3016_v11 = vsel %vm2964_vm7, %v6221_v63, %v3015_v33  ;;  %v6230_v20 = vld [vmem:[#allocation30_spill] sm:$0xff]  ;;  %v6231_v56 = vld [vmem:[#allocation37_spill] sm:$0xff]  ;;  %v6233_v15 = vld [vmem:[#allocation24_spill] sm:$0xff] }
 0x1d4   :  { %v5442_v51 = vsel %vm2968_vm9, %v6222_v31, %v3003_v44  ;;  %v5446_v35 = vsel %vm2968_vm9, %v6223_v10, %v3010_v2  ;;  %v3017_v12 = vsel %vm2966_vm8, %v6224_v49, %v3016_v11  ;;  %v3019_v59 = vsel %vm2956_vm3, %v6226_v13, %v6225_v0  ;;  %v6232_v52 = vld [vmem:[#allocation38_spill] sm:$0xff]  ;;  %v6234_v46 = vld [vmem:[#allocation31_spill] sm:$0xff]  ;;  %v6236_v60 = vld [vmem:[#allocation45_spill] sm:$0xff] }
 0x1d5   :  { %v5455_v14 = vsel %vm2968_vm9, %v6227_v54, %v3017_v12  ;;  %v3020_v22 = vsel %vm2958_vm4, %v6228_v32, %v3019_v59  ;;  %v3026_v3 = vsel %vm2956_vm3, %v6230_v20, %v6229_v30  ;;  %v3033_v19 = vsel %vm2956_vm3, %v6232_v52, %v6231_v56  ;;  %v6235_v21 = vld [vmem:[#allocation39_spill] sm:$0xff]  ;;  %v6237_v6 = vld [vmem:[#allocation46_spill] sm:$0xff]  ;;  %v6238_v61 = vld [vmem:[#allocation25_spill] sm:$0xff] }
 0x1d6   :  { %v3021_v16 = vsel %vm2960_vm5, %v6233_v15, %v3020_v22  ;;  %v3027_v43 = vsel %vm2958_vm4, %v6234_v46, %v3026_v3  ;;  %v3034_v48 = vsel %vm2958_vm4, %v6235_v21, %v3033_v19  ;;  %v3040_v25 = vsel %vm2956_vm3, %v6237_v6, %v6236_v60  ;;  %v6239_v34 = vld [vmem:[#allocation32_spill] sm:$0xff]  ;;  %v6241_v47 = vld [vmem:[#allocation47_spill] sm:$0xff]  ;;  %v6242_v5 = vld [vmem:[#allocation26_spill] sm:$0xff] }
 0x1d7   :  { %v3022_v28 = vsel %vm2962_vm6, %v6238_v61, %v3021_v16  ;;  %v3028_v7 = vsel %vm2960_vm5, %v6239_v34, %v3027_v43  ;;  %v6240_v33 = vld [vmem:[#allocation40_spill] sm:$0xff]  ;;  %v3041_v44 = vsel %vm2958_vm4, %v6241_v47, %v3040_v25  ;;  %v6243_v63 = vld [vmem:[#allocation33_spill] sm:$0xff]  ;;  %v6246_v0 = vld [vmem:[#allocation27_spill] sm:$0xff] }
 0x1d8   :  { %v3035_v4 = vsel %vm2960_vm5, %v6240_v33, %v3034_v48  ;;  %v3023_v2 = vsel %vm2964_vm7, %v6242_v5, %v3022_v28  ;;  %v3029_v11 = vsel %vm2962_vm6, %v6243_v63, %v3028_v7  ;;  %v6244_v31 = vld [vmem:[#allocation41_spill] sm:$0xff]  ;;  %v6245_v49 = vld [vmem:[#allocation48_spill] sm:$0xff]  ;;  %v6247_v59 = vld [vmem:[#allocation34_spill] sm:$0xff] }
 0x1d9   :  { %v3036_v10 = vsel %vm2962_vm6, %v6244_v31, %v3035_v4  ;;  %v3042_v12 = vsel %vm2960_vm5, %v6245_v49, %v3041_v44  ;;  %v3024_v13 = vsel %vm2966_vm8, %v6246_v0, %v3023_v2  ;;  %v3030_v54 = vsel %vm2964_vm7, %v6247_v59, %v3029_v11  ;;  %v6248_v32 = vld [vmem:[#allocation42_spill] sm:$0xff]  ;;  %v6249_v30 = vld [vmem:[#allocation49_spill] sm:$0xff]  ;;  %v6250_v3 = vld [vmem:[#allocation28_spill] sm:$0xff] }
 0x1da   :  { %v3037_v22 = vsel %vm2964_vm7, %v6248_v32, %v3036_v10  ;;  %v3043_v20 = vsel %vm2962_vm6, %v6249_v30, %v3042_v12  ;;  %v5500_v56 = vsel %vm2968_vm9, %v6250_v3, %v3024_v13  ;;  %v6251_v52 = vld [vmem:[#allocation35_spill] sm:$0xff]  ;;  %v6253_v46 = vld [vmem:[#allocation50_spill] sm:$0xff]  ;;  %v6254_v21 = vld [vmem:[#allocation36_spill] sm:$0xff]  ;;  %v3061_v11 = vsel %vm2956_vm3, %v5246_v27, %v5241_v42 }
 0x1db   :  { %v3031_v19 = vsel %vm2966_vm8, %v6251_v52, %v3030_v54  ;;  %v6252_v15 = vld [vmem:[#allocation43_spill] sm:$0xff]  ;;  %v3044_v43 = vsel %vm2964_vm7, %v6253_v46, %v3043_v20  ;;  %v6255_v60 = vld [vmem:[#allocation44_spill] sm:$0xff]  ;;  %v6257_v28 = vld [vmem:[#allocation53_spill] sm:$0xff]  ;;  %v3062_v0 = vsel %vm2958_vm4, %v5251_v45, %v3061_v11  ;;  %v3068_v13 = vsel %vm2956_vm3, %v5286_v50, %v5281_v8 }
 0x1dc   :  { %v3038_v16 = vsel %vm2966_vm8, %v6252_v15, %v3037_v22  ;;  %v3032_v48 = vsel %vm2968_vm9, %v6254_v21, %v3031_v19  ;;  %v6256_v25 = vld [vmem:[#allocation51_spill] sm:$0xff]  ;;  %v6258_v34 = vld [vmem:[#allocation54_spill] sm:$0xff]  ;;  %v6259_v33 = vld [vmem:[#allocation52_spill] sm:$0xff]  ;;  %v3063_v42 = vsel %vm2960_vm5, %v5256_v57, %v3062_v0  ;;  %v3069_v27 = vsel %vm2958_vm4, %v5291_v24, %v3068_v13 }
 0x1dd   :  { %v3039_v6 = vsel %vm2968_vm9, %v6255_v60, %v3038_v16  ;;  %v3045_v61 = vsel %vm2966_vm8, %v6256_v25, %v3044_v43  ;;  %v3047_v7 = vsel %vm2956_vm3, %v6258_v34, %v6257_v28  ;;  %v6260_v47 = vld [vmem:[#allocation55_spill] sm:$0xff]  ;;  %v6261_v5 = vld [vmem:[#allocation61_spill] sm:$0xff]  ;;  %v6262_v2 = vld [vmem:[#allocation62_spill] sm:$0xff]  ;;  %v3064_v8 = vsel %vm2962_vm6, %v5261_v18, %v3063_v42 }
 0x1de   :  { %v3046_v4 = vsel %vm2968_vm9, %v6259_v33, %v3045_v61  ;;  %v3048_v44 = vsel %vm2958_vm4, %v6260_v47, %v3047_v7  ;;  %v3054_v63 = vsel %vm2956_vm3, %v6262_v2, %v6261_v5  ;;  %v6263_v31 = vld [vmem:[#allocation56_spill] sm:$0xff]  ;;  %v6264_v49 = vld [vmem:[#allocation63_spill] sm:$0xff]  ;;  %v6265_v59 = vld [vmem:[#allocation57_spill] sm:$0xff]  ;;  %v3070_v50 = vsel %vm2960_vm5, %v5296_v37, %v3069_v27 }
 0x1df   :  { %v3049_v10 = vsel %vm2960_vm5, %v6263_v31, %v3048_v44  ;;  %v3055_v12 = vsel %vm2958_vm4, %v6264_v49, %v3054_v63  ;;  %v6266_v22 = vld [vmem:[#allocation58_spill] sm:$0xff]  ;;  %v6267_v20 = vld [vmem:[#allocation59_spill] sm:$0xff]  ;;  %v3065_v24 = vsel %vm2964_vm7, %v5266_v53, %v3064_v8  ;;  %v3071_v3 = vsel %vm2962_vm6, %v5301_v62, %v3070_v50  ;;  %v6268_v52 = vld [vmem:[#allocation60_spill] sm:$0xff] }
 0x1e0   :  { %v3050_v54 = vsel %vm2962_vm6, %v6265_v59, %v3049_v10  ;;  %v3056_v32 = vsel %vm2960_vm5, %v5216_v58, %v3055_v12  ;;  %v3066_v37 = vsel %vm2966_vm8, %v5271_v36, %v3065_v24  ;;  %v3072_v19 = vsel %vm2964_vm7, %v5306_v9, %v3071_v3  ;;  %v6269_v15 = vld [vmem:[#allocation64_spill] sm:$0xff]  ;;  %v6270_v16 = vld [vmem:[#allocation65_spill] sm:$0xff] }
 0x1e1   :  { %v3051_v30 = vsel %vm2964_vm7, %v6266_v22, %v3050_v54  ;;  %v3057_v45 = vsel %vm2962_vm6, %v5221_v26, %v3056_v32  ;;  %v3067_v53 = vsel %vm2968_vm9, %v6270_v16, %v3066_v37  ;;  %v3073_v62 = vsel %vm2966_vm8, %v5311_v1, %v3072_v19 }
 0x1e2   :  { %v3052_v58 = vsel %vm2966_vm8, %v6267_v20, %v3051_v30  ;;  %v3058_v57 = vsel %vm2964_vm7, %v5226_v17, %v3057_v45  ;;  %v3075_v46 = vpack.c.b16 %v5364_v29, %v5364_v29  ;;  %v3076_v36 = vpack.c.b16 %v5374_v38, %v5374_v38 }
 0x1e3   :  { %v3053_v26 = vsel %vm2968_vm9, %v6268_v52, %v3052_v58  ;;  %v3059_v18 = vsel %vm2966_vm8, %v5231_v41, %v3058_v57  ;;  %v3074_v41 = vsel %vm2968_vm9, %v5316_v55, %v3073_v62  ;;  %v3077_v9 = vpack.c.b16 %v5378_v23, %v5378_v23 }
 0x1e4   :  { %v3060_v17 = vsel %vm2968_vm9, %v6269_v15, %v3059_v18  ;;  %v3078_v43 = vpack.c.b16 %v5387_v40, %v5387_v40  ;;  %v3079_v21 = vpack.c.b16 %v5432_v39, %v5432_v39  ;;  %v3080_v1 = vpack.c.b16 %v5442_v51, %v5442_v51  ;;  %3108 = vst.msk [vmem:[%s5659_s1] sm:$0xf] %vm3107_vm10, %v3075_v46 }
 0x1e5   :  { %v3081_v29 = vpack.c.b16 %v5446_v35, %v5446_v35  ;;  %v3082_v55 = vpack.c.b16 %v5455_v14, %v5455_v14  ;;  %v3083_v38 = vpack.c.b16 %v5500_v56, %v5500_v56  ;;  %v3084_v60 = vpack.c.b16 %v3032_v48, %v3032_v48  ;;  %3109 = vst.msk [vmem:[%s5659_s1 + $0x4] sm:$0xf] %vm3107_vm10, %v3076_v36 }
 0x1e6   :  { %v3085_v23 = vpack.c.b16 %v3039_v6, %v3039_v6  ;;  %v3086_v25 = vpack.c.b16 %v3046_v4, %v3046_v4  ;;  %v3087_v61 = vpack.c.b16 %v3053_v26, %v3053_v26  ;;  %v3088_v40 = vpack.c.b16 %v3060_v17, %v3060_v17  ;;  %3110 = vst.msk [vmem:[%s5659_s1 + $0x8] sm:$0xf] %vm3107_vm10, %v3077_v9 }
 0x1e7   :  { %v3089_v28 = vpack.c.b16 %v3067_v53, %v3067_v53  ;;  %v3090_v34 = vpack.c.b16 %v3074_v41, %v3074_v41  ;;  %3111 = vst.msk [vmem:[%s5659_s1 + $0xc] sm:$0xf] %vm3107_vm10, %v3078_v43  ;;  %3112 = vst.msk [vmem:[%s5659_s1 + $0x10] sm:$0xf] %vm3107_vm10, %v3079_v21 }
 0x1e8   :  { %3113 = vst.msk [vmem:[%s5659_s1 + $0x14] sm:$0xf] %vm3107_vm10, %v3080_v1  ;;  %3114 = vst.msk [vmem:[%s5659_s1 + $0x18] sm:$0xf] %vm3107_vm10, %v3081_v29 }
 0x1e9   :  { %3115 = vst.msk [vmem:[%s5659_s1 + $0x1c] sm:$0xf] %vm3107_vm10, %v3082_v55  ;;  %3116 = vst.msk [vmem:[%s5659_s1 + $0x20] sm:$0xf] %vm3107_vm10, %v3083_v38 }
 0x1ea   :  { %3117 = vst.msk [vmem:[%s5659_s1 + $0x24] sm:$0xf] %vm3107_vm10, %v3084_v60  ;;  %3118 = vst.msk [vmem:[%s5659_s1 + $0x28] sm:$0xf] %vm3107_vm10, %v3085_v23 }
 0x1eb   :  { %3119 = vst.msk [vmem:[%s5659_s1 + $0x2c] sm:$0xf] %vm3107_vm10, %v3086_v25  ;;  %3120 = vst.msk [vmem:[%s5659_s1 + $0x30] sm:$0xf] %vm3107_vm10, %v3087_v61 }
 0x1ec   :  { %3121 = vst.msk [vmem:[%s5659_s1 + $0x34] sm:$0xf] %vm3107_vm10, %v3088_v40  ;;  %3122 = vst.msk [vmem:[%s5659_s1 + $0x38] sm:$0xf] %vm3107_vm10, %v3089_v28 }
 0x1ed   :  { %3123 = vst.msk [vmem:[%s5659_s1 + $0x3c] sm:$0xf] %vm3107_vm10, %v3090_v34 }

// kernel: _lambda_.60
= control target key start
LH: loop header
LB: loop body
LE: loop exit
PB: predicated region body
PF: predicated region fallthrough
CT: control target
= control target key end

     0   :  { %vm110_vm0 = vcmask 588800   ;;  %vm135_vm1 = vcmask 1043456   ;;  %vm362_vm2 = vcmask 60416   ;;  %s680_s1 = inlined_call_operand.vmem [shape: bf16[72,8], index: 1, kind: input, shape index: {}]   ;;  %s681_s0 = inlined_call_operand.vmem [shape: bf16[128,72], index: 0, kind: input, shape index: {}]   ;;  %s682_s2 = inlined_call_operand.vmem [shape: f32[1,8], index: 2, kind: input, shape index: {}]   ;;  %s683_s3 = inlined_call_operand.vmem [shape: f32[1,8], index: 3, kind: input, shape index: {}]   ;;  %s684_s4 = inlined_call_operand.vmem [shape: bf16[128,8], index: 4, kind: output, shape index: {}]  }
   0x1   :  { %v489_v0 = vld [vmem:[%s680_s1] sm:$0xff]   ;;  %v490_v1 = vld [vmem:[%s680_s1 + $0x8] sm:$0xff]   ;;  %v491_v2 = vld [vmem:[%s680_s1 + $0x10] sm:$0xff]  }
   0x2   :  { %451 = vmatprep.subr.bf16.mxu0 %v489_v0  ;;  %477 = vmatprep.subr.bf16.mxu1 %v489_v0  ;;  %v494_v3 = vld [vmem:[%s681_s0] sm:$0xff]   ;;  %v492_v5 = vld [vmem:[%s680_s1 + $0x18] sm:$0xff]   ;;  %v496_v8 = vld [vmem:[%s681_s0 + $0x8] sm:$0xff]  }
   0x3   :  { %452 = vmatpush3.bf16.msra.mxu0 %v489_v0  ;;  %482 = vmatpush3.bf16.msra.mxu1 %v489_v0  ;;  %v495_v4 = vld [vmem:[%s681_s0 + $0x20] sm:$0xff]   ;;  %v497_v9 = vld [vmem:[%s681_s0 + $0x28] sm:$0xff]   ;;  %v498_v10 = vld [vmem:[%s681_s0 + $0x10] sm:$0xff]  }
   0x4   :  { %453 = vmatprep.subr.bf16.mxu0 %v490_v1  ;;  %478 = vmatprep.subr.bf16.mxu1 %v490_v1  ;;  %v493_v6 = vld [vmem:[%s680_s1 + $0x20] ss:$0 sps:$4 sm:$0xff]   ;;  %v499_v11 = vld [vmem:[%s681_s0 + $0x30] sm:$0xff]   ;;  %v500_v12 = vld [vmem:[%s681_s0 + $0x18] sm:$0xff]  }
   0x5   :  { %461 = vmatprep.mubr.msk.bf16.mxu0 %vm110_vm0, %v494_v3  ;;  %469 = vmatprep.mubr.msk.bf16.mxu1 %vm110_vm0, %v495_v4  ;;  %v137_v7 = vsel %vm135_vm1, %v493_v6, 0  ;;  %v501_v13 = vld [vmem:[%s681_s0 + $0x38] sm:$0xff]   ;;  %v577_v14 = vld [vmem:[%s682_s2] ss:$0 sm:$0xff] }
   0x6   :  { %v582_v16 = vld [vmem:[%s683_s3] ss:$0 sm:$0xff] }
   0x7   :  { %454 = vmatpush3.bf16.msra.mxu0 %v490_v1  ;;  %483 = vmatpush3.bf16.msra.mxu1 %v490_v1 }
   0x8   :  { %455 = vmatprep.subr.bf16.mxu0 %v491_v2  ;;  %479 = vmatprep.subr.bf16.mxu1 %v491_v2 }
   0xb   :  { %456 = vmatpush3.bf16.msra.mxu0 %v491_v2  ;;  %484 = vmatpush3.bf16.msra.mxu1 %v491_v2 }
   0xc   :  { %457 = vmatprep.subr.bf16.mxu0 %v492_v5  ;;  %480 = vmatprep.subr.bf16.mxu1 %v492_v5 }
   0xf   :  { %458 = vmatpush3.bf16.msra.mxu0 %v492_v5  ;;  %485 = vmatpush3.bf16.msra.mxu1 %v492_v5 }
  0x10   :  { %487 = vmatprep.subr.msk.bf16.mxu0 %vm135_vm1, %v493_v6  ;;  %488 = vmatprep.subr.msk.bf16.mxu1 %vm135_vm1, %v493_v6 }
  0x13   :  { %460 = vmatpush3.bf16.msra.mxu0 %v137_v7  ;;  %486 = vmatpush3.bf16.msra.mxu1 %v137_v7 }
  0x16   :  { %462 = vmatmul.mubr.msk.bf16.vlgmr.msra.gmra.mrb[0].mxu0 %vm110_vm0, %v496_v8  ;;  %470 = vmatmul.mubr.msk.bf16.vlgmr.msra.gmra.mrb[0].mxu1 %vm110_vm0, %v497_v9 }
  0x17   :  { %465 = vmatprep.mubr.msk.bf16.mxu0 %vm110_vm0, %v498_v10  ;;  %473 = vmatprep.mubr.msk.bf16.mxu1 %vm110_vm0, %v499_v11 }
  0x1e   :  { %466 = vmatmul.mubr.msk.bf16.gmra.mrb[4].mxu0 %vm110_vm0, %v500_v12  ;;  %474 = vmatmul.mubr.msk.bf16.gmra.mrb[4].mxu1 %vm110_vm0, %v501_v13 }
  0xe9   :  { %v463_v15 = vpop.f32.mrb[0].mxu0  ;;  %v471_v17 = vpop.f32.mrb[0].mxu1 }
  0xea   :  { %v245_v18 = vmul.f32 %v463_v15, %v577_v14  ;;  %v253_v19 = vmul.f32 %v471_v17, %v577_v14  ;;  %v173_v20 = vpop.f32.mrb[1].mxu0  ;;  %v205_v21 = vpop.f32.mrb[1].mxu1 }
  0xeb   :  { %v243_v22 = vmul.f32 %v577_v14, %v173_v20  ;;  %v251_v23 = vmul.f32 %v577_v14, %v205_v21  ;;  %v464_v24 = vpop.f32.mrb[2].mxu0  ;;  %v472_v25 = vpop.f32.mrb[2].mxu1 }
  0xec   :  { %v268_v26 = vadd.f32 %v582_v16, %v245_v18  ;;  %v276_v27 = vadd.f32 %v582_v16, %v253_v19  ;;  %v246_v28 = vmul.f32 %v464_v24, %v577_v14  ;;  %v254_v29 = vmul.f32 %v472_v25, %v577_v14  ;;  %v176_v30 = vpop.f32.mrb[3].mxu0  ;;  %v208_v31 = vpop.f32.mrb[3].mxu1 }
  0xed   :  { %v266_v32 = vadd.f32 %v582_v16, %v243_v22  ;;  %v274_v33 = vadd.f32 %v582_v16, %v251_v23  ;;  %v244_v34 = vmul.f32 %v577_v14, %v176_v30  ;;  %v252_v35 = vmul.f32 %v577_v14, %v208_v31 }
  0xee   :  { %v284_v36 = vmax.f32 %v268_v26, 0.0  ;;  %v292_v37 = vmax.f32 %v276_v27, 0.0  ;;  %v269_v38 = vadd.f32 %v582_v16, %v246_v28  ;;  %v277_v39 = vadd.f32 %v582_v16, %v254_v29 }
  0xef   :  { %v282_v40 = vmax.f32 %v266_v32, 0.0  ;;  %v290_v41 = vmax.f32 %v274_v33, 0.0  ;;  %v267_v42 = vadd.f32 %v582_v16, %v244_v34  ;;  %v275_v43 = vadd.f32 %v582_v16, %v252_v35 }
  0xf0   :  { %v424_v44 = vpack.c.bf16 %v284_v36, %v284_v36  ;;  %v432_v45 = vpack.c.bf16 %v292_v37, %v292_v37  ;;  %v285_v46 = vmax.f32 %v269_v38, 0.0  ;;  %v293_v47 = vmax.f32 %v277_v39, 0.0 }
  0xf1   :  { %v422_v48 = vpack.c.bf16 %v282_v40, %v282_v40  ;;  %v430_v49 = vpack.c.bf16 %v290_v41, %v290_v41  ;;  %v283_v50 = vmax.f32 %v267_v42, 0.0  ;;  %v291_v51 = vmax.f32 %v275_v43, 0.0  ;;  %v467_v52 = vpop.f32.mrb[4].mxu0  ;;  %v475_v53 = vpop.f32.mrb[4].mxu1 }
  0xf2   :  { %365 = vst.msk [vmem:[%s684_s4 + $0x8] sm:$0xf] %vm362_vm2, %v424_v44  ;;  %373 = vst.msk [vmem:[%s684_s4 + $0x28] sm:$0xf] %vm362_vm2, %v432_v45  ;;  %v425_v54 = vpack.c.bf16 %v285_v46, %v285_v46  ;;  %v433_v55 = vpack.c.bf16 %v293_v47, %v293_v47  ;;  %v249_v56 = vmul.f32 %v467_v52, %v577_v14  ;;  %v189_v58 = vpop.f32.mrb[5].mxu0  ;;  %v221_v59 = vpop.f32.mrb[5].mxu1 }
  0xf3   :  { %v257_v57 = vmul.f32 %v475_v53, %v577_v14  ;;  %363 = vst.msk [vmem:[%s684_s4] sm:$0xf] %vm362_vm2, %v422_v48  ;;  %371 = vst.msk [vmem:[%s684_s4 + $0x20] sm:$0xf] %vm362_vm2, %v430_v49  ;;  %v423_v60 = vpack.c.bf16 %v283_v50, %v283_v50  ;;  %v431_v61 = vpack.c.bf16 %v291_v51, %v291_v51  ;;  %v468_v0 = vpop.f32.mrb[6].mxu0  ;;  %v476_v1 = vpop.f32.mrb[6].mxu1 }
  0xf4   :  { %v247_v62 = vmul.f32 %v577_v14, %v189_v58  ;;  %v255_v63 = vmul.f32 %v577_v14, %v221_v59  ;;  %366 = vst.msk [vmem:[%s684_s4 + $0xc] sm:$0xf] %vm362_vm2, %v425_v54  ;;  %374 = vst.msk [vmem:[%s684_s4 + $0x2c] sm:$0xf] %vm362_vm2, %v433_v55  ;;  %v272_v2 = vadd.f32 %v582_v16, %v249_v56  ;;  %v192_v6 = vpop.f32.mrb[7].mxu0  ;;  %v224_v7 = vpop.f32.mrb[7].mxu1 }
  0xf5   :  { %v280_v3 = vadd.f32 %v582_v16, %v257_v57  ;;  %v250_v4 = vmul.f32 %v468_v0, %v577_v14  ;;  %v258_v5 = vmul.f32 %v476_v1, %v577_v14  ;;  %364 = vst.msk [vmem:[%s684_s4 + $0x4] sm:$0xf] %vm362_vm2, %v423_v60  ;;  %372 = vst.msk [vmem:[%s684_s4 + $0x24] sm:$0xf] %vm362_vm2, %v431_v61 }
  0xf6   :  { %v270_v8 = vadd.f32 %v582_v16, %v247_v62  ;;  %v278_v9 = vadd.f32 %v582_v16, %v255_v63  ;;  %v248_v10 = vmul.f32 %v577_v14, %v192_v6  ;;  %v256_v11 = vmul.f32 %v577_v14, %v224_v7 }
  0xf7   :  { %v288_v12 = vmax.f32 %v272_v2, 0.0  ;;  %v296_v13 = vmax.f32 %v280_v3, 0.0  ;;  %v273_v15 = vadd.f32 %v582_v16, %v250_v4  ;;  %v281_v17 = vadd.f32 %v582_v16, %v258_v5 }
  0xf8   :  { %v286_v18 = vmax.f32 %v270_v8, 0.0  ;;  %v294_v19 = vmax.f32 %v278_v9, 0.0  ;;  %v271_v20 = vadd.f32 %v582_v16, %v248_v10  ;;  %v279_v21 = vadd.f32 %v582_v16, %v256_v11 }
  0xf9   :  { %v428_v22 = vpack.c.bf16 %v288_v12, %v288_v12  ;;  %v436_v23 = vpack.c.bf16 %v296_v13, %v296_v13  ;;  %v289_v24 = vmax.f32 %v273_v15, 0.0  ;;  %v297_v25 = vmax.f32 %v281_v17, 0.0 }
  0xfa   :  { %v426_v26 = vpack.c.bf16 %v286_v18, %v286_v18  ;;  %v434_v27 = vpack.c.bf16 %v294_v19, %v294_v19  ;;  %v287_v28 = vmax.f32 %v271_v20, 0.0  ;;  %v295_v14 = vmax.f32 %v279_v21, 0.0 }
  0xfb   :  { %369 = vst.msk [vmem:[%s684_s4 + $0x18] sm:$0xf] %vm362_vm2, %v428_v22  ;;  %377 = vst.msk [vmem:[%s684_s4 + $0x38] sm:$0xf] %vm362_vm2, %v436_v23  ;;  %v429_v29 = vpack.c.bf16 %v289_v24, %v289_v24  ;;  %v437_v16 = vpack.c.bf16 %v297_v25, %v297_v25 }
  0xfc   :  { %367 = vst.msk [vmem:[%s684_s4 + $0x10] sm:$0xf] %vm362_vm2, %v426_v26  ;;  %375 = vst.msk [vmem:[%s684_s4 + $0x30] sm:$0xf] %vm362_vm2, %v434_v27  ;;  %v427_v30 = vpack.c.bf16 %v287_v28, %v287_v28  ;;  %v435_v31 = vpack.c.bf16 %v295_v14, %v295_v14 }
  0xfd   :  { %370 = vst.msk [vmem:[%s684_s4 + $0x1c] sm:$0xf] %vm362_vm2, %v429_v29  ;;  %378 = vst.msk [vmem:[%s684_s4 + $0x3c] sm:$0xf] %vm362_vm2, %v437_v16 }
  0xfe   :  { %368 = vst.msk [vmem:[%s684_s4 + $0x14] sm:$0xf] %vm362_vm2, %v427_v30  ;;  %376 = vst.msk [vmem:[%s684_s4 + $0x34] sm:$0xf] %vm362_vm2, %v435_v31 }

// kernel: _lambda_.61
= control target key start
LH: loop header
LB: loop body
LE: loop exit
PB: predicated region body
PF: predicated region fallthrough
CT: control target
= control target key end

     0   :  { %vm100_vm0 = vcmask 1043456   ;;  %vm75_vm1 = vcmask 64512   ;;  %vm311_vm2 = vcmask 257024   ;;  %s587_s1 = inlined_call_operand.vmem [shape: bf16[8,32], index: 1, kind: input, shape index: {}]   ;;  %s588_s0 = inlined_call_operand.vmem [shape: bf16[128,8], index: 0, kind: input, shape index: {}]   ;;  %s589_s2 = inlined_call_operand.vmem [shape: f32[1,32], index: 2, kind: input, shape index: {}]   ;;  %s590_s3 = inlined_call_operand.vmem [shape: f32[1,32], index: 3, kind: input, shape index: {}]   ;;  %s591_s4 = inlined_call_operand.vmem [shape: bf16[128,32], index: 4, kind: output, shape index: {}]  }
   0x1   :  { %v34_v0 = vld [vmem:[%s587_s1] sm:$0xf]  ;;  %v415_v4 = vld [vmem:[%s588_s0 + $0x8] sm:$0xff]   ;;  %v417_v6 = vld [vmem:[%s588_s0 + $0x10] sm:$0xff]  }
   0x2   :  { %411 = vmatprep.subr.msk.bf16.mxu0 %vm100_vm0, %v34_v0  ;;  %412 = vmatprep.subr.msk.bf16.mxu1 %vm100_vm0, %v34_v0  ;;  %v102_v1 = vsel %vm100_vm0, %v34_v0, 0  ;;  %v413_v2 = vld [vmem:[%s588_s0] sm:$0xff]   ;;  %v416_v5 = vld [vmem:[%s588_s0 + $0x28] sm:$0xff]   ;;  %v418_v7 = vld [vmem:[%s588_s0 + $0x30] sm:$0xff]  }
   0x3   :  { %392 = vmatpush3.bf16.msra.mxu0 %v102_v1  ;;  %410 = vmatpush3.bf16.msra.mxu1 %v102_v1  ;;  %v414_v3 = vld [vmem:[%s588_s0 + $0x20] sm:$0xff]   ;;  %v419_v8 = vld [vmem:[%s588_s0 + $0x18] sm:$0xff]  }
   0x4   :  { %393 = vmatprep.mubr.msk.bf16.mxu0 %vm75_vm1, %v413_v2  ;;  %401 = vmatprep.mubr.msk.bf16.mxu1 %vm75_vm1, %v414_v3  ;;  %v420_v9 = vld [vmem:[%s588_s0 + $0x38] sm:$0xff]   ;;  %v484_v10 = vld [vmem:[%s589_s2] ss:$0 sm:$0xff] }
   0x5   :  { %v489_v12 = vld [vmem:[%s590_s3] ss:$0 sm:$0xff] }
   0x6   :  { %394 = vmatmul.mubr.msk.bf16.vlgmr.msra.gmra.mrb[0].mxu0 %vm75_vm1, %v415_v4  ;;  %402 = vmatmul.mubr.msk.bf16.vlgmr.msra.gmra.mrb[0].mxu1 %vm75_vm1, %v416_v5 }
   0x7   :  { %397 = vmatprep.mubr.msk.bf16.mxu0 %vm75_vm1, %v417_v6  ;;  %405 = vmatprep.mubr.msk.bf16.mxu1 %vm75_vm1, %v418_v7 }
   0xe   :  { %398 = vmatmul.mubr.msk.bf16.gmra.mrb[4].mxu0 %vm75_vm1, %v419_v8  ;;  %406 = vmatmul.mubr.msk.bf16.gmra.mrb[4].mxu1 %vm75_vm1, %v420_v9 }
  0xd9   :  { %v395_v11 = vpop.f32.mrb[0].mxu0  ;;  %v403_v14 = vpop.f32.mrb[0].mxu1 }
  0xda   :  { %v210_v13 = vmul.f32 %v395_v11, %v484_v10  ;;  %v138_v15 = vpop.f32.mrb[1].mxu0  ;;  %v218_v16 = vmul.f32 %v403_v14, %v484_v10  ;;  %v170_v18 = vpop.f32.mrb[1].mxu1 }
  0xdb   :  { %v208_v17 = vmul.f32 %v484_v10, %v138_v15  ;;  %v396_v19 = vpop.f32.mrb[2].mxu0  ;;  %v216_v21 = vmul.f32 %v484_v10, %v170_v18  ;;  %v404_v23 = vpop.f32.mrb[2].mxu1 }
  0xdc   :  { %v233_v20 = vadd.f32 %v489_v12, %v210_v13  ;;  %v211_v22 = vmul.f32 %v396_v19, %v484_v10  ;;  %v141_v24 = vpop.f32.mrb[3].mxu0  ;;  %v241_v25 = vadd.f32 %v489_v12, %v218_v16  ;;  %v219_v27 = vmul.f32 %v404_v23, %v484_v10  ;;  %v173_v29 = vpop.f32.mrb[3].mxu1 }
  0xdd   :  { %v231_v26 = vadd.f32 %v489_v12, %v208_v17  ;;  %v209_v28 = vmul.f32 %v484_v10, %v141_v24  ;;  %v239_v31 = vadd.f32 %v489_v12, %v216_v21  ;;  %v217_v33 = vmul.f32 %v484_v10, %v173_v29 }
  0xde   :  { %v368_v30 = vpack.c.bf16 %v233_v20, %v233_v20  ;;  %v234_v32 = vadd.f32 %v489_v12, %v211_v22  ;;  %v376_v34 = vpack.c.bf16 %v241_v25, %v241_v25  ;;  %v242_v36 = vadd.f32 %v489_v12, %v219_v27 }
  0xdf   :  { %v366_v35 = vpack.c.bf16 %v231_v26, %v231_v26  ;;  %v232_v37 = vadd.f32 %v489_v12, %v209_v28  ;;  %v374_v38 = vpack.c.bf16 %v239_v31, %v239_v31  ;;  %v240_v40 = vadd.f32 %v489_v12, %v217_v33 }
  0xe0   :  { %314 = vst.msk [vmem:[%s591_s4 + $0x8] sm:$0xf] %vm311_vm2, %v368_v30  ;;  %v369_v39 = vpack.c.bf16 %v234_v32, %v234_v32  ;;  %322 = vst.msk [vmem:[%s591_s4 + $0x28] sm:$0xf] %vm311_vm2, %v376_v34  ;;  %v377_v41 = vpack.c.bf16 %v242_v36, %v242_v36 }
  0xe1   :  { %312 = vst.msk [vmem:[%s591_s4] sm:$0xf] %vm311_vm2, %v366_v35  ;;  %v367_v42 = vpack.c.bf16 %v232_v37, %v232_v37  ;;  %v399_v43 = vpop.f32.mrb[4].mxu0  ;;  %320 = vst.msk [vmem:[%s591_s4 + $0x20] sm:$0xf] %vm311_vm2, %v374_v38  ;;  %v375_v44 = vpack.c.bf16 %v240_v40, %v240_v40  ;;  %v407_v46 = vpop.f32.mrb[4].mxu1 }
  0xe2   :  { %315 = vst.msk [vmem:[%s591_s4 + $0xc] sm:$0xf] %vm311_vm2, %v369_v39  ;;  %v214_v45 = vmul.f32 %v399_v43, %v484_v10  ;;  %v154_v47 = vpop.f32.mrb[5].mxu0  ;;  %323 = vst.msk [vmem:[%s591_s4 + $0x2c] sm:$0xf] %vm311_vm2, %v377_v41  ;;  %v222_v48 = vmul.f32 %v407_v46, %v484_v10  ;;  %v186_v50 = vpop.f32.mrb[5].mxu1 }
  0xe3   :  { %313 = vst.msk [vmem:[%s591_s4 + $0x4] sm:$0xf] %vm311_vm2, %v367_v42  ;;  %v212_v49 = vmul.f32 %v484_v10, %v154_v47  ;;  %v400_v51 = vpop.f32.mrb[6].mxu0  ;;  %321 = vst.msk [vmem:[%s591_s4 + $0x24] sm:$0xf] %vm311_vm2, %v375_v44  ;;  %v220_v53 = vmul.f32 %v484_v10, %v186_v50  ;;  %v408_v55 = vpop.f32.mrb[6].mxu1 }
  0xe4   :  { %v237_v52 = vadd.f32 %v489_v12, %v214_v45  ;;  %v215_v54 = vmul.f32 %v400_v51, %v484_v10  ;;  %v157_v56 = vpop.f32.mrb[7].mxu0  ;;  %v245_v57 = vadd.f32 %v489_v12, %v222_v48  ;;  %v223_v59 = vmul.f32 %v408_v55, %v484_v10  ;;  %v189_v61 = vpop.f32.mrb[7].mxu1 }
  0xe5   :  { %v235_v58 = vadd.f32 %v489_v12, %v212_v49  ;;  %v213_v60 = vmul.f32 %v484_v10, %v157_v56  ;;  %v243_v63 = vadd.f32 %v489_v12, %v220_v53  ;;  %v221_v1 = vmul.f32 %v484_v10, %v189_v61 }
  0xe6   :  { %v372_v62 = vpack.c.bf16 %v237_v52, %v237_v52  ;;  %v238_v0 = vadd.f32 %v489_v12, %v215_v54  ;;  %v380_v2 = vpack.c.bf16 %v245_v57, %v245_v57  ;;  %v246_v4 = vadd.f32 %v489_v12, %v223_v59 }
  0xe7   :  { %v370_v3 = vpack.c.bf16 %v235_v58, %v235_v58  ;;  %v236_v5 = vadd.f32 %v489_v12, %v213_v60  ;;  %v378_v6 = vpack.c.bf16 %v243_v63, %v243_v63  ;;  %v244_v8 = vadd.f32 %v489_v12, %v221_v1 }
  0xe8   :  { %318 = vst.msk [vmem:[%s591_s4 + $0x18] sm:$0xf] %vm311_vm2, %v372_v62  ;;  %v373_v7 = vpack.c.bf16 %v238_v0, %v238_v0  ;;  %326 = vst.msk [vmem:[%s591_s4 + $0x38] sm:$0xf] %vm311_vm2, %v380_v2  ;;  %v381_v9 = vpack.c.bf16 %v246_v4, %v246_v4 }
  0xe9   :  { %316 = vst.msk [vmem:[%s591_s4 + $0x10] sm:$0xf] %vm311_vm2, %v370_v3  ;;  %v371_v10 = vpack.c.bf16 %v236_v5, %v236_v5  ;;  %324 = vst.msk [vmem:[%s591_s4 + $0x30] sm:$0xf] %vm311_vm2, %v378_v6  ;;  %v379_v11 = vpack.c.bf16 %v244_v8, %v244_v8 }
  0xea   :  { %319 = vst.msk [vmem:[%s591_s4 + $0x1c] sm:$0xf] %vm311_vm2, %v373_v7  ;;  %327 = vst.msk [vmem:[%s591_s4 + $0x3c] sm:$0xf] %vm311_vm2, %v381_v9 }
  0xeb   :  { %317 = vst.msk [vmem:[%s591_s4 + $0x14] sm:$0xf] %vm311_vm2, %v371_v10  ;;  %325 = vst.msk [vmem:[%s591_s4 + $0x34] sm:$0xf] %vm311_vm2, %v379_v11 }

// kernel: _lambda_.62
= control target key start
LH: loop header
LB: loop body
LE: loop exit
PB: predicated region body
PF: predicated region fallthrough
CT: control target
= control target key end

     0   :  { %vm103_vm0 = vcmask 1043456   ;;  %vm78_vm1 = vcmask 64512   ;;  %vm378_vm2 = vcmask 257024   ;;  %s758_s1 = inlined_call_operand.vmem [shape: bf16[8,32], index: 1, kind: input, shape index: {}]   ;;  %s759_s0 = inlined_call_operand.vmem [shape: bf16[128,8], index: 0, kind: input, shape index: {}]   ;;  %s760_s4 = inlined_call_operand.vmem [shape: bf16[128,32], index: 4, kind: input, shape index: {}]   ;;  %s761_s2 = inlined_call_operand.vmem [shape: f32[1,32], index: 2, kind: input, shape index: {}]   ;;  %s762_s3 = inlined_call_operand.vmem [shape: f32[1,32], index: 3, kind: input, shape index: {}]   ;;  %s763_s5 = inlined_call_operand.vmem [shape: bf16[128,32], index: 5, kind: output, shape index: {}]  }
   0x1   :  { %v37_v0 = vld [vmem:[%s758_s1] sm:$0xf]  ;;  %v521_v4 = vld [vmem:[%s759_s0 + $0x8] sm:$0xff]   ;;  %v523_v6 = vld [vmem:[%s759_s0 + $0x10] sm:$0xff]  }
   0x2   :  { %517 = vmatprep.subr.msk.bf16.mxu0 %vm103_vm0, %v37_v0  ;;  %518 = vmatprep.subr.msk.bf16.mxu1 %vm103_vm0, %v37_v0  ;;  %v105_v1 = vsel %vm103_vm0, %v37_v0, 0  ;;  %v519_v2 = vld [vmem:[%s759_s0] sm:$0xff]   ;;  %v522_v5 = vld [vmem:[%s759_s0 + $0x28] sm:$0xff]   ;;  %v524_v7 = vld [vmem:[%s759_s0 + $0x30] sm:$0xff]  }
   0x3   :  { %498 = vmatpush3.bf16.msra.mxu0 %v105_v1  ;;  %516 = vmatpush3.bf16.msra.mxu1 %v105_v1  ;;  %v520_v3 = vld [vmem:[%s759_s0 + $0x20] sm:$0xff]   ;;  %v525_v8 = vld [vmem:[%s759_s0 + $0x18] sm:$0xff]   ;;  %v481_v10 = vld [vmem:[%s760_s4 + $0x8] sm:$0xff]  }
   0x4   :  { %499 = vmatprep.mubr.msk.bf16.mxu0 %vm78_vm1, %v519_v2  ;;  %507 = vmatprep.mubr.msk.bf16.mxu1 %vm78_vm1, %v520_v3  ;;  %v526_v9 = vld [vmem:[%s759_s0 + $0x38] sm:$0xff]   ;;  %v485_v11 = vld [vmem:[%s760_s4 + $0x28] sm:$0xff]   ;;  %v450_v12 = vld [vmem:[%s760_s4] sm:$0xff]   ;;  %v455_v17 = vunpack.c.l.bf16 %v481_v10  ;;  %v456_v23 = vunpack.c.h.bf16 %v481_v10 }
   0x5   :  { %v604_v13 = vld [vmem:[%s760_s4 + $0x20] sm:$0xff]   ;;  %v609_v14 = vld [vmem:[%s760_s4 + $0x18] sm:$0xff]   ;;  %v471_v18 = vunpack.c.l.bf16 %v485_v11  ;;  %v451_v19 = vunpack.c.l.bf16 %v450_v12  ;;  %v624_v20 = vld [vmem:[%s760_s4 + $0x10] sm:$0xff]   ;;  %v472_v24 = vunpack.c.h.bf16 %v485_v11  ;;  %v452_v25 = vunpack.c.h.bf16 %v450_v12 }
   0x6   :  { %500 = vmatmul.mubr.msk.bf16.vlgmr.msra.gmra.mrb[0].mxu0 %vm78_vm1, %v521_v4  ;;  %508 = vmatmul.mubr.msk.bf16.vlgmr.msra.gmra.mrb[0].mxu1 %vm78_vm1, %v522_v5  ;;  %v614_v15 = vld [vmem:[%s760_s4 + $0x38] sm:$0xff]   ;;  %v619_v16 = vld [vmem:[%s761_s2] ss:$0 sm:$0xff]  ;;  %v629_v21 = vld [vmem:[%s760_s4 + $0x30] sm:$0xff]   ;;  %v467_v22 = vunpack.c.l.bf16 %v604_v13  ;;  %v468_v28 = vunpack.c.h.bf16 %v604_v13  ;;  %v463_v29 = vunpack.c.l.bf16 %v609_v14  ;;  %v459_v34 = vunpack.c.l.bf16 %v624_v20 }
   0x7   :  { %503 = vmatprep.mubr.msk.bf16.mxu0 %vm78_vm1, %v523_v6  ;;  %511 = vmatprep.mubr.msk.bf16.mxu1 %vm78_vm1, %v524_v7  ;;  %v635_v27 = vld [vmem:[%s762_s3] ss:$0 sm:$0xff]  ;;  %v479_v30 = vunpack.c.l.bf16 %v614_v15  ;;  %v475_v35 = vunpack.c.l.bf16 %v629_v21  ;;  %v464_v36 = vunpack.c.h.bf16 %v609_v14  ;;  %v480_v41 = vunpack.c.h.bf16 %v614_v15 }
   0x8   :  { %v460_v42 = vunpack.c.h.bf16 %v624_v20  ;;  %v476_v48 = vunpack.c.h.bf16 %v629_v21 }
   0xe   :  { %504 = vmatmul.mubr.msk.bf16.gmra.mrb[4].mxu0 %vm78_vm1, %v525_v8  ;;  %512 = vmatmul.mubr.msk.bf16.gmra.mrb[4].mxu1 %vm78_vm1, %v526_v9 }
  0xd9   :  { %v501_v26 = vpop.f32.mrb[0].mxu0  ;;  %v509_v32 = vpop.f32.mrb[0].mxu1 }
  0xda   :  { %v213_v31 = vmul.f32 %v501_v26, %v619_v16  ;;  %v141_v33 = vpop.f32.mrb[1].mxu0  ;;  %v221_v37 = vmul.f32 %v509_v32, %v619_v16  ;;  %v173_v39 = vpop.f32.mrb[1].mxu1 }
  0xdb   :  { %v211_v38 = vmul.f32 %v619_v16, %v141_v33  ;;  %v502_v40 = vpop.f32.mrb[2].mxu0  ;;  %v219_v44 = vmul.f32 %v619_v16, %v173_v39  ;;  %v510_v46 = vpop.f32.mrb[2].mxu1 }
  0xdc   :  { %v236_v43 = vadd.f32 %v635_v27, %v213_v31  ;;  %v214_v45 = vmul.f32 %v502_v40, %v619_v16  ;;  %v144_v47 = vpop.f32.mrb[3].mxu0  ;;  %v244_v49 = vadd.f32 %v635_v27, %v221_v37  ;;  %v222_v51 = vmul.f32 %v510_v46, %v619_v16  ;;  %v176_v53 = vpop.f32.mrb[3].mxu1 }
  0xdd   :  { %v234_v50 = vadd.f32 %v635_v27, %v211_v38  ;;  %v212_v52 = vmul.f32 %v619_v16, %v144_v47  ;;  %v242_v55 = vadd.f32 %v635_v27, %v219_v44  ;;  %v220_v57 = vmul.f32 %v619_v16, %v176_v53 }
  0xde   :  { %v284_v54 = vadd.f32 %v455_v17, %v236_v43  ;;  %v237_v56 = vadd.f32 %v635_v27, %v214_v45  ;;  %v292_v58 = vadd.f32 %v471_v18, %v244_v49  ;;  %v245_v60 = vadd.f32 %v635_v27, %v222_v51 }
  0xdf   :  { %v282_v59 = vadd.f32 %v451_v19, %v234_v50  ;;  %v235_v61 = vadd.f32 %v635_v27, %v212_v52  ;;  %v290_v63 = vadd.f32 %v467_v22, %v242_v55  ;;  %v243_v1 = vadd.f32 %v635_v27, %v220_v57 }
  0xe0   :  { %v300_v62 = vmax.f32 %v284_v54, 0.0  ;;  %v285_v0 = vadd.f32 %v456_v23, %v237_v56  ;;  %v308_v2 = vmax.f32 %v292_v58, 0.0  ;;  %v293_v4 = vadd.f32 %v472_v24, %v245_v60 }
  0xe1   :  { %v298_v3 = vmax.f32 %v282_v59, 0.0  ;;  %v283_v5 = vadd.f32 %v452_v25, %v235_v61  ;;  %v505_v6 = vpop.f32.mrb[4].mxu0  ;;  %v306_v8 = vmax.f32 %v290_v63, 0.0  ;;  %v291_v10 = vadd.f32 %v468_v28, %v243_v1  ;;  %v513_v11 = vpop.f32.mrb[4].mxu1 }
  0xe2   :  { %v435_v7 = vpack.c.bf16 %v300_v62, %v300_v62  ;;  %v301_v9 = vmax.f32 %v285_v0, 0.0  ;;  %v157_v12 = vpop.f32.mrb[5].mxu0  ;;  %v443_v13 = vpack.c.bf16 %v308_v2, %v308_v2  ;;  %v309_v18 = vmax.f32 %v293_v4, 0.0  ;;  %v189_v26 = vpop.f32.mrb[5].mxu1 }
  0xe3   :  { %v433_v17 = vpack.c.bf16 %v298_v3, %v298_v3  ;;  %v299_v19 = vmax.f32 %v283_v5, 0.0  ;;  %v506_v22 = vpop.f32.mrb[6].mxu0  ;;  %v441_v23 = vpack.c.bf16 %v306_v8, %v306_v8  ;;  %v307_v25 = vmax.f32 %v291_v10, 0.0  ;;  %v514_v32 = vpop.f32.mrb[6].mxu1 }
  0xe4   :  { %381 = vst.msk [vmem:[%s763_s5 + $0x8] sm:$0xf] %vm378_vm2, %v435_v7  ;;  %v436_v24 = vpack.c.bf16 %v301_v9, %v301_v9  ;;  %v217_v31 = vmul.f32 %v505_v6, %v619_v16  ;;  %v160_v28 = vpop.f32.mrb[7].mxu0  ;;  %389 = vst.msk [vmem:[%s763_s5 + $0x28] sm:$0xf] %vm378_vm2, %v443_v13  ;;  %v444_v33 = vpack.c.bf16 %v309_v18, %v309_v18  ;;  %v192_v40 = vpop.f32.mrb[7].mxu1 }
  0xe5   :  { %379 = vst.msk [vmem:[%s763_s5] sm:$0xf] %vm378_vm2, %v433_v17  ;;  %v434_v37 = vpack.c.bf16 %v299_v19, %v299_v19  ;;  %v225_v38 = vmul.f32 %v513_v11, %v619_v16  ;;  %v215_v39 = vmul.f32 %v619_v16, %v157_v12  ;;  %387 = vst.msk [vmem:[%s763_s5 + $0x20] sm:$0xf] %vm378_vm2, %v441_v23 }
  0xe6   :  { %382 = vst.msk [vmem:[%s763_s5 + $0xc] sm:$0xf] %vm378_vm2, %v436_v24  ;;  %v442_v43 = vpack.c.bf16 %v307_v25, %v307_v25  ;;  %v240_v44 = vadd.f32 %v635_v27, %v217_v31  ;;  %v223_v45 = vmul.f32 %v619_v16, %v189_v26  ;;  %v218_v46 = vmul.f32 %v506_v22, %v619_v16 }
  0xe7   :  { %390 = vst.msk [vmem:[%s763_s5 + $0x2c] sm:$0xf] %vm378_vm2, %v444_v33  ;;  %380 = vst.msk [vmem:[%s763_s5 + $0x4] sm:$0xf] %vm378_vm2, %v434_v37  ;;  %v248_v47 = vadd.f32 %v635_v27, %v225_v38  ;;  %v238_v49 = vadd.f32 %v635_v27, %v215_v39  ;;  %v226_v50 = vmul.f32 %v514_v32, %v619_v16 }
  0xe8   :  { %v216_v51 = vmul.f32 %v619_v16, %v160_v28  ;;  %388 = vst.msk [vmem:[%s763_s5 + $0x24] sm:$0xf] %vm378_vm2, %v442_v43  ;;  %v288_v52 = vadd.f32 %v463_v29, %v240_v44  ;;  %v246_v53 = vadd.f32 %v635_v27, %v223_v45  ;;  %v241_v54 = vadd.f32 %v635_v27, %v218_v46 }
  0xe9   :  { %v224_v55 = vmul.f32 %v619_v16, %v192_v40  ;;  %v296_v56 = vadd.f32 %v479_v30, %v248_v47  ;;  %v286_v57 = vadd.f32 %v459_v34, %v238_v49  ;;  %v249_v58 = vadd.f32 %v635_v27, %v226_v50 }
  0xea   :  { %v239_v59 = vadd.f32 %v635_v27, %v216_v51  ;;  %v304_v60 = vmax.f32 %v288_v52, 0.0  ;;  %v294_v29 = vadd.f32 %v475_v35, %v246_v53  ;;  %v289_v61 = vadd.f32 %v464_v36, %v241_v54 }
  0xeb   :  { %v247_v62 = vadd.f32 %v635_v27, %v224_v55  ;;  %v312_v16 = vmax.f32 %v296_v56, 0.0  ;;  %v302_v63 = vmax.f32 %v286_v57, 0.0  ;;  %v297_v30 = vadd.f32 %v480_v41, %v249_v58 }
  0xec   :  { %v287_v34 = vadd.f32 %v460_v42, %v239_v59  ;;  %v439_v0 = vpack.c.bf16 %v304_v60, %v304_v60  ;;  %v310_v1 = vmax.f32 %v294_v29, 0.0  ;;  %v305_v2 = vmax.f32 %v289_v61, 0.0 }
  0xed   :  { %v295_v3 = vadd.f32 %v476_v48, %v247_v62  ;;  %v447_v35 = vpack.c.bf16 %v312_v16, %v312_v16  ;;  %v437_v4 = vpack.c.bf16 %v302_v63, %v302_v63  ;;  %v313_v14 = vmax.f32 %v297_v30, 0.0 }
  0xee   :  { %v303_v36 = vmax.f32 %v287_v34, 0.0  ;;  %385 = vst.msk [vmem:[%s763_s5 + $0x18] sm:$0xf] %vm378_vm2, %v439_v0  ;;  %v445_v15 = vpack.c.bf16 %v310_v1, %v310_v1  ;;  %v440_v27 = vpack.c.bf16 %v305_v2, %v305_v2 }
  0xef   :  { %v311_v41 = vmax.f32 %v295_v3, 0.0  ;;  %393 = vst.msk [vmem:[%s763_s5 + $0x38] sm:$0xf] %vm378_vm2, %v447_v35  ;;  %383 = vst.msk [vmem:[%s763_s5 + $0x10] sm:$0xf] %vm378_vm2, %v437_v4  ;;  %v448_v20 = vpack.c.bf16 %v313_v14, %v313_v14 }
  0xf0   :  { %v438_v21 = vpack.c.bf16 %v303_v36, %v303_v36  ;;  %391 = vst.msk [vmem:[%s763_s5 + $0x30] sm:$0xf] %vm378_vm2, %v445_v15  ;;  %386 = vst.msk [vmem:[%s763_s5 + $0x1c] sm:$0xf] %vm378_vm2, %v440_v27 }
  0xf1   :  { %v446_v42 = vpack.c.bf16 %v311_v41, %v311_v41  ;;  %394 = vst.msk [vmem:[%s763_s5 + $0x3c] sm:$0xf] %vm378_vm2, %v448_v20 }
  0xf2   :  { %384 = vst.msk [vmem:[%s763_s5 + $0x14] sm:$0xf] %vm378_vm2, %v438_v21 }
  0xf3   :  { %392 = vst.msk [vmem:[%s763_s5 + $0x34] sm:$0xf] %vm378_vm2, %v446_v42 }

// kernel: _lambda_.69
= control target key start
LH: loop header
LB: loop body
LE: loop exit
PB: predicated region body
PF: predicated region fallthrough
CT: control target
= control target key end

     0   :  { %vm90_vm0 = vcmask 261120   ;;  %vm338_vm1 = vcmask 125952   ;;  %s624_s1 = inlined_call_operand.vmem [shape: bf16[32,16], index: 1, kind: input, shape index: {}]   ;;  %s625_s0 = inlined_call_operand.vmem [shape: bf16[128,32], index: 0, kind: input, shape index: {}]   ;;  %s626_s2 = inlined_call_operand.vmem [shape: f32[1,16], index: 2, kind: input, shape index: {}]   ;;  %s627_s3 = inlined_call_operand.vmem [shape: f32[1,16], index: 3, kind: input, shape index: {}]   ;;  %s628_s4 = inlined_call_operand.vmem [shape: bf16[128,16], index: 4, kind: output, shape index: {}]  }
   0x1   :  { %v445_v0 = vld [vmem:[%s624_s1] sm:$0xff]   ;;  %v446_v1 = vld [vmem:[%s624_s1 + $0x8] sm:$0xff]   ;;  %v451_v6 = vld [vmem:[%s625_s0 + $0x10] sm:$0xff]  }
   0x2   :  { %421 = vmatprep.subr.bf16.mxu0 %v445_v0  ;;  %441 = vmatprep.subr.bf16.mxu1 %v445_v0  ;;  %v447_v2 = vld [vmem:[%s625_s0] sm:$0xff]   ;;  %v449_v4 = vld [vmem:[%s625_s0 + $0x8] sm:$0xff]   ;;  %v452_v7 = vld [vmem:[%s625_s0 + $0x30] sm:$0xff]  }
   0x3   :  { %422 = vmatpush3.bf16.msra.mxu0 %v445_v0  ;;  %443 = vmatpush3.bf16.msra.mxu1 %v445_v0  ;;  %v448_v3 = vld [vmem:[%s625_s0 + $0x20] sm:$0xff]   ;;  %v450_v5 = vld [vmem:[%s625_s0 + $0x28] sm:$0xff]   ;;  %v453_v8 = vld [vmem:[%s625_s0 + $0x18] sm:$0xff]  }
   0x4   :  { %423 = vmatprep.subr.bf16.mxu0 %v446_v1  ;;  %442 = vmatprep.subr.bf16.mxu1 %v446_v1  ;;  %v454_v9 = vld [vmem:[%s625_s0 + $0x38] sm:$0xff]   ;;  %v521_v10 = vld [vmem:[%s626_s2] ss:$0 sm:$0xff] }
   0x5   :  { %425 = vmatprep.mubr.msk.bf16.mxu0 %vm90_vm0, %v447_v2  ;;  %433 = vmatprep.mubr.msk.bf16.mxu1 %vm90_vm0, %v448_v3  ;;  %v526_v12 = vld [vmem:[%s627_s3] ss:$0 sm:$0xff] }
   0x7   :  { %424 = vmatpush3.bf16.msra.mxu0 %v446_v1  ;;  %444 = vmatpush3.bf16.msra.mxu1 %v446_v1 }
   0xa   :  { %426 = vmatmul.mubr.msk.bf16.vlgmr.msra.gmra.mrb[0].mxu0 %vm90_vm0, %v449_v4  ;;  %434 = vmatmul.mubr.msk.bf16.vlgmr.msra.gmra.mrb[0].mxu1 %vm90_vm0, %v450_v5 }
   0xb   :  { %429 = vmatprep.mubr.msk.bf16.mxu0 %vm90_vm0, %v451_v6  ;;  %437 = vmatprep.mubr.msk.bf16.mxu1 %vm90_vm0, %v452_v7 }
  0x12   :  { %430 = vmatmul.mubr.msk.bf16.gmra.mrb[4].mxu0 %vm90_vm0, %v453_v8  ;;  %438 = vmatmul.mubr.msk.bf16.gmra.mrb[4].mxu1 %vm90_vm0, %v454_v9 }
  0xdd   :  { %v427_v11 = vpop.f32.mrb[0].mxu0  ;;  %v435_v13 = vpop.f32.mrb[0].mxu1 }
  0xde   :  { %v221_v14 = vmul.f32 %v427_v11, %v521_v10  ;;  %v229_v15 = vmul.f32 %v435_v13, %v521_v10  ;;  %v149_v16 = vpop.f32.mrb[1].mxu0  ;;  %v181_v17 = vpop.f32.mrb[1].mxu1 }
  0xdf   :  { %v219_v18 = vmul.f32 %v521_v10, %v149_v16  ;;  %v227_v19 = vmul.f32 %v521_v10, %v181_v17  ;;  %v428_v20 = vpop.f32.mrb[2].mxu0  ;;  %v436_v21 = vpop.f32.mrb[2].mxu1 }
  0xe0   :  { %v244_v22 = vadd.f32 %v526_v12, %v221_v14  ;;  %v252_v23 = vadd.f32 %v526_v12, %v229_v15  ;;  %v222_v24 = vmul.f32 %v428_v20, %v521_v10  ;;  %v230_v25 = vmul.f32 %v436_v21, %v521_v10  ;;  %v152_v26 = vpop.f32.mrb[3].mxu0  ;;  %v184_v27 = vpop.f32.mrb[3].mxu1 }
  0xe1   :  { %v242_v28 = vadd.f32 %v526_v12, %v219_v18  ;;  %v250_v29 = vadd.f32 %v526_v12, %v227_v19  ;;  %v220_v30 = vmul.f32 %v521_v10, %v152_v26  ;;  %v228_v31 = vmul.f32 %v521_v10, %v184_v27 }
  0xe2   :  { %v260_v32 = vmax.f32 %v244_v22, 0.0  ;;  %v268_v33 = vmax.f32 %v252_v23, 0.0  ;;  %v245_v34 = vadd.f32 %v526_v12, %v222_v24  ;;  %v253_v35 = vadd.f32 %v526_v12, %v230_v25 }
  0xe3   :  { %v258_v36 = vmax.f32 %v242_v28, 0.0  ;;  %v266_v37 = vmax.f32 %v250_v29, 0.0  ;;  %v243_v38 = vadd.f32 %v526_v12, %v220_v30  ;;  %v251_v39 = vadd.f32 %v526_v12, %v228_v31 }
  0xe4   :  { %v397_v40 = vpack.c.bf16 %v260_v32, %v260_v32  ;;  %v405_v41 = vpack.c.bf16 %v268_v33, %v268_v33  ;;  %v261_v42 = vmax.f32 %v245_v34, 0.0  ;;  %v269_v43 = vmax.f32 %v253_v35, 0.0 }
  0xe5   :  { %v395_v44 = vpack.c.bf16 %v258_v36, %v258_v36  ;;  %v403_v45 = vpack.c.bf16 %v266_v37, %v266_v37  ;;  %v259_v46 = vmax.f32 %v243_v38, 0.0  ;;  %v267_v47 = vmax.f32 %v251_v39, 0.0  ;;  %v431_v48 = vpop.f32.mrb[4].mxu0  ;;  %v439_v49 = vpop.f32.mrb[4].mxu1 }
  0xe6   :  { %341 = vst.msk [vmem:[%s628_s4 + $0x8] sm:$0xf] %vm338_vm1, %v397_v40  ;;  %349 = vst.msk [vmem:[%s628_s4 + $0x28] sm:$0xf] %vm338_vm1, %v405_v41  ;;  %v398_v50 = vpack.c.bf16 %v261_v42, %v261_v42  ;;  %v406_v51 = vpack.c.bf16 %v269_v43, %v269_v43  ;;  %v225_v52 = vmul.f32 %v431_v48, %v521_v10  ;;  %v165_v54 = vpop.f32.mrb[5].mxu0  ;;  %v197_v55 = vpop.f32.mrb[5].mxu1 }
  0xe7   :  { %v233_v53 = vmul.f32 %v439_v49, %v521_v10  ;;  %339 = vst.msk [vmem:[%s628_s4] sm:$0xf] %vm338_vm1, %v395_v44  ;;  %347 = vst.msk [vmem:[%s628_s4 + $0x20] sm:$0xf] %vm338_vm1, %v403_v45  ;;  %v396_v56 = vpack.c.bf16 %v259_v46, %v259_v46  ;;  %v404_v57 = vpack.c.bf16 %v267_v47, %v267_v47  ;;  %v432_v60 = vpop.f32.mrb[6].mxu0  ;;  %v440_v61 = vpop.f32.mrb[6].mxu1 }
  0xe8   :  { %v223_v58 = vmul.f32 %v521_v10, %v165_v54  ;;  %v231_v59 = vmul.f32 %v521_v10, %v197_v55  ;;  %342 = vst.msk [vmem:[%s628_s4 + $0xc] sm:$0xf] %vm338_vm1, %v398_v50  ;;  %350 = vst.msk [vmem:[%s628_s4 + $0x2c] sm:$0xf] %vm338_vm1, %v406_v51  ;;  %v248_v62 = vadd.f32 %v526_v12, %v225_v52  ;;  %v168_v2 = vpop.f32.mrb[7].mxu0  ;;  %v200_v3 = vpop.f32.mrb[7].mxu1 }
  0xe9   :  { %v256_v63 = vadd.f32 %v526_v12, %v233_v53  ;;  %v226_v0 = vmul.f32 %v432_v60, %v521_v10  ;;  %v234_v1 = vmul.f32 %v440_v61, %v521_v10  ;;  %340 = vst.msk [vmem:[%s628_s4 + $0x4] sm:$0xf] %vm338_vm1, %v396_v56  ;;  %348 = vst.msk [vmem:[%s628_s4 + $0x24] sm:$0xf] %vm338_vm1, %v404_v57 }
  0xea   :  { %v246_v4 = vadd.f32 %v526_v12, %v223_v58  ;;  %v254_v5 = vadd.f32 %v526_v12, %v231_v59  ;;  %v224_v6 = vmul.f32 %v521_v10, %v168_v2  ;;  %v232_v7 = vmul.f32 %v521_v10, %v200_v3 }
  0xeb   :  { %v264_v8 = vmax.f32 %v248_v62, 0.0  ;;  %v272_v9 = vmax.f32 %v256_v63, 0.0  ;;  %v249_v11 = vadd.f32 %v526_v12, %v226_v0  ;;  %v257_v13 = vadd.f32 %v526_v12, %v234_v1 }
  0xec   :  { %v262_v14 = vmax.f32 %v246_v4, 0.0  ;;  %v270_v15 = vmax.f32 %v254_v5, 0.0  ;;  %v247_v16 = vadd.f32 %v526_v12, %v224_v6  ;;  %v255_v17 = vadd.f32 %v526_v12, %v232_v7 }
  0xed   :  { %v401_v18 = vpack.c.bf16 %v264_v8, %v264_v8  ;;  %v409_v19 = vpack.c.bf16 %v272_v9, %v272_v9  ;;  %v265_v20 = vmax.f32 %v249_v11, 0.0  ;;  %v273_v21 = vmax.f32 %v257_v13, 0.0 }
  0xee   :  { %v399_v22 = vpack.c.bf16 %v262_v14, %v262_v14  ;;  %v407_v23 = vpack.c.bf16 %v270_v15, %v270_v15  ;;  %v263_v24 = vmax.f32 %v247_v16, 0.0  ;;  %v271_v10 = vmax.f32 %v255_v17, 0.0 }
  0xef   :  { %345 = vst.msk [vmem:[%s628_s4 + $0x18] sm:$0xf] %vm338_vm1, %v401_v18  ;;  %353 = vst.msk [vmem:[%s628_s4 + $0x38] sm:$0xf] %vm338_vm1, %v409_v19  ;;  %v402_v25 = vpack.c.bf16 %v265_v20, %v265_v20  ;;  %v410_v12 = vpack.c.bf16 %v273_v21, %v273_v21 }
  0xf0   :  { %343 = vst.msk [vmem:[%s628_s4 + $0x10] sm:$0xf] %vm338_vm1, %v399_v22  ;;  %351 = vst.msk [vmem:[%s628_s4 + $0x30] sm:$0xf] %vm338_vm1, %v407_v23  ;;  %v400_v26 = vpack.c.bf16 %v263_v24, %v263_v24  ;;  %v408_v27 = vpack.c.bf16 %v271_v10, %v271_v10 }
  0xf1   :  { %346 = vst.msk [vmem:[%s628_s4 + $0x1c] sm:$0xf] %vm338_vm1, %v402_v25  ;;  %354 = vst.msk [vmem:[%s628_s4 + $0x3c] sm:$0xf] %vm338_vm1, %v410_v12 }
  0xf2   :  { %344 = vst.msk [vmem:[%s628_s4 + $0x14] sm:$0xf] %vm338_vm1, %v400_v26  ;;  %352 = vst.msk [vmem:[%s628_s4 + $0x34] sm:$0xf] %vm338_vm1, %v408_v27 }

// kernel: _lambda_.63
= control target key start
LH: loop header
LB: loop body
LE: loop exit
PB: predicated region body
PF: predicated region fallthrough
CT: control target
= control target key end

     0   :  { %vm90_vm0 = vcmask 261120   ;;  %vm338_vm1 = vcmask 60416   ;;  %s624_s1 = inlined_call_operand.vmem [shape: bf16[32,8], index: 1, kind: input, shape index: {}]   ;;  %s625_s0 = inlined_call_operand.vmem [shape: bf16[128,32], index: 0, kind: input, shape index: {}]   ;;  %s626_s2 = inlined_call_operand.vmem [shape: f32[1,8], index: 2, kind: input, shape index: {}]   ;;  %s627_s3 = inlined_call_operand.vmem [shape: f32[1,8], index: 3, kind: input, shape index: {}]   ;;  %s628_s4 = inlined_call_operand.vmem [shape: bf16[128,8], index: 4, kind: output, shape index: {}]  }
   0x1   :  { %v445_v0 = vld [vmem:[%s624_s1] sm:$0xff]   ;;  %v446_v1 = vld [vmem:[%s624_s1 + $0x8] sm:$0xff]   ;;  %v451_v6 = vld [vmem:[%s625_s0 + $0x10] sm:$0xff]  }
   0x2   :  { %421 = vmatprep.subr.bf16.mxu0 %v445_v0  ;;  %441 = vmatprep.subr.bf16.mxu1 %v445_v0  ;;  %v447_v2 = vld [vmem:[%s625_s0] sm:$0xff]   ;;  %v449_v4 = vld [vmem:[%s625_s0 + $0x8] sm:$0xff]   ;;  %v452_v7 = vld [vmem:[%s625_s0 + $0x30] sm:$0xff]  }
   0x3   :  { %422 = vmatpush3.bf16.msra.mxu0 %v445_v0  ;;  %443 = vmatpush3.bf16.msra.mxu1 %v445_v0  ;;  %v448_v3 = vld [vmem:[%s625_s0 + $0x20] sm:$0xff]   ;;  %v450_v5 = vld [vmem:[%s625_s0 + $0x28] sm:$0xff]   ;;  %v453_v8 = vld [vmem:[%s625_s0 + $0x18] sm:$0xff]  }
   0x4   :  { %423 = vmatprep.subr.bf16.mxu0 %v446_v1  ;;  %442 = vmatprep.subr.bf16.mxu1 %v446_v1  ;;  %v454_v9 = vld [vmem:[%s625_s0 + $0x38] sm:$0xff]   ;;  %v521_v10 = vld [vmem:[%s626_s2] ss:$0 sm:$0xff] }
   0x5   :  { %425 = vmatprep.mubr.msk.bf16.mxu0 %vm90_vm0, %v447_v2  ;;  %433 = vmatprep.mubr.msk.bf16.mxu1 %vm90_vm0, %v448_v3  ;;  %v526_v12 = vld [vmem:[%s627_s3] ss:$0 sm:$0xff] }
   0x7   :  { %424 = vmatpush3.bf16.msra.mxu0 %v446_v1  ;;  %444 = vmatpush3.bf16.msra.mxu1 %v446_v1 }
   0xa   :  { %426 = vmatmul.mubr.msk.bf16.vlgmr.msra.gmra.mrb[0].mxu0 %vm90_vm0, %v449_v4  ;;  %434 = vmatmul.mubr.msk.bf16.vlgmr.msra.gmra.mrb[0].mxu1 %vm90_vm0, %v450_v5 }
   0xb   :  { %429 = vmatprep.mubr.msk.bf16.mxu0 %vm90_vm0, %v451_v6  ;;  %437 = vmatprep.mubr.msk.bf16.mxu1 %vm90_vm0, %v452_v7 }
  0x12   :  { %430 = vmatmul.mubr.msk.bf16.gmra.mrb[4].mxu0 %vm90_vm0, %v453_v8  ;;  %438 = vmatmul.mubr.msk.bf16.gmra.mrb[4].mxu1 %vm90_vm0, %v454_v9 }
  0xdd   :  { %v427_v11 = vpop.f32.mrb[0].mxu0  ;;  %v435_v13 = vpop.f32.mrb[0].mxu1 }
  0xde   :  { %v221_v14 = vmul.f32 %v427_v11, %v521_v10  ;;  %v229_v15 = vmul.f32 %v435_v13, %v521_v10  ;;  %v149_v16 = vpop.f32.mrb[1].mxu0  ;;  %v181_v17 = vpop.f32.mrb[1].mxu1 }
  0xdf   :  { %v219_v18 = vmul.f32 %v521_v10, %v149_v16  ;;  %v227_v19 = vmul.f32 %v521_v10, %v181_v17  ;;  %v428_v20 = vpop.f32.mrb[2].mxu0  ;;  %v436_v21 = vpop.f32.mrb[2].mxu1 }
  0xe0   :  { %v244_v22 = vadd.f32 %v526_v12, %v221_v14  ;;  %v252_v23 = vadd.f32 %v526_v12, %v229_v15  ;;  %v222_v24 = vmul.f32 %v428_v20, %v521_v10  ;;  %v230_v25 = vmul.f32 %v436_v21, %v521_v10  ;;  %v152_v26 = vpop.f32.mrb[3].mxu0  ;;  %v184_v27 = vpop.f32.mrb[3].mxu1 }
  0xe1   :  { %v242_v28 = vadd.f32 %v526_v12, %v219_v18  ;;  %v250_v29 = vadd.f32 %v526_v12, %v227_v19  ;;  %v220_v30 = vmul.f32 %v521_v10, %v152_v26  ;;  %v228_v31 = vmul.f32 %v521_v10, %v184_v27 }
  0xe2   :  { %v260_v32 = vmax.f32 %v244_v22, 0.0  ;;  %v268_v33 = vmax.f32 %v252_v23, 0.0  ;;  %v245_v34 = vadd.f32 %v526_v12, %v222_v24  ;;  %v253_v35 = vadd.f32 %v526_v12, %v230_v25 }
  0xe3   :  { %v258_v36 = vmax.f32 %v242_v28, 0.0  ;;  %v266_v37 = vmax.f32 %v250_v29, 0.0  ;;  %v243_v38 = vadd.f32 %v526_v12, %v220_v30  ;;  %v251_v39 = vadd.f32 %v526_v12, %v228_v31 }
  0xe4   :  { %v397_v40 = vpack.c.bf16 %v260_v32, %v260_v32  ;;  %v405_v41 = vpack.c.bf16 %v268_v33, %v268_v33  ;;  %v261_v42 = vmax.f32 %v245_v34, 0.0  ;;  %v269_v43 = vmax.f32 %v253_v35, 0.0 }
  0xe5   :  { %v395_v44 = vpack.c.bf16 %v258_v36, %v258_v36  ;;  %v403_v45 = vpack.c.bf16 %v266_v37, %v266_v37  ;;  %v259_v46 = vmax.f32 %v243_v38, 0.0  ;;  %v267_v47 = vmax.f32 %v251_v39, 0.0  ;;  %v431_v48 = vpop.f32.mrb[4].mxu0  ;;  %v439_v49 = vpop.f32.mrb[4].mxu1 }
  0xe6   :  { %341 = vst.msk [vmem:[%s628_s4 + $0x8] sm:$0xf] %vm338_vm1, %v397_v40  ;;  %349 = vst.msk [vmem:[%s628_s4 + $0x28] sm:$0xf] %vm338_vm1, %v405_v41  ;;  %v398_v50 = vpack.c.bf16 %v261_v42, %v261_v42  ;;  %v406_v51 = vpack.c.bf16 %v269_v43, %v269_v43  ;;  %v225_v52 = vmul.f32 %v431_v48, %v521_v10  ;;  %v165_v54 = vpop.f32.mrb[5].mxu0  ;;  %v197_v55 = vpop.f32.mrb[5].mxu1 }
  0xe7   :  { %v233_v53 = vmul.f32 %v439_v49, %v521_v10  ;;  %339 = vst.msk [vmem:[%s628_s4] sm:$0xf] %vm338_vm1, %v395_v44  ;;  %347 = vst.msk [vmem:[%s628_s4 + $0x20] sm:$0xf] %vm338_vm1, %v403_v45  ;;  %v396_v56 = vpack.c.bf16 %v259_v46, %v259_v46  ;;  %v404_v57 = vpack.c.bf16 %v267_v47, %v267_v47  ;;  %v432_v60 = vpop.f32.mrb[6].mxu0  ;;  %v440_v61 = vpop.f32.mrb[6].mxu1 }
  0xe8   :  { %v223_v58 = vmul.f32 %v521_v10, %v165_v54  ;;  %v231_v59 = vmul.f32 %v521_v10, %v197_v55  ;;  %342 = vst.msk [vmem:[%s628_s4 + $0xc] sm:$0xf] %vm338_vm1, %v398_v50  ;;  %350 = vst.msk [vmem:[%s628_s4 + $0x2c] sm:$0xf] %vm338_vm1, %v406_v51  ;;  %v248_v62 = vadd.f32 %v526_v12, %v225_v52  ;;  %v168_v2 = vpop.f32.mrb[7].mxu0  ;;  %v200_v3 = vpop.f32.mrb[7].mxu1 }
  0xe9   :  { %v256_v63 = vadd.f32 %v526_v12, %v233_v53  ;;  %v226_v0 = vmul.f32 %v432_v60, %v521_v10  ;;  %v234_v1 = vmul.f32 %v440_v61, %v521_v10  ;;  %340 = vst.msk [vmem:[%s628_s4 + $0x4] sm:$0xf] %vm338_vm1, %v396_v56  ;;  %348 = vst.msk [vmem:[%s628_s4 + $0x24] sm:$0xf] %vm338_vm1, %v404_v57 }
  0xea   :  { %v246_v4 = vadd.f32 %v526_v12, %v223_v58  ;;  %v254_v5 = vadd.f32 %v526_v12, %v231_v59  ;;  %v224_v6 = vmul.f32 %v521_v10, %v168_v2  ;;  %v232_v7 = vmul.f32 %v521_v10, %v200_v3 }
  0xeb   :  { %v264_v8 = vmax.f32 %v248_v62, 0.0  ;;  %v272_v9 = vmax.f32 %v256_v63, 0.0  ;;  %v249_v11 = vadd.f32 %v526_v12, %v226_v0  ;;  %v257_v13 = vadd.f32 %v526_v12, %v234_v1 }
  0xec   :  { %v262_v14 = vmax.f32 %v246_v4, 0.0  ;;  %v270_v15 = vmax.f32 %v254_v5, 0.0  ;;  %v247_v16 = vadd.f32 %v526_v12, %v224_v6  ;;  %v255_v17 = vadd.f32 %v526_v12, %v232_v7 }
  0xed   :  { %v401_v18 = vpack.c.bf16 %v264_v8, %v264_v8  ;;  %v409_v19 = vpack.c.bf16 %v272_v9, %v272_v9  ;;  %v265_v20 = vmax.f32 %v249_v11, 0.0  ;;  %v273_v21 = vmax.f32 %v257_v13, 0.0 }
  0xee   :  { %v399_v22 = vpack.c.bf16 %v262_v14, %v262_v14  ;;  %v407_v23 = vpack.c.bf16 %v270_v15, %v270_v15  ;;  %v263_v24 = vmax.f32 %v247_v16, 0.0  ;;  %v271_v10 = vmax.f32 %v255_v17, 0.0 }
  0xef   :  { %345 = vst.msk [vmem:[%s628_s4 + $0x18] sm:$0xf] %vm338_vm1, %v401_v18  ;;  %353 = vst.msk [vmem:[%s628_s4 + $0x38] sm:$0xf] %vm338_vm1, %v409_v19  ;;  %v402_v25 = vpack.c.bf16 %v265_v20, %v265_v20  ;;  %v410_v12 = vpack.c.bf16 %v273_v21, %v273_v21 }
  0xf0   :  { %343 = vst.msk [vmem:[%s628_s4 + $0x10] sm:$0xf] %vm338_vm1, %v399_v22  ;;  %351 = vst.msk [vmem:[%s628_s4 + $0x30] sm:$0xf] %vm338_vm1, %v407_v23  ;;  %v400_v26 = vpack.c.bf16 %v263_v24, %v263_v24  ;;  %v408_v27 = vpack.c.bf16 %v271_v10, %v271_v10 }
  0xf1   :  { %346 = vst.msk [vmem:[%s628_s4 + $0x1c] sm:$0xf] %vm338_vm1, %v402_v25  ;;  %354 = vst.msk [vmem:[%s628_s4 + $0x3c] sm:$0xf] %vm338_vm1, %v410_v12 }
  0xf2   :  { %344 = vst.msk [vmem:[%s628_s4 + $0x14] sm:$0xf] %vm338_vm1, %v400_v26  ;;  %352 = vst.msk [vmem:[%s628_s4 + $0x34] sm:$0xf] %vm338_vm1, %v408_v27 }

// kernel: _lambda_.70
= control target key start
LH: loop header
LB: loop body
LE: loop exit
PB: predicated region body
PF: predicated region fallthrough
CT: control target
= control target key end

     0   :  { %v278_v0 = vmov 0   ;;  %vm112_vm0 = vcmask 130048   ;;  %vm210_vm1 = vcmask 125952   ;;  %s361_s1 = inlined_call_operand.vmem [shape: bf16[144,16], index: 1, kind: input, shape index: {}]   ;;  %s362_s0 = inlined_call_operand.vmem [shape: bf16[32,144], index: 0, kind: input, shape index: {}]   ;;  %s363_s2 = inlined_call_operand.vmem [shape: f32[1,16], index: 2, kind: input, shape index: {}]   ;;  %s364_s3 = inlined_call_operand.vmem [shape: f32[1,16], index: 3, kind: input, shape index: {}]   ;;  %s365_s4 = inlined_call_operand.vmem [shape: bf16[32,16], index: 4, kind: output, shape index: {}]  }
   0x1   :  { %119 = vmatprep.subr.bf16.mxu0 %v278_v0  ;;  %244 = vmatprep.subr.bf16.mxu1 %v278_v0  ;;  %v263_v1 = vld [vmem:[%s361_s1] sm:$0xff]   ;;  %v264_v2 = vld [vmem:[%s361_s1 + $0x8] sm:$0xff]   ;;  %v265_v3 = vld [vmem:[%s361_s1 + $0x10] sm:$0xff]  }
   0x2   :  { %120 = vmatpush1.bf16.msra.mxu0 %v263_v1  ;;  %253 = vmatpush1.bf16.msra.mxu1 %v263_v1  ;;  %v266_v4 = vld [vmem:[%s361_s1 + $0x18] sm:$0xff]   ;;  %v274_v5 = vld [vmem:[%s362_s0 + $0x4] ss:$8 sps:$4 sm:$0xff]   ;;  %v269_v9 = vld [vmem:[%s361_s1 + $0x30] sm:$0xff]  }
   0x3   :  { %121 = vmatprep.subr.bf16.mxu0 %v278_v0  ;;  %245 = vmatprep.subr.bf16.mxu1 %v278_v0  ;;  %v277_v6 = vld [vmem:[%s362_s0 + $0x14] ss:$8 sps:$4 sm:$0xff]   ;;  %v267_v7 = vld [vmem:[%s361_s1 + $0x20] sm:$0xff]   ;;  %v268_v8 = vld [vmem:[%s361_s1 + $0x28] sm:$0xff]  }
   0x4   :  { %232 = vmatprep.mubr.msk.bf16.mxu0 %vm112_vm0, %v274_v5  ;;  %233 = vmatprep.mubr.msk.bf16.mxu1 %vm112_vm0, %v277_v6  ;;  %v270_v10 = vld [vmem:[%s361_s1 + $0x38] sm:$0xff]   ;;  %v271_v11 = vld [vmem:[%s361_s1 + $0x40] sm:$0xff]  }
   0x5   :  { %v272_v12 = vld [vmem:[%s362_s0] ss:$8 sps:$4 sm:$0xff]   ;;  %v275_v13 = vld [vmem:[%s362_s0 + $0x10] ss:$8 sps:$4 sm:$0xff]  }
   0x6   :  { %122 = vmatpush1.bf16.msra.mxu0 %v264_v2  ;;  %254 = vmatpush1.bf16.msra.mxu1 %v264_v2  ;;  %v234_v14 = vld [vmem:[%s363_s2] ss:$0 sm:$0xff] }
   0x7   :  { %123 = vmatprep.subr.bf16.mxu0 %v278_v0  ;;  %246 = vmatprep.subr.bf16.mxu1 %v278_v0  ;;  %v235_v16 = vld [vmem:[%s364_s3] ss:$0 sm:$0xff] }
   0xa   :  { %124 = vmatpush1.bf16.msra.mxu0 %v265_v3  ;;  %255 = vmatpush1.bf16.msra.mxu1 %v265_v3 }
   0xb   :  { %125 = vmatprep.subr.bf16.mxu0 %v278_v0  ;;  %247 = vmatprep.subr.bf16.mxu1 %v278_v0 }
   0xe   :  { %126 = vmatpush1.bf16.msra.mxu0 %v266_v4  ;;  %256 = vmatpush1.bf16.msra.mxu1 %v266_v4 }
   0xf   :  { %127 = vmatprep.subr.bf16.mxu0 %v278_v0  ;;  %248 = vmatprep.subr.bf16.mxu1 %v278_v0 }
  0x12   :  { %128 = vmatpush1.bf16.msra.mxu0 %v267_v7  ;;  %257 = vmatpush1.bf16.msra.mxu1 %v267_v7 }
  0x13   :  { %129 = vmatprep.subr.bf16.mxu0 %v278_v0  ;;  %249 = vmatprep.subr.bf16.mxu1 %v278_v0 }
  0x16   :  { %130 = vmatpush1.bf16.msra.mxu0 %v268_v8  ;;  %258 = vmatpush1.bf16.msra.mxu1 %v268_v8 }
  0x17   :  { %131 = vmatprep.subr.bf16.mxu0 %v278_v0  ;;  %250 = vmatprep.subr.bf16.mxu1 %v278_v0 }
  0x1a   :  { %132 = vmatpush1.bf16.msra.mxu0 %v269_v9  ;;  %259 = vmatpush1.bf16.msra.mxu1 %v269_v9 }
  0x1b   :  { %133 = vmatprep.subr.bf16.mxu0 %v278_v0  ;;  %251 = vmatprep.subr.bf16.mxu1 %v278_v0 }
  0x1e   :  { %134 = vmatpush1.bf16.msra.mxu0 %v270_v10  ;;  %260 = vmatpush1.bf16.msra.mxu1 %v270_v10 }
  0x1f   :  { %135 = vmatprep.subr.bf16.mxu0 %v278_v0  ;;  %252 = vmatprep.subr.bf16.mxu1 %v278_v0 }
  0x22   :  { %136 = vmatpush1.bf16.msra.mxu0 %v271_v11  ;;  %261 = vmatpush1.bf16.msra.mxu1 %v271_v11 }
  0x25   :  { %152 = vmatmul.mubr.bf16.vlgmr.msra.gmra.mrb[0].mxu0 %v272_v12  ;;  %160 = vmatmul.mubr.bf16.vlgmr.msra.gmra.mrb[0].mxu1 %v275_v13 }
  0xf8   :  { %v153_v15 = vpop.f32.mrb[0].mxu0  ;;  %v161_v17 = vpop.f32.mrb[0].mxu1 }
  0xf9   :  { %v175_v18 = vmul.f32 %v234_v14, %v153_v15  ;;  %v177_v19 = vmul.f32 %v234_v14, %v161_v17  ;;  %v155_v20 = vpop.f32.mrb[1].mxu0  ;;  %v163_v21 = vpop.f32.mrb[1].mxu1 }
  0xfa   :  { %v156_v22 = vpop.f32.mrb[2].mxu0  ;;  %v164_v23 = vpop.f32.mrb[2].mxu1 }
  0xfb   :  { %v186_v24 = vadd.f32 %v235_v16, %v175_v18  ;;  %v188_v25 = vadd.f32 %v235_v16, %v177_v19  ;;  %v176_v26 = vmul.f32 %v234_v14, %v156_v22  ;;  %v178_v27 = vmul.f32 %v234_v14, %v164_v23  ;;  %v158_v28 = vpop.f32.mrb[3].mxu0  ;;  %v166_v29 = vpop.f32.mrb[3].mxu1 }
  0xfd   :  { %v190_v30 = vmax.f32 %v186_v24, 0.0  ;;  %v192_v31 = vmax.f32 %v188_v25, 0.0  ;;  %v187_v32 = vadd.f32 %v235_v16, %v176_v26  ;;  %v189_v33 = vadd.f32 %v235_v16, %v178_v27 }
  0xff   :  { %v240_v34 = vpack.c.bf16 %v190_v30, %v190_v30  ;;  %v242_v35 = vpack.c.bf16 %v192_v31, %v192_v31  ;;  %v191_v36 = vmax.f32 %v187_v32, 0.0  ;;  %v193_v37 = vmax.f32 %v189_v33, 0.0 }
 0x101   :  { %211 = vst.msk [vmem:[%s365_s4] sm:$0xf] %vm210_vm1, %v240_v34  ;;  %213 = vst.msk [vmem:[%s365_s4 + $0x8] sm:$0xf] %vm210_vm1, %v242_v35  ;;  %v241_v38 = vpack.c.bf16 %v191_v36, %v191_v36  ;;  %v243_v39 = vpack.c.bf16 %v193_v37, %v193_v37 }
 0x103   :  { %212 = vst.msk [vmem:[%s365_s4 + $0x4] sm:$0xf] %vm210_vm1, %v241_v38  ;;  %214 = vst.msk [vmem:[%s365_s4 + $0xc] sm:$0xf] %vm210_vm1, %v243_v39 }

// kernel: _lambda_.72
= control target key start
LH: loop header
LB: loop body
LE: loop exit
PB: predicated region body
PF: predicated region fallthrough
CT: control target
= control target key end

     0   :  { %vm43_vm0 = vcmask 130048   ;;  %vm153_vm1 = vcmask 519168   ;;  %s261_s1 = inlined_call_operand.vmem [shape: bf16[16,64], index: 1, kind: input, shape index: {}]   ;;  %s262_s0 = inlined_call_operand.vmem [shape: bf16[32,16], index: 0, kind: input, shape index: {}]   ;;  %s263_s2 = inlined_call_operand.vmem [shape: f32[1,64], index: 2, kind: input, shape index: {}]   ;;  %s264_s4 = inlined_call_operand.vmem [shape: bf16[32,64], index: 4, kind: input, shape index: {}]   ;;  %s265_s3 = inlined_call_operand.vmem [shape: f32[1,64], index: 3, kind: input, shape index: {}]   ;;  %s266_s5 = inlined_call_operand.vmem [shape: bf16[32,64], index: 5, kind: output, shape index: {}]  }
   0x1   :  { %v195_v0 = vld [vmem:[%s261_s1] sm:$0xff]   ;;  %v197_v2 = vld [vmem:[%s262_s0 + $0x8] sm:$0xff]  }
   0x2   :  { %v196_v1 = vld [vmem:[%s262_s0] sm:$0xff]   ;;  %189 = vmatprep.subr.bf16.mxu0 %v195_v0  ;;  %v185_v4 = vld [vmem:[%s264_s4 + $0x8] sm:$0xff]  }
   0x3   :  { %190 = vmatpush3.bf16.msra.mxu0 %v195_v0  ;;  %191 = vmatprep.mubr.msk.bf16.mxu0 %vm43_vm0, %v196_v1  ;;  %v167_v3 = vld [vmem:[%s263_s2] ss:$0 sm:$0xff]  ;;  %v183_v9 = vunpack.c.l.bf16 %v185_v4  ;;  %v184_v16 = vunpack.c.h.bf16 %v185_v4 }
   0x4   :  { %v178_v5 = vld [vmem:[%s264_s4] sm:$0xff]  }
   0x5   :  { %v168_v7 = vld [vmem:[%s265_s3] ss:$0 sm:$0xff]  ;;  %v179_v12 = vunpack.c.l.bf16 %v178_v5  ;;  %v180_v20 = vunpack.c.h.bf16 %v178_v5 }
   0x6   :  { %192 = vmatmul.mubr.msk.bf16.vlgmr.msra.gmra.mrb[0].mxu0 %vm43_vm0, %v197_v2 }
  0xd9   :  { %v193_v6 = vpop.f32.mrb[0].mxu0 }
  0xda   :  { %v108_v8 = vmul.f32 %v193_v6, %v167_v3  ;;  %v84_v10 = vpop.f32.mrb[1].mxu0 }
  0xdb   :  { %v106_v11 = vmul.f32 %v167_v3, %v84_v10  ;;  %v194_v13 = vpop.f32.mrb[2].mxu0 }
  0xdc   :  { %v119_v14 = vadd.f32 %v168_v7, %v108_v8  ;;  %v109_v15 = vmul.f32 %v194_v13, %v167_v3  ;;  %v87_v17 = vpop.f32.mrb[3].mxu0 }
  0xdd   :  { %v117_v18 = vadd.f32 %v168_v7, %v106_v11  ;;  %v107_v19 = vmul.f32 %v167_v3, %v87_v17 }
  0xde   :  { %v131_v21 = vadd.f32 %v183_v9, %v119_v14  ;;  %v120_v22 = vadd.f32 %v168_v7, %v109_v15 }
  0xdf   :  { %v129_v23 = vadd.f32 %v179_v12, %v117_v18  ;;  %v118_v24 = vadd.f32 %v168_v7, %v107_v19 }
  0xe0   :  { %v135_v25 = vmax.f32 %v131_v21, 0.0  ;;  %v132_v26 = vadd.f32 %v184_v16, %v120_v22 }
  0xe1   :  { %v133_v27 = vmax.f32 %v129_v23, 0.0  ;;  %v130_v28 = vadd.f32 %v180_v20, %v118_v24 }
  0xe2   :  { %v175_v29 = vpack.c.bf16 %v135_v25, %v135_v25  ;;  %v136_v30 = vmax.f32 %v132_v26, 0.0 }
  0xe3   :  { %v173_v31 = vpack.c.bf16 %v133_v27, %v133_v27  ;;  %v134_v32 = vmax.f32 %v130_v28, 0.0 }
  0xe4   :  { %156 = vst.msk [vmem:[%s266_s5 + $0x8] sm:$0xf] %vm153_vm1, %v175_v29  ;;  %v176_v33 = vpack.c.bf16 %v136_v30, %v136_v30 }
  0xe5   :  { %154 = vst.msk [vmem:[%s266_s5] sm:$0xf] %vm153_vm1, %v173_v31  ;;  %v174_v34 = vpack.c.bf16 %v134_v32, %v134_v32 }
  0xe6   :  { %157 = vst.msk [vmem:[%s266_s5 + $0xc] sm:$0xf] %vm153_vm1, %v176_v33 }
  0xe7   :  { %155 = vst.msk [vmem:[%s266_s5 + $0x4] sm:$0xf] %vm153_vm1, %v174_v34 }

// kernel: _lambda_.71
= control target key start
LH: loop header
LB: loop body
LE: loop exit
PB: predicated region body
PF: predicated region fallthrough
CT: control target
= control target key end

     0   :  { %vm48_vm0 = vcmask 261120   ;;  %vm142_vm1 = vcmask 519168   ;;  %s238_s1 = inlined_call_operand.vmem [shape: bf16[32,64], index: 1, kind: input, shape index: {}]   ;;  %s239_s0 = inlined_call_operand.vmem [shape: bf16[32,32], index: 0, kind: input, shape index: {}]   ;;  %s240_s2 = inlined_call_operand.vmem [shape: f32[1,64], index: 2, kind: input, shape index: {}]   ;;  %s241_s3 = inlined_call_operand.vmem [shape: f32[1,64], index: 3, kind: input, shape index: {}]   ;;  %s242_s4 = inlined_call_operand.vmem [shape: bf16[32,64], index: 4, kind: output, shape index: {}]  }
   0x1   :  { %v179_v0 = vld [vmem:[%s238_s1] sm:$0xff]   ;;  %v180_v1 = vld [vmem:[%s238_s1 + $0x8] sm:$0xff]  }
   0x2   :  { %171 = vmatprep.subr.bf16.mxu0 %v179_v0  ;;  %v181_v2 = vld [vmem:[%s239_s0] sm:$0xff]   ;;  %v182_v3 = vld [vmem:[%s239_s0 + $0x8] sm:$0xff]  }
   0x3   :  { %172 = vmatpush3.bf16.msra.mxu0 %v179_v0  ;;  %175 = vmatprep.mubr.msk.bf16.mxu0 %vm48_vm0, %v181_v2  ;;  %v157_v4 = vld [vmem:[%s240_s2] ss:$0 sm:$0xff] }
   0x4   :  { %173 = vmatprep.subr.bf16.mxu0 %v180_v1  ;;  %v158_v6 = vld [vmem:[%s241_s3] ss:$0 sm:$0xff] }
   0x7   :  { %174 = vmatpush3.bf16.msra.mxu0 %v180_v1 }
   0xa   :  { %176 = vmatmul.mubr.msk.bf16.vlgmr.msra.gmra.mrb[0].mxu0 %vm48_vm0, %v182_v3 }
  0xdd   :  { %v177_v5 = vpop.f32.mrb[0].mxu0 }
  0xde   :  { %v113_v7 = vmul.f32 %v177_v5, %v157_v4  ;;  %v89_v8 = vpop.f32.mrb[1].mxu0 }
  0xdf   :  { %v111_v9 = vmul.f32 %v157_v4, %v89_v8  ;;  %v178_v10 = vpop.f32.mrb[2].mxu0 }
  0xe0   :  { %v124_v11 = vadd.f32 %v158_v6, %v113_v7  ;;  %v114_v12 = vmul.f32 %v178_v10, %v157_v4  ;;  %v92_v13 = vpop.f32.mrb[3].mxu0 }
  0xe1   :  { %v122_v14 = vadd.f32 %v158_v6, %v111_v9  ;;  %v112_v15 = vmul.f32 %v157_v4, %v92_v13 }
  0xe2   :  { %v165_v16 = vpack.c.bf16 %v124_v11, %v124_v11  ;;  %v125_v17 = vadd.f32 %v158_v6, %v114_v12 }
  0xe3   :  { %v163_v18 = vpack.c.bf16 %v122_v14, %v122_v14  ;;  %v123_v19 = vadd.f32 %v158_v6, %v112_v15 }
  0xe4   :  { %145 = vst.msk [vmem:[%s242_s4 + $0x8] sm:$0xf] %vm142_vm1, %v165_v16  ;;  %v166_v20 = vpack.c.bf16 %v125_v17, %v125_v17 }
  0xe5   :  { %143 = vst.msk [vmem:[%s242_s4] sm:$0xf] %vm142_vm1, %v163_v18  ;;  %v164_v21 = vpack.c.bf16 %v123_v19, %v123_v19 }
  0xe6   :  { %146 = vst.msk [vmem:[%s242_s4 + $0xc] sm:$0xf] %vm142_vm1, %v166_v20 }
  0xe7   :  { %144 = vst.msk [vmem:[%s242_s4 + $0x4] sm:$0xf] %vm142_vm1, %v164_v21 }

// kernel: _lambda_.73
= control target key start
LH: loop header
LB: loop body
LE: loop exit
PB: predicated region body
PF: predicated region fallthrough
CT: control target
= control target key end

     0   :  { %vm64_vm0 = vcmask 523264   ;;  %vm162_vm1 = vcmask 125952   ;;  %s274_s1 = inlined_call_operand.vmem [shape: bf16[64,16], index: 1, kind: input, shape index: {}]   ;;  %s275_s0 = inlined_call_operand.vmem [shape: bf16[32,64], index: 0, kind: input, shape index: {}]   ;;  %s276_s2 = inlined_call_operand.vmem [shape: f32[1,16], index: 2, kind: input, shape index: {}]   ;;  %s277_s3 = inlined_call_operand.vmem [shape: f32[1,16], index: 3, kind: input, shape index: {}]   ;;  %s278_s4 = inlined_call_operand.vmem [shape: bf16[32,16], index: 4, kind: output, shape index: {}]  }
   0x1   :  { %v207_v0 = vld [vmem:[%s274_s1] sm:$0xff]   ;;  %v208_v1 = vld [vmem:[%s274_s1 + $0x8] sm:$0xff]   ;;  %v209_v2 = vld [vmem:[%s274_s1 + $0x10] sm:$0xff]  }
   0x2   :  { %195 = vmatprep.subr.bf16.mxu0 %v207_v0  ;;  %v211_v3 = vld [vmem:[%s275_s0] sm:$0xff]   ;;  %v210_v4 = vld [vmem:[%s274_s1 + $0x18] sm:$0xff]   ;;  %v212_v5 = vld [vmem:[%s275_s0 + $0x8] sm:$0xff]  }
   0x3   :  { %196 = vmatpush3.bf16.msra.mxu0 %v207_v0  ;;  %203 = vmatprep.mubr.msk.bf16.mxu0 %vm64_vm0, %v211_v3  ;;  %v179_v6 = vld [vmem:[%s276_s2] ss:$0 sm:$0xff] }
   0x4   :  { %197 = vmatprep.subr.bf16.mxu0 %v208_v1  ;;  %v180_v8 = vld [vmem:[%s277_s3] ss:$0 sm:$0xff] }
   0x7   :  { %198 = vmatpush3.bf16.msra.mxu0 %v208_v1 }
   0x8   :  { %199 = vmatprep.subr.bf16.mxu0 %v209_v2 }
   0xb   :  { %200 = vmatpush3.bf16.msra.mxu0 %v209_v2 }
   0xc   :  { %201 = vmatprep.subr.bf16.mxu0 %v210_v4 }
   0xf   :  { %202 = vmatpush3.bf16.msra.mxu0 %v210_v4 }
  0x12   :  { %204 = vmatmul.mubr.msk.bf16.vlgmr.msra.gmra.mrb[0].mxu0 %vm64_vm0, %v212_v5 }
  0xe5   :  { %v205_v7 = vpop.f32.mrb[0].mxu0 }
  0xe6   :  { %v129_v9 = vmul.f32 %v205_v7, %v179_v6  ;;  %v105_v10 = vpop.f32.mrb[1].mxu0 }
  0xe7   :  { %v127_v11 = vmul.f32 %v179_v6, %v105_v10  ;;  %v206_v12 = vpop.f32.mrb[2].mxu0 }
  0xe8   :  { %v140_v13 = vadd.f32 %v180_v8, %v129_v9  ;;  %v130_v14 = vmul.f32 %v206_v12, %v179_v6  ;;  %v108_v15 = vpop.f32.mrb[3].mxu0 }
  0xe9   :  { %v138_v16 = vadd.f32 %v180_v8, %v127_v11  ;;  %v128_v17 = vmul.f32 %v179_v6, %v108_v15 }
  0xea   :  { %v144_v18 = vmax.f32 %v140_v13, 0.0  ;;  %v141_v19 = vadd.f32 %v180_v8, %v130_v14 }
  0xeb   :  { %v142_v20 = vmax.f32 %v138_v16, 0.0  ;;  %v139_v21 = vadd.f32 %v180_v8, %v128_v17 }
  0xec   :  { %v187_v22 = vpack.c.bf16 %v144_v18, %v144_v18  ;;  %v145_v23 = vmax.f32 %v141_v19, 0.0 }
  0xed   :  { %v185_v24 = vpack.c.bf16 %v142_v20, %v142_v20  ;;  %v143_v25 = vmax.f32 %v139_v21, 0.0 }
  0xee   :  { %165 = vst.msk [vmem:[%s278_s4 + $0x8] sm:$0xf] %vm162_vm1, %v187_v22  ;;  %v188_v26 = vpack.c.bf16 %v145_v23, %v145_v23 }
  0xef   :  { %163 = vst.msk [vmem:[%s278_s4] sm:$0xf] %vm162_vm1, %v185_v24  ;;  %v186_v27 = vpack.c.bf16 %v143_v25, %v143_v25 }
  0xf0   :  { %166 = vst.msk [vmem:[%s278_s4 + $0xc] sm:$0xf] %vm162_vm1, %v188_v26 }
  0xf1   :  { %164 = vst.msk [vmem:[%s278_s4 + $0x4] sm:$0xf] %vm162_vm1, %v186_v27 }

// kernel: _lambda_.82
= control target key start
LH: loop header
LB: loop body
LE: loop exit
PB: predicated region body
PF: predicated region fallthrough
CT: control target
= control target key end

     0   :  { %vm64_vm0 = vcmask 523264   ;;  %vm162_vm1 = vcmask 257024   ;;  %s274_s1 = inlined_call_operand.vmem [shape: bf16[64,32], index: 1, kind: input, shape index: {}]   ;;  %s275_s0 = inlined_call_operand.vmem [shape: bf16[32,64], index: 0, kind: input, shape index: {}]   ;;  %s276_s2 = inlined_call_operand.vmem [shape: f32[1,32], index: 2, kind: input, shape index: {}]   ;;  %s277_s3 = inlined_call_operand.vmem [shape: f32[1,32], index: 3, kind: input, shape index: {}]   ;;  %s278_s4 = inlined_call_operand.vmem [shape: bf16[32,32], index: 4, kind: output, shape index: {}]  }
   0x1   :  { %v207_v0 = vld [vmem:[%s274_s1] sm:$0xff]   ;;  %v208_v1 = vld [vmem:[%s274_s1 + $0x8] sm:$0xff]   ;;  %v209_v2 = vld [vmem:[%s274_s1 + $0x10] sm:$0xff]  }
   0x2   :  { %195 = vmatprep.subr.bf16.mxu0 %v207_v0  ;;  %v211_v3 = vld [vmem:[%s275_s0] sm:$0xff]   ;;  %v210_v4 = vld [vmem:[%s274_s1 + $0x18] sm:$0xff]   ;;  %v212_v5 = vld [vmem:[%s275_s0 + $0x8] sm:$0xff]  }
   0x3   :  { %196 = vmatpush3.bf16.msra.mxu0 %v207_v0  ;;  %203 = vmatprep.mubr.msk.bf16.mxu0 %vm64_vm0, %v211_v3  ;;  %v179_v6 = vld [vmem:[%s276_s2] ss:$0 sm:$0xff] }
   0x4   :  { %197 = vmatprep.subr.bf16.mxu0 %v208_v1  ;;  %v180_v8 = vld [vmem:[%s277_s3] ss:$0 sm:$0xff] }
   0x7   :  { %198 = vmatpush3.bf16.msra.mxu0 %v208_v1 }
   0x8   :  { %199 = vmatprep.subr.bf16.mxu0 %v209_v2 }
   0xb   :  { %200 = vmatpush3.bf16.msra.mxu0 %v209_v2 }
   0xc   :  { %201 = vmatprep.subr.bf16.mxu0 %v210_v4 }
   0xf   :  { %202 = vmatpush3.bf16.msra.mxu0 %v210_v4 }
  0x12   :  { %204 = vmatmul.mubr.msk.bf16.vlgmr.msra.gmra.mrb[0].mxu0 %vm64_vm0, %v212_v5 }
  0xe5   :  { %v205_v7 = vpop.f32.mrb[0].mxu0 }
  0xe6   :  { %v129_v9 = vmul.f32 %v205_v7, %v179_v6  ;;  %v105_v10 = vpop.f32.mrb[1].mxu0 }
  0xe7   :  { %v127_v11 = vmul.f32 %v179_v6, %v105_v10  ;;  %v206_v12 = vpop.f32.mrb[2].mxu0 }
  0xe8   :  { %v140_v13 = vadd.f32 %v180_v8, %v129_v9  ;;  %v130_v14 = vmul.f32 %v206_v12, %v179_v6  ;;  %v108_v15 = vpop.f32.mrb[3].mxu0 }
  0xe9   :  { %v138_v16 = vadd.f32 %v180_v8, %v127_v11  ;;  %v128_v17 = vmul.f32 %v179_v6, %v108_v15 }
  0xea   :  { %v144_v18 = vmax.f32 %v140_v13, 0.0  ;;  %v141_v19 = vadd.f32 %v180_v8, %v130_v14 }
  0xeb   :  { %v142_v20 = vmax.f32 %v138_v16, 0.0  ;;  %v139_v21 = vadd.f32 %v180_v8, %v128_v17 }
  0xec   :  { %v187_v22 = vpack.c.bf16 %v144_v18, %v144_v18  ;;  %v145_v23 = vmax.f32 %v141_v19, 0.0 }
  0xed   :  { %v185_v24 = vpack.c.bf16 %v142_v20, %v142_v20  ;;  %v143_v25 = vmax.f32 %v139_v21, 0.0 }
  0xee   :  { %165 = vst.msk [vmem:[%s278_s4 + $0x8] sm:$0xf] %vm162_vm1, %v187_v22  ;;  %v188_v26 = vpack.c.bf16 %v145_v23, %v145_v23 }
  0xef   :  { %163 = vst.msk [vmem:[%s278_s4] sm:$0xf] %vm162_vm1, %v185_v24  ;;  %v186_v27 = vpack.c.bf16 %v143_v25, %v143_v25 }
  0xf0   :  { %166 = vst.msk [vmem:[%s278_s4 + $0xc] sm:$0xf] %vm162_vm1, %v188_v26 }
  0xf1   :  { %164 = vst.msk [vmem:[%s278_s4 + $0x4] sm:$0xf] %vm162_vm1, %v186_v27 }

// kernel: _lambda_.75
= control target key start
LH: loop header
LB: loop body
LE: loop exit
PB: predicated region body
PF: predicated region fallthrough
CT: control target
= control target key end

     0   :  { %10 = vsyncpa [#allocation3], 0  ;;  %s357_s0 = inlined_call_operand.vmem [shape: bf16[32,16], index: 0, kind: input, shape index: {}]   ;;  %s358_s1 = inlined_call_operand.vmem [shape: bf16[16,64], index: 1, kind: input, shape index: {}]   ;;  %s359_s2 = inlined_call_operand.hbm [shape: f32[1,64], index: 2, kind: input, shape index: {}]   ;;  %s360_s3 = inlined_call_operand.hbm [shape: f32[1,64], index: 3, kind: input, shape index: {}]   ;;  %s361_s4 = inlined_call_operand.vmem [shape: bf16[32,64], index: 4, kind: input, shape index: {}]   ;;  %s362_s5 = inlined_call_operand.vmem [shape: bf16[32,64], index: 5, kind: output, shape index: {}]  }
   0x1   :  { %11 = vsyncpa [#allocation5], 0  ;;  %s274_s18 = smov [#allocation2]   ;;  %s275_s20 = smov [#allocation4]  }
   0x2   :  { %s22_s19 = sshll.u32 %s274_s18, 4  ;;  %s32_s21 = sshll.u32 %s275_s20, 4  ;;  %s23_s19 = int_to_ptr.vmem [resolvable:$true] %s22_s19  ;;  %s33_s21 = int_to_ptr.vmem [resolvable:$true] %s32_s21 }
   0x3   :  { %s226_s24 = scalar_lea.hbm %s359_s2, 16 }
   0x4   :  { %p227_p0 = scmp.ne.s32.totalorder %s359_s2, %s226_s24  ;;  %p230_p1 = scmp.lt.u32.totalorder %s226_s24, %s359_s2 }
   0x6   :  { %p232_p2 = pnand %p230_p1, %p227_p0 }
   0x8   :  { %235 = shalt.err (!%p232_p2)
}
   0x9   :  { %s236_s29 = scalar_lea.vmem %s23_s19, 16  ;;  %s240_s30 = scalar_lea.vmem %s23_s19, 32 }
   0xa   :  { %p237_p3 = scmp.ne.s32.totalorder %s23_s19, %s236_s29  ;;  %p241_p4 = scmp.lt.s32.totalorder %s23_s19, %s23_s19 }
   0xb   :  { %p242_p5 = scmp.lt.s32.totalorder %s240_s30, %s236_s29 }
   0xd   :  { %p243_p6 = por %p242_p5, %p241_p4 }
   0xf   :  { %p244_p7 = pnand %p243_p6, %p237_p3 }
  0x11   :  { %247 = shalt.err (!%p244_p7)
}
  0x12   :  { %25 = dma.hbm_to_vmem [thread:$0]  %s359_s2, 16, %s23_s19, [#allocation3]  }
  0x13   :  { %s248_s10 = scalar_lea.hbm %s360_s3, 16 }
  0x14   :  { %p249_p8 = scmp.ne.s32.totalorder %s360_s3, %s248_s10  ;;  %p252_p9 = scmp.lt.u32.totalorder %s248_s10, %s360_s3 }
  0x16   :  { %p254_p10 = pnand %p252_p9, %p249_p8 }
  0x18   :  { %257 = shalt.err (!%p254_p10)
}
  0x19   :  { %s258_s15 = scalar_lea.vmem %s33_s21, 16  ;;  %s262_s16 = scalar_lea.vmem %s33_s21, 32 }
  0x1a   :  { %p259_p11 = scmp.ne.s32.totalorder %s33_s21, %s258_s15  ;;  %p263_p12 = scmp.lt.s32.totalorder %s33_s21, %s33_s21 }
  0x1b   :  { %p264_p13 = scmp.lt.s32.totalorder %s262_s16, %s258_s15 }
  0x1d   :  { %p265_p0 = por %p264_p13, %p263_p12 }
  0x1f   :  { %p266_p1 = pnand %p265_p0, %p259_p11 }
  0x21   :  { %269 = shalt.err (!%p266_p1)
}
  0x22   :  { %35 = dma.hbm_to_vmem [thread:$0]  %s360_s3, 16, %s33_s21, [#allocation5]  }
  0x23   :  { %270 = dma.done.wait [#allocation3], 16  }
  0x24   :  { %271 = vsyncadd [#allocation3], 4294967280 }
  0x25   :  { %272 = dma.done.wait [#allocation5], 16  }
  0x26   :  { %273 = vsyncadd [#allocation5], 4294967280  ;;  %v223_v0 = vld [vmem:[%s358_s1] sm:$0xff]   ;;  %vm67_vm0 = vcmask 130048   ;;  %v225_v2 = vld [vmem:[%s357_s0 + $0x8] sm:$0xff]   ;;  %vm177_vm1 = vcmask 519168  }
  0x27   :  { %v224_v1 = vld [vmem:[%s357_s0] sm:$0xff]   ;;  %215 = vmatprep.subr.bf16.mxu0 %v223_v0  ;;  %v211_v4 = vld [vmem:[%s361_s4 + $0x8] sm:$0xff]  }
  0x28   :  { %216 = vmatpush3.bf16.msra.mxu0 %v223_v0  ;;  %217 = vmatprep.mubr.msk.bf16.mxu0 %vm67_vm0, %v224_v1  ;;  %v193_v3 = vld [vmem:[#allocation2] ss:$0 sm:$0xff]  ;;  %v194_v7 = vld [vmem:[#allocation4] ss:$0 sm:$0xff]  ;;  %v209_v9 = vunpack.c.l.bf16 %v211_v4  ;;  %v210_v16 = vunpack.c.h.bf16 %v211_v4 }
  0x29   :  { %v204_v5 = vld [vmem:[%s361_s4] sm:$0xff]  }
  0x2a   :  { %v205_v12 = vunpack.c.l.bf16 %v204_v5  ;;  %v206_v20 = vunpack.c.h.bf16 %v204_v5 }
  0x2b   :  { %218 = vmatmul.mubr.msk.bf16.vlgmr.msra.gmra.mrb[0].mxu0 %vm67_vm0, %v225_v2 }
  0xfe   :  { %v219_v6 = vpop.f32.mrb[0].mxu0 }
  0xff   :  { %v132_v8 = vmul.f32 %v219_v6, %v193_v3  ;;  %v108_v10 = vpop.f32.mrb[1].mxu0 }
 0x100   :  { %v130_v11 = vmul.f32 %v193_v3, %v108_v10  ;;  %v220_v13 = vpop.f32.mrb[2].mxu0 }
 0x101   :  { %v143_v14 = vadd.f32 %v194_v7, %v132_v8  ;;  %v133_v15 = vmul.f32 %v220_v13, %v193_v3  ;;  %v111_v17 = vpop.f32.mrb[3].mxu0 }
 0x102   :  { %v141_v18 = vadd.f32 %v194_v7, %v130_v11  ;;  %v131_v19 = vmul.f32 %v193_v3, %v111_v17 }
 0x103   :  { %v155_v21 = vadd.f32 %v209_v9, %v143_v14  ;;  %v144_v22 = vadd.f32 %v194_v7, %v133_v15 }
 0x104   :  { %v153_v23 = vadd.f32 %v205_v12, %v141_v18  ;;  %v142_v24 = vadd.f32 %v194_v7, %v131_v19 }
 0x105   :  { %v159_v25 = vmax.f32 %v155_v21, 0.0  ;;  %v156_v26 = vadd.f32 %v210_v16, %v144_v22 }
 0x106   :  { %v157_v27 = vmax.f32 %v153_v23, 0.0  ;;  %v154_v28 = vadd.f32 %v206_v20, %v142_v24 }
 0x107   :  { %v201_v29 = vpack.c.bf16 %v159_v25, %v159_v25  ;;  %v160_v30 = vmax.f32 %v156_v26, 0.0 }
 0x108   :  { %v199_v31 = vpack.c.bf16 %v157_v27, %v157_v27  ;;  %v158_v32 = vmax.f32 %v154_v28, 0.0 }
 0x109   :  { %180 = vst.msk [vmem:[%s362_s5 + $0x8] sm:$0xf] %vm177_vm1, %v201_v29  ;;  %v202_v33 = vpack.c.bf16 %v160_v30, %v160_v30 }
 0x10a   :  { %178 = vst.msk [vmem:[%s362_s5] sm:$0xf] %vm177_vm1, %v199_v31  ;;  %v200_v34 = vpack.c.bf16 %v158_v32, %v158_v32 }
 0x10b   :  { %181 = vst.msk [vmem:[%s362_s5 + $0xc] sm:$0xf] %vm177_vm1, %v202_v33 }
 0x10c   :  { %179 = vst.msk [vmem:[%s362_s5 + $0x4] sm:$0xf] %vm177_vm1, %v200_v34 }
 0x10d   :  { %186 = vsyncpa [#allocation3], 1 }
 0x10e   :  { %187 = vsyncpa [#allocation5], 1 }

// kernel: _lambda_.84
= control target key start
LH: loop header
LB: loop body
LE: loop exit
PB: predicated region body
PF: predicated region fallthrough
CT: control target
= control target key end

     0   :  { %9 = vsyncpa [#allocation3], 0  ;;  %s294_s0 = inlined_call_operand.vmem [shape: bf16[8,64], index: 0, kind: input, shape index: {}]   ;;  %s295_s1 = inlined_call_operand.vmem [shape: bf16[64,128], index: 1, kind: input, shape index: {}]   ;;  %s296_s2 = inlined_call_operand.hbm [shape: f32[1,128], index: 2, kind: input, shape index: {}]   ;;  %s297_s3 = inlined_call_operand.hbm [shape: f32[1,128], index: 3, kind: input, shape index: {}]   ;;  %s298_s4 = inlined_call_operand.vmem [shape: bf16[8,128], index: 4, kind: output, shape index: {}]  }
   0x1   :  { %10 = vsyncpa [#allocation5], 0  ;;  %s223_s15 = smov [#allocation2]   ;;  %s224_s17 = smov [#allocation4]  }
   0x2   :  { %s21_s16 = sshll.u32 %s223_s15, 4  ;;  %s31_s18 = sshll.u32 %s224_s17, 4  ;;  %s22_s16 = int_to_ptr.vmem [resolvable:$true] %s21_s16  ;;  %s32_s18 = int_to_ptr.vmem [resolvable:$true] %s31_s18 }
   0x3   :  { %s175_s21 = scalar_lea.hbm %s296_s2, 16 }
   0x4   :  { %p176_p0 = scmp.ne.s32.totalorder %s296_s2, %s175_s21  ;;  %p179_p1 = scmp.lt.u32.totalorder %s175_s21, %s296_s2 }
   0x6   :  { %p181_p2 = pnand %p179_p1, %p176_p0 }
   0x8   :  { %184 = shalt.err (!%p181_p2)
}
   0x9   :  { %s185_s26 = scalar_lea.vmem %s22_s16, 16  ;;  %s189_s27 = scalar_lea.vmem %s22_s16, 32 }
   0xa   :  { %p186_p3 = scmp.ne.s32.totalorder %s22_s16, %s185_s26  ;;  %p190_p4 = scmp.lt.s32.totalorder %s22_s16, %s22_s16 }
   0xb   :  { %p191_p5 = scmp.lt.s32.totalorder %s189_s27, %s185_s26 }
   0xd   :  { %p192_p6 = por %p191_p5, %p190_p4 }
   0xf   :  { %p193_p7 = pnand %p192_p6, %p186_p3 }
  0x11   :  { %196 = shalt.err (!%p193_p7)
}
  0x12   :  { %24 = dma.hbm_to_vmem [thread:$0]  %s296_s2, 16, %s22_s16, [#allocation3]  }
  0x13   :  { %s197_s6 = scalar_lea.hbm %s297_s3, 16 }
  0x14   :  { %p198_p8 = scmp.ne.s32.totalorder %s297_s3, %s197_s6  ;;  %p201_p9 = scmp.lt.u32.totalorder %s197_s6, %s297_s3 }
  0x16   :  { %p203_p10 = pnand %p201_p9, %p198_p8 }
  0x18   :  { %206 = shalt.err (!%p203_p10)
}
  0x19   :  { %s207_s11 = scalar_lea.vmem %s32_s18, 16  ;;  %s211_s12 = scalar_lea.vmem %s32_s18, 32 }
  0x1a   :  { %p208_p11 = scmp.ne.s32.totalorder %s32_s18, %s207_s11  ;;  %p212_p12 = scmp.lt.s32.totalorder %s32_s18, %s32_s18 }
  0x1b   :  { %p213_p13 = scmp.lt.s32.totalorder %s211_s12, %s207_s11 }
  0x1d   :  { %p214_p0 = por %p213_p13, %p212_p12 }
  0x1f   :  { %p215_p1 = pnand %p214_p0, %p208_p11 }
  0x21   :  { %218 = shalt.err (!%p215_p1)
}
  0x22   :  { %34 = dma.hbm_to_vmem [thread:$0]  %s297_s3, 16, %s32_s18, [#allocation5]  }
  0x23   :  { %219 = dma.done.wait [#allocation3], 16  }
  0x24   :  { %220 = vsyncadd [#allocation3], 4294967280 }
  0x25   :  { %221 = dma.done.wait [#allocation5], 16  }
  0x26   :  { %222 = vsyncadd [#allocation5], 4294967280  ;;  %v225_v0 = vmov 0.0   ;;  %vm226_vm0 = vmmov 0   ;;  %v171_v1 = vld [vmem:[%s295_s1] sm:$0xff]   ;;  %v172_v2 = vld [vmem:[%s295_s1 + $0x8] sm:$0xff]  }
  0x27   :  { %155 = vmatprep.subr.bf16.mxu0 %v225_v0  ;;  %163 = vmatprep.mubr.msk.bf16.mxu0 %vm226_vm0, %v225_v0  ;;  %v173_v3 = vld [vmem:[%s295_s1 + $0x10] sm:$0xff]   ;;  %v174_v4 = vld [vmem:[%s295_s1 + $0x18] sm:$0xff]   ;;  %v42_v5 = vld [vmem:[%s294_s0] sm:$0xf]  ;;  %vm75_vm1 = vcmask 523264  }
  0x28   :  { %156 = vmatpush3.bf16.msra.mxu0 %v171_v1  ;;  %v148_v6 = vld [vmem:[#allocation2] ss:$0 sm:$0xff]  ;;  %v149_v8 = vld [vmem:[#allocation4] ss:$0 sm:$0xff] }
  0x29   :  { %157 = vmatprep.subr.bf16.mxu0 %v225_v0 }
  0x2c   :  { %158 = vmatpush3.bf16.msra.mxu0 %v172_v2 }
  0x2d   :  { %159 = vmatprep.subr.bf16.mxu0 %v225_v0 }
  0x30   :  { %160 = vmatpush3.bf16.msra.mxu0 %v173_v3 }
  0x31   :  { %161 = vmatprep.subr.bf16.mxu0 %v225_v0 }
  0x34   :  { %162 = vmatpush3.bf16.msra.mxu0 %v174_v4 }
  0x37   :  { %164 = vmatmul.mubr.msk.bf16.vlgmr.msra.gmra.mrb[0].mxu0 %vm75_vm1, %v42_v5 }
 0x10a   :  { %v113_v7 = vpop.f32.mrb[0].mxu0 }
 0x10b   :  { %v126_v9 = vmul.f32 %v148_v6, %v113_v7  ;;  %v165_v10 = vpop.f32.mrb[1].mxu0 }
 0x10c   :  { %v116_v11 = vpop.f32.mrb[2].mxu0 }
 0x10d   :  { %v134_v12 = vadd.f32 %v149_v8, %v126_v9  ;;  %v166_v13 = vpop.f32.mrb[3].mxu0 }
 0x10f   :  { %v135_v14 = vpack.c.bf16 %v134_v12, %v134_v12 }
 0x111   :  { %136 = vst [vmem:[%s298_s4] sm:$0xf] %v135_v14 }
 0x112   :  { %141 = vsyncpa [#allocation3], 1 }
 0x113   :  { %142 = vsyncpa [#allocation5], 1 }

// kernel: _lambda_.83
= control target key start
LH: loop header
LB: loop body
LE: loop exit
PB: predicated region body
PF: predicated region fallthrough
CT: control target
= control target key end

     0   :  { %9 = vsyncpa [#allocation3], 0  ;;  %s554_s0 = inlined_call_operand.vmem [shape: bf16[8,288], index: 0, kind: input, shape index: {}]   ;;  %s555_s1 = inlined_call_operand.vmem [shape: bf16[288,32], index: 1, kind: input, shape index: {}]   ;;  %s556_s2 = inlined_call_operand.hbm [shape: f32[1,32], index: 2, kind: input, shape index: {}]   ;;  %s557_s3 = inlined_call_operand.hbm [shape: f32[1,32], index: 3, kind: input, shape index: {}]   ;;  %s558_s4 = inlined_call_operand.vmem [shape: bf16[8,32], index: 4, kind: output, shape index: {}]  }
   0x1   :  { %10 = vsyncpa [#allocation5], 0  ;;  %s438_s15 = smov [#allocation2]   ;;  %s439_s17 = smov [#allocation4]  }
   0x2   :  { %s21_s16 = sshll.u32 %s438_s15, 4  ;;  %s31_s18 = sshll.u32 %s439_s17, 4  ;;  %s22_s16 = int_to_ptr.vmem [resolvable:$true] %s21_s16  ;;  %s32_s18 = int_to_ptr.vmem [resolvable:$true] %s31_s18 }
   0x3   :  { %s390_s21 = scalar_lea.hbm %s556_s2, 16 }
   0x4   :  { %p391_p0 = scmp.ne.s32.totalorder %s556_s2, %s390_s21  ;;  %p394_p1 = scmp.lt.u32.totalorder %s390_s21, %s556_s2 }
   0x6   :  { %p396_p2 = pnand %p394_p1, %p391_p0 }
   0x8   :  { %399 = shalt.err (!%p396_p2)
}
   0x9   :  { %s400_s26 = scalar_lea.vmem %s22_s16, 16  ;;  %s404_s27 = scalar_lea.vmem %s22_s16, 32 }
   0xa   :  { %p401_p3 = scmp.ne.s32.totalorder %s22_s16, %s400_s26  ;;  %p405_p4 = scmp.lt.s32.totalorder %s22_s16, %s22_s16 }
   0xb   :  { %p406_p5 = scmp.lt.s32.totalorder %s404_s27, %s400_s26 }
   0xd   :  { %p407_p6 = por %p406_p5, %p405_p4 }
   0xf   :  { %p408_p7 = pnand %p407_p6, %p401_p3 }
  0x11   :  { %411 = shalt.err (!%p408_p7)
}
  0x12   :  { %24 = dma.hbm_to_vmem [thread:$0]  %s556_s2, 16, %s22_s16, [#allocation3]  }
  0x13   :  { %s412_s6 = scalar_lea.hbm %s557_s3, 16 }
  0x14   :  { %p413_p8 = scmp.ne.s32.totalorder %s557_s3, %s412_s6  ;;  %p416_p9 = scmp.lt.u32.totalorder %s412_s6, %s557_s3 }
  0x16   :  { %p418_p10 = pnand %p416_p9, %p413_p8 }
  0x18   :  { %421 = shalt.err (!%p418_p10)
}
  0x19   :  { %s422_s11 = scalar_lea.vmem %s32_s18, 16  ;;  %s426_s12 = scalar_lea.vmem %s32_s18, 32 }
  0x1a   :  { %p423_p11 = scmp.ne.s32.totalorder %s32_s18, %s422_s11  ;;  %p427_p12 = scmp.lt.s32.totalorder %s32_s18, %s32_s18 }
  0x1b   :  { %p428_p13 = scmp.lt.s32.totalorder %s426_s12, %s422_s11 }
  0x1d   :  { %p429_p0 = por %p428_p13, %p427_p12 }
  0x1f   :  { %p430_p1 = pnand %p429_p0, %p423_p11 }
  0x21   :  { %433 = shalt.err (!%p430_p1)
}
  0x22   :  { %34 = dma.hbm_to_vmem [thread:$0]  %s557_s3, 16, %s32_s18, [#allocation5]  }
  0x23   :  { %434 = dma.done.wait [#allocation3], 16  }
  0x24   :  { %435 = vsyncadd [#allocation3], 4294967280 }
  0x25   :  { %436 = dma.done.wait [#allocation5], 16  }
  0x26   :  { %437 = vsyncadd [#allocation5], 4294967280  ;;  %v440_v0 = vmov 0.0   ;;  %vm441_vm0 = vmmov 0   ;;  %v369_v1 = vld [vmem:[%s555_s1 + $0x40] sm:$0xff]   ;;  %v371_v3 = vld [vmem:[%s555_s1 + $0x48] sm:$0xff]  }
  0x27   :  { %357 = vmatprep.subr.bf16.mxu1 %v440_v0  ;;  %361 = vmatprep.mubr.msk.bf16.mxu1 %vm441_vm0, %v440_v0  ;;  %v370_v2 = vld [vmem:[%s555_s1] sm:$0xff]   ;;  %v372_v4 = vld [vmem:[%s555_s1 + $0x8] sm:$0xff]   ;;  %v373_v5 = vld [vmem:[%s555_s1 + $0x50] sm:$0xff]   ;;  %vm198_vm1 = vcmask 261120   ;;  %vm300_vm2 = vcmask 257024  }
  0x28   :  { %332 = vmatprep.subr.bf16.mxu0 %v369_v1  ;;  %v374_v6 = vld [vmem:[%s555_s1 + $0x10] sm:$0xff]   ;;  %v375_v7 = vld [vmem:[%s555_s1 + $0x58] sm:$0xff]   ;;  %v377_v9 = vld [vmem:[%s555_s1 + $0x60] sm:$0xff]  }
  0x29   :  { %333 = vmatpush3.bf16.msra.mxu0 %v370_v2  ;;  %v376_v8 = vld [vmem:[%s555_s1 + $0x18] sm:$0xff]   ;;  %v383_v10 = vld [vmem:[%s555_s1 + $0x80] sm:$0xff]   ;;  %v379_v12 = vld [vmem:[%s555_s1 + $0x68] sm:$0xff]  }
  0x2a   :  { %334 = vmatprep.subr.bf16.mxu0 %v371_v3  ;;  %v378_v11 = vld [vmem:[%s555_s1 + $0x20] sm:$0xff]   ;;  %358 = vmatpush3.bf16.msra.mxu1 %v383_v10  ;;  %v386_v13 = vld [vmem:[%s555_s1 + $0x88] sm:$0xff]   ;;  %v381_v18 = vld [vmem:[%s555_s1 + $0x70] sm:$0xff]  }
  0x2b   :  { %359 = vmatprep.subr.bf16.mxu1 %v440_v0  ;;  %v42_v14 = vld [vmem:[%s554_s0] sm:$0xff]  ;;  %v380_v15 = vld [vmem:[%s555_s1 + $0x28] sm:$0xff]   ;;  %v382_v19 = vld [vmem:[%s555_s1 + $0x30] sm:$0xff]  }
  0x2c   :  { %v309_v16 = vcombine.high %v42_v14, %v42_v14  ;;  %v389_v17 = vld [vmem:[%s554_s0 + $0x8] ss:$0 sps:$4 sm:$0xff]   ;;  %v384_v20 = vld [vmem:[%s555_s1 + $0x78] sm:$0xff]   ;;  %v308_v22 = vcombine.low %v42_v14, %v42_v14  ;;  %v330_v31 = vld [vmem:[#allocation2] ss:$0 sm:$0xff] }
  0x2d   :  { %335 = vmatpush3.bf16.msra.mxu0 %v372_v4  ;;  %v385_v21 = vld [vmem:[%s555_s1 + $0x38] sm:$0xff]   ;;  %v331_v34 = vld [vmem:[#allocation4] ss:$0 sm:$0xff] }
  0x2e   :  { %336 = vmatprep.subr.bf16.mxu0 %v373_v5  ;;  %360 = vmatpush3.bf16.msra.mxu1 %v386_v13 }
  0x2f   :  { %234 = vmatprep.mubr.bf16.mxu0 %v309_v16 }
  0x31   :  { %337 = vmatpush3.bf16.msra.mxu0 %v374_v6  ;;  %362 = vmatmul.mubr.msk.bf16.vlgmr.msra.gmra.mrb[0].mxu1 %vm198_vm1, %v389_v17 }
  0x32   :  { %338 = vmatprep.subr.bf16.mxu0 %v375_v7 }
  0x35   :  { %339 = vmatpush3.bf16.msra.mxu0 %v376_v8 }
  0x36   :  { %340 = vmatprep.subr.bf16.mxu0 %v377_v9 }
  0x39   :  { %341 = vmatpush3.bf16.msra.mxu0 %v378_v11 }
  0x3a   :  { %342 = vmatprep.subr.bf16.mxu0 %v379_v12 }
  0x3d   :  { %343 = vmatpush3.bf16.msra.mxu0 %v380_v15 }
  0x3e   :  { %344 = vmatprep.subr.bf16.mxu0 %v381_v18 }
  0x41   :  { %345 = vmatpush3.bf16.msra.mxu0 %v382_v19 }
  0x42   :  { %346 = vmatprep.subr.bf16.mxu0 %v384_v20 }
  0x45   :  { %347 = vmatpush3.bf16.msra.mxu0 %v385_v21 }
  0x48   :  { %235 = vmatmul.mubr.bf16.vlgmr.msra.gmra.mrb[0].mxu0 %v308_v22 }
 0x104   :  { %v276_v23 = vpop.f32.mrb[0].mxu1 }
 0x105   :  { %v363_v24 = vpop.f32.mrb[1].mxu1 }
 0x106   :  { %v279_v25 = vpop.f32.mrb[2].mxu1 }
 0x107   :  { %v364_v26 = vpop.f32.mrb[3].mxu1 }
 0x11b   :  { %v348_v27 = vpop.f32.mrb[0].mxu0 }
 0x11c   :  { %v349_v28 = vpop.f32.mrb[1].mxu0 }
 0x11d   :  { %v350_v29 = vadd.f32 %v349_v28, %v348_v27  ;;  %v351_v30 = vpop.f32.mrb[2].mxu0 }
 0x11e   :  { %v352_v32 = vpop.f32.mrb[3].mxu0 }
 0x11f   :  { %v277_v33 = vadd.f32 %v350_v29, %v276_v23 }
 0x121   :  { %v289_v35 = vmul.f32 %v330_v31, %v277_v33 }
 0x123   :  { %v297_v36 = vadd.f32 %v331_v34, %v289_v35 }
 0x125   :  { %v298_v37 = vmax.f32 %v297_v36, 0.0 }
 0x127   :  { %v299_v38 = vpack.c.bf16 %v298_v37, %v298_v37 }
 0x129   :  { %301 = vst.msk [vmem:[%s558_s4] sm:$0xf] %vm300_vm2, %v299_v38 }
 0x12a   :  { %306 = vsyncpa [#allocation3], 1 }
 0x12b   :  { %307 = vsyncpa [#allocation5], 1 }

// kernel: _lambda_.85
= control target key start
LH: loop header
LB: loop body
LE: loop exit
PB: predicated region body
PF: predicated region fallthrough
CT: control target
= control target key end

     0   :  { %10 = vsyncpa [#allocation3], 0  ;;  %s166_s18 = smov [#allocation2]   ;;  %s229_s0 = inlined_call_operand.vmem [shape: bf16[8,32], index: 0, kind: input, shape index: {}]   ;;  %s230_s1 = inlined_call_operand.vmem [shape: bf16[32,128], index: 1, kind: input, shape index: {}]   ;;  %s231_s2 = inlined_call_operand.vmem [shape: f32[1,128], index: 2, kind: input, shape index: {}]   ;;  %s232_s3 = inlined_call_operand.hbm [shape: f32[1,128], index: 3, kind: input, shape index: {}]   ;;  %s233_s4 = inlined_call_operand.vmem [shape: bf16[8,128], index: 4, kind: input, shape index: {}]   ;;  %s234_s5 = inlined_call_operand.vmem [shape: bf16[8,128], index: 5, kind: output, shape index: {}]  }
   0x1   :  { %s23_s19 = sshll.u32 %s166_s18, 4  ;;  %s142_s22 = scalar_lea.hbm %s232_s3, 16  ;;  %s24_s19 = int_to_ptr.vmem [resolvable:$true] %s23_s19 }
   0x2   :  { %p143_p0 = scmp.ne.s32.totalorder %s232_s3, %s142_s22  ;;  %p146_p1 = scmp.lt.u32.totalorder %s142_s22, %s232_s3 }
   0x4   :  { %p148_p2 = pnand %p146_p1, %p143_p0 }
   0x6   :  { %151 = shalt.err (!%p148_p2)
}
   0x7   :  { %s152_s27 = scalar_lea.vmem %s24_s19, 16  ;;  %s156_s28 = scalar_lea.vmem %s24_s19, 32 }
   0x8   :  { %p153_p3 = scmp.ne.s32.totalorder %s24_s19, %s152_s27  ;;  %p157_p4 = scmp.lt.s32.totalorder %s24_s19, %s24_s19 }
   0x9   :  { %p158_p5 = scmp.lt.s32.totalorder %s156_s28, %s152_s27 }
   0xb   :  { %p159_p6 = por %p158_p5, %p157_p4 }
   0xd   :  { %p160_p7 = pnand %p159_p6, %p153_p3 }
   0xf   :  { %163 = shalt.err (!%p160_p7)
}
  0x10   :  { %26 = dma.hbm_to_vmem [thread:$0]  %s232_s3, 16, %s24_s19, [#allocation3]  }
  0x11   :  { %164 = dma.done.wait [#allocation3], 16  }
  0x12   :  { %165 = vsyncadd [#allocation3], 4294967280  ;;  %v167_v0 = vmov 0.0   ;;  %vm168_vm0 = vmmov 0   ;;  %v140_v1 = vld [vmem:[%s230_s1] sm:$0xff]   ;;  %v141_v2 = vld [vmem:[%s230_s1 + $0x8] sm:$0xff]  }
  0x13   :  { %129 = vmatprep.subr.bf16.mxu0 %v167_v0  ;;  %133 = vmatprep.mubr.msk.bf16.mxu0 %vm168_vm0, %v167_v0  ;;  %v33_v3 = vld [vmem:[%s229_s0] sm:$0xf]  ;;  %vm50_vm1 = vcmask 261120  }
  0x14   :  { %130 = vmatpush3.bf16.msra.mxu0 %v140_v1  ;;  %v124_v4 = vld [vmem:[%s231_s2] ss:$0 sm:$0xff] }
  0x15   :  { %131 = vmatprep.subr.bf16.mxu0 %v167_v0  ;;  %v110_v5 = vld [vmem:[%s233_s4] sm:$0xf] }
  0x16   :  { %v125_v7 = vld [vmem:[#allocation2] ss:$0 sm:$0xff]  ;;  %v111_v9 = vunpack.c.l.bf16 %v110_v5 }
  0x18   :  { %132 = vmatpush3.bf16.msra.mxu0 %v141_v2 }
  0x1b   :  { %134 = vmatmul.mubr.msk.bf16.vlgmr.msra.gmra.mrb[0].mxu0 %vm50_vm1, %v33_v3 }
  0xee   :  { %v88_v6 = vpop.f32.mrb[0].mxu0 }
  0xef   :  { %v101_v8 = vmul.f32 %v124_v4, %v88_v6  ;;  %v135_v10 = vpop.f32.mrb[1].mxu0 }
  0xf0   :  { %v91_v11 = vpop.f32.mrb[2].mxu0 }
  0xf1   :  { %v109_v12 = vadd.f32 %v125_v7, %v101_v8  ;;  %v136_v13 = vpop.f32.mrb[3].mxu0 }
  0xf3   :  { %v112_v14 = vadd.f32 %v111_v9, %v109_v12 }
  0xf5   :  { %v113_v15 = vmax.f32 %v112_v14, 0.0 }
  0xf7   :  { %v114_v16 = vpack.c.bf16 %v113_v15, %v113_v15 }
  0xf9   :  { %115 = vst [vmem:[%s234_s5] sm:$0xf] %v114_v16 }
  0xfa   :  { %120 = vsyncpa [#allocation3], 1 }

// kernel: _lambda_.86
= control target key start
LH: loop header
LB: loop body
LE: loop exit
PB: predicated region body
PF: predicated region fallthrough
CT: control target
= control target key end

     0   :  { %v196_v0 = vmov 0.0   ;;  %vm197_vm0 = vmmov 0   ;;  %vm141_vm1 = vcmask 257024   ;;  %s259_s1 = inlined_call_operand.vmem [shape: bf16[128,32], index: 1, kind: input, shape index: {}]   ;;  %s260_s0 = inlined_call_operand.vmem [shape: bf16[8,128], index: 0, kind: input, shape index: {}]   ;;  %s261_s2 = inlined_call_operand.vmem [shape: f32[1,32], index: 2, kind: input, shape index: {}]   ;;  %s262_s3 = inlined_call_operand.vmem [shape: f32[1,32], index: 3, kind: input, shape index: {}]   ;;  %s263_s4 = inlined_call_operand.vmem [shape: bf16[8,32], index: 4, kind: output, shape index: {}]  }
   0x1   :  { %166 = vmatprep.subr.bf16.mxu0 %v196_v0  ;;  %v188_v1 = vld [vmem:[%s259_s1] sm:$0xff]   ;;  %182 = vmatprep.mubr.msk.bf16.mxu0 %vm197_vm0, %v196_v0  ;;  %v189_v2 = vld [vmem:[%s259_s1 + $0x8] sm:$0xff]   ;;  %v190_v3 = vld [vmem:[%s259_s1 + $0x10] sm:$0xff]  }
   0x2   :  { %167 = vmatpush3.bf16.msra.mxu0 %v188_v1  ;;  %v191_v4 = vld [vmem:[%s259_s1 + $0x18] sm:$0xff]   ;;  %v192_v5 = vld [vmem:[%s259_s1 + $0x20] sm:$0xff]   ;;  %v193_v6 = vld [vmem:[%s259_s1 + $0x28] sm:$0xff]  }
   0x3   :  { %168 = vmatprep.subr.bf16.mxu0 %v196_v0  ;;  %v194_v7 = vld [vmem:[%s259_s1 + $0x30] sm:$0xff]   ;;  %v195_v8 = vld [vmem:[%s259_s1 + $0x38] sm:$0xff]   ;;  %v18_v9 = vld [vmem:[%s260_s0] sm:$0xf] }
   0x4   :  { %v155_v10 = vld [vmem:[%s261_s2] ss:$0 sm:$0xff] }
   0x5   :  { %v156_v12 = vld [vmem:[%s262_s3] ss:$0 sm:$0xff] }
   0x6   :  { %169 = vmatpush3.bf16.msra.mxu0 %v189_v2 }
   0x7   :  { %170 = vmatprep.subr.bf16.mxu0 %v196_v0 }
   0xa   :  { %171 = vmatpush3.bf16.msra.mxu0 %v190_v3 }
   0xb   :  { %172 = vmatprep.subr.bf16.mxu0 %v196_v0 }
   0xe   :  { %173 = vmatpush3.bf16.msra.mxu0 %v191_v4 }
   0xf   :  { %174 = vmatprep.subr.bf16.mxu0 %v196_v0 }
  0x12   :  { %175 = vmatpush3.bf16.msra.mxu0 %v192_v5 }
  0x13   :  { %176 = vmatprep.subr.bf16.mxu0 %v196_v0 }
  0x16   :  { %177 = vmatpush3.bf16.msra.mxu0 %v193_v6 }
  0x17   :  { %178 = vmatprep.subr.bf16.mxu0 %v196_v0 }
  0x1a   :  { %179 = vmatpush3.bf16.msra.mxu0 %v194_v7 }
  0x1b   :  { %180 = vmatprep.subr.bf16.mxu0 %v196_v0 }
  0x1e   :  { %181 = vmatpush3.bf16.msra.mxu0 %v195_v8 }
  0x21   :  { %183 = vmatmul.mubr.bf16.vlgmr.msra.gmra.mrb[0].mxu0 %v18_v9 }
  0xf4   :  { %v117_v11 = vpop.f32.mrb[0].mxu0 }
  0xf5   :  { %v130_v13 = vmul.f32 %v155_v10, %v117_v11  ;;  %v184_v14 = vpop.f32.mrb[1].mxu0 }
  0xf6   :  { %v120_v15 = vpop.f32.mrb[2].mxu0 }
  0xf7   :  { %v138_v16 = vadd.f32 %v156_v12, %v130_v13  ;;  %v185_v17 = vpop.f32.mrb[3].mxu0 }
  0xf9   :  { %v139_v18 = vmax.f32 %v138_v16, 0.0 }
  0xfb   :  { %v140_v19 = vpack.c.bf16 %v139_v18, %v139_v18 }
  0xfd   :  { %142 = vst.msk [vmem:[%s263_s4] sm:$0xf] %vm141_vm1, %v140_v19 }

// kernel: _lambda_.101
= control target key start
LH: loop header
LB: loop body
LE: loop exit
PB: predicated region body
PF: predicated region fallthrough
CT: control target
= control target key end

     0   :  { %v196_v0 = vmov 0.0   ;;  %vm197_vm0 = vmmov 0   ;;  %vm141_vm1 = vcmask 519168   ;;  %s259_s1 = inlined_call_operand.vmem [shape: bf16[128,64], index: 1, kind: input, shape index: {}]   ;;  %s260_s0 = inlined_call_operand.vmem [shape: bf16[8,128], index: 0, kind: input, shape index: {}]   ;;  %s261_s2 = inlined_call_operand.vmem [shape: f32[1,64], index: 2, kind: input, shape index: {}]   ;;  %s262_s3 = inlined_call_operand.vmem [shape: f32[1,64], index: 3, kind: input, shape index: {}]   ;;  %s263_s4 = inlined_call_operand.vmem [shape: bf16[8,64], index: 4, kind: output, shape index: {}]  }
   0x1   :  { %166 = vmatprep.subr.bf16.mxu0 %v196_v0  ;;  %v188_v1 = vld [vmem:[%s259_s1] sm:$0xff]   ;;  %182 = vmatprep.mubr.msk.bf16.mxu0 %vm197_vm0, %v196_v0  ;;  %v189_v2 = vld [vmem:[%s259_s1 + $0x8] sm:$0xff]   ;;  %v190_v3 = vld [vmem:[%s259_s1 + $0x10] sm:$0xff]  }
   0x2   :  { %167 = vmatpush3.bf16.msra.mxu0 %v188_v1  ;;  %v191_v4 = vld [vmem:[%s259_s1 + $0x18] sm:$0xff]   ;;  %v192_v5 = vld [vmem:[%s259_s1 + $0x20] sm:$0xff]   ;;  %v193_v6 = vld [vmem:[%s259_s1 + $0x28] sm:$0xff]  }
   0x3   :  { %168 = vmatprep.subr.bf16.mxu0 %v196_v0  ;;  %v194_v7 = vld [vmem:[%s259_s1 + $0x30] sm:$0xff]   ;;  %v195_v8 = vld [vmem:[%s259_s1 + $0x38] sm:$0xff]   ;;  %v18_v9 = vld [vmem:[%s260_s0] sm:$0xf] }
   0x4   :  { %v155_v10 = vld [vmem:[%s261_s2] ss:$0 sm:$0xff] }
   0x5   :  { %v156_v12 = vld [vmem:[%s262_s3] ss:$0 sm:$0xff] }
   0x6   :  { %169 = vmatpush3.bf16.msra.mxu0 %v189_v2 }
   0x7   :  { %170 = vmatprep.subr.bf16.mxu0 %v196_v0 }
   0xa   :  { %171 = vmatpush3.bf16.msra.mxu0 %v190_v3 }
   0xb   :  { %172 = vmatprep.subr.bf16.mxu0 %v196_v0 }
   0xe   :  { %173 = vmatpush3.bf16.msra.mxu0 %v191_v4 }
   0xf   :  { %174 = vmatprep.subr.bf16.mxu0 %v196_v0 }
  0x12   :  { %175 = vmatpush3.bf16.msra.mxu0 %v192_v5 }
  0x13   :  { %176 = vmatprep.subr.bf16.mxu0 %v196_v0 }
  0x16   :  { %177 = vmatpush3.bf16.msra.mxu0 %v193_v6 }
  0x17   :  { %178 = vmatprep.subr.bf16.mxu0 %v196_v0 }
  0x1a   :  { %179 = vmatpush3.bf16.msra.mxu0 %v194_v7 }
  0x1b   :  { %180 = vmatprep.subr.bf16.mxu0 %v196_v0 }
  0x1e   :  { %181 = vmatpush3.bf16.msra.mxu0 %v195_v8 }
  0x21   :  { %183 = vmatmul.mubr.bf16.vlgmr.msra.gmra.mrb[0].mxu0 %v18_v9 }
  0xf4   :  { %v117_v11 = vpop.f32.mrb[0].mxu0 }
  0xf5   :  { %v130_v13 = vmul.f32 %v155_v10, %v117_v11  ;;  %v184_v14 = vpop.f32.mrb[1].mxu0 }
  0xf6   :  { %v120_v15 = vpop.f32.mrb[2].mxu0 }
  0xf7   :  { %v138_v16 = vadd.f32 %v156_v12, %v130_v13  ;;  %v185_v17 = vpop.f32.mrb[3].mxu0 }
  0xf9   :  { %v139_v18 = vmax.f32 %v138_v16, 0.0 }
  0xfb   :  { %v140_v19 = vpack.c.bf16 %v139_v18, %v139_v18 }
  0xfd   :  { %142 = vst.msk [vmem:[%s263_s4] sm:$0xf] %vm141_vm1, %v140_v19 }

// kernel: _lambda_.88
= control target key start
LH: loop header
LB: loop body
LE: loop exit
PB: predicated region body
PF: predicated region fallthrough
CT: control target
= control target key end

     0   :  { %10 = vsyncpa [#allocation3], 0  ;;  %s277_s0 = inlined_call_operand.vmem [shape: bf16[8,32], index: 0, kind: input, shape index: {}]   ;;  %s278_s1 = inlined_call_operand.vmem [shape: bf16[32,128], index: 1, kind: input, shape index: {}]   ;;  %s279_s2 = inlined_call_operand.hbm [shape: f32[1,128], index: 2, kind: input, shape index: {}]   ;;  %s280_s3 = inlined_call_operand.hbm [shape: f32[1,128], index: 3, kind: input, shape index: {}]   ;;  %s281_s4 = inlined_call_operand.vmem [shape: bf16[8,128], index: 4, kind: input, shape index: {}]   ;;  %s282_s5 = inlined_call_operand.vmem [shape: bf16[8,128], index: 5, kind: output, shape index: {}]  }
   0x1   :  { %11 = vsyncpa [#allocation5], 0  ;;  %s204_s18 = smov [#allocation2]   ;;  %s205_s20 = smov [#allocation4]  }
   0x2   :  { %s22_s19 = sshll.u32 %s204_s18, 4  ;;  %s32_s21 = sshll.u32 %s205_s20, 4  ;;  %s23_s19 = int_to_ptr.vmem [resolvable:$true] %s22_s19  ;;  %s33_s21 = int_to_ptr.vmem [resolvable:$true] %s32_s21 }
   0x3   :  { %s156_s24 = scalar_lea.hbm %s279_s2, 16 }
   0x4   :  { %p157_p0 = scmp.ne.s32.totalorder %s279_s2, %s156_s24  ;;  %p160_p1 = scmp.lt.u32.totalorder %s156_s24, %s279_s2 }
   0x6   :  { %p162_p2 = pnand %p160_p1, %p157_p0 }
   0x8   :  { %165 = shalt.err (!%p162_p2)
}
   0x9   :  { %s166_s29 = scalar_lea.vmem %s23_s19, 16  ;;  %s170_s30 = scalar_lea.vmem %s23_s19, 32 }
   0xa   :  { %p167_p3 = scmp.ne.s32.totalorder %s23_s19, %s166_s29  ;;  %p171_p4 = scmp.lt.s32.totalorder %s23_s19, %s23_s19 }
   0xb   :  { %p172_p5 = scmp.lt.s32.totalorder %s170_s30, %s166_s29 }
   0xd   :  { %p173_p6 = por %p172_p5, %p171_p4 }
   0xf   :  { %p174_p7 = pnand %p173_p6, %p167_p3 }
  0x11   :  { %177 = shalt.err (!%p174_p7)
}
  0x12   :  { %25 = dma.hbm_to_vmem [thread:$0]  %s279_s2, 16, %s23_s19, [#allocation3]  }
  0x13   :  { %s178_s10 = scalar_lea.hbm %s280_s3, 16 }
  0x14   :  { %p179_p8 = scmp.ne.s32.totalorder %s280_s3, %s178_s10  ;;  %p182_p9 = scmp.lt.u32.totalorder %s178_s10, %s280_s3 }
  0x16   :  { %p184_p10 = pnand %p182_p9, %p179_p8 }
  0x18   :  { %187 = shalt.err (!%p184_p10)
}
  0x19   :  { %s188_s15 = scalar_lea.vmem %s33_s21, 16  ;;  %s192_s16 = scalar_lea.vmem %s33_s21, 32 }
  0x1a   :  { %p189_p11 = scmp.ne.s32.totalorder %s33_s21, %s188_s15  ;;  %p193_p12 = scmp.lt.s32.totalorder %s33_s21, %s33_s21 }
  0x1b   :  { %p194_p13 = scmp.lt.s32.totalorder %s192_s16, %s188_s15 }
  0x1d   :  { %p195_p0 = por %p194_p13, %p193_p12 }
  0x1f   :  { %p196_p1 = pnand %p195_p0, %p189_p11 }
  0x21   :  { %199 = shalt.err (!%p196_p1)
}
  0x22   :  { %35 = dma.hbm_to_vmem [thread:$0]  %s280_s3, 16, %s33_s21, [#allocation5]  }
  0x23   :  { %200 = dma.done.wait [#allocation3], 16  }
  0x24   :  { %201 = vsyncadd [#allocation3], 4294967280 }
  0x25   :  { %202 = dma.done.wait [#allocation5], 16  }
  0x26   :  { %203 = vsyncadd [#allocation5], 4294967280  ;;  %v206_v0 = vmov 0.0   ;;  %vm207_vm0 = vmmov 0   ;;  %v154_v1 = vld [vmem:[%s278_s1] sm:$0xff]   ;;  %v155_v2 = vld [vmem:[%s278_s1 + $0x8] sm:$0xff]  }
  0x27   :  { %142 = vmatprep.subr.bf16.mxu0 %v206_v0  ;;  %146 = vmatprep.mubr.msk.bf16.mxu0 %vm207_vm0, %v206_v0  ;;  %v45_v3 = vld [vmem:[%s277_s0] sm:$0xf]  ;;  %vm62_vm1 = vcmask 261120  }
  0x28   :  { %143 = vmatpush3.bf16.msra.mxu0 %v154_v1  ;;  %v137_v4 = vld [vmem:[#allocation2] ss:$0 sm:$0xff]  ;;  %v138_v7 = vld [vmem:[#allocation4] ss:$0 sm:$0xff] }
  0x29   :  { %144 = vmatprep.subr.bf16.mxu0 %v206_v0  ;;  %v122_v5 = vld [vmem:[%s281_s4] sm:$0xf] }
  0x2a   :  { %v123_v9 = vunpack.c.l.bf16 %v122_v5 }
  0x2c   :  { %145 = vmatpush3.bf16.msra.mxu0 %v155_v2 }
  0x2f   :  { %147 = vmatmul.mubr.msk.bf16.vlgmr.msra.gmra.mrb[0].mxu0 %vm62_vm1, %v45_v3 }
 0x102   :  { %v100_v6 = vpop.f32.mrb[0].mxu0 }
 0x103   :  { %v113_v8 = vmul.f32 %v137_v4, %v100_v6  ;;  %v148_v10 = vpop.f32.mrb[1].mxu0 }
 0x104   :  { %v103_v11 = vpop.f32.mrb[2].mxu0 }
 0x105   :  { %v121_v12 = vadd.f32 %v138_v7, %v113_v8  ;;  %v149_v13 = vpop.f32.mrb[3].mxu0 }
 0x107   :  { %v124_v14 = vadd.f32 %v123_v9, %v121_v12 }
 0x109   :  { %v125_v15 = vmax.f32 %v124_v14, 0.0 }
 0x10b   :  { %v126_v16 = vpack.c.bf16 %v125_v15, %v125_v15 }
 0x10d   :  { %127 = vst [vmem:[%s282_s5] sm:$0xf] %v126_v16 }
 0x10e   :  { %132 = vsyncpa [#allocation3], 1 }
 0x10f   :  { %133 = vsyncpa [#allocation5], 1 }

// kernel: _lambda_.103
= control target key start
LH: loop header
LB: loop body
LE: loop exit
PB: predicated region body
PF: predicated region fallthrough
CT: control target
= control target key end

     0   :  { %v253_v1 = vmov 0   ;;  %v158_v18 = vlaneseq  ;;  %v254_v24 = vmov 1966171168   ;;  %s340_s1 = inlined_call_operand.vmem [shape: bf16[128,256], index: 1, kind: input, shape index: {}]   ;;  %s341_s0 = inlined_call_operand.vmem [shape: bf16[2,128], index: 0, kind: input, shape index: {}]   ;;  %s342_s2 = inlined_call_operand.vmem [shape: f32[1,256], index: 2, kind: input, shape index: {}]   ;;  %s343_s3 = inlined_call_operand.vmem [shape: f32[1,256], index: 3, kind: input, shape index: {}]   ;;  %s344_s4 = inlined_call_operand.vmem [shape: bf16[2,256], index: 4, kind: output, shape index: {}]  }
   0x1   :  { %v229_v0 = vld [vmem:[%s340_s1 + $0x4] ss:$8 sps:$4 sm:$0xff]   ;;  %147 = vmatprep.mubr.bf16.mxu0 %v253_v1  ;;  %v231_v2 = vld [vmem:[%s340_s1] ss:$8 sps:$4 sm:$0xff]   ;;  %v232_v3 = vld [vmem:[%s340_s1 + $0x14] ss:$8 sps:$4 sm:$0xff]   ;;  %v190_v25 = vunpack.c.l.s4 %v254_v24 }
   0x2   :  { %115 = vmatprep.subr.bf16.mxu0 %v229_v0  ;;  %v234_v4 = vld [vmem:[%s340_s1 + $0x10] ss:$8 sps:$4 sm:$0xff]   ;;  %v235_v5 = vld [vmem:[%s340_s1 + $0x24] ss:$8 sps:$4 sm:$0xff]   ;;  %v237_v6 = vld [vmem:[%s340_s1 + $0x20] ss:$8 sps:$4 sm:$0xff]  }
   0x3   :  { %116 = vmatpush1.bf16.msra.mxu0 %v231_v2  ;;  %v238_v7 = vld [vmem:[%s340_s1 + $0x34] ss:$8 sps:$4 sm:$0xff]   ;;  %v240_v8 = vld [vmem:[%s340_s1 + $0x30] ss:$8 sps:$4 sm:$0xff]   ;;  %v241_v9 = vld [vmem:[%s340_s1 + $0x44] ss:$8 sps:$4 sm:$0xff]   ;;  %v191_v31 = vunpack.c.0.s8 %v190_v25 }
   0x4   :  { %117 = vmatprep.subr.bf16.mxu0 %v232_v3  ;;  %v243_v10 = vld [vmem:[%s340_s1 + $0x40] ss:$8 sps:$4 sm:$0xff]   ;;  %v244_v11 = vld [vmem:[%s340_s1 + $0x54] ss:$8 sps:$4 sm:$0xff]   ;;  %v246_v12 = vld [vmem:[%s340_s1 + $0x50] ss:$8 sps:$4 sm:$0xff]  }
   0x5   :  { %v247_v13 = vld [vmem:[%s340_s1 + $0x64] ss:$8 sps:$4 sm:$0xff]   ;;  %v249_v14 = vld [vmem:[%s340_s1 + $0x60] ss:$8 sps:$4 sm:$0xff]   ;;  %v250_v15 = vld [vmem:[%s340_s1 + $0x74] ss:$8 sps:$4 sm:$0xff]  }
   0x6   :  { %v252_v16 = vld [vmem:[%s340_s1 + $0x70] ss:$8 sps:$4 sm:$0xff]   ;;  %v18_v17 = vld [vmem:[%s341_s0] sm:$0x1]  ;;  %v159_v19 = vshrl.u32 %v158_v18, 7 }
   0x7   :  { %118 = vmatpush1.bf16.msra.mxu0 %v234_v4  ;;  %v156_v21 = vld [vmem:[%s342_s2] sm:$0x3] }
   0x8   :  { %119 = vmatprep.subr.bf16.mxu0 %v235_v5  ;;  %v160_v20 = vsub.s32 0, %v159_v19  ;;  %v164_v22 = vsub.s32 1, %v159_v19  ;;  %v170_v23 = vld [vmem:[%s343_s3] sm:$0x3]  ;;  %v194_v39 = vsub.s32 %v191_v31, %v159_v19 }
   0xa   :  { %v161_v26 = vrot.slane %v156_v21, %v160_v20  ;;  %v165_v27 = vrot.slane %v156_v21, %v164_v22  ;;  %v175_v28 = vrot.slane %v170_v23, %v160_v20  ;;  %v179_v30 = vrot.slane %v170_v23, %v164_v22 }
   0xb   :  { %120 = vmatpush1.bf16.msra.mxu0 %v237_v6 }
   0xc   :  { %121 = vmatprep.subr.bf16.mxu0 %v238_v7 }
   0xf   :  { %122 = vmatpush1.bf16.msra.mxu0 %v240_v8 }
  0x10   :  { %123 = vmatprep.subr.bf16.mxu0 %v241_v9 }
  0x13   :  { %124 = vmatpush1.bf16.msra.mxu0 %v243_v10 }
  0x14   :  { %125 = vmatprep.subr.bf16.mxu0 %v244_v11 }
  0x17   :  { %126 = vmatpush1.bf16.msra.mxu0 %v246_v12 }
  0x18   :  { %127 = vmatprep.subr.bf16.mxu0 %v247_v13 }
  0x1b   :  { %128 = vmatpush1.bf16.msra.mxu0 %v249_v14 }
  0x1c   :  { %129 = vmatprep.subr.bf16.mxu0 %v250_v15 }
  0x1f   :  { %130 = vmatpush1.bf16.msra.mxu0 %v252_v16 }
  0x22   :  { %148 = vmatmul.mubr.bf16.vlgmr.msra.gmra.mrb[0].mxu0 %v18_v17 }
  0xf5   :  { %v149_v29 = vpop.f32.mrb[0].mxu0 }
  0xf6   :  { %v168_v32 = vmul.f32 %v161_v26, %v149_v29  ;;  %v151_v33 = vpop.f32.mrb[1].mxu0 }
  0xf7   :  { %v169_v34 = vmul.f32 %v165_v27, %v151_v33  ;;  %v153_v35 = vpop.f32.mrb[2].mxu0 }
  0xf8   :  { %v182_v36 = vadd.f32 %v175_v28, %v168_v32  ;;  %v154_v37 = vpop.f32.mrb[3].mxu0 }
  0xf9   :  { %v183_v38 = vadd.f32 %v179_v30, %v169_v34 }
  0xfb   :  { %v225_v40 = vpack.c.bf16 %v183_v38, %v182_v36 }
  0xfd   :  { %v195_v41 = vrot.slane %v225_v40, %v194_v39 }
  0xff   :  { %226 = vst.sshfl [vmem:[%s344_s4] sm:$0x5 pattern:$0x73625140] %v195_v41 }

// kernel: _lambda_.104
= control target key start
LH: loop header
LB: loop body
LE: loop exit
PB: predicated region body
PF: predicated region fallthrough
CT: control target
= control target key end

     0   :  { %v211_v1 = vmov 0   ;;  %vm70_vm0 = vcmask 523264   ;;  %v117_v10 = vlaneseq  ;;  %v212_v11 = vmov 1983009808   ;;  %s283_s1 = inlined_call_operand.vmem [shape: bf16[64,256], index: 1, kind: input, shape index: {}]   ;;  %s284_s0 = inlined_call_operand.vmem [shape: bf16[2,64], index: 0, kind: input, shape index: {}]   ;;  %s285_s4 = inlined_call_operand.vmem [shape: bf16[2,256], index: 4, kind: input, shape index: {}]   ;;  %s286_s2 = inlined_call_operand.vmem [shape: f32[1,256], index: 2, kind: input, shape index: {}]   ;;  %s287_s3 = inlined_call_operand.vmem [shape: f32[1,256], index: 3, kind: input, shape index: {}]   ;;  %s288_s5 = inlined_call_operand.vmem [shape: bf16[2,256], index: 5, kind: output, shape index: {}]  }
   0x1   :  { %v199_v0 = vld [vmem:[%s283_s1 + $0x4] ss:$8 sps:$4 sm:$0xff]   ;;  %106 = vmatprep.mubr.bf16.mxu0 %v211_v1  ;;  %v201_v2 = vld [vmem:[%s283_s1] ss:$8 sps:$4 sm:$0xff]   ;;  %v202_v3 = vld [vmem:[%s283_s1 + $0x14] ss:$8 sps:$4 sm:$0xff]   ;;  %v147_v12 = vunpack.c.l.s4 %v212_v11 }
   0x2   :  { %74 = vmatprep.subr.bf16.mxu0 %v199_v0  ;;  %v204_v4 = vld [vmem:[%s283_s1 + $0x10] ss:$8 sps:$4 sm:$0xff]   ;;  %v205_v5 = vld [vmem:[%s283_s1 + $0x24] ss:$8 sps:$4 sm:$0xff]   ;;  %v207_v6 = vld [vmem:[%s283_s1 + $0x20] ss:$8 sps:$4 sm:$0xff]  }
   0x3   :  { %75 = vmatpush1.bf16.msra.mxu0 %v201_v2  ;;  %v208_v7 = vld [vmem:[%s283_s1 + $0x34] ss:$8 sps:$4 sm:$0xff]   ;;  %v210_v8 = vld [vmem:[%s283_s1 + $0x30] ss:$8 sps:$4 sm:$0xff]   ;;  %v21_v9 = vld [vmem:[%s284_s0] sm:$0x1]  ;;  %v148_v14 = vunpack.c.0.s8 %v147_v12 }
   0x4   :  { %76 = vmatprep.subr.bf16.mxu0 %v202_v3  ;;  %v118_v13 = vshrl.u32 %v117_v10, 7  ;;  %v143_v15 = vld [vmem:[%s285_s4] sm:$0x3]  ;;  %v213_v28 = vmov 1966171168  }
   0x5   :  { %v115_v17 = vld [vmem:[%s286_s2] sm:$0x3]  ;;  %v144_v18 = vunpack.c.l.bf16 %v143_v15  ;;  %v166_v29 = vunpack.c.l.s4 %v213_v28 }
   0x6   :  { %v119_v16 = vsub.s32 0, %v118_v13  ;;  %v151_v19 = vsub.s32 %v148_v14, %v118_v13  ;;  %v123_v20 = vsub.s32 1, %v118_v13  ;;  %v129_v21 = vld [vmem:[%s287_s3] sm:$0x3] }
   0x7   :  { %77 = vmatpush1.bf16.msra.mxu0 %v204_v4  ;;  %v167_v38 = vunpack.c.0.s8 %v166_v29 }
   0x8   :  { %78 = vmatprep.subr.bf16.mxu0 %v205_v5  ;;  %v120_v22 = vrot.slane %v115_v17, %v119_v16  ;;  %v152_v23 = vrot.slane %v144_v18, %v151_v19  ;;  %v124_v24 = vrot.slane %v115_v17, %v123_v20  ;;  %v134_v25 = vrot.slane %v129_v21, %v119_v16 }
   0x9   :  { %v138_v27 = vrot.slane %v129_v21, %v123_v20  ;;  %v170_v43 = vsub.s32 %v167_v38, %v118_v13 }
   0xa   :  { %v153_v33 = vcombine.high %v152_v23, %v152_v23 }
   0xb   :  { %79 = vmatpush1.bf16.msra.mxu0 %v207_v6 }
   0xc   :  { %80 = vmatprep.subr.bf16.mxu0 %v208_v7 }
   0xf   :  { %81 = vmatpush1.bf16.msra.mxu0 %v210_v8 }
  0x12   :  { %193 = vmatmul.mubr.msk.bf16.vlgmr.msra.gmra.mrb[0].mxu0 %vm70_vm0, %v21_v9 }
  0xe5   :  { %v108_v26 = vpop.f32.mrb[0].mxu0 }
  0xe6   :  { %v127_v30 = vmul.f32 %v120_v22, %v108_v26  ;;  %v110_v31 = vpop.f32.mrb[1].mxu0 }
  0xe7   :  { %v128_v32 = vmul.f32 %v124_v24, %v110_v31  ;;  %v112_v34 = vpop.f32.mrb[2].mxu0 }
  0xe8   :  { %v141_v35 = vadd.f32 %v134_v25, %v127_v30  ;;  %v113_v36 = vpop.f32.mrb[3].mxu0 }
  0xe9   :  { %v142_v37 = vadd.f32 %v138_v27, %v128_v32 }
  0xea   :  { %v156_v39 = vadd.f32 %v152_v23, %v141_v35 }
  0xeb   :  { %v157_v40 = vadd.f32 %v153_v33, %v142_v37 }
  0xec   :  { %v158_v41 = vmax.f32 %v156_v39, 0.0 }
  0xed   :  { %v159_v42 = vmax.f32 %v157_v40, 0.0 }
  0xef   :  { %v194_v44 = vpack.c.bf16 %v159_v42, %v158_v41 }
  0xf1   :  { %v171_v45 = vrot.slane %v194_v44, %v170_v43 }
  0xf3   :  { %195 = vst.sshfl [vmem:[%s288_s5] sm:$0x5 pattern:$0x73625140] %v171_v45 }

// kernel: _lambda_.102
= control target key start
LH: loop header
LB: loop body
LE: loop exit
PB: predicated region body
PF: predicated region fallthrough
CT: control target
= control target key end

     0   :  { %v639_v22 = vmov 1966171168   ;;  %v96_v24 = vlaneseq  ;;  %v640_v40 = vmov 0.0   ;;  %vm641_vm0 = vmmov 0   ;;  %s787_s1 = inlined_call_operand.vmem [shape: bf16[576,64], index: 1, kind: input, shape index: {}]   ;;  %s788_s0 = inlined_call_operand.vmem [shape: bf16[2,576], index: 0, kind: input, shape index: {}]   ;;  %s789_s2 = inlined_call_operand.vmem [shape: f32[1,64], index: 2, kind: input, shape index: {}]   ;;  %s790_s3 = inlined_call_operand.vmem [shape: f32[1,64], index: 3, kind: input, shape index: {}]   ;;  %s791_s4 = inlined_call_operand.vmem [shape: bf16[2,64], index: 4, kind: output, shape index: {}]  }
   0x1   :  { %v602_v0 = vld [vmem:[%s787_s1 + $0x40] sm:$0xff]   ;;  %v606_v4 = vld [vmem:[%s787_s1 + $0x48] sm:$0xff]   ;;  %v610_v8 = vld [vmem:[%s787_s1 + $0x50] sm:$0xff]   ;;  %v94_v23 = vunpack.c.l.s4 %v639_v22  ;;  %vm351_vm1 = vcmask 523264   ;;  %vm493_vm2 = vcmask 516096  }
   0x2   :  { %v603_v1 = vld [vmem:[%s787_s1 + $0xc0] sm:$0xff]   ;;  %538 = vmatprep.subr.bf16.mxu0 %v602_v0  ;;  %v607_v5 = vld [vmem:[%s787_s1 + $0xc8] sm:$0xff]   ;;  %v611_v9 = vld [vmem:[%s787_s1 + $0xd0] sm:$0xff]   ;;  %v97_v30 = vshrl.u32 %v96_v24, 7 }
   0x3   :  { %v604_v2 = vld [vmem:[%s787_s1] sm:$0xff]   ;;  %560 = vmatprep.subr.bf16.mxu1 %v603_v1  ;;  %v608_v6 = vld [vmem:[%s787_s1 + $0x8] sm:$0xff]   ;;  %v612_v10 = vld [vmem:[%s787_s1 + $0x10] sm:$0xff]   ;;  %v95_v29 = vunpack.c.0.s8 %v94_v23 }
   0x4   :  { %v605_v3 = vld [vmem:[%s787_s1 + $0x80] sm:$0xff]   ;;  %539 = vmatpush3.bf16.msra.mxu0 %v604_v2  ;;  %v609_v7 = vld [vmem:[%s787_s1 + $0x88] sm:$0xff]   ;;  %v613_v11 = vld [vmem:[%s787_s1 + $0x90] sm:$0xff]  }
   0x5   :  { %561 = vmatpush3.bf16.msra.mxu1 %v605_v3  ;;  %540 = vmatprep.subr.bf16.mxu0 %v606_v4  ;;  %v614_v12 = vld [vmem:[%s787_s1 + $0x58] sm:$0xff]   ;;  %v618_v16 = vld [vmem:[%s787_s1 + $0x60] sm:$0xff]   ;;  %v622_v20 = vld [vmem:[%s787_s1 + $0x68] sm:$0xff]   ;;  %v98_v35 = vsub.s32 %v95_v29, %v97_v30 }
   0x6   :  { %562 = vmatprep.subr.bf16.mxu1 %v607_v5  ;;  %v615_v13 = vld [vmem:[%s787_s1 + $0xd8] sm:$0xff]   ;;  %v619_v17 = vld [vmem:[%s787_s1 + $0xe0] sm:$0xff]   ;;  %v623_v21 = vld [vmem:[%s787_s1 + $0xe8] sm:$0xff]  }
   0x7   :  { %v616_v14 = vld [vmem:[%s787_s1 + $0x18] sm:$0xff]   ;;  %v620_v18 = vld [vmem:[%s787_s1 + $0x20] sm:$0xff]   ;;  %v624_v25 = vld [vmem:[%s787_s1 + $0x28] sm:$0xff]  }
   0x8   :  { %541 = vmatpush3.bf16.msra.mxu0 %v608_v6  ;;  %v617_v15 = vld [vmem:[%s787_s1 + $0x98] sm:$0xff]   ;;  %v621_v19 = vld [vmem:[%s787_s1 + $0xa0] sm:$0xff]   ;;  %v625_v26 = vld [vmem:[%s787_s1 + $0xa8] sm:$0xff]  }
   0x9   :  { %563 = vmatpush3.bf16.msra.mxu1 %v609_v7  ;;  %542 = vmatprep.subr.bf16.mxu0 %v610_v8  ;;  %v626_v27 = vld [vmem:[%s787_s1 + $0x70] sm:$0xff]   ;;  %v630_v33 = vld [vmem:[%s787_s1 + $0x78] sm:$0xff]   ;;  %v18_v38 = vld [vmem:[%s788_s0] sm:$0x1f] }
   0xa   :  { %564 = vmatprep.subr.bf16.mxu1 %v611_v9  ;;  %v627_v28 = vld [vmem:[%s787_s1 + $0xf0] sm:$0xff]   ;;  %v631_v34 = vld [vmem:[%s787_s1 + $0xf8] sm:$0xff]   ;;  %v99_v39 = vrot.slane %v18_v38, %v98_v35  ;;  %v635_v44 = vld [vmem:[%s787_s1 + $0x100] sm:$0xff]   ;;  %v92_v48 = vcombine.high %v18_v38, %v18_v38 }
   0xb   :  { %v628_v31 = vld [vmem:[%s787_s1 + $0x30] sm:$0xff]   ;;  %v632_v36 = vld [vmem:[%s787_s1 + $0x38] sm:$0xff]   ;;  %v636_v47 = vld [vmem:[%s787_s1 + $0x108] sm:$0xff]  }
   0xc   :  { %543 = vmatpush3.bf16.msra.mxu0 %v612_v10  ;;  %v629_v32 = vld [vmem:[%s787_s1 + $0xb0] sm:$0xff]   ;;  %v633_v37 = vld [vmem:[%s787_s1 + $0xb8] sm:$0xff]   ;;  %v107_v41 = vcombine.high %v99_v39, %v99_v39  ;;  %v114_v42 = vrot.slane %v99_v39, %v98_v35  ;;  %v106_v50 = vrot.slane %v92_v48, %v98_v35  ;;  %v536_v1 = vld [vmem:[%s789_s2] ss:$0 sm:$0xff] }
   0xd   :  { %565 = vmatpush3.bf16.msra.mxu1 %v613_v11  ;;  %544 = vmatprep.subr.bf16.mxu0 %v614_v12  ;;  %v637_v49 = vld [vmem:[%s787_s1 + $0x110] sm:$0xff]   ;;  %v638_v51 = vld [vmem:[%s787_s1 + $0x118] sm:$0xff]   ;;  %v537_v4 = vld [vmem:[%s790_s3] ss:$0 sm:$0xff] }
   0xe   :  { %566 = vmatprep.subr.bf16.mxu1 %v615_v13  ;;  %v128_v43 = vrot.slane %v107_v41, %v98_v35  ;;  %v129_v45 = vcombine.high %v114_v42, %v114_v42  ;;  %v121_v52 = vrot.slane %v106_v50, %v98_v35 }
  0x10   :  { %545 = vmatpush3.bf16.msra.mxu0 %v616_v14  ;;  %387 = vmatprep.mubr.bf16.mxu0 %v128_v43  ;;  %v130_v46 = vcombine.high %v128_v43, %v128_v43 }
  0x11   :  { %567 = vmatpush3.bf16.msra.mxu1 %v617_v15  ;;  %546 = vmatprep.subr.bf16.mxu0 %v618_v16 }
  0x12   :  { %568 = vmatprep.subr.bf16.mxu1 %v619_v17  ;;  %427 = vmatprep.mubr.bf16.mxu1 %v130_v46 }
  0x14   :  { %547 = vmatpush3.bf16.msra.mxu0 %v620_v18 }
  0x15   :  { %569 = vmatpush3.bf16.msra.mxu1 %v621_v19  ;;  %548 = vmatprep.subr.bf16.mxu0 %v622_v20 }
  0x16   :  { %570 = vmatprep.subr.bf16.mxu1 %v623_v21 }
  0x18   :  { %549 = vmatpush3.bf16.msra.mxu0 %v624_v25 }
  0x19   :  { %571 = vmatpush3.bf16.msra.mxu1 %v625_v26  ;;  %550 = vmatprep.subr.bf16.mxu0 %v626_v27 }
  0x1a   :  { %572 = vmatprep.subr.bf16.mxu1 %v627_v28 }
  0x1c   :  { %551 = vmatpush3.bf16.msra.mxu0 %v628_v31 }
  0x1d   :  { %573 = vmatpush3.bf16.msra.mxu1 %v629_v32  ;;  %552 = vmatprep.subr.bf16.mxu0 %v630_v33 }
  0x1e   :  { %574 = vmatprep.subr.bf16.mxu1 %v631_v34 }
  0x20   :  { %553 = vmatpush3.bf16.msra.mxu0 %v632_v36 }
  0x21   :  { %575 = vmatpush3.bf16.msra.mxu1 %v633_v37  ;;  %587 = vmatprep.subr.bf16.mxu0 %v640_v40 }
  0x23   :  { %388 = vmatmul.mubr.bf16.vlgmr.msra.gmra.mrb[0].mxu0 %v114_v42 }
  0x24   :  { %588 = vmatpush3.bf16.msra.mxu0 %v635_v44  ;;  %428 = vmatmul.mubr.bf16.vlgmr.msra.gmra.mrb[0].mxu1 %v129_v45 }
  0x25   :  { %589 = vmatprep.subr.bf16.mxu0 %v640_v40  ;;  %595 = vmatprep.mubr.msk.bf16.mxu0 %vm641_vm0, %v640_v40 }
  0x28   :  { %590 = vmatpush3.bf16.msra.mxu0 %v636_v47 }
  0x29   :  { %591 = vmatprep.subr.bf16.mxu0 %v640_v40 }
  0x2c   :  { %592 = vmatpush3.bf16.msra.mxu0 %v637_v49 }
  0x2d   :  { %593 = vmatprep.subr.bf16.mxu0 %v640_v40 }
  0x30   :  { %594 = vmatpush3.bf16.msra.mxu0 %v638_v51 }
  0x33   :  { %596 = vmatmul.mubr.msk.bf16.vlgmr.msra.gmra.mrb[4].mxu0 %vm351_vm1, %v121_v52 }
  0xf6   :  { %v554_v53 = vpop.f32.mrb[0].mxu0 }
  0xf7   :  { %v555_v54 = vpop.f32.mrb[1].mxu0  ;;  %v576_v55 = vpop.f32.mrb[0].mxu1 }
  0xf8   :  { %v556_v56 = vadd.f32 %v555_v54, %v554_v53  ;;  %v557_v57 = vpop.f32.mrb[2].mxu0  ;;  %v577_v58 = vpop.f32.mrb[1].mxu1 }
  0xf9   :  { %v558_v59 = vpop.f32.mrb[3].mxu0  ;;  %v578_v60 = vadd.f32 %v577_v58, %v576_v55  ;;  %v579_v61 = vpop.f32.mrb[2].mxu1 }
  0xfa   :  { %v580_v62 = vpop.f32.mrb[3].mxu1 }
  0xfb   :  { %v430_v63 = vadd.f32 %v578_v60, %v556_v56 }
 0x106   :  { %v469_v0 = vpop.f32.mrb[4].mxu0 }
 0x107   :  { %v470_v2 = vadd.f32 %v469_v0, %v430_v63  ;;  %v597_v3 = vpop.f32.mrb[5].mxu0 }
 0x108   :  { %v472_v5 = vpop.f32.mrb[6].mxu0 }
 0x109   :  { %v482_v6 = vmul.f32 %v536_v1, %v470_v2  ;;  %v598_v7 = vpop.f32.mrb[7].mxu0 }
 0x10b   :  { %v490_v8 = vadd.f32 %v537_v4, %v482_v6 }
 0x10d   :  { %v491_v9 = vmax.f32 %v490_v8, 0.0 }
 0x10f   :  { %v492_v10 = vpack.c.bf16 %v491_v9, %v491_v9 }
 0x111   :  { %494 = vst.msk [vmem:[%s791_s4] sm:$0x1] %vm493_vm2, %v492_v10 }

// kernel: _lambda_.110
= control target key start
LH: loop header
LB: loop body
LE: loop exit
PB: predicated region body
PF: predicated region fallthrough
CT: control target
= control target key end

     0   :  { %v65_v9 = vlaneseq  ;;  %v332_v13 = vmov 1966171168   ;;  %vm232_vm0 = vcmask 516096   ;;  %s423_s0 = inlined_call_operand.vmem [shape: bf16[2,1,1,9,64], index: 0, kind: input, shape index: {}, may-alias: {0,5}]   ;;  %s424_s1 = inlined_call_operand.vmem [shape: bf16[2,256], index: 1, kind: input, shape index: {}]   ;;  %s425_s2 = inlined_call_operand.vmem [shape: bf16[256,64], index: 2, kind: input, shape index: {}]   ;;  %s426_s3 = inlined_call_operand.vmem [shape: f32[1,64], index: 3, kind: input, shape index: {}]   ;;  %s427_s4 = inlined_call_operand.vmem [shape: f32[1,64], index: 4, kind: input, shape index: {}]   ;;  %s428_s5 = inlined_call_operand.vmem [shape: bf16[2,1,1,9,64], index: 5, kind: output, shape index: {}, may-alias: {0,5}]  }
   0x1   :  { %v316_v0 = vld [vmem:[%s425_s2 + $0x40] sm:$0xff]   ;;  %v318_v2 = vld [vmem:[%s425_s2 + $0x48] sm:$0xff]   ;;  %v320_v4 = vld [vmem:[%s425_s2 + $0x50] sm:$0xff]   ;;  %v63_v14 = vunpack.c.l.s4 %v332_v13 }
   0x2   :  { %v317_v1 = vld [vmem:[%s425_s2] sm:$0xff]   ;;  %293 = vmatprep.subr.bf16.mxu0 %v316_v0  ;;  %v319_v3 = vld [vmem:[%s425_s2 + $0x8] sm:$0xff]   ;;  %v321_v5 = vld [vmem:[%s425_s2 + $0x10] sm:$0xff]   ;;  %v66_v15 = vshrl.u32 %v65_v9, 7 }
   0x3   :  { %294 = vmatpush3.bf16.msra.mxu0 %v317_v1  ;;  %v322_v6 = vld [vmem:[%s425_s2 + $0x58] sm:$0xff]   ;;  %v324_v8 = vld [vmem:[%s425_s2 + $0x60] sm:$0xff]   ;;  %v326_v11 = vld [vmem:[%s425_s2 + $0x68] sm:$0xff]   ;;  %v64_v18 = vunpack.c.0.s8 %v63_v14 }
   0x4   :  { %295 = vmatprep.subr.bf16.mxu0 %v318_v2  ;;  %v323_v7 = vld [vmem:[%s425_s2 + $0x18] sm:$0xff]   ;;  %v325_v10 = vld [vmem:[%s425_s2 + $0x20] sm:$0xff]   ;;  %v327_v16 = vld [vmem:[%s425_s2 + $0x28] sm:$0xff]  }
   0x5   :  { %v273_v12 = vld.sshfl [vmem:[%s424_s1] sm:$0x11 pattern:$0x75316420]  ;;  %v328_v19 = vld [vmem:[%s425_s2 + $0x70] sm:$0xff]   ;;  %v67_v20 = vsub.s32 %v64_v18, %v66_v15  ;;  %v330_v23 = vld [vmem:[%s425_s2 + $0x78] sm:$0xff]  }
   0x6   :  { %v61_v17 = vcombine.high %v273_v12, %v273_v12  ;;  %v329_v21 = vld [vmem:[%s425_s2 + $0x30] sm:$0xff]   ;;  %v331_v24 = vld [vmem:[%s425_s2 + $0x38] sm:$0xff]   ;;  %v290_v28 = vld [vmem:[%s426_s3] ss:$0 sm:$0xff] }
   0x7   :  { %296 = vmatpush3.bf16.msra.mxu0 %v319_v3  ;;  %v68_v25 = vrot.slane %v273_v12, %v67_v20  ;;  %v291_v31 = vld [vmem:[%s427_s4] ss:$0 sm:$0xff] }
   0x8   :  { %297 = vmatprep.subr.bf16.mxu0 %v320_v4  ;;  %v75_v22 = vrot.slane %v61_v17, %v67_v20 }
   0xa   :  { %206 = vmatprep.mubr.bf16.mxu0 %v75_v22 }
   0xb   :  { %298 = vmatpush3.bf16.msra.mxu0 %v321_v5 }
   0xc   :  { %299 = vmatprep.subr.bf16.mxu0 %v322_v6 }
   0xf   :  { %300 = vmatpush3.bf16.msra.mxu0 %v323_v7 }
  0x10   :  { %301 = vmatprep.subr.bf16.mxu0 %v324_v8 }
  0x13   :  { %302 = vmatpush3.bf16.msra.mxu0 %v325_v10 }
  0x14   :  { %303 = vmatprep.subr.bf16.mxu0 %v326_v11 }
  0x17   :  { %304 = vmatpush3.bf16.msra.mxu0 %v327_v16 }
  0x18   :  { %305 = vmatprep.subr.bf16.mxu0 %v328_v19 }
  0x1b   :  { %306 = vmatpush3.bf16.msra.mxu0 %v329_v21 }
  0x1c   :  { %307 = vmatprep.subr.bf16.mxu0 %v330_v23 }
  0x1f   :  { %308 = vmatpush3.bf16.msra.mxu0 %v331_v24 }
  0x22   :  { %207 = vmatmul.mubr.bf16.vlgmr.msra.gmra.mrb[0].mxu0 %v68_v25 }
  0xf5   :  { %v309_v26 = vpop.f32.mrb[0].mxu0 }
  0xf6   :  { %v310_v27 = vpop.f32.mrb[1].mxu0 }
  0xf7   :  { %v311_v29 = vadd.f32 %v310_v27, %v309_v26  ;;  %v312_v30 = vpop.f32.mrb[2].mxu0 }
  0xf8   :  { %v313_v32 = vpop.f32.mrb[3].mxu0 }
  0xf9   :  { %v221_v33 = vmul.f32 %v311_v29, %v290_v28 }
  0xfb   :  { %v229_v34 = vadd.f32 %v291_v31, %v221_v33 }
  0xfd   :  { %v230_v35 = vmax.f32 %v229_v34, 0.0 }
  0xff   :  { %v231_v36 = vpack.c.bf16 %v230_v35, %v230_v35 }
 0x101   :  { %233 = vst.msk [vmem:[#allocation2] sm:$0x1] %vm232_vm0, %v231_v36 }
 0x108   :  { %v251_v37 = vld [vmem:[#allocation2] sm:$0x1] }
 0x109   :  { %292 = vst [vmem:[%s428_s5 + $0x4] sm:$0x1] %v251_v37 }

// kernel: _lambda_.109
= control target key start
LH: loop header
LB: loop body
LE: loop exit
PB: predicated region body
PF: predicated region fallthrough
CT: control target
= control target key end

     0   :  { %v32_v5 = vlaneseq  ;;  %s959_s0 = inlined_call_operand.vmem [shape: bf16[2,1,256], index: 0, kind: input, shape index: {}]   ;;  %s960_s1 = inlined_call_operand.vmem [shape: bf16[256,64], index: 1, kind: input, shape index: {}]   ;;  %s961_s2 = inlined_call_operand.vmem [shape: f32[1,64], index: 2, kind: input, shape index: {}]   ;;  %s962_s3 = inlined_call_operand.vmem [shape: bf16[64,160], index: 3, kind: input, shape index: {}]   ;;  %s963_s4 = inlined_call_operand.vmem [shape: f32[1,160], index: 4, kind: input, shape index: {}]   ;;  %s964_s5 = inlined_call_operand.hbm [shape: f32[5,2,32], index: 5, kind: output, shape index: {0}]   ;;  %s965_s6 = inlined_call_operand.vmem [shape: s32[5,2,1], index: 6, kind: output, shape index: {1}]  }
   0x1   :  { %v635_v0 = vld [vmem:[%s960_s1 + $0x40] sm:$0xff]   ;;  %v637_v2 = vld [vmem:[%s960_s1 + $0x48] sm:$0xff]   ;;  %v639_v4 = vld [vmem:[%s960_s1 + $0x50] sm:$0xff]  }
   0x2   :  { %v636_v1 = vld [vmem:[%s960_s1] sm:$0xff]   ;;  %607 = vmatprep.subr.bf16.mxu0 %v635_v0  ;;  %v638_v3 = vld [vmem:[%s960_s1 + $0x8] sm:$0xff]   ;;  %v640_v6 = vld [vmem:[%s960_s1 + $0x10] sm:$0xff]   ;;  %v774_v8 = vshrl.u32 %v32_v5, 7 }
   0x3   :  { %608 = vmatpush3.bf16.msra.mxu0 %v636_v1  ;;  %v641_v7 = vld [vmem:[%s960_s1 + $0x58] sm:$0xff]   ;;  %v643_v10 = vld [vmem:[%s960_s1 + $0x60] sm:$0xff]   ;;  %v645_v13 = vld [vmem:[%s960_s1 + $0x68] sm:$0xff]  }
   0x4   :  { %609 = vmatprep.subr.bf16.mxu0 %v637_v2  ;;  %v642_v9 = vld [vmem:[%s960_s1 + $0x18] sm:$0xff]   ;;  %v644_v11 = vld [vmem:[%s960_s1 + $0x20] sm:$0xff]   ;;  %v38_v12 = vsub.s32 2, %v774_v8  ;;  %v790_v14 = vsub.s32 0, %v774_v8  ;;  %v646_v19 = vld [vmem:[%s960_s1 + $0x28] sm:$0xff]  }
   0x5   :  { %v24_v15 = vld [vmem:[%s959_s0] sm:$0x3]  ;;  %v25_v16 = vld [vmem:[%s959_s0 + $0x2] sm:$0x3] }
   0x6   :  { %v26_v17 = vunpack.c.l.bf16 %v24_v15  ;;  %v27_v18 = vunpack.c.l.bf16 %v25_v16 }
   0x7   :  { %610 = vmatpush3.bf16.msra.mxu0 %v638_v3 }
   0x8   :  { %611 = vmatprep.subr.bf16.mxu0 %v639_v4  ;;  %v39_v20 = vrot.slane %v26_v17, %v38_v12  ;;  %v47_v21 = vrot.slane %v27_v18, %v38_v12  ;;  %v35_v22 = vrot.slane %v26_v17, %v790_v14  ;;  %v43_v23 = vrot.slane %v27_v18, %v790_v14 }
   0xb   :  { %612 = vmatpush3.bf16.msra.mxu0 %v640_v6 }
   0xc   :  { %613 = vmatprep.subr.bf16.mxu0 %v641_v7 }
   0xf   :  { %614 = vmatpush3.bf16.msra.mxu0 %v642_v9 }
  0x10   :  { %615 = vmatprep.subr.bf16.mxu0 %v643_v10 }
  0x13   :  { %616 = vmatpush3.bf16.msra.mxu0 %v644_v11 }
  0x14   :  { %12 = vsyncpa [#allocation3], 0  ;;  %617 = vmatprep.subr.bf16.mxu0 %v645_v13  ;;  %v647_v24 = vld [vmem:[%s960_s1 + $0x70] sm:$0xff]   ;;  %v53_v25 = vpack.c.bf16 %v39_v20, %v39_v20  ;;  %v55_v26 = vpack.c.bf16 %v47_v21, %v47_v21  ;;  %v52_v27 = vpack.c.bf16 %v35_v22, %v35_v22  ;;  %v54_v28 = vpack.c.bf16 %v43_v23, %v43_v23  ;;  %v649_v34 = vld [vmem:[%s960_s1 + $0x78] sm:$0xff]   ;;  %s712_s23 = smov 32   ;;  %s715_s10 = smov [#allocation2]  }
  0x15   :  { %v648_v29 = vld [vmem:[%s960_s1 + $0x30] sm:$0xff]   ;;  %vm104_vm0 = vcmask 1041409   ;;  %v650_v37 = vld [vmem:[%s960_s1 + $0x38] sm:$0xff]   ;;  %v651_v42 = vld [vmem:[%s962_s3 + $0x4] ss:$8 sps:$4 sm:$0xff]   ;;  %v711_v50 = vmov 0  }
  0x16   :  { %v100_v30 = vunpack.c.l.b16 %v53_v25  ;;  %v102_v31 = vunpack.c.l.b16 %v55_v26  ;;  %v99_v32 = vunpack.c.l.b16 %v52_v27  ;;  %v101_v33 = vunpack.c.l.b16 %v54_v28  ;;  %v653_v43 = vld [vmem:[%s962_s3] ss:$8 sps:$4 sm:$0xff]   ;;  %320 = vmatprep.subr.bf16.mxu1 %v651_v42  ;;  %v654_v44 = vld [vmem:[%s962_s3 + $0x14] ss:$8 sps:$4 sm:$0xff]   ;;  %v656_v45 = vld [vmem:[%s962_s3 + $0x10] ss:$8 sps:$4 sm:$0xff]   ;;  %352 = vmatprep.mubr.bf16.mxu1 %v711_v50 }
  0x17   :  { %618 = vmatpush3.bf16.msra.mxu0 %v646_v19  ;;  %321 = vmatpush1.bf16.msra.mxu1 %v653_v43  ;;  %v657_v46 = vld [vmem:[%s962_s3 + $0x24] ss:$8 sps:$4 sm:$0xff]   ;;  %v659_v47 = vld [vmem:[%s962_s3 + $0x20] ss:$8 sps:$4 sm:$0xff]   ;;  %v660_v48 = vld [vmem:[%s962_s3 + $0x34] ss:$8 sps:$4 sm:$0xff]  }
  0x18   :  { %619 = vmatprep.subr.bf16.mxu0 %v647_v24  ;;  %v106_v35 = vrot.slane %v102_v31, 7  ;;  %v103_v36 = vrot.slane %v101_v33, 7  ;;  %322 = vmatprep.subr.bf16.mxu1 %v654_v44  ;;  %v662_v49 = vld [vmem:[%s962_s3 + $0x30] ss:$8 sps:$4 sm:$0xff]   ;;  %v840_v51 = vand.u32 127, %v32_v5  ;;  %vm316_vm1 = vcmask 523264  }
  0x19   :  { %v576_v53 = vld [vmem:[%s961_s2] ss:$0 sm:$0xff]  ;;  %vm481_vm2 = vcmask 1042176   ;;  %vm395_vm3 = vcmask 517376   ;;  %vm438_vm4 = vcmask 779776   ;;  %s713_s2 = smov 96  }
  0x1a   :  { %v107_v38 = vsel %vm104_vm0, %v106_v35, %v100_v30  ;;  %v105_v39 = vsel %vm104_vm0, %v103_v36, %v99_v32  ;;  %418 = vrot.lane.b32.xlu1 %v840_v51, %s712_s23  ;;  %v264_v1 = vld [vmem:[%s963_s4] sm:$0x3]  ;;  %s714_s4 = smov 64   ;;  %v272_v12 = vsub.s32 1, %v774_v8  ;;  %vm361_vm5 = vcmask 254976   ;;  %s561_s11 = sshll.u32 %s715_s10, 4  ;;  %s562_s11 = int_to_ptr.vmem [resolvable:$true] %s561_s11 }
  0x1b   :  { %620 = vmatpush3.bf16.msra.mxu0 %v648_v29  ;;  %v109_v40 = vpack.c.b16 %v107_v38, %v107_v38  ;;  %v108_v41 = vpack.c.b16 %v105_v39, %v105_v39  ;;  %323 = vmatpush1.bf16.msra.mxu1 %v656_v45  ;;  %v269_v2 = vrot.slane %v264_v1, %v790_v14  ;;  %vm393_vm0 = vcmask 1024   ;;  %s687_s12 = scalar_lea.vmem %s562_s11, 160  ;;  %p692_p1 = scmp.lt.s32.totalorder %s562_s11, %s562_s11 }
  0x1c   :  { %621 = vmatprep.subr.bf16.mxu0 %v649_v34  ;;  %324 = vmatprep.subr.bf16.mxu1 %v657_v46  ;;  %v273_v13 = vrot.slane %v264_v1, %v272_v12  ;;  %p688_p0 = scmp.ne.s32.totalorder %s562_s11, %s687_s12  ;;  %p693_p2 = scmp.lt.s32.totalorder %s687_s12, %s687_s12 }
  0x1d   :  { %240 = vmatprep.mubr.bf16.mxu0 %v109_v40 }
  0x1e   :  { %p694_p3 = por %p693_p2, %p692_p1 }
  0x1f   :  { %622 = vmatpush3.bf16.msra.mxu0 %v650_v37  ;;  %325 = vmatpush1.bf16.msra.mxu1 %v659_v47 }
  0x20   :  { %326 = vmatprep.subr.bf16.mxu1 %v660_v48  ;;  %p695_p4 = pnand %p694_p3, %p688_p0 }
  0x22   :  { %241 = vmatmul.mubr.bf16.vlgmr.msra.gmra.mrb[0].mxu0 %v108_v41 }
  0x23   :  { %327 = vmatpush1.bf16.msra.mxu1 %v662_v49 }
  0x8c   :  { %v419_v17 = vpop.permute.xlu1 %418 }
  0xf5   :  { %v623_v52 = vpop.f32.mrb[0].mxu0 }
  0xf6   :  { %v624_v54 = vpop.f32.mrb[1].mxu0 }
  0xf7   :  { %v625_v55 = vadd.f32 %v624_v54, %v623_v52  ;;  %v626_v56 = vpop.f32.mrb[2].mxu0 }
  0xf8   :  { %v627_v57 = vpop.f32.mrb[3].mxu0 }
  0xf9   :  { %v243_v58 = vadd.f32 %v625_v55, %v576_v53 }
  0xfb   :  { %v593_v59 = vmul.f32 -1.442695, %v243_v58 }
  0xfd   :  { %663 = vpow2.f32 %v593_v59 }
 0x107   :  { %v664_v60 = vpop.eup %663 }
 0x108   :  { %v251_v61 = vadd.f32 1.0, %v664_v60 }
 0x10a   :  { %665 = vrcp.f32 %v251_v61 }
 0x114   :  { %v666_v62 = vpop.eup %665 }
 0x115   :  { %v254_v63 = vmul.f32 %v666_v62, %v243_v58 }
 0x117   :  { %v255_v0 = vpack.c.bf16 %v254_v63, %v254_v63 }
 0x119   :  { %602 = vmatmul.mubr.msk.bf16.vlgmr.msra.gmra.mrb[0].mxu1 %vm316_vm1, %v255_v0 }
 0x1ec   :  { %v354_v3 = vpop.f32.mrb[0].mxu1 }
 0x1ed   :  { %v355_v4 = vadd.f32 %v354_v3, %v269_v2  ;;  %v356_v5 = vpop.f32.mrb[1].mxu1 }
 0x1ee   :  { %v358_v6 = vpop.f32.mrb[2].mxu1  ;;  %v859_v14 = vadd.f32 %v356_v5, %v273_v13 }
 0x1ef   :  { %v359_v7 = vpop.f32.mrb[3].mxu1  ;;  %v482_v9 = vsel %vm481_vm2, %v355_v4, -inf  ;;  %v396_v10 = vsel %vm395_vm3, %v355_v4, -inf  ;;  %v439_v11 = vsel %vm438_vm4, %v355_v4, -inf  ;;  %v362_v15 = vsel %vm361_vm5, %v355_v4, -inf }
 0x1f0   :  { %483 = vmax.xlane.f32.xlu1 %v482_v9  ;;  %397 = vmax.xlane.f32.xlu0 %v396_v10  ;;  %v524_v16 = vsel %vm361_vm5, %v859_v14, -inf }
 0x1f4   :  { %440 = vmax.xlane.f32.xlu0 %v439_v11 }
 0x201   :  { %504 = vrot.lane.b32.xlu1 %v840_v51, %s713_s2 }
 0x20a   :  { %461 = vrot.lane.b32.xlu0 %v840_v51, %s714_s4 }
 0x225   :  { %363 = vmax.xlane.f32.xlu1 %v362_v15 }
 0x229   :  { %525 = vmax.xlane.f32.xlu0 %v524_v16 }
 0x27d   :  { %v484_v18 = vpop.xlane.xlu1 %483  ;;  %v398_v19 = vpop.xlane.xlu0 %397 }
 0x27e   :  { %v485_v20 = vsub.f32 %v355_v4, %v484_v18  ;;  %v399_v21 = vsub.f32 %v355_v4, %v398_v19  ;;  %vm503_vm6 = vcmp.ge.f32.partialorder %v355_v4, %v484_v18  ;;  %vm417_vm7 = vcmp.ge.f32.partialorder %v355_v4, %v398_v19 }
 0x27f   :  { %v420_v33 = vsel %vm417_vm7, %v419_v17, 32 }
 0x280   :  { %v486_v22 = vmul.f32 1.442695, %v485_v20  ;;  %v400_v23 = vmul.f32 1.442695, %v399_v21  ;;  %v421_v41 = vsel %vm395_vm3, %v420_v33, 2147483647 }
 0x281   :  { %v441_v24 = vpop.xlane.xlu0 %440  ;;  %v505_v29 = vpop.permute.xlu1 %504  ;;  %v423_v46 = vshra.s32 %v421_v41, 16  ;;  %v422_v6 = vand.u32 65535, %v421_v41 }
 0x282   :  { %667 = vpow2.f32 %v486_v22  ;;  %v442_v8 = vsub.f32 %v355_v4, %v441_v24  ;;  %v506_v30 = vsel %vm503_vm6, %v505_v29, 32  ;;  %vm460_vm9 = vcmp.ge.f32.partialorder %v355_v4, %v441_v24 }
 0x283   :  { %669 = vpow2.f32 %v400_v23  ;;  %v877_v31 = vsel %vm481_vm2, %v506_v30, 2147483647  ;;  %v425_v49 = vcvt.s32.f32 %v423_v46  ;;  %v424_v11 = vcvt.s32.f32 %v422_v6 }
 0x284   :  { %v443_v25 = vmul.f32 1.442695, %v442_v8  ;;  %v509_v32 = vshra.s32 %v877_v31, 16 }
 0x285   :  { %v462_v34 = vpop.permute.xlu0 %461 }
 0x286   :  { %671 = vpow2.f32 %v443_v25  ;;  %v881_v38 = vcvt.s32.f32 %v509_v32  ;;  %v463_v42 = vsel %vm460_vm9, %v462_v34, 32 }
 0x287   :  { %v464_v47 = vsel %vm438_vm4, %v463_v42, 2147483647 }
 0x288   :  { %v466_v50 = vshra.s32 %v464_v47, 16  ;;  %v465_v9 = vand.u32 65535, %v464_v47 }
 0x28a   :  { %v468_v53 = vcvt.s32.f32 %v466_v50  ;;  %v467_v16 = vcvt.s32.f32 %v465_v9 }
 0x28c   :  { %v864_v26 = vpop.eup %667 }
 0x28d   :  { %v866_v27 = vpop.eup %669  ;;  %489 = vrot.lane.b32.xlu0 %v864_v26, %s712_s23 }
 0x28e   :  { %403 = vrot.lane.b32.xlu1 %v866_v27, %s713_s2 }
 0x290   :  { %v872_v28 = vpop.eup %671 }
 0x292   :  { %446 = vrot.lane.b32.xlu1 %v872_v28, %s714_s4 }
 0x2b2   :  { %v364_v35 = vpop.xlane.xlu1 %363 }
 0x2b3   :  { %v365_v36 = vsub.f32 %v355_v4, %v364_v35  ;;  %vm376_vm8 = vcmp.ge.f32.partialorder %v355_v4, %v364_v35 }
 0x2b4   :  { %v377_v37 = vsel %vm376_vm8, %v840_v51, 32 }
 0x2b5   :  { %v366_v39 = vmul.f32 1.442695, %v365_v36  ;;  %v378_v40 = vsel %vm361_vm5, %v377_v37, 2147483647 }
 0x2b6   :  { %512 = vmin.xlane.f32.xlu1 %v881_v38  ;;  %v526_v43 = vpop.xlane.xlu0 %525  ;;  %v380_v44 = vshra.s32 %v378_v40, 16  ;;  %v379_v3 = vand.u32 65535, %v378_v40 }
 0x2b7   :  { %673 = vpow2.f32 %v366_v39  ;;  %vm537_vm10 = vcmp.ge.f32.partialorder %v859_v14, %v526_v43 }
 0x2b8   :  { %v382_v45 = vcvt.s32.f32 %v380_v44  ;;  %v538_v48 = vsel %vm537_vm10, %v840_v51, 32  ;;  %v527_v51 = vsub.f32 %v859_v14, %v526_v43  ;;  %v381_v5 = vcvt.s32.f32 %v379_v3 }
 0x2b9   :  { %v890_v52 = vsel %vm361_vm5, %v538_v48, 2147483647  ;;  %v508_v14 = vand.u32 65535, %v877_v31 }
 0x2ba   :  { %383 = vmin.xlane.f32.xlu0 %v382_v45  ;;  %v541_v54 = vshra.s32 %v890_v52, 16  ;;  %v528_v58 = vmul.f32 1.442695, %v527_v51 }
 0x2bb   :  { %v510_v19 = vcvt.s32.f32 %v508_v14 }
 0x2bc   :  { %v894_v57 = vcvt.s32.f32 %v541_v54  ;;  %675 = vpow2.f32 %v528_v58 }
 0x2be   :  { %426 = vmin.xlane.f32.xlu0 %v425_v49 }
 0x2c1   :  { %v674_v55 = vpop.eup %673 }
 0x2c2   :  { %469 = vmin.xlane.f32.xlu0 %v468_v53  ;;  %v368_v56 = vsel %vm361_vm5, %v674_v55, 0.0 }
 0x2c3   :  { %369 = vadd.xlane.f32.xlu1 %v368_v56 }
 0x2c6   :  { %544 = vmin.xlane.f32.xlu0 %v894_v57  ;;  %v676_v1 = vpop.eup %675 }
 0x2c7   :  { %v530_v2 = vsel %vm361_vm5, %v676_v1, 0.0 }
 0x2ff   :  { %v490_v61 = vpop.permute.xlu0 %489 }
 0x300   :  { %v404_v59 = vpop.permute.xlu1 %403  ;;  %v492_v63 = vsel %vm361_vm5, %v490_v61, 0.0 }
 0x301   :  { %v406_v60 = vsel %vm361_vm5, %v404_v59, 0.0 }
 0x302   :  { %407 = vadd.xlane.f32.xlu1 %v406_v60 }
 0x304   :  { %v447_v62 = vpop.permute.xlu1 %446 }
 0x305   :  { %v449_v0 = vsel %vm361_vm5, %v447_v62, 0.0 }
 0x306   :  { %493 = vadd.xlane.f32.xlu1 %v492_v63  ;;  %450 = vadd.xlane.f32.xlu0 %v449_v0 }
 0x30a   :  { %531 = vadd.xlane.f32.xlu0 %v530_v2 }
 0x343   :  { %v902_v12 = vpop.xlane.xlu1 %512 }
 0x344   :  { %vm514_vm14 = vcmp.eq.f32.partialorder %v881_v38, %v902_v12  ;;  %v540_v38 = vand.u32 65535, %v890_v52  ;;  %v519_v50 = vcvt.f32.s32 %v902_v12 }
 0x345   :  { %v515_v20 = vsel %vm514_vm14, %v510_v19, inf }
 0x346   :  { %v520_v56 = vshll.u32 %v519_v50, 16 }
 0x347   :  { %v384_v4 = vpop.xlane.xlu0 %383 }
 0x348   :  { %vm385_vm11 = vcmp.eq.f32.partialorder %v382_v45, %v384_v4 }
 0x349   :  { %v386_v7 = vsel %vm385_vm11, %v381_v5, inf }
 0x34a   :  { %387 = vmin.xlane.f32.xlu0 %v386_v7 }
 0x34b   :  { %v427_v10 = vpop.xlane.xlu0 %426 }
 0x34c   :  { %vm428_vm12 = vcmp.eq.f32.partialorder %v425_v49, %v427_v10  ;;  %v433_v42 = vcvt.f32.s32 %v427_v10 }
 0x34d   :  { %v429_v13 = vsel %vm428_vm12, %v424_v11, inf }
 0x34e   :  { %430 = vmin.xlane.f32.xlu0 %v429_v13  ;;  %v434_v45 = vshll.u32 %v433_v42, 16 }
 0x34f   :  { %v470_v15 = vpop.xlane.xlu0 %469 }
 0x350   :  { %v370_v17 = vpop.xlane.xlu1 %369  ;;  %vm471_vm13 = vcmp.eq.f32.partialorder %v468_v53, %v470_v15  ;;  %v476_v46 = vcvt.f32.s32 %v470_v15 }
 0x351   :  { %677 = vrcp.f32 %v370_v17  ;;  %v472_v18 = vsel %vm471_vm13, %v467_v16, inf }
 0x352   :  { %473 = vmin.xlane.f32.xlu1 %v472_v18  ;;  %v477_v52 = vshll.u32 %v476_v46, 16 }
 0x353   :  { %v908_v23 = vpop.xlane.xlu0 %544 }
 0x354   :  { %vm546_vm15 = vcmp.eq.f32.partialorder %v894_v57, %v908_v23 }
 0x356   :  { %516 = vmin.xlane.f32.xlu1 %v515_v20 }
 0x35b   :  { %v678_v21 = vpop.eup %677 }
 0x35c   :  { %v372_v22 = vmul.f32 %v678_v21, %v674_v55 }
 0x35e   :  { %373 = vst.msk [vmem:[#allocation2] sm:$0x3] %vm361_vm5, %v372_v22 }
 0x38f   :  { %v408_v24 = vpop.xlane.xlu1 %407 }
 0x390   :  { %679 = vrcp.f32 %v408_v24 }
 0x393   :  { %v451_v8 = vpop.xlane.xlu0 %450  ;;  %v494_v25 = vpop.xlane.xlu1 %493 }
 0x394   :  { %681 = vrcp.f32 %v451_v8 }
 0x395   :  { %683 = vrcp.f32 %v494_v25 }
 0x397   :  { %v532_v29 = vpop.xlane.xlu0 %531 }
 0x398   :  { %685 = vrcp.f32 %v532_v29 }
 0x39a   :  { %v680_v30 = vpop.eup %679 }
 0x39b   :  { %v410_v31 = vmul.f32 %v680_v30, %v866_v27  ;;  %v542_v27 = vcvt.s32.f32 %v540_v38 }
 0x39d   :  { %412 = vrot.lane.b32.xlu1 %v410_v31, %s713_s2  ;;  %v547_v39 = vsel %vm546_vm15, %v542_v27, inf }
 0x39e   :  { %v682_v32 = vpop.eup %681 }
 0x39f   :  { %v453_v33 = vmul.f32 %v682_v32, %v872_v28  ;;  %v684_v34 = vpop.eup %683  ;;  %v390_v28 = vcvt.f32.s32 %v384_v4 }
 0x3a0   :  { %v496_v37 = vmul.f32 %v684_v34, %v864_v26 }
 0x3a1   :  { %455 = vrot.lane.b32.xlu0 %v453_v33, %s714_s4  ;;  %v391_v41 = vshll.u32 %v390_v28, 16 }
 0x3a2   :  { %v686_v35 = vpop.eup %685 }
 0x3a3   :  { %v534_v36 = vmul.f32 %v686_v35, %v676_v1 }
 0x3a5   :  { %536 = vst.msk [vmem:[#allocation2 + $0x8] sm:$0x3] %vm361_vm5, %v534_v36  ;;  %498 = vrot.lane.b32.xlu0 %v496_v37, %s712_s23 }
 0x3c1   :  { %548 = vmin.xlane.f32.xlu1 %v547_v39 }
 0x3d7   :  { %v388_v40 = vpop.xlane.xlu0 %387 }
 0x3d8   :  { %v389_v43 = vcvt.f32.s32 %v388_v40 }
 0x3da   :  { %v392_v44 = vadd.s32 %v391_v41, %v389_v43 }
 0x3db   :  { %v431_v26 = vpop.xlane.xlu0 %430 }
 0x3dc   :  { %394 = vst.msk [vmem:[%s965_s6] sm:$0x3] %vm393_vm0, %v392_v44  ;;  %v432_v47 = vcvt.f32.s32 %v431_v26 }
 0x3de   :  { %v435_v48 = vadd.s32 %v434_v45, %v432_v47 }
 0x3df   :  { %v474_v49 = vpop.xlane.xlu1 %473 }
 0x3e0   :  { %603 = vst.msk [vmem:[%s965_s6 + $0x2] sm:$0x3] %vm393_vm0, %v435_v48  ;;  %v475_v53 = vcvt.f32.s32 %v474_v49 }
 0x3e2   :  { %v478_v54 = vadd.s32 %v477_v52, %v475_v53 }
 0x3e3   :  { %v517_v55 = vpop.xlane.xlu1 %516 }
 0x3e4   :  { %604 = vst.msk [vmem:[%s965_s6 + $0x4] sm:$0x3] %vm393_vm0, %v478_v54  ;;  %v518_v57 = vcvt.f32.s32 %v517_v55 }
 0x3e6   :  { %v521_v51 = vadd.s32 %v520_v56, %v518_v57 }
 0x3e8   :  { %605 = vst.msk [vmem:[%s965_s6 + $0x6] sm:$0x3] %vm393_vm0, %v521_v51 }
 0x40f   :  { %v413_v58 = vpop.permute.xlu1 %412 }
 0x410   :  { %416 = vst.msk [vmem:[#allocation2 + $0x2] sm:$0x3] %vm361_vm5, %v413_v58 }
 0x413   :  { %v456_v59 = vpop.permute.xlu0 %455 }
 0x414   :  { %459 = vst.msk [vmem:[#allocation2 + $0x4] sm:$0x3] %vm361_vm5, %v456_v59 }
 0x417   :  { %v499_v60 = vpop.permute.xlu0 %498 }
 0x418   :  { %502 = vst.msk [vmem:[#allocation2 + $0x6] sm:$0x3] %vm361_vm5, %v499_v60 }
 0x419   :  { %698 = shalt.err (!%p695_p4)
}
 0x41a   :  { %s699_s14 = scalar_lea.hbm %s964_s5, 160 }
 0x41b   :  { %p700_p5 = scmp.ne.s32.totalorder %s964_s5, %s699_s14  ;;  %p703_p6 = scmp.lt.u32.totalorder %s699_s14, %s964_s5 }
 0x41d   :  { %p705_p7 = pnand %p703_p6, %p700_p5 }
 0x41f   :  { %708 = shalt.err (!%p705_p7)
}
 0x420   :  { %s716_s19 = smov 2   ;;  %v551_v61 = vcvt.f32.s32 %v908_v23 }
 0x421   :  { %567 = dma.vmem_to_hbm [thread:$0]  %s562_s11, 160, %s964_s5, [#allocation3], %s712_s23, %s712_s23, %s716_s19  }
 0x422   :  { %v552_v63 = vshll.u32 %v551_v61, 16 }
 0x44e   :  { %v549_v62 = vpop.xlane.xlu1 %548 }
 0x44f   :  { %v550_v0 = vcvt.f32.s32 %v549_v62 }
 0x451   :  { %v553_v1 = vadd.s32 %v552_v63, %v550_v0 }
 0x453   :  { %606 = vst.msk [vmem:[%s965_s6 + $0x8] sm:$0x3] %vm393_vm0, %v553_v1 }
 0x454   :  { %709 = dma.done.wait [#allocation3], 160  }
 0x455   :  { %710 = vsyncadd [#allocation3], 4294967136 }
 0x456   :  { %575 = vsyncpa [#allocation3], 1 }

</bundles_post_ra>
